<compile_context>
chip_gen: v5e
topology: v5e:2x2
jax: 0.10.0
libtpu: 0.0.40
codegen_flags: <defaults>
</compile_context>

<pallas_src>
import jax
import jax.numpy as jnp
import numpy as np
from jax.experimental import pallas as pl
from jax.experimental.pallas import tpu as pltpu

# MXU operand dtype (accumulation is always f32 via preferred_element_type).
# Set to jnp.float32 to reproduce exact f32 PyTorch numerics.
MATMUL_DTYPE = jnp.bfloat16


def _layernorm(x, gamma, beta, eps=1e-5):
    mu = jnp.mean(x, axis=-1, keepdims=True)
    var = jnp.mean((x - mu) ** 2, axis=-1, keepdims=True)
    return (x - mu) * jax.lax.rsqrt(var + eps) * gamma + beta


def gnn_di_kernel(h0_ref, g_ref, we_ref, be_ref,
                  wnode_hbm, wc_hbm, wout_hbm,
                  bnode_ref, bc_ref, bout_ref, nstk_ref,
                  gn_avg_ref, gn_g_ref, gn_b_ref, wconvT_ref, bconv_ref,
                  o_ref,
                  h_scr, e_scr, wnode_buf, wc_buf, wout_buf, sem):
    V = h0_ref.shape[1]
    H = h0_ref.shape[2]
    L = nstk_ref.shape[0]
    f32 = jnp.float32

    def start_fetch(layer, slot):
        pltpu.make_async_copy(wnode_hbm.at[layer], wnode_buf.at[slot], sem.at[0, slot]).start()
        pltpu.make_async_copy(wc_hbm.at[layer],    wc_buf.at[slot],    sem.at[1, slot]).start()
        pltpu.make_async_copy(wout_hbm.at[layer],  wout_buf.at[slot],  sem.at[2, slot]).start()

    def wait_fetch(slot):
        pltpu.make_async_copy(wnode_hbm.at[0], wnode_buf.at[slot], sem.at[0, slot]).wait()
        pltpu.make_async_copy(wc_hbm.at[0],    wc_buf.at[slot],    sem.at[1, slot]).wait()
        pltpu.make_async_copy(wout_hbm.at[0],  wout_buf.at[slot],  sem.at[2, slot]).wait()

    start_fetch(0, 0)  # overlap layer-0 weight DMA with the embeddings below

    # node features: embedding + node_embed Linear already folded in the wrapper.
    h_scr[...] = h0_ref[0]

    # edge features: edge_attr_embed + edge_embed folded into one (6, H) Linear.
    e_scr[...] = jnp.dot(g_ref[0], we_ref[...], preferred_element_type=f32) + be_ref[...]

    def layer_body(l, carry):
        slot = l % 2
        wait_fetch(slot)

        @pl.when(l + 1 < L)
        def _():
            start_fetch(l + 1, 1 - slot)

        h = h_scr[...]                                   # (V, H)   f32 residual state
        e = e_scr[...]                                   # (V*V, H) f32 residual state
        nl = nstk_ref[l]                                 # (6, H) norm params

        # fused U/V/A/B projection: one (V, H) x (H, 4H) MXU call.
        nproj = jnp.dot(h.astype(MATMUL_DTYPE), wnode_buf[slot],
                        preferred_element_type=f32) + bnode_ref[l]             # (V, 4H)
        Uh = nproj[:, 0 * H:1 * H]
        Vh = nproj[:, 1 * H:2 * H]
        Ah = nproj[:, 2 * H:3 * H]
        Bh = nproj[:, 3 * H:4 * H]
        Ce = jnp.dot(e.astype(MATMUL_DTYPE), wc_buf[slot],
                     preferred_element_type=f32) + bc_ref[l]                   # (V*V, H)

        # e_new[i, j] = Ce[i, j] + A(h)[j] + B(h)[i]
        e_new = Ce.reshape(V, V, H) + Ah[None, :, :] + Bh[:, None, :]
        gates = jax.nn.sigmoid(e_new)
        # aggregation='sum': agg[i] = sum_j gates[i, j] * V(h)[j]
        agg = jnp.sum(gates * Vh[None, :, :], axis=1)                          # (V, H)

        h_new = jax.nn.relu(_layernorm(Uh + agg, nl[0:1], nl[1:2]))
        e_rel = jax.nn.relu(_layernorm(e_new.reshape(V * V, H), nl[2:3], nl[3:4]))

        # residuals: x = x_in + x ; e = e_in + per_layer_out(e)  (LN -> SiLU -> Linear)
        h_scr[...] = h + h_new
        t = _layernorm(e_rel, nl[4:5], nl[5:6])
        t = t * jax.nn.sigmoid(t)
        e_scr[...] = e + jnp.dot(t.astype(MATMUL_DTYPE), wout_buf[slot],
                                 preferred_element_type=f32) + bout_ref[l]
        return carry

    jax.lax.fori_loop(0, L, layer_body, 0)

    # output head: GroupNorm(32, H) -> ReLU -> 1x1 Conv, stored channels-major
    # (lane-dense (OC, V*V) store; no NCHW transpose in the wrapper).
    e = e_scr[...]
    mean_c = jnp.mean(e, axis=0, keepdims=True)                                # (1, H)
    mean_g = jnp.dot(mean_c, gn_avg_ref[...], preferred_element_type=f32)      # per-channel group mean
    cen = e - mean_g
    var_c = jnp.mean(cen * cen, axis=0, keepdims=True)                         # centered variance
    var_g = jnp.dot(var_c, gn_avg_ref[...], preferred_element_type=f32)
    e_gn = jax.nn.relu(cen * jax.lax.rsqrt(var_g + 1e-5) * gn_g_ref[...] + gn_b_ref[...])
    out = jax.lax.dot_general(wconvT_ref[...], e_gn, (((1,), (1,)), ((), ())),
                              preferred_element_type=f32)                      # (OC, V*V)
    o_ref[0] = out + bconv_ref[...]


def _vmem_limit_bytes(V, H, L, OC):
    f32b = 4
    wb = jnp.dtype(MATMUL_DTYPE).itemsize
    edge = V * V * H * f32b
    est = (
        6 * edge                                              # e state + in-flight edge temporaries
        + 4 * V * H * f32b                                    # h state + node temporaries
        + 4 * (V * V * 6 + OC * V * V + V * H) * f32b         # double-buffered I/O blocks
        + 2 * (6 * H * H) * wb                                # 2-slot streamed layer weights
        + 2 * (12 * L * H + H * H + 8 * H) * f32b             # biases / norms / GN matrix
        + (4 << 20)                                           # headroom
    )
    return int(min(128 * 1024 * 1024, max(32 * 1024 * 1024, est)))


def gnn_di_forward(x_types, adj_matrix, params):
    """x_types: (B, V) int32 in {0,1}; adj_matrix: (B, 6, V, V) f32 -> (B, OC, V, V)."""
    B, V = x_types.shape
    H = params["node_table"].shape[1]
    L = params["Wstk"].shape[0]
    OC = params["Wconv"].shape[1]
    assert H % 32 == 0, "GroupNorm(32, H) requires H % 32 == 0"
    f32 = jnp.float32

    # ---- wrapper-side weight algebra (one-time folds, no per-element work) ----
    node_tbl = params["node_table"] @ params["Wn"] + params["bn"]              # (2, H)
    h0 = node_tbl[x_types]                                                     # (B, V, H)
    we_eff = params["We1"] @ params["We2"]                                     # (6, H)
    be_eff = (params["be1"] @ params["We2"] + params["be2"])[None, :]          # (1, H)
    graph = jnp.transpose(adj_matrix, (0, 2, 3, 1)).reshape(B, V * V, 6)

    # fuse U/V/A/B node projections into a single (H, 4H) weight per layer
    wnode = jnp.concatenate([params["Wstk"][:, i] for i in range(4)], axis=-1)  # (L, H, 4H)
    bnode = jnp.concatenate([params["bstk"][:, i] for i in range(4)], axis=-1)[:, None, :]
    wc, bc = params["Wstk"][:, 4], params["bstk"][:, 4][:, None, :]
    wout, bout = params["Wstk"][:, 5], params["bstk"][:, 5][:, None, :]

    # GroupNorm(32, H) group-averaging matrix
    cg = H // 32
    gid = jnp.arange(H) // cg
    gn_avg = (gid[:, None] == gid[None, :]).astype(f32) / cg

    wnode = wnode.astype(MATMUL_DTYPE)
    wc_w = wc.astype(MATMUL_DTYPE)
    wout_w = wout.astype(MATMUL_DTYPE)

    def _full(shape):
        nd = len(shape)
        return pl.BlockSpec(shape, lambda b, _nd=nd: (0,) * _nd)

    in_specs = [
        pl.BlockSpec((1, V, H), lambda b: (b, 0, 0)),          # h0
        pl.BlockSpec((1, V * V, 6), lambda b: (b, 0, 0)),      # graph
        _full((6, H)), _full((1, H)),                          # folded edge embed
        pl.BlockSpec(memory_space=pl.ANY),                     # wnode (streamed per layer)
        pl.BlockSpec(memory_space=pl.ANY),                     # wc    (streamed per layer)
        pl.BlockSpec(memory_space=pl.ANY),                     # wout  (streamed per layer)
        _full((L, 1, 4 * H)), _full((L, 1, H)), _full((L, 1, H)),
        _full((L, 6, H)),
        _full((H, H)), _full((1, H)), _full((1, H)),
        _full((OC, H)), _full((OC, 1)),
    ]
    out_spec = pl.BlockSpec((1, OC, V * V), lambda b: (b, 0, 0))

    scratch = [
        pltpu.VMEM((V, H), f32),                   # h state
        pltpu.VMEM((V * V, H), f32),               # e state
        pltpu.VMEM((2, H, 4 * H), MATMUL_DTYPE),   # streamed node weights (2 slots)
        pltpu.VMEM((2, H, H), MATMUL_DTYPE),       # streamed C weights
        pltpu.VMEM((2, H, H), MATMUL_DTYPE),       # streamed per_layer_out weights
        pltpu.SemaphoreType.DMA((3, 2)),
    ]

    out = pl.pallas_call(
        gnn_di_kernel,
        out_shape=jax.ShapeDtypeStruct((B, OC, V * V), f32),
        grid_spec=pltpu.PrefetchScalarGridSpec(
            num_scalar_prefetch=0, grid=(B,),
            in_specs=in_specs, out_specs=out_spec, scratch_shapes=scratch),
        compiler_params=pltpu.CompilerParams(
            dimension_semantics=("parallel",),
            vmem_limit_bytes=_vmem_limit_bytes(V, H, L, OC)),
    )(h0, graph, we_eff, be_eff,
      wnode, wc_w, wout_w,
      bnode, bc, bout, params["nstk"],
      gn_avg, params["gn_g"][None, :], params["gn_b"][None, :],
      params["Wconv"].T, params["bconv"][:, None])

    return out.reshape(B, OC, V, V)   # NCHW; pure reshape, no transpose pass


def reference_forward(x_types, adj_matrix, params):
    """Pure-JAX reference mirroring dense_forward (same MXU precision policy)."""
    B, V = x_types.shape
    H = params["node_table"].shape[1]
    L = params["Wstk"].shape[0]

    def mm(a, w):
        return jnp.dot(a.astype(MATMUL_DTYPE), w.astype(MATMUL_DTYPE),
                       preferred_element_type=jnp.float32)

    def ln(x, g, b):
        mu = x.mean(-1, keepdims=True)
        var = ((x - mu) ** 2).mean(-1, keepdims=True)
        return (x - mu) * jax.lax.rsqrt(var + 1e-5) * g + b

    h = params["node_table"][x_types] @ params["Wn"] + params["bn"]
    graph = jnp.transpose(adj_matrix, (0, 2, 3, 1))
    e = graph @ params["We1"] + params["be1"]
    e = e @ params["We2"] + params["be2"]

    for l in range(L):
        Wl, bl, nl = params["Wstk"][l], params["bstk"][l], params["nstk"][l]
        Uh = mm(h, Wl[0]) + bl[0]
        Vh = mm(h, Wl[1]) + bl[1]
        Ah = mm(h, Wl[2]) + bl[2]
        Bh = mm(h, Wl[3]) + bl[3]
        Ce = mm(e, Wl[4]) + bl[4]
        e_new = Ah[:, None, :, :] + Bh[:, :, None, :] + Ce
        gates = jax.nn.sigmoid(e_new)
        agg = jnp.sum(gates * Vh[:, None, :, :], axis=2)
        h_new = jax.nn.relu(ln(Uh + agg, nl[0], nl[1]))
        e_rel = jax.nn.relu(ln(e_new, nl[2], nl[3]))
        h = h + h_new
        t = ln(e_rel, nl[4], nl[5])
        t = t * jax.nn.sigmoid(t)
        e = e + mm(t, Wl[5]) + bl[5]

    cg = H // 32
    eg = e.reshape(B, V * V, 32, cg)
    mean = eg.mean(axis=(1, 3), keepdims=True)
    var = ((eg - mean) ** 2).mean(axis=(1, 3), keepdims=True)
    egn = ((eg - mean) * jax.lax.rsqrt(var + 1e-5)).reshape(B, V, V, H)
    egn = jax.nn.relu(egn * params["gn_g"] + params["gn_b"])
    out = egn @ params["Wconv"] + params["bconv"]
    return jnp.transpose(out, (0, 3, 1, 2))


def make_params(key, L, H, OC=1):
    ks = iter(jax.random.split(key, 12))
    sH, s6 = H ** -0.5, 6 ** -0.5

    def w(shape, scale):
        return jax.random.normal(next(ks), shape, dtype=jnp.float32) * scale

    # nstk rows: [norm_h gamma, norm_h beta, norm_e gamma, norm_e beta, lnout gamma, lnout beta]
    nstk = jnp.tile(jnp.array([1.0, 0.0, 1.0, 0.0, 1.0, 0.0], jnp.float32)[None, :, None],
                    (L, 1, H))
    return {
        "node_table": w((2, H), 1.0),
        "Wn": w((H, H), sH), "bn": w((H,), 0.02),
        "We1": w((6, H), s6), "be1": w((H,), 0.02),
        "We2": w((H, H), sH), "be2": w((H,), 0.02),
        # Wstk rows: [U, V, A, B, C, per_layer_out Linear]
        # (per_layer_out is zero_module at PyTorch init; random here to exercise the matmul)
        "Wstk": w((L, 6, H, H), sH), "bstk": w((L, 6, H), 0.02),
        "nstk": nstk,
        "gn_g": jnp.ones((H,), jnp.float32), "gn_b": jnp.zeros((H,), jnp.float32),
        "Wconv": w((H, OC), sH), "bconv": w((OC,), 0.02),
    }


if __name__ == "__main__":
    B, V, H, L, OC = 2, 16, 128, 2, 1
    key = jax.random.PRNGKey(0)
    k1, k2, kp = jax.random.split(key, 3)
    x_types = jax.random.randint(k1, (B, V), 0, 2, dtype=jnp.int32)      # node types (B x V)
    adj = jax.random.normal(k2, (B, 6, V, V), dtype=jnp.float32)         # (B x 6 x V x V)
    adj = adj.at[:, 0].set((adj[:, 0] > 0).astype(jnp.float32))          # channel 0 = adjacency

    params = make_params(kp, L, H, OC)
    out = gnn_di_forward(x_types, adj, params)
    out = jax.block_until_ready(out)

    ref = reference_forward(x_types, adj, params)
    assert out.shape == (B, OC, V, V)
    np.testing.assert_allclose(np.asarray(out), np.asarray(ref), atol=2e-3, rtol=2e-3)
    print("KERNEL_OK")
</pallas_src>

<mosaic_0001>
module attributes {stable_mosaic.version = 11 : i64} {
  func.func @gnn_di_kernel(%arg0: i32, %arg1: memref<1x16x128xf32, #tpu.memory_space<vmem>>, %arg2: memref<1x256x6xf32, #tpu.memory_space<vmem>>, %arg3: memref<6x128xf32, #tpu.memory_space<vmem>>, %arg4: memref<1x128xf32, #tpu.memory_space<vmem>>, %arg5: memref<2x128x512xbf16, #tpu.memory_space<any>>, %arg6: memref<2x128x128xbf16, #tpu.memory_space<any>>, %arg7: memref<2x128x128xbf16, #tpu.memory_space<any>>, %arg8: memref<2x1x512xf32, #tpu.memory_space<vmem>>, %arg9: memref<2x1x128xf32, #tpu.memory_space<vmem>>, %arg10: memref<2x1x128xf32, #tpu.memory_space<vmem>>, %arg11: memref<2x6x128xf32, #tpu.memory_space<vmem>>, %arg12: memref<128x128xf32, #tpu.memory_space<vmem>>, %arg13: memref<1x128xf32, #tpu.memory_space<vmem>>, %arg14: memref<1x128xf32, #tpu.memory_space<vmem>>, %arg15: memref<1x128xf32, #tpu.memory_space<vmem>>, %arg16: memref<1x1xf32, #tpu.memory_space<vmem>>, %arg17: memref<1x1x256xf32, #tpu.memory_space<vmem>>, %arg18: memref<16x128xf32, #tpu.memory_space<vmem>>, %arg19: memref<256x128xf32, #tpu.memory_space<vmem>>, %arg20: memref<2x128x512xbf16, #tpu.memory_space<vmem>>, %arg21: memref<2x128x128xbf16, #tpu.memory_space<vmem>>, %arg22: memref<2x128x128xbf16, #tpu.memory_space<vmem>>, %arg23: memref<3x2x!tpu.dma_semaphore, #tpu.memory_space<semaphore_mem>>) attributes {dimension_semantics = [#tpu.dimension_semantics<parallel>], iteration_bounds = array<i64: 2>, scalar_prefetch = 0 : i64, scratch_operands = 6 : i64, tpu.core_type = #tpu.core_type<tc>, window_params = [{transform_indices = @transform_0, window_bounds = array<i64: 1, 16, 128>}, {transform_indices = @transform_1, window_bounds = array<i64: 1, 256, 6>}, {pipeline_mode = #tpu.pipeline_mode<synchronous>, transform_indices = @transform_2, window_bounds = array<i64: 6, 128>}, {pipeline_mode = #tpu.pipeline_mode<synchronous>, transform_indices = @transform_3, window_bounds = array<i64: 1, 128>}, {}, {}, {}, {pipeline_mode = #tpu.pipeline_mode<synchronous>, transform_indices = @transform_7, window_bounds = array<i64: 2, 1, 512>}, {pipeline_mode = #tpu.pipeline_mode<synchronous>, transform_indices = @transform_8, window_bounds = array<i64: 2, 1, 128>}, {pipeline_mode = #tpu.pipeline_mode<synchronous>, transform_indices = @transform_9, window_bounds = array<i64: 2, 1, 128>}, {pipeline_mode = #tpu.pipeline_mode<synchronous>, transform_indices = @transform_10, window_bounds = array<i64: 2, 6, 128>}, {pipeline_mode = #tpu.pipeline_mode<synchronous>, transform_indices = @transform_11, window_bounds = array<i64: 128, 128>}, {pipeline_mode = #tpu.pipeline_mode<synchronous>, transform_indices = @transform_12, window_bounds = array<i64: 1, 128>}, {pipeline_mode = #tpu.pipeline_mode<synchronous>, transform_indices = @transform_13, window_bounds = array<i64: 1, 128>}, {pipeline_mode = #tpu.pipeline_mode<synchronous>, transform_indices = @transform_14, window_bounds = array<i64: 1, 128>}, {pipeline_mode = #tpu.pipeline_mode<synchronous>, transform_indices = @transform_15, window_bounds = array<i64: 1, 1>}, {transform_indices = @transform_16, window_bounds = array<i64: 1, 1, 256>}]} {
    %c0_i32 = arith.constant 0 : i32
    %c0_i32_0 = arith.constant 0 : i32
    %c0_i32_1 = arith.constant 0 : i32
    %c0_i32_2 = arith.constant 0 : i32
    %c0_i32_3 = arith.constant 0 : i32
    %c0_i32_4 = arith.constant 0 : i32
    %0 = tpu.memref_slice %arg5[%c0_i32, %c0_i32_3, %c0_i32_4] : memref<2x128x512xbf16, #tpu.memory_space<any>> -> memref<1x128x512xbf16, #tpu.memory_space<any>>
    %1 = tpu.memref_squeeze %0 : memref<1x128x512xbf16, #tpu.memory_space<any>> -> memref<128x512xbf16, #tpu.memory_space<any>>
    %c0_i32_5 = arith.constant 0 : i32
    %c0_i32_6 = arith.constant 0 : i32
    %2 = tpu.memref_slice %arg20[%c0_i32_0, %c0_i32_5, %c0_i32_6] : memref<2x128x512xbf16, #tpu.memory_space<vmem>> -> memref<1x128x512xbf16, #tpu.memory_space<vmem>>
    %3 = tpu.memref_squeeze %2 : memref<1x128x512xbf16, #tpu.memory_space<vmem>> -> memref<128x512xbf16, #tpu.memory_space<vmem>>
    %4 = tpu.memref_slice %arg23[%c0_i32_1, %c0_i32_2] : memref<3x2x!tpu.dma_semaphore, #tpu.memory_space<semaphore_mem>> -> memref<1x1x!tpu.dma_semaphore, #tpu.memory_space<semaphore_mem>>
    %5 = tpu.memref_squeeze %4 : memref<1x1x!tpu.dma_semaphore, #tpu.memory_space<semaphore_mem>> -> memref<!tpu.dma_semaphore, #tpu.memory_space<semaphore_mem>>
    tpu.enqueue_dma source(%1 : memref<128x512xbf16, #tpu.memory_space<any>>) target(%3 : memref<128x512xbf16, #tpu.memory_space<vmem>>) target_semaphore(%5 : memref<!tpu.dma_semaphore, #tpu.memory_space<semaphore_mem>>)
    %c0_i32_7 = arith.constant 0 : i32
    %c0_i32_8 = arith.constant 0 : i32
    %c1_i32 = arith.constant 1 : i32
    %c0_i32_9 = arith.constant 0 : i32
    %c0_i32_10 = arith.constant 0 : i32
    %c0_i32_11 = arith.constant 0 : i32
    %6 = tpu.memref_slice %arg6[%c0_i32_7, %c0_i32_10, %c0_i32_11] : memref<2x128x128xbf16, #tpu.memory_space<any>> -> memref<1x128x128xbf16, #tpu.memory_space<any>>
    %7 = tpu.memref_squeeze %6 : memref<1x128x128xbf16, #tpu.memory_space<any>> -> memref<128x128xbf16, #tpu.memory_space<any>>
    %c0_i32_12 = arith.constant 0 : i32
    %c0_i32_13 = arith.constant 0 : i32
    %8 = tpu.memref_slice %arg21[%c0_i32_8, %c0_i32_12, %c0_i32_13] : memref<2x128x128xbf16, #tpu.memory_space<vmem>> -> memref<1x128x128xbf16, #tpu.memory_space<vmem>>
    %9 = tpu.memref_squeeze %8 : memref<1x128x128xbf16, #tpu.memory_space<vmem>> -> memref<128x128xbf16, #tpu.memory_space<vmem>>
    %10 = tpu.memref_slice %arg23[%c1_i32, %c0_i32_9] : memref<3x2x!tpu.dma_semaphore, #tpu.memory_space<semaphore_mem>> -> memref<1x1x!tpu.dma_semaphore, #tpu.memory_space<semaphore_mem>>
    %11 = tpu.memref_squeeze %10 : memref<1x1x!tpu.dma_semaphore, #tpu.memory_space<semaphore_mem>> -> memref<!tpu.dma_semaphore, #tpu.memory_space<semaphore_mem>>
    tpu.enqueue_dma source(%7 : memref<128x128xbf16, #tpu.memory_space<any>>) target(%9 : memref<128x128xbf16, #tpu.memory_space<vmem>>) target_semaphore(%11 : memref<!tpu.dma_semaphore, #tpu.memory_space<semaphore_mem>>)
    %c0_i32_14 = arith.constant 0 : i32
    %c0_i32_15 = arith.constant 0 : i32
    %c2_i32 = arith.constant 2 : i32
    %c0_i32_16 = arith.constant 0 : i32
    %c0_i32_17 = arith.constant 0 : i32
    %c0_i32_18 = arith.constant 0 : i32
    %12 = tpu.memref_slice %arg7[%c0_i32_14, %c0_i32_17, %c0_i32_18] : memref<2x128x128xbf16, #tpu.memory_space<any>> -> memref<1x128x128xbf16, #tpu.memory_space<any>>
    %13 = tpu.memref_squeeze %12 : memref<1x128x128xbf16, #tpu.memory_space<any>> -> memref<128x128xbf16, #tpu.memory_space<any>>
    %c0_i32_19 = arith.constant 0 : i32
    %c0_i32_20 = arith.constant 0 : i32
    %14 = tpu.memref_slice %arg22[%c0_i32_15, %c0_i32_19, %c0_i32_20] : memref<2x128x128xbf16, #tpu.memory_space<vmem>> -> memref<1x128x128xbf16, #tpu.memory_space<vmem>>
    %15 = tpu.memref_squeeze %14 : memref<1x128x128xbf16, #tpu.memory_space<vmem>> -> memref<128x128xbf16, #tpu.memory_space<vmem>>
    %16 = tpu.memref_slice %arg23[%c2_i32, %c0_i32_16] : memref<3x2x!tpu.dma_semaphore, #tpu.memory_space<semaphore_mem>> -> memref<1x1x!tpu.dma_semaphore, #tpu.memory_space<semaphore_mem>>
    %17 = tpu.memref_squeeze %16 : memref<1x1x!tpu.dma_semaphore, #tpu.memory_space<semaphore_mem>> -> memref<!tpu.dma_semaphore, #tpu.memory_space<semaphore_mem>>
    tpu.enqueue_dma source(%13 : memref<128x128xbf16, #tpu.memory_space<any>>) target(%15 : memref<128x128xbf16, #tpu.memory_space<vmem>>) target_semaphore(%17 : memref<!tpu.dma_semaphore, #tpu.memory_space<semaphore_mem>>)
    %c0 = arith.constant 0 : index
    %c0_21 = arith.constant 0 : index
    %c0_22 = arith.constant 0 : index
    %18 = vector.load %arg1[%c0, %c0_21, %c0_22] : memref<1x16x128xf32, #tpu.memory_space<vmem>>, vector<1x16x128xf32>
    %19 = vector.shape_cast %18 : vector<1x16x128xf32> to vector<16x128xf32>
    %c0_23 = arith.constant 0 : index
    %c0_24 = arith.constant 0 : index
    %20 = vector.load %arg18[%c0_23, %c0_24] : memref<16x128xf32, #tpu.memory_space<vmem>>, vector<16x128xf32>
    tpu.vector_store %arg18[%c0_23, %c0_24], %19 {strides = array<i32>} : memref<16x128xf32, #tpu.memory_space<vmem>>, vector<16x128xf32>,
    %c0_25 = arith.constant 0 : index
    %c0_26 = arith.constant 0 : index
    %c0_27 = arith.constant 0 : index
    %21 = vector.load %arg2[%c0_25, %c0_26, %c0_27] : memref<1x256x6xf32, #tpu.memory_space<vmem>>, vector<1x256x6xf32>
    %22 = vector.shape_cast %21 : vector<1x256x6xf32> to vector<256x6xf32>
    %c0_28 = arith.constant 0 : index
    %c0_29 = arith.constant 0 : index
    %23 = vector.load %arg3[%c0_28, %c0_29] : memref<6x128xf32, #tpu.memory_space<vmem>>, vector<6x128xf32>
    %cst = arith.constant dense<0.000000e+00> : vector<256x128xf32>
    %24 = tpu.matmul %22, %23, %cst {dimension_numbers = #tpu.dot_dimension_numbers<[1], [0], [0], [1], [0, 0, 1, 1], [], []>} : vector<256x6xf32>, vector<6x128xf32>, vector<256x128xf32> -> vector<256x128xf32>
    %c0_30 = arith.constant 0 : index
    %c0_31 = arith.constant 0 : index
    %25 = vector.load %arg4[%c0_30, %c0_31] : memref<1x128xf32, #tpu.memory_space<vmem>>, vector<1x128xf32>
    %26 = vector.broadcast %25 : vector<1x128xf32> to vector<256x128xf32>
    %27 = arith.addf %24, %26 : vector<256x128xf32>
    %c0_32 = arith.constant 0 : index
    %c0_33 = arith.constant 0 : index
    %28 = vector.load %arg19[%c0_32, %c0_33] : memref<256x128xf32, #tpu.memory_space<vmem>>, vector<256x128xf32>
    tpu.vector_store %arg19[%c0_32, %c0_33], %27 {strides = array<i32>} : memref<256x128xf32, #tpu.memory_space<vmem>>, vector<256x128xf32>,
    %c0_i32_34 = arith.constant 0 : i32
    %c2_i32_35 = arith.constant 2 : i32
    %29 = arith.addi %c0_i32_34, %c2_i32_35 : i32
    %c1_i32_36 = arith.constant 1 : i32
    scf.for %arg24 = %c0_i32_34 to %29 step %c1_i32_36  : i32 {
      %c2_i32_64 = arith.constant 2 : i32
      %c0_i32_65 = arith.constant 0 : i32
      %67 = arith.cmpi eq, %c2_i32_64, %c0_i32_65 : i32
      %c1_i32_66 = arith.constant 1 : i32
      %68 = arith.select %67, %c1_i32_66, %c2_i32_64 : i32
      %69 = arith.remsi %arg24, %68 : i32
      %c0_i32_67 = arith.constant 0 : i32
      %70 = arith.cmpi ne, %69, %c0_i32_67 : i32
      %c0_i32_68 = arith.constant 0 : i32
      %71 = arith.cmpi slt, %69, %c0_i32_68 : i32
      %c0_i32_69 = arith.constant 0 : i32
      %72 = arith.cmpi slt, %68, %c0_i32_69 : i32
      %73 = arith.xori %71, %72 : i1
      %74 = arith.andi %73, %70 : i1
      %75 = arith.addi %69, %68 : i32
      %76 = arith.select %74, %75, %69 : i32
      %c0_i32_70 = arith.constant 0 : i32
      %c0_i32_71 = arith.constant 0 : i32
      %c0_i32_72 = arith.constant 0 : i32
      %c0_i32_73 = arith.constant 0 : i32
      %77 = tpu.memref_slice %arg5[%c0_i32_70, %c0_i32_72, %c0_i32_73] : memref<2x128x512xbf16, #tpu.memory_space<any>> -> memref<1x128x512xbf16, #tpu.memory_space<any>>
      %78 = tpu.memref_squeeze %77 : memref<1x128x512xbf16, #tpu.memory_space<any>> -> memref<128x512xbf16, #tpu.memory_space<any>>
      %c0_i32_74 = arith.constant 0 : i32
      %c0_i32_75 = arith.constant 0 : i32
      %79 = tpu.memref_slice %arg20[%76, %c0_i32_74, %c0_i32_75] : memref<2x128x512xbf16, #tpu.memory_space<vmem>> -> memref<1x128x512xbf16, #tpu.memory_space<vmem>>
      %80 = tpu.memref_squeeze %79 : memref<1x128x512xbf16, #tpu.memory_space<vmem>> -> memref<128x512xbf16, #tpu.memory_space<vmem>>
      %81 = tpu.memref_slice %arg23[%c0_i32_71, %76] : memref<3x2x!tpu.dma_semaphore, #tpu.memory_space<semaphore_mem>> -> memref<1x1x!tpu.dma_semaphore, #tpu.memory_space<semaphore_mem>>
      %82 = tpu.memref_squeeze %81 : memref<1x1x!tpu.dma_semaphore, #tpu.memory_space<semaphore_mem>> -> memref<!tpu.dma_semaphore, #tpu.memory_space<semaphore_mem>>
      tpu.wait_dma2 semaphore(%82 : memref<!tpu.dma_semaphore, #tpu.memory_space<semaphore_mem>>) src(%78 : memref<128x512xbf16, #tpu.memory_space<any>>) dst(%80 : memref<128x512xbf16, #tpu.memory_space<vmem>>)
      %c0_i32_76 = arith.constant 0 : i32
      %c1_i32_77 = arith.constant 1 : i32
      %c0_i32_78 = arith.constant 0 : i32
      %c0_i32_79 = arith.constant 0 : i32
      %83 = tpu.memref_slice %arg6[%c0_i32_76, %c0_i32_78, %c0_i32_79] : memref<2x128x128xbf16, #tpu.memory_space<any>> -> memref<1x128x128xbf16, #tpu.memory_space<any>>
      %84 = tpu.memref_squeeze %83 : memref<1x128x128xbf16, #tpu.memory_space<any>> -> memref<128x128xbf16, #tpu.memory_space<any>>
      %c0_i32_80 = arith.constant 0 : i32
      %c0_i32_81 = arith.constant 0 : i32
      %85 = tpu.memref_slice %arg21[%76, %c0_i32_80, %c0_i32_81] : memref<2x128x128xbf16, #tpu.memory_space<vmem>> -> memref<1x128x128xbf16, #tpu.memory_space<vmem>>
      %86 = tpu.memref_squeeze %85 : memref<1x128x128xbf16, #tpu.memory_space<vmem>> -> memref<128x128xbf16, #tpu.memory_space<vmem>>
      %87 = tpu.memref_slice %arg23[%c1_i32_77, %76] : memref<3x2x!tpu.dma_semaphore, #tpu.memory_space<semaphore_mem>> -> memref<1x1x!tpu.dma_semaphore, #tpu.memory_space<semaphore_mem>>
      %88 = tpu.memref_squeeze %87 : memref<1x1x!tpu.dma_semaphore, #tpu.memory_space<semaphore_mem>> -> memref<!tpu.dma_semaphore, #tpu.memory_space<semaphore_mem>>
      tpu.wait_dma2 semaphore(%88 : memref<!tpu.dma_semaphore, #tpu.memory_space<semaphore_mem>>) src(%84 : memref<128x128xbf16, #tpu.memory_space<any>>) dst(%86 : memref<128x128xbf16, #tpu.memory_space<vmem>>)
      %c0_i32_82 = arith.constant 0 : i32
      %c2_i32_83 = arith.constant 2 : i32
      %c0_i32_84 = arith.constant 0 : i32
      %c0_i32_85 = arith.constant 0 : i32
      %89 = tpu.memref_slice %arg7[%c0_i32_82, %c0_i32_84, %c0_i32_85] : memref<2x128x128xbf16, #tpu.memory_space<any>> -> memref<1x128x128xbf16, #tpu.memory_space<any>>
      %90 = tpu.memref_squeeze %89 : memref<1x128x128xbf16, #tpu.memory_space<any>> -> memref<128x128xbf16, #tpu.memory_space<any>>
      %c0_i32_86 = arith.constant 0 : i32
      %c0_i32_87 = arith.constant 0 : i32
      %91 = tpu.memref_slice %arg22[%76, %c0_i32_86, %c0_i32_87] : memref<2x128x128xbf16, #tpu.memory_space<vmem>> -> memref<1x128x128xbf16, #tpu.memory_space<vmem>>
      %92 = tpu.memref_squeeze %91 : memref<1x128x128xbf16, #tpu.memory_space<vmem>> -> memref<128x128xbf16, #tpu.memory_space<vmem>>
      %93 = tpu.memref_slice %arg23[%c2_i32_83, %76] : memref<3x2x!tpu.dma_semaphore, #tpu.memory_space<semaphore_mem>> -> memref<1x1x!tpu.dma_semaphore, #tpu.memory_space<semaphore_mem>>
      %94 = tpu.memref_squeeze %93 : memref<1x1x!tpu.dma_semaphore, #tpu.memory_space<semaphore_mem>> -> memref<!tpu.dma_semaphore, #tpu.memory_space<semaphore_mem>>
      tpu.wait_dma2 semaphore(%94 : memref<!tpu.dma_semaphore, #tpu.memory_space<semaphore_mem>>) src(%90 : memref<128x128xbf16, #tpu.memory_space<any>>) dst(%92 : memref<128x128xbf16, #tpu.memory_space<vmem>>)
      %c1_i32_88 = arith.constant 1 : i32
      %95 = arith.addi %arg24, %c1_i32_88 : i32
      %c2_i32_89 = arith.constant 2 : i32
      %96 = arith.cmpi slt, %95, %c2_i32_89 : i32
      %97 = arith.extui %96 : i1 to i32
      %c0_i32_90 = arith.constant 0 : i32
      %98 = arith.cmpi ne, %97, %c0_i32_90 : i32
      scf.if %98 {
        %c1_i32_136 = arith.constant 1 : i32
        %242 = arith.addi %arg24, %c1_i32_136 : i32
        %c1_i32_137 = arith.constant 1 : i32
        %243 = arith.subi %c1_i32_137, %76 : i32
        %c0_i32_138 = arith.constant 0 : i32
        %c0_i32_139 = arith.constant 0 : i32
        %c0_i32_140 = arith.constant 0 : i32
        %244 = tpu.memref_slice %arg5[%242, %c0_i32_139, %c0_i32_140] : memref<2x128x512xbf16, #tpu.memory_space<any>> -> memref<1x128x512xbf16, #tpu.memory_space<any>>
        %245 = tpu.memref_squeeze %244 : memref<1x128x512xbf16, #tpu.memory_space<any>> -> memref<128x512xbf16, #tpu.memory_space<any>>
        %c0_i32_141 = arith.constant 0 : i32
        %c0_i32_142 = arith.constant 0 : i32
        %246 = tpu.memref_slice %arg20[%243, %c0_i32_141, %c0_i32_142] : memref<2x128x512xbf16, #tpu.memory_space<vmem>> -> memref<1x128x512xbf16, #tpu.memory_space<vmem>>
        %247 = tpu.memref_squeeze %246 : memref<1x128x512xbf16, #tpu.memory_space<vmem>> -> memref<128x512xbf16, #tpu.memory_space<vmem>>
        %248 = tpu.memref_slice %arg23[%c0_i32_138, %243] : memref<3x2x!tpu.dma_semaphore, #tpu.memory_space<semaphore_mem>> -> memref<1x1x!tpu.dma_semaphore, #tpu.memory_space<semaphore_mem>>
        %249 = tpu.memref_squeeze %248 : memref<1x1x!tpu.dma_semaphore, #tpu.memory_space<semaphore_mem>> -> memref<!tpu.dma_semaphore, #tpu.memory_space<semaphore_mem>>
        tpu.enqueue_dma source(%245 : memref<128x512xbf16, #tpu.memory_space<any>>) target(%247 : memref<128x512xbf16, #tpu.memory_space<vmem>>) target_semaphore(%249 : memref<!tpu.dma_semaphore, #tpu.memory_space<semaphore_mem>>)
        %c1_i32_143 = arith.constant 1 : i32
        %c0_i32_144 = arith.constant 0 : i32
        %c0_i32_145 = arith.constant 0 : i32
        %250 = tpu.memref_slice %arg6[%242, %c0_i32_144, %c0_i32_145] : memref<2x128x128xbf16, #tpu.memory_space<any>> -> memref<1x128x128xbf16, #tpu.memory_space<any>>
        %251 = tpu.memref_squeeze %250 : memref<1x128x128xbf16, #tpu.memory_space<any>> -> memref<128x128xbf16, #tpu.memory_space<any>>
        %c0_i32_146 = arith.constant 0 : i32
        %c0_i32_147 = arith.constant 0 : i32
        %252 = tpu.memref_slice %arg21[%243, %c0_i32_146, %c0_i32_147] : memref<2x128x128xbf16, #tpu.memory_space<vmem>> -> memref<1x128x128xbf16, #tpu.memory_space<vmem>>
        %253 = tpu.memref_squeeze %252 : memref<1x128x128xbf16, #tpu.memory_space<vmem>> -> memref<128x128xbf16, #tpu.memory_space<vmem>>
        %254 = tpu.memref_slice %arg23[%c1_i32_143, %243] : memref<3x2x!tpu.dma_semaphore, #tpu.memory_space<semaphore_mem>> -> memref<1x1x!tpu.dma_semaphore, #tpu.memory_space<semaphore_mem>>
        %255 = tpu.memref_squeeze %254 : memref<1x1x!tpu.dma_semaphore, #tpu.memory_space<semaphore_mem>> -> memref<!tpu.dma_semaphore, #tpu.memory_space<semaphore_mem>>
        tpu.enqueue_dma source(%251 : memref<128x128xbf16, #tpu.memory_space<any>>) target(%253 : memref<128x128xbf16, #tpu.memory_space<vmem>>) target_semaphore(%255 : memref<!tpu.dma_semaphore, #tpu.memory_space<semaphore_mem>>)
        %c2_i32_148 = arith.constant 2 : i32
        %c0_i32_149 = arith.constant 0 : i32
        %c0_i32_150 = arith.constant 0 : i32
        %256 = tpu.memref_slice %arg7[%242, %c0_i32_149, %c0_i32_150] : memref<2x128x128xbf16, #tpu.memory_space<any>> -> memref<1x128x128xbf16, #tpu.memory_space<any>>
        %257 = tpu.memref_squeeze %256 : memref<1x128x128xbf16, #tpu.memory_space<any>> -> memref<128x128xbf16, #tpu.memory_space<any>>
        %c0_i32_151 = arith.constant 0 : i32
        %c0_i32_152 = arith.constant 0 : i32
        %258 = tpu.memref_slice %arg22[%243, %c0_i32_151, %c0_i32_152] : memref<2x128x128xbf16, #tpu.memory_space<vmem>> -> memref<1x128x128xbf16, #tpu.memory_space<vmem>>
        %259 = tpu.memref_squeeze %258 : memref<1x128x128xbf16, #tpu.memory_space<vmem>> -> memref<128x128xbf16, #tpu.memory_space<vmem>>
        %260 = tpu.memref_slice %arg23[%c2_i32_148, %243] : memref<3x2x!tpu.dma_semaphore, #tpu.memory_space<semaphore_mem>> -> memref<1x1x!tpu.dma_semaphore, #tpu.memory_space<semaphore_mem>>
        %261 = tpu.memref_squeeze %260 : memref<1x1x!tpu.dma_semaphore, #tpu.memory_space<semaphore_mem>> -> memref<!tpu.dma_semaphore, #tpu.memory_space<semaphore_mem>>
        tpu.enqueue_dma source(%257 : memref<128x128xbf16, #tpu.memory_space<any>>) target(%259 : memref<128x128xbf16, #tpu.memory_space<vmem>>) target_semaphore(%261 : memref<!tpu.dma_semaphore, #tpu.memory_space<semaphore_mem>>)
      } else {
      }
      %c0_91 = arith.constant 0 : index
      %c0_92 = arith.constant 0 : index
      %99 = vector.load %arg18[%c0_91, %c0_92] : memref<16x128xf32, #tpu.memory_space<vmem>>, vector<16x128xf32>
      %c0_93 = arith.constant 0 : index
      %c0_94 = arith.constant 0 : index
      %100 = vector.load %arg19[%c0_93, %c0_94] : memref<256x128xf32, #tpu.memory_space<vmem>>, vector<256x128xf32>
      %101 = arith.index_cast %arg24 : i32 to index
      %c0_95 = arith.constant 0 : index
      %c0_96 = arith.constant 0 : index
      %102 = vector.load %arg11[%101, %c0_95, %c0_96] : memref<2x6x128xf32, #tpu.memory_space<vmem>>, vector<1x6x128xf32>
      %103 = vector.shape_cast %102 : vector<1x6x128xf32> to vector<6x128xf32>
      %104 = arith.truncf %99 : vector<16x128xf32> to vector<16x128xbf16>
      %105 = arith.index_cast %76 : i32 to index
      %c0_97 = arith.constant 0 : index
      %c0_98 = arith.constant 0 : index
      %106 = vector.load %arg20[%105, %c0_97, %c0_98] : memref<2x128x512xbf16, #tpu.memory_space<vmem>>, vector<1x128x512xbf16>
      %107 = vector.shape_cast %106 : vector<1x128x512xbf16> to vector<128x512xbf16>
      %cst_99 = arith.constant dense<0.000000e+00> : vector<16x512xf32>
      %108 = tpu.matmul %104, %107, %cst_99 {dimension_numbers = #tpu.dot_dimension_numbers<[1], [0], [0], [1], [0, 0, 1, 1], [], []>} : vector<16x128xbf16>, vector<128x512xbf16>, vector<16x512xf32> -> vector<16x512xf32>
      %109 = arith.index_cast %arg24 : i32 to index
      %c0_100 = arith.constant 0 : index
      %c0_101 = arith.constant 0 : index
      %110 = vector.load %arg8[%109, %c0_100, %c0_101] : memref<2x1x512xf32, #tpu.memory_space<vmem>>, vector<1x1x512xf32>
      %111 = vector.shape_cast %110 : vector<1x1x512xf32> to vector<1x512xf32>
      %112 = vector.broadcast %111 : vector<1x512xf32> to vector<16x512xf32>
      %113 = arith.addf %108, %112 : vector<16x512xf32>
      %114 = vector.extract_strided_slice %113 {offsets = [0, 0], sizes = [16, 128], strides = [1, 1]} : vector<16x512xf32> to vector<16x128xf32>
      %115 = vector.extract_strided_slice %113 {offsets = [0, 128], sizes = [16, 128], strides = [1, 1]} : vector<16x512xf32> to vector<16x128xf32>
      %116 = vector.extract_strided_slice %113 {offsets = [0, 256], sizes = [16, 128], strides = [1, 1]} : vector<16x512xf32> to vector<16x128xf32>
      %117 = vector.extract_strided_slice %113 {offsets = [0, 384], sizes = [16, 128], strides = [1, 1]} : vector<16x512xf32> to vector<16x128xf32>
      %118 = arith.truncf %100 : vector<256x128xf32> to vector<256x128xbf16>
      %119 = arith.index_cast %76 : i32 to index
      %c0_102 = arith.constant 0 : index
      %c0_103 = arith.constant 0 : index
      %120 = vector.load %arg21[%119, %c0_102, %c0_103] : memref<2x128x128xbf16, #tpu.memory_space<vmem>>, vector<1x128x128xbf16>
      %121 = vector.shape_cast %120 : vector<1x128x128xbf16> to vector<128x128xbf16>
      %cst_104 = arith.constant dense<0.000000e+00> : vector<256x128xf32>
      %122 = tpu.matmul %118, %121, %cst_104 {dimension_numbers = #tpu.dot_dimension_numbers<[1], [0], [0], [1], [0, 0, 1, 1], [], []>} : vector<256x128xbf16>, vector<128x128xbf16>, vector<256x128xf32> -> vector<256x128xf32>
      %123 = arith.index_cast %arg24 : i32 to index
      %c0_105 = arith.constant 0 : index
      %c0_106 = arith.constant 0 : index
      %124 = vector.load %arg9[%123, %c0_105, %c0_106] : memref<2x1x128xf32, #tpu.memory_space<vmem>>, vector<1x1x128xf32>
      %125 = vector.shape_cast %124 : vector<1x1x128xf32> to vector<1x128xf32>
      %126 = vector.broadcast %125 : vector<1x128xf32> to vector<256x128xf32>
      %127 = arith.addf %122, %126 : vector<256x128xf32>
      %128 = vector.shape_cast %127 : vector<256x128xf32> to vector<16x16x128xf32>
      %129 = vector.shape_cast %116 : vector<16x128xf32> to vector<1x16x128xf32>
      %130 = vector.broadcast %129 : vector<1x16x128xf32> to vector<16x16x128xf32>
      %131 = arith.addf %128, %130 : vector<16x16x128xf32>
      %132 = vector.shape_cast %117 : vector<16x128xf32> to vector<16x1x128xf32>
      %133 = vector.broadcast %132 : vector<16x1x128xf32> to vector<16x16x128xf32>
      %134 = arith.addf %131, %133 : vector<16x16x128xf32>
      %135 = arith.negf %134 : vector<16x16x128xf32>
      %136 = math.exp %135 : vector<16x16x128xf32>
      %cst_107 = arith.constant 1.000000e+00 : f32
      %137 = vector.broadcast %cst_107 : f32 to vector<16x16x128xf32>
      %138 = arith.addf %137, %136 : vector<16x16x128xf32>
      %139 = arith.divf %137, %138 : vector<16x16x128xf32>
      %140 = vector.shape_cast %115 : vector<16x128xf32> to vector<1x16x128xf32>
      %141 = vector.broadcast %140 : vector<1x16x128xf32> to vector<16x16x128xf32>
      %142 = arith.mulf %139, %141 : vector<16x16x128xf32>
      %cst_108 = arith.constant dense<0.000000e+00> : vector<16x128xf32>
      %143 = vector.multi_reduction <add>, %142, %cst_108 [1] : vector<16x16x128xf32> to vector<16x128xf32>
      %144 = arith.addf %114, %143 : vector<16x128xf32>
      %145 = vector.extract_strided_slice %103 {offsets = [0, 0], sizes = [1, 128], strides = [1, 1]} : vector<6x128xf32> to vector<1x128xf32>
      %146 = vector.extract_strided_slice %103 {offsets = [1, 0], sizes = [1, 128], strides = [1, 1]} : vector<6x128xf32> to vector<1x128xf32>
      %cst_109 = arith.constant dense<0.000000e+00> : vector<16xf32>
      %147 = vector.multi_reduction <add>, %144, %cst_109 [1] : vector<16x128xf32> to vector<16xf32>
      %148 = vector.shape_cast %147 : vector<16xf32> to vector<16x1xf32>
      %cst_110 = arith.constant 1.280000e+02 : f32
      %149 = vector.broadcast %cst_110 : f32 to vector<16x1xf32>
      %150 = arith.divf %148, %149 : vector<16x1xf32>
      %151 = vector.broadcast %150 : vector<16x1xf32> to vector<16x128xf32>
      %152 = arith.subf %144, %151 : vector<16x128xf32>
      %153 = arith.mulf %152, %152 : vector<16x128xf32>
      %cst_111 = arith.constant dense<0.000000e+00> : vector<16xf32>
      %154 = vector.multi_reduction <add>, %153, %cst_111 [1] : vector<16x128xf32> to vector<16xf32>
      %155 = vector.shape_cast %154 : vector<16xf32> to vector<16x1xf32>
      %cst_112 = arith.constant 1.280000e+02 : f32
      %156 = vector.broadcast %cst_112 : f32 to vector<16x1xf32>
      %157 = arith.divf %155, %156 : vector<16x1xf32>
      %158 = vector.broadcast %150 : vector<16x1xf32> to vector<16x128xf32>
      %159 = arith.subf %144, %158 : vector<16x128xf32>
      %cst_113 = arith.constant 9.99999974E-6 : f32
      %160 = vector.broadcast %cst_113 : f32 to vector<16x1xf32>
      %161 = arith.addf %157, %160 : vector<16x1xf32>
      %162 = math.rsqrt %161 : vector<16x1xf32>
      %163 = vector.broadcast %162 : vector<16x1xf32> to vector<16x128xf32>
      %164 = arith.mulf %159, %163 : vector<16x128xf32>
      %165 = vector.broadcast %145 : vector<1x128xf32> to vector<16x128xf32>
      %166 = arith.mulf %164, %165 : vector<16x128xf32>
      %167 = vector.broadcast %146 : vector<1x128xf32> to vector<16x128xf32>
      %168 = arith.addf %166, %167 : vector<16x128xf32>
      %cst_114 = arith.constant 0.000000e+00 : f32
      %169 = vector.broadcast %cst_114 : f32 to vector<16x128xf32>
      %170 = arith.maximumf %168, %169 : vector<16x128xf32>
      %171 = vector.shape_cast %134 : vector<16x16x128xf32> to vector<256x128xf32>
      %172 = vector.extract_strided_slice %103 {offsets = [2, 0], sizes = [1, 128], strides = [1, 1]} : vector<6x128xf32> to vector<1x128xf32>
      %173 = vector.extract_strided_slice %103 {offsets = [3, 0], sizes = [1, 128], strides = [1, 1]} : vector<6x128xf32> to vector<1x128xf32>
      %cst_115 = arith.constant dense<0.000000e+00> : vector<256xf32>
      %174 = vector.multi_reduction <add>, %171, %cst_115 [1] : vector<256x128xf32> to vector<256xf32>
      %175 = vector.shape_cast %174 : vector<256xf32> to vector<256x1xf32>
      %cst_116 = arith.constant 1.280000e+02 : f32
      %176 = vector.broadcast %cst_116 : f32 to vector<256x1xf32>
      %177 = arith.divf %175, %176 : vector<256x1xf32>
      %178 = vector.broadcast %177 : vector<256x1xf32> to vector<256x128xf32>
      %179 = arith.subf %171, %178 : vector<256x128xf32>
      %180 = arith.mulf %179, %179 : vector<256x128xf32>
      %cst_117 = arith.constant dense<0.000000e+00> : vector<256xf32>
      %181 = vector.multi_reduction <add>, %180, %cst_117 [1] : vector<256x128xf32> to vector<256xf32>
      %182 = vector.shape_cast %181 : vector<256xf32> to vector<256x1xf32>
      %cst_118 = arith.constant 1.280000e+02 : f32
      %183 = vector.broadcast %cst_118 : f32 to vector<256x1xf32>
      %184 = arith.divf %182, %183 : vector<256x1xf32>
      %185 = vector.broadcast %177 : vector<256x1xf32> to vector<256x128xf32>
      %186 = arith.subf %171, %185 : vector<256x128xf32>
      %cst_119 = arith.constant 9.99999974E-6 : f32
      %187 = vector.broadcast %cst_119 : f32 to vector<256x1xf32>
      %188 = arith.addf %184, %187 : vector<256x1xf32>
      %189 = math.rsqrt %188 : vector<256x1xf32>
      %190 = vector.broadcast %189 : vector<256x1xf32> to vector<256x128xf32>
      %191 = arith.mulf %186, %190 : vector<256x128xf32>
      %192 = vector.broadcast %172 : vector<1x128xf32> to vector<256x128xf32>
      %193 = arith.mulf %191, %192 : vector<256x128xf32>
      %194 = vector.broadcast %173 : vector<1x128xf32> to vector<256x128xf32>
      %195 = arith.addf %193, %194 : vector<256x128xf32>
      %cst_120 = arith.constant 0.000000e+00 : f32
      %196 = vector.broadcast %cst_120 : f32 to vector<256x128xf32>
      %197 = arith.maximumf %195, %196 : vector<256x128xf32>
      %198 = arith.addf %99, %170 : vector<16x128xf32>
      %c0_121 = arith.constant 0 : index
      %c0_122 = arith.constant 0 : index
      %199 = vector.load %arg18[%c0_121, %c0_122] : memref<16x128xf32, #tpu.memory_space<vmem>>, vector<16x128xf32>
      tpu.vector_store %arg18[%c0_121, %c0_122], %198 {strides = array<i32>} : memref<16x128xf32, #tpu.memory_space<vmem>>, vector<16x128xf32>,
      %200 = vector.extract_strided_slice %103 {offsets = [4, 0], sizes = [1, 128], strides = [1, 1]} : vector<6x128xf32> to vector<1x128xf32>
      %201 = vector.extract_strided_slice %103 {offsets = [5, 0], sizes = [1, 128], strides = [1, 1]} : vector<6x128xf32> to vector<1x128xf32>
      %cst_123 = arith.constant dense<0.000000e+00> : vector<256xf32>
      %202 = vector.multi_reduction <add>, %197, %cst_123 [1] : vector<256x128xf32> to vector<256xf32>
      %203 = vector.shape_cast %202 : vector<256xf32> to vector<256x1xf32>
      %cst_124 = arith.constant 1.280000e+02 : f32
      %204 = vector.broadcast %cst_124 : f32 to vector<256x1xf32>
      %205 = arith.divf %203, %204 : vector<256x1xf32>
      %206 = vector.broadcast %205 : vector<256x1xf32> to vector<256x128xf32>
      %207 = arith.subf %197, %206 : vector<256x128xf32>
      %208 = arith.mulf %207, %207 : vector<256x128xf32>
      %cst_125 = arith.constant dense<0.000000e+00> : vector<256xf32>
      %209 = vector.multi_reduction <add>, %208, %cst_125 [1] : vector<256x128xf32> to vector<256xf32>
      %210 = vector.shape_cast %209 : vector<256xf32> to vector<256x1xf32>
      %cst_126 = arith.constant 1.280000e+02 : f32
      %211 = vector.broadcast %cst_126 : f32 to vector<256x1xf32>
      %212 = arith.divf %210, %211 : vector<256x1xf32>
      %213 = vector.broadcast %205 : vector<256x1xf32> to vector<256x128xf32>
      %214 = arith.subf %197, %213 : vector<256x128xf32>
      %cst_127 = arith.constant 9.99999974E-6 : f32
      %215 = vector.broadcast %cst_127 : f32 to vector<256x1xf32>
      %216 = arith.addf %212, %215 : vector<256x1xf32>
      %217 = math.rsqrt %216 : vector<256x1xf32>
      %218 = vector.broadcast %217 : vector<256x1xf32> to vector<256x128xf32>
      %219 = arith.mulf %214, %218 : vector<256x128xf32>
      %220 = vector.broadcast %200 : vector<1x128xf32> to vector<256x128xf32>
      %221 = arith.mulf %219, %220 : vector<256x128xf32>
      %222 = vector.broadcast %201 : vector<1x128xf32> to vector<256x128xf32>
      %223 = arith.addf %221, %222 : vector<256x128xf32>
      %224 = arith.negf %223 : vector<256x128xf32>
      %225 = math.exp %224 : vector<256x128xf32>
      %cst_128 = arith.constant 1.000000e+00 : f32
      %226 = vector.broadcast %cst_128 : f32 to vector<256x128xf32>
      %227 = arith.addf %226, %225 : vector<256x128xf32>
      %228 = arith.divf %226, %227 : vector<256x128xf32>
      %229 = arith.mulf %223, %228 : vector<256x128xf32>
      %230 = arith.truncf %229 : vector<256x128xf32> to vector<256x128xbf16>
      %231 = arith.index_cast %76 : i32 to index
      %c0_129 = arith.constant 0 : index
      %c0_130 = arith.constant 0 : index
      %232 = vector.load %arg22[%231, %c0_129, %c0_130] : memref<2x128x128xbf16, #tpu.memory_space<vmem>>, vector<1x128x128xbf16>
      %233 = vector.shape_cast %232 : vector<1x128x128xbf16> to vector<128x128xbf16>
      %cst_131 = arith.constant dense<0.000000e+00> : vector<256x128xf32>
      %234 = tpu.matmul %230, %233, %cst_131 {dimension_numbers = #tpu.dot_dimension_numbers<[1], [0], [0], [1], [0, 0, 1, 1], [], []>} : vector<256x128xbf16>, vector<128x128xbf16>, vector<256x128xf32> -> vector<256x128xf32>
      %235 = arith.addf %100, %234 : vector<256x128xf32>
      %236 = arith.index_cast %arg24 : i32 to index
      %c0_132 = arith.constant 0 : index
      %c0_133 = arith.constant 0 : index
      %237 = vector.load %arg10[%236, %c0_132, %c0_133] : memref<2x1x128xf32, #tpu.memory_space<vmem>>, vector<1x1x128xf32>
      %238 = vector.shape_cast %237 : vector<1x1x128xf32> to vector<1x128xf32>
      %239 = vector.broadcast %238 : vector<1x128xf32> to vector<256x128xf32>
      %240 = arith.addf %235, %239 : vector<256x128xf32>
      %c0_134 = arith.constant 0 : index
      %c0_135 = arith.constant 0 : index
      %241 = vector.load %arg19[%c0_134, %c0_135] : memref<256x128xf32, #tpu.memory_space<vmem>>, vector<256x128xf32>
      tpu.vector_store %arg19[%c0_134, %c0_135], %240 {strides = array<i32>} : memref<256x128xf32, #tpu.memory_space<vmem>>, vector<256x128xf32>,
    }
    %c2_i32_37 = arith.constant 2 : i32
    %c0_38 = arith.constant 0 : index
    %c0_39 = arith.constant 0 : index
    %30 = vector.load %arg19[%c0_38, %c0_39] : memref<256x128xf32, #tpu.memory_space<vmem>>, vector<256x128xf32>
    %cst_40 = arith.constant dense<0.000000e+00> : vector<128xf32>
    %31 = vector.multi_reduction <add>, %30, %cst_40 [0] : vector<256x128xf32> to vector<128xf32>
    %32 = vector.shape_cast %31 : vector<128xf32> to vector<1x128xf32>
    %cst_41 = arith.constant 2.560000e+02 : f32
    %33 = vector.broadcast %cst_41 : f32 to vector<1x128xf32>
    %34 = arith.divf %32, %33 : vector<1x128xf32>
    %c0_42 = arith.constant 0 : index
    %c0_43 = arith.constant 0 : index
    %35 = vector.load %arg12[%c0_42, %c0_43] : memref<128x128xf32, #tpu.memory_space<vmem>>, vector<128x128xf32>
    %cst_44 = arith.constant dense<0.000000e+00> : vector<1x128xf32>
    %36 = tpu.matmul %34, %35, %cst_44 {dimension_numbers = #tpu.dot_dimension_numbers<[1], [0], [0], [1], [0, 0, 1, 1], [], []>} : vector<1x128xf32>, vector<128x128xf32>, vector<1x128xf32> -> vector<1x128xf32>
    %37 = vector.broadcast %36 : vector<1x128xf32> to vector<256x128xf32>
    %38 = arith.subf %30, %37 : vector<256x128xf32>
    %39 = arith.mulf %38, %38 : vector<256x128xf32>
    %cst_45 = arith.constant dense<0.000000e+00> : vector<128xf32>
    %40 = vector.multi_reduction <add>, %39, %cst_45 [0] : vector<256x128xf32> to vector<128xf32>
    %41 = vector.shape_cast %40 : vector<128xf32> to vector<1x128xf32>
    %cst_46 = arith.constant 2.560000e+02 : f32
    %42 = vector.broadcast %cst_46 : f32 to vector<1x128xf32>
    %43 = arith.divf %41, %42 : vector<1x128xf32>
    %c0_47 = arith.constant 0 : index
    %c0_48 = arith.constant 0 : index
    %44 = vector.load %arg12[%c0_47, %c0_48] : memref<128x128xf32, #tpu.memory_space<vmem>>, vector<128x128xf32>
    %cst_49 = arith.constant dense<0.000000e+00> : vector<1x128xf32>
    %45 = tpu.matmul %43, %44, %cst_49 {dimension_numbers = #tpu.dot_dimension_numbers<[1], [0], [0], [1], [0, 0, 1, 1], [], []>} : vector<1x128xf32>, vector<128x128xf32>, vector<1x128xf32> -> vector<1x128xf32>
    %cst_50 = arith.constant 9.99999974E-6 : f32
    %46 = vector.broadcast %cst_50 : f32 to vector<1x128xf32>
    %47 = arith.addf %45, %46 : vector<1x128xf32>
    %48 = math.rsqrt %47 : vector<1x128xf32>
    %49 = vector.broadcast %48 : vector<1x128xf32> to vector<256x128xf32>
    %50 = arith.mulf %38, %49 : vector<256x128xf32>
    %c0_51 = arith.constant 0 : index
    %c0_52 = arith.constant 0 : index
    %51 = vector.load %arg13[%c0_51, %c0_52] : memref<1x128xf32, #tpu.memory_space<vmem>>, vector<1x128xf32>
    %52 = vector.broadcast %51 : vector<1x128xf32> to vector<256x128xf32>
    %53 = arith.mulf %50, %52 : vector<256x128xf32>
    %c0_53 = arith.constant 0 : index
    %c0_54 = arith.constant 0 : index
    %54 = vector.load %arg14[%c0_53, %c0_54] : memref<1x128xf32, #tpu.memory_space<vmem>>, vector<1x128xf32>
    %55 = vector.broadcast %54 : vector<1x128xf32> to vector<256x128xf32>
    %56 = arith.addf %53, %55 : vector<256x128xf32>
    %cst_55 = arith.constant 0.000000e+00 : f32
    %57 = vector.broadcast %cst_55 : f32 to vector<256x128xf32>
    %58 = arith.maximumf %56, %57 : vector<256x128xf32>
    %c0_56 = arith.constant 0 : index
    %c0_57 = arith.constant 0 : index
    %59 = vector.load %arg15[%c0_56, %c0_57] : memref<1x128xf32, #tpu.memory_space<vmem>>, vector<1x128xf32>
    %cst_58 = arith.constant dense<0.000000e+00> : vector<1x256xf32>
    %60 = tpu.matmul %59, %58, %cst_58 {dimension_numbers = #tpu.dot_dimension_numbers<[1], [1], [0], [0], [0, 0, 1, 0], [], []>} : vector<1x128xf32>, vector<256x128xf32>, vector<1x256xf32> -> vector<1x256xf32>
    %c0_59 = arith.constant 0 : index
    %c0_60 = arith.constant 0 : index
    %61 = vector.load %arg16[%c0_59, %c0_60] : memref<1x1xf32, #tpu.memory_space<vmem>>, vector<1x1xf32>
    %62 = vector.broadcast %61 : vector<1x1xf32> to vector<1x256xf32>
    %63 = arith.addf %60, %62 : vector<1x256xf32>
    %c0_61 = arith.constant 0 : index
    %c0_62 = arith.constant 0 : index
    %c0_63 = arith.constant 0 : index
    %64 = vector.load %arg17[%c0_61, %c0_62, %c0_63] : memref<1x1x256xf32, #tpu.memory_space<vmem>>, vector<1x1x256xf32>
    %65 = vector.shape_cast %64 : vector<1x1x256xf32> to vector<1x256xf32>
    %66 = vector.shape_cast %63 : vector<1x256xf32> to vector<1x1x256xf32>
    tpu.vector_store %arg17[%c0_61, %c0_62, %c0_63], %66 {strides = array<i32>} : memref<1x1x256xf32, #tpu.memory_space<vmem>>, vector<1x1x256xf32>,
    return
  }
  func.func @transform_0(%arg0: i32) -> (i32, i32, i32) {
    %c0_i32 = arith.constant 0 : i32
    %c0_i32_0 = arith.constant 0 : i32
    %c0_i32_1 = arith.constant 0 : i32
    return %arg0, %c0_i32, %c0_i32_0 : i32, i32, i32
  }
  func.func @transform_1(%arg0: i32) -> (i32, i32, i32) {
    %c0_i32 = arith.constant 0 : i32
    %c0_i32_0 = arith.constant 0 : i32
    %c0_i32_1 = arith.constant 0 : i32
    return %arg0, %c0_i32, %c0_i32_0 : i32, i32, i32
  }
  func.func @transform_2(%arg0: i32) -> (i32, i32) {
    %c0_i32 = arith.constant 0 : i32
    %c0_i32_0 = arith.constant 0 : i32
    %c0_i32_1 = arith.constant 0 : i32
    return %c0_i32, %c0_i32_0 : i32, i32
  }
  func.func @transform_3(%arg0: i32) -> (i32, i32) {
    %c0_i32 = arith.constant 0 : i32
    %c0_i32_0 = arith.constant 0 : i32
    %c0_i32_1 = arith.constant 0 : i32
    return %c0_i32, %c0_i32_0 : i32, i32
  }
  func.func @transform_7(%arg0: i32) -> (i32, i32, i32) {
    %c0_i32 = arith.constant 0 : i32
    %c0_i32_0 = arith.constant 0 : i32
    %c0_i32_1 = arith.constant 0 : i32
    %c0_i32_2 = arith.constant 0 : i32
    return %c0_i32, %c0_i32_0, %c0_i32_1 : i32, i32, i32
  }
  func.func @transform_8(%arg0: i32) -> (i32, i32, i32) {
    %c0_i32 = arith.constant 0 : i32
    %c0_i32_0 = arith.constant 0 : i32
    %c0_i32_1 = arith.constant 0 : i32
    %c0_i32_2 = arith.constant 0 : i32
    return %c0_i32, %c0_i32_0, %c0_i32_1 : i32, i32, i32
  }
  func.func @transform_9(%arg0: i32) -> (i32, i32, i32) {
    %c0_i32 = arith.constant 0 : i32
    %c0_i32_0 = arith.constant 0 : i32
    %c0_i32_1 = arith.constant 0 : i32
    %c0_i32_2 = arith.constant 0 : i32
    return %c0_i32, %c0_i32_0, %c0_i32_1 : i32, i32, i32
  }
  func.func @transform_10(%arg0: i32) -> (i32, i32, i32) {
    %c0_i32 = arith.constant 0 : i32
    %c0_i32_0 = arith.constant 0 : i32
    %c0_i32_1 = arith.constant 0 : i32
    %c0_i32_2 = arith.constant 0 : i32
    return %c0_i32, %c0_i32_0, %c0_i32_1 : i32, i32, i32
  }
  func.func @transform_11(%arg0: i32) -> (i32, i32) {
    %c0_i32 = arith.constant 0 : i32
    %c0_i32_0 = arith.constant 0 : i32
    %c0_i32_1 = arith.constant 0 : i32
    return %c0_i32, %c0_i32_0 : i32, i32
  }
  func.func @transform_12(%arg0: i32) -> (i32, i32) {
    %c0_i32 = arith.constant 0 : i32
    %c0_i32_0 = arith.constant 0 : i32
    %c0_i32_1 = arith.constant 0 : i32
    return %c0_i32, %c0_i32_0 : i32, i32
  }
  func.func @transform_13(%arg0: i32) -> (i32, i32) {
    %c0_i32 = arith.constant 0 : i32
    %c0_i32_0 = arith.constant 0 : i32
    %c0_i32_1 = arith.constant 0 : i32
    return %c0_i32, %c0_i32_0 : i32, i32
  }
  func.func @transform_14(%arg0: i32) -> (i32, i32) {
    %c0_i32 = arith.constant 0 : i32
    %c0_i32_0 = arith.constant 0 : i32
    %c0_i32_1 = arith.constant 0 : i32
    return %c0_i32, %c0_i32_0 : i32, i32
  }
  func.func @transform_15(%arg0: i32) -> (i32, i32) {
    %c0_i32 = arith.constant 0 : i32
    %c0_i32_0 = arith.constant 0 : i32
    %c0_i32_1 = arith.constant 0 : i32
    return %c0_i32, %c0_i32_0 : i32, i32
  }
  func.func @transform_16(%arg0: i32) -> (i32, i32, i32) {
    %c0_i32 = arith.constant 0 : i32
    %c0_i32_0 = arith.constant 0 : i32
    %c0_i32_1 = arith.constant 0 : i32
    return %arg0, %c0_i32, %c0_i32_0 : i32, i32, i32
  }
}

</mosaic_0001>

<bundles_post_ra>
// kernel: tpu_custom_call.1
= control target key start
LH: loop header
LB: loop body
LE: loop exit
PB: predicated region body
PF: predicated region fallthrough
CT: control target
= control target key end

     0   :  { %s11951_s0 = inlined_call_operand.hbm [shape: f32[2,16,128], index: 0, kind: input, shape index: {}]   ;;  %s11952_s1 = inlined_call_operand.vmem [shape: f32[2,256,6], index: 1, kind: input, shape index: {}]   ;;  %s11953_s2 = inlined_call_operand.vmem [shape: f32[6,128], index: 2, kind: input, shape index: {}]   ;;  %s11954_s3 = inlined_call_operand.vmem [shape: f32[1,128], index: 3, kind: input, shape index: {}]   ;;  %s11955_s4 = inlined_call_operand.vmem [shape: bf16[2,128,512], index: 4, kind: input, shape index: {}]   ;;  %s11956_s5 = inlined_call_operand.hbm [shape: bf16[2,128,128], index: 5, kind: input, shape index: {}]   ;;  %s11957_s6 = inlined_call_operand.hbm [shape: bf16[2,128,128], index: 6, kind: input, shape index: {}]   ;;  %s11958_s7 = inlined_call_operand.vmem [shape: f32[2,1,512], index: 7, kind: input, shape index: {}]   ;;  %s11959_s8 = inlined_call_operand.vmem [shape: f32[2,1,128], index: 8, kind: input, shape index: {}]   ;;  %s11960_s9 = inlined_call_operand.vmem [shape: f32[2,1,128], index: 9, kind: input, shape index: {}]   ;;  %s11961_s10 = inlined_call_operand.vmem [shape: f32[2,6,128], index: 10, kind: input, shape index: {}]   ;;  %s11962_s11 = inlined_call_operand.hbm [shape: f32[128,128], index: 11, kind: input, shape index: {}]   ;;  %s11963_s12 = inlined_call_operand.vmem [shape: f32[1,128], index: 12, kind: input, shape index: {}]   ;;  %s11964_s13 = inlined_call_operand.vmem [shape: f32[1,128], index: 13, kind: input, shape index: {}]   ;;  %s11965_s14 = inlined_call_operand.vmem [shape: f32[1,128], index: 14, kind: input, shape index: {}]   ;;  %s11966_s15 = inlined_call_operand.<no memory space> [shape: f32[1,1], index: 15, kind: input, shape index: {}]   ;;  %s11967_s16 = inlined_call_operand.hbm [shape: f32[2,1,256], index: 16, kind: output, shape index: {}]  }
   0x1   :  { %12103 = sst [smem:[#allocation103_spill]] %s11951_s0  ;;  %v21_v0 = vstv %s11966_s15 }
   0x2   :  { %12104 = sst [smem:[#allocation104_spill]] %s11952_s1  ;;  %22 = vst [vmem:[#allocation8] sm:$0x1] %v21_v0 }
   0x3   :  { %12105 = sst [smem:[#allocation105_spill]] %s11953_s2 }
   0x4   :  { %12106 = sst [smem:[#allocation106_spill]] %s11954_s3 }
   0x5   :  { %12107 = sst [smem:[#allocation107_spill]] %s11955_s4 }
   0x6   :  { %12108 = sst [smem:[#allocation108_spill]] %s11962_s11 }
   0x7   :  { %12109 = sst [smem:[#allocation109_spill]] %s11964_s13 }
   0x8   :  { %12110 = sst [smem:[#allocation110_spill]] %s11965_s14 }
   0x9   :  { %12111 = sst [smem:[#allocation111_spill]] %s11967_s16 }
   0xa   :  { %23 = vsyncpa [#allocation10], 0 }
   0xb   :  { %25 = vsyncpa [#allocation10 + $0x1], 0 }
   0xc   :  { %26 = vsyncpa [#allocation13], 0 }
   0xd   :  { %27 = vsyncpa [#allocation11], 0 }
   0xe   :  { %29 = vsyncpa [#allocation11 + $0x1], 0  ;;  %s6789_s23 = smov 0   ;;  %s6791_s24 = smov 0  }
   0xf   :  { %s6793_s25 = smov 0   ;;  %s6795_s26 = smov 0  }
  0x10 LB: > { %12112 = sst [smem:[#allocation33_spill]] %s6673_s23  ;;  %s6810_s15 = sadd.s32 4294967295, %s6685_s26   ;;  %s6685_s26 = sphi %s6795_s26, %s12632_s26   ;;  %s6681_s25 = sphi %s6793_s25, %s12635_s25   ;;  %s6677_s24 = sphi %s6791_s24, %s12634_s24   ;;  %s6673_s23 = sphi %s6789_s23, %s12633_s23  }
  0x11   : > { %12113 = sst [smem:[#allocation34_spill]] %s6677_s24  ;;  %s5502_s27 = sadd.s32 4294967294, %s6685_s26  }
  0x12   : > { %12114 = sst [smem:[#allocation35_spill]] %s6681_s25  ;;  %p55_p0 = scmp.ne.s32.totalorder %s6677_s24, %s6673_s23 }
  0x13   : > { %12115 = sst [smem:[#allocation36_spill]] %s6685_s26  ;;  %p56_p1 = scmp.eq.s32.totalorder %s6810_s15, 0 }
  0x14   : > { %12116 = sst [smem:[#allocation37_spill]] %s6810_s15  ;;  %p336_p2 = scmp.eq.s32.totalorder %s6810_s15, 1 }
  0x15   : > { %p342_p3 = scmp.eq.s32.totalorder %s5502_s27, 1  ;;  %p6819_p4 = por %p56_p1, %p55_p0 }
  0x16   : > { %p5503_p5 = scmp.ge.s32.totalorder %s6685_s26, 1  ;;  %p349_p7 = scmp.lt.s32.totalorder %s6685_s26, 3 }
  0x17   : > { %p6824_p6 = por %p342_p3, %p55_p0  ;;  %s12120_s11 = sld [smem:[#allocation108_spill]] }
  0x18   : > { %p6832_p8 = pnand %p5503_p5, %p349_p7  ;;  %s6691_s19 = smov [#allocation12]  }
  0x19   : > { %s12118_s29 = scalar_select %p6824_p6, 1, 0 }
  0x1a   : > { %p5948_p9 = pneg %p6832_p8  ;;  %s380_s20 = sshll.u32 %s6691_s19, 4  ;;  %s381_s20 = int_to_ptr.vmem [resolvable:$true] %s380_s20 }
  0x1b   : > { %12119 = sst [smem:[#allocation38_spill]] %s12118_s29  ;;  %s6842_s21 = sadd.s32 1, %s6685_s26  }
  0x1c   : > { %p5949_p10 = pnand %p5948_p9, %p56_p1  ;;  %12122 = sst [smem:[#allocation39_spill]] %s6842_s21 }
  0x1d   : > { %s378_s17 = sshll.u32 %s12120_s11, 4  ;;  %s11972_s22 = smov 128   ;;  %s379_s17 = int_to_ptr.hbm [resolvable:$true] %s378_s17 }
  0x1e   : > { %s11973_s27 = smov 8   ;;  %s39_s30 = ssub.s32 %s6685_s26, %s6842_s21 }
  0x1f   : > { %5951 = dma.hbm_to_vmem [thread:$0]  (!%p5949_p10), %s379_s17, 2048, %s381_s20, [#allocation13], %s11972_s22, %s11972_s22, %s11973_s27  }
  0x20   : > { %s42_s0 = sadd.s32 1, %s6681_s25  ;;  %p40_p12 = scmp.eq.s32.totalorder %s39_s30, 0 }
  0x21   : > { %p49_p13 = scmp.ne.s32.totalorder %s6681_s25, %s6677_s24  ;;  %p50_p0 = scmp.eq.s32.totalorder %s6685_s26, 0 }
  0x22   : > { %s6854_s19 = scalar_select %p40_p12, %s6681_s25, %s42_s0  }
  0x23   : > { %p6858_p3 = por %p336_p2, %p49_p13  ;;  %p5961_p5 = scmp.lt.s32.totalorder %s6685_s26, 2 }
  0x24   : > { %12123 = sst [smem:[#allocation40_spill]] %s6854_s19  ;;  %s406_s29 = sand.u32 1, %s6681_s25  }
  0x25   : > { %s12124_s11 = scalar_select %p6858_p3, 1, 0 }
  0x26   : > { %s5865_s23 = sshll.u32 %s6685_s26, 4  ;;  %p51_p7 = por %p50_p0, %p49_p13 }
  0x27   : > { %12125 = sst [smem:[#allocation41_spill]] %s12124_s11  ;;  %s5506_s16 = sshll.u32 %s406_s29, 4 }
  0x28   : > { %s12126_s17 = sld [smem:[#allocation103_spill]]  ;;  %s410_s30 = scalar_lea.vmem [#allocation9], %s5506_s16 }
  0x29   : > { %s418_s27 = sshll.u32 %s410_s30, 4  ;;  %p6868_p9 = pnand %p5961_p5, %p51_p7  ;;  %s419_s27 = int_to_ptr.vmem [resolvable:$true] %s418_s27 }
  0x2a   : > { %s407_s19 = scalar_lea.sflag [#allocation10], %s406_s29 }
  0x2b   : > { %p6483_p10 = pneg %p6868_p9 }
  0x2e   : > { %s415_s20 = scalar_lea.hbm %s12126_s17, %s5865_s23  ;;  %s6486_s16 = scalar_lea.hbm %s12126_s17, 32 }
  0x2f   : > { %s416_s22 = sshll.u32 %s415_s20, 4  ;;  %s417_s22 = int_to_ptr.hbm [resolvable:$true] %s416_s22 }
  0x30   : > { %s6479_s21 = sshra.s32 %s417_s22, 4  ;;  %s6480_s21 = int_to_ptr.hbm [resolvable:$true] %s6479_s21 }
  0x31   : > { %s6481_s25 = scalar_lea.hbm %s6480_s21, 16  ;;  %p6487_p0 = scmp.lt.s32.totalorder %s6480_s21, %s12126_s17 }
  0x32   : > { %p6482_p2 = scmp.ne.s32.totalorder %s6480_s21, %s6481_s25  ;;  %p6488_p5 = scmp.lt.s32.totalorder %s6486_s16, %s6481_s25 }
  0x34   : > { %p6484_p12 = pnand %p6483_p10, %p6482_p2  ;;  %p6489_p7 = por %p6488_p5, %p6487_p0 }
  0x36   : > { %p6485_p13 = pneg %p6484_p12 }
  0x38   : > { %p6490_p11 = pnand %p6489_p7, %p6485_p13 }
  0x3a   : > { %6493 = shalt.err (!%p6490_p11)
}
  0x3b   : > { %s12128_s29 = smov 8   ;;  %s12129_s30 = smov 128  }
  0x3c   : > { %5955 = dma.hbm_to_vmem [thread:$0]  (!%p6868_p9), %s417_s22, 256, %s419_s27, %s407_s19, %s12129_s30, %s12129_s30, %s12128_s29  }
  0x3d   : > { %438 = sbr.rel (%p6832_p8) target bundleno = 2229 (0x8b5), region = 72 }
  0x42   : > { %s6888_s13 = sand.u32 1, %s6677_s24  }
  0x43   : > { %12130 = sst [smem:[#allocation42_spill]] %s6888_s13  ;;  %s5510_s21 = sshll.u32 %s6888_s13, 4 }
  0x44   : > { %s441_s25 = scalar_lea.sflag [#allocation10], %s6888_s13  ;;  %s6892_s14 = scalar_lea.vmem [#allocation9], %s5510_s21 }
  0x45   : > { %6654 = dma.done.wait (%p6819_p4), %s441_s25, 256  }
  0x46   : > { %6656 = vsyncadd (%p6819_p4), %s441_s25, 4294967040 }
  0x47   : > { %6658 = dma.done.wait (%p56_p1), [#allocation13], 2048  }
  0x48   : > { %6660 = vsyncadd (%p56_p1), [#allocation13], 4294965248  ;;  %s5512_s18 = sshll.u32 %s6888_s13, 1  ;;  %p498_p8 = scmp.lt.s32.totalorder %s6810_s15, 1  ;;  %vm749_vm0 = vcmask 1045504   ;;  %vm652_vm1 = vcmask 48128  }
  0x49   : > { %s12131_s1 = sld [smem:[#allocation104_spill]]  ;;  %s7008_s19 = scalar_lea.vmem [#allocation14], %s5512_s18  ;;  %v611_v36 = vld [vmem:[%s6892_s14] sm:$0xff]  ;;  %v612_v37 = vld [vmem:[%s6892_s14 + $0x8] sm:$0xff] }
  0x4a   : > { %s499_s22 = scalar_select %p498_p8, %s6810_s15, 1  ;;  %613 = vst [vmem:[#allocation2] sm:$0xff] %v611_v36 }
  0x4b   : > { %s12132_s4 = sld [smem:[#allocation107_spill]]  ;;  %614 = vst [vmem:[#allocation2 + $0x8] sm:$0xff] %v612_v37 }
  0x4c   : > { %s5866_s27 = sshll.u32 %s499_s22, 8  ;;  %12133 = sst [smem:[#allocation43_spill]] %s7008_s19 }
  0x4d   : > { %s12134_s2 = sld [smem:[#allocation105_spill]] }
  0x4f   : > { %s6908_s16 = scalar_lea.vmem %s12131_s1, %s5866_s27 }
  0x50   : > { %v631_v34 = vld [vmem:[%s6908_s16 + $0x80] sm:$0xff]  ;;  %v632_v40 = vld [vmem:[%s6908_s16 + $0x88] sm:$0xff] }
  0x51   : > { %v513_v1 = vld [vmem:[%s12132_s4] sm:$0xff]  ;;  %v515_v2 = vld [vmem:[%s12132_s4 + $0x8] sm:$0xff]  ;;  %v517_v3 = vld [vmem:[%s12132_s4 + $0x10] sm:$0xff] }
  0x52   : > { %514 = vst [vmem:[#allocation4] sm:$0xff] %v513_v1  ;;  %v519_v4 = vld [vmem:[%s12132_s4 + $0x18] sm:$0xff]  ;;  %v521_v5 = vld [vmem:[%s12132_s4 + $0x20] sm:$0xff]  ;;  %v523_v6 = vld [vmem:[%s12132_s4 + $0x28] sm:$0xff] }
  0x53   : > { %516 = vst [vmem:[#allocation4 + $0x8] sm:$0xff] %v515_v2  ;;  %v525_v7 = vld [vmem:[%s12132_s4 + $0x30] sm:$0xff]  ;;  %v527_v8 = vld [vmem:[%s12132_s4 + $0x38] sm:$0xff]  ;;  %v529_v9 = vld [vmem:[%s12132_s4 + $0x40] sm:$0xff] }
  0x54   : > { %518 = vst [vmem:[#allocation4 + $0x10] sm:$0xff] %v517_v3  ;;  %v531_v10 = vld [vmem:[%s12132_s4 + $0x48] sm:$0xff]  ;;  %v533_v11 = vld [vmem:[%s12132_s4 + $0x50] sm:$0xff]  ;;  %v535_v12 = vld [vmem:[%s12132_s4 + $0x58] sm:$0xff] }
  0x55   : > { %520 = vst [vmem:[#allocation4 + $0x18] sm:$0xff] %v519_v4  ;;  %v537_v13 = vld [vmem:[%s12132_s4 + $0x60] sm:$0xff]  ;;  %v539_v14 = vld [vmem:[%s12132_s4 + $0x68] sm:$0xff]  ;;  %v541_v15 = vld [vmem:[%s12132_s4 + $0x70] sm:$0xff] }
  0x56   : > { %522 = vst [vmem:[#allocation4 + $0x20] sm:$0xff] %v521_v5  ;;  %v543_v16 = vld [vmem:[%s12132_s4 + $0x78] sm:$0xff]  ;;  %v545_v17 = vld [vmem:[%s12132_s4 + $0x80] sm:$0xff]  ;;  %v547_v18 = vld [vmem:[%s12132_s4 + $0x88] sm:$0xff] }
  0x57   : > { %524 = vst [vmem:[#allocation4 + $0x28] sm:$0xff] %v523_v6  ;;  %v549_v19 = vld [vmem:[%s12132_s4 + $0x90] sm:$0xff]  ;;  %v551_v20 = vld [vmem:[%s12132_s4 + $0x98] sm:$0xff]  ;;  %v553_v21 = vld [vmem:[%s12132_s4 + $0xa0] sm:$0xff] }
  0x58   : > { %526 = vst [vmem:[#allocation4 + $0x30] sm:$0xff] %v525_v7  ;;  %v555_v22 = vld [vmem:[%s12132_s4 + $0xa8] sm:$0xff]  ;;  %v557_v23 = vld [vmem:[%s12132_s4 + $0xb0] sm:$0xff]  ;;  %v559_v24 = vld [vmem:[%s12132_s4 + $0xb8] sm:$0xff] }
  0x59   : > { %528 = vst [vmem:[#allocation4 + $0x38] sm:$0xff] %v527_v8  ;;  %v561_v25 = vld [vmem:[%s12132_s4 + $0xc0] sm:$0xff]  ;;  %v563_v26 = vld [vmem:[%s12132_s4 + $0xc8] sm:$0xff]  ;;  %v565_v27 = vld [vmem:[%s12132_s4 + $0xd0] sm:$0xff] }
  0x5a   : > { %530 = vst [vmem:[#allocation4 + $0x40] sm:$0xff] %v529_v9  ;;  %v567_v28 = vld [vmem:[%s12132_s4 + $0xd8] sm:$0xff]  ;;  %v569_v29 = vld [vmem:[%s12132_s4 + $0xe0] sm:$0xff]  ;;  %v571_v30 = vld [vmem:[%s12132_s4 + $0xe8] sm:$0xff] }
  0x5b   : > { %532 = vst [vmem:[#allocation4 + $0x48] sm:$0xff] %v531_v10  ;;  %v573_v31 = vld [vmem:[%s12132_s4 + $0xf0] sm:$0xff]  ;;  %v575_v32 = vld [vmem:[%s12132_s4 + $0xf8] sm:$0xff]  ;;  %v647_v33 = vld [vmem:[%s12134_s2] sm:$0x3f] }
  0x5c   : > { %534 = vst [vmem:[#allocation4 + $0x50] sm:$0xff] %v533_v11  ;;  %v639_v35 = vld [vmem:[%s6908_s16 + $0xc0] sm:$0xff]  ;;  %5922 = vmatpush.msk.msra.mxu2 %vm749_vm0, %v647_v33  ;;  %5923 = vmatpush.msk.msra.mxu3 %vm749_vm0, %v647_v33  ;;  %v640_v41 = vld [vmem:[%s6908_s16 + $0xc8] sm:$0xff] }
  0x5d   : > { %536 = vst [vmem:[#allocation4 + $0x58] sm:$0xff] %v535_v12  ;;  %v615_v38 = vld [vmem:[%s6908_s16] sm:$0xff]  ;;  %5532 = vmatmul.msk.f32.vlgmr.msra.gmra.mxu2 %vm652_vm1, %v631_v34  ;;  %5540 = vmatmul.msk.f32.vlgmr.msra.gmra.mxu3 %vm652_vm1, %v639_v35 }
  0x5e   : > { %538 = vst [vmem:[#allocation4 + $0x60] sm:$0xff] %v537_v13  ;;  %v623_v39 = vld [vmem:[%s6908_s16 + $0x40] sm:$0xff]  ;;  %5515 = vmatpush.msk.msra.mxu0 %vm749_vm0, %v647_v33  ;;  %5921 = vmatpush.msk.msra.mxu1 %vm749_vm0, %v647_v33 }
  0x5f   : > { %540 = vst [vmem:[#allocation4 + $0x68] sm:$0xff] %v539_v14  ;;  %5516 = vmatmul.msk.f32.vlgmr.msra.gmra.mxu0 %vm652_vm1, %v615_v38  ;;  %5524 = vmatmul.msk.f32.vlgmr.msra.gmra.mxu1 %vm652_vm1, %v623_v39 }
  0x60   : > { %542 = vst [vmem:[#allocation4 + $0x70] sm:$0xff] %v541_v15 }
  0x61   : > { %544 = vst [vmem:[#allocation4 + $0x78] sm:$0xff] %v543_v16 }
  0x62   : > { %546 = vst [vmem:[#allocation4 + $0x80] sm:$0xff] %v545_v17 }
  0x63   : > { %548 = vst [vmem:[#allocation4 + $0x88] sm:$0xff] %v547_v18 }
  0x64   : > { %550 = vst [vmem:[#allocation4 + $0x90] sm:$0xff] %v549_v19 }
  0x65   : > { %552 = vst [vmem:[#allocation4 + $0x98] sm:$0xff] %v551_v20 }
  0x66   : > { %554 = vst [vmem:[#allocation4 + $0xa0] sm:$0xff] %v553_v21 }
  0x67   : > { %556 = vst [vmem:[#allocation4 + $0xa8] sm:$0xff] %v555_v22 }
  0x68   : > { %558 = vst [vmem:[#allocation4 + $0xb0] sm:$0xff] %v557_v23 }
  0x69   : > { %560 = vst [vmem:[#allocation4 + $0xb8] sm:$0xff] %v559_v24 }
  0x6a   : > { %562 = vst [vmem:[#allocation4 + $0xc0] sm:$0xff] %v561_v25 }
  0x6b   : > { %564 = vst [vmem:[#allocation4 + $0xc8] sm:$0xff] %v563_v26 }
  0x6c   : > { %566 = vst [vmem:[#allocation4 + $0xd0] sm:$0xff] %v565_v27 }
  0x6d   : > { %568 = vst [vmem:[#allocation4 + $0xd8] sm:$0xff] %v567_v28 }
  0x6e   : > { %570 = vst [vmem:[#allocation4 + $0xe0] sm:$0xff] %v569_v29 }
  0x6f   : > { %572 = vst [vmem:[#allocation4 + $0xe8] sm:$0xff] %v571_v30 }
  0x70   : > { %574 = vst [vmem:[#allocation4 + $0xf0] sm:$0xff] %v573_v31 }
  0x71   : > { %576 = vst [vmem:[#allocation4 + $0xf8] sm:$0xff] %v575_v32 }
  0x72   : > { %582 = vsyncadd [#allocation7], 4096  ;;  %v616_v42 = vld [vmem:[%s6908_s16 + $0x8] sm:$0xff]  ;;  %5533 = vmatmul.msk.f32.gmra.mxu2 %vm652_vm1, %v632_v40  ;;  %5541 = vmatmul.msk.f32.gmra.mxu3 %vm652_vm1, %v640_v41  ;;  %v633_v44 = vld [vmem:[%s6908_s16 + $0x90] sm:$0xff]  ;;  %s591_s23 = sshll.u32 %s11956_s5, 4  ;;  %s6694_s20 = smov [#allocation5]   ;;  %s592_s23 = int_to_ptr.hbm [resolvable:$true] %s591_s23 }
  0x73   : > { %v624_v43 = vld [vmem:[%s6908_s16 + $0x48] sm:$0xff]  ;;  %5517 = vmatmul.msk.f32.gmra.mxu0 %vm652_vm1, %v616_v42  ;;  %v641_v45 = vld [vmem:[%s6908_s16 + $0xd0] sm:$0xff]  ;;  %v634_v48 = vld [vmem:[%s6908_s16 + $0x98] sm:$0xff]  ;;  %s593_s29 = sshll.u32 %s6694_s20, 4  ;;  %s6695_s25 = smov [#allocation6]   ;;  %s594_s29 = int_to_ptr.vmem [resolvable:$true] %s593_s29 }
  0x74   : > { %5525 = vmatmul.msk.f32.gmra.mxu1 %vm652_vm1, %v624_v43  ;;  %v617_v46 = vld [vmem:[%s6908_s16 + $0x10] sm:$0xff]  ;;  %v642_v49 = vld [vmem:[%s6908_s16 + $0xd8] sm:$0xff]  ;;  %v635_v52 = vld [vmem:[%s6908_s16 + $0xa0] sm:$0xff]  ;;  %596 = dma.hbm_to_vmem [thread:$0]  %s592_s23, 1024, %s594_s29, [#allocation7 + $0x2] }
  0x75   : > { %v625_v47 = vld [vmem:[%s6908_s16 + $0x50] sm:$0xff]  ;;  %v618_v50 = vld [vmem:[%s6908_s16 + $0x18] sm:$0xff]  ;;  %v643_v53 = vld [vmem:[%s6908_s16 + $0xe0] sm:$0xff]  ;;  %s607_s22 = sshll.u32 %s6695_s25, 4  ;;  %s12135_s3 = sld [smem:[#allocation106_spill]]  ;;  %s608_s22 = int_to_ptr.vmem [resolvable:$true] %s607_s22 }
  0x76   : > { %v626_v51 = vld [vmem:[%s6908_s16 + $0x58] sm:$0xff]  ;;  %v619_v54 = vld [vmem:[%s6908_s16 + $0x20] sm:$0xff]  ;;  %v636_v56 = vld [vmem:[%s6908_s16 + $0xa8] sm:$0xff]  ;;  %s7122_s28 = smov 0  }
  0x77   : > { %v627_v55 = vld [vmem:[%s6908_s16 + $0x60] sm:$0xff]  ;;  %v644_v57 = vld [vmem:[%s6908_s16 + $0xe8] sm:$0xff]  ;;  %v637_v60 = vld [vmem:[%s6908_s16 + $0xb0] sm:$0xff] }
  0x78   : > { %v620_v58 = vld [vmem:[%s6908_s16 + $0x28] sm:$0xff]  ;;  %v645_v61 = vld [vmem:[%s6908_s16 + $0xf0] sm:$0xff]  ;;  %v638_v0 = vld [vmem:[%s6908_s16 + $0xb8] sm:$0xff] }
  0x79   : > { %v628_v59 = vld [vmem:[%s6908_s16 + $0x68] sm:$0xff]  ;;  %v621_v62 = vld [vmem:[%s6908_s16 + $0x30] sm:$0xff]  ;;  %v646_v1 = vld [vmem:[%s6908_s16 + $0xf8] sm:$0xff] }
  0x7a   : > { %5534 = vmatmul.msk.f32.gmra.mxu2 %vm652_vm1, %v633_v44  ;;  %5542 = vmatmul.msk.f32.gmra.mxu3 %vm652_vm1, %v641_v45  ;;  %v629_v63 = vld [vmem:[%s6908_s16 + $0x70] sm:$0xff]  ;;  %v622_v2 = vld [vmem:[%s6908_s16 + $0x38] sm:$0xff] }
  0x7b   : > { %5518 = vmatmul.msk.f32.gmra.mxu0 %vm652_vm1, %v617_v46  ;;  %v630_v3 = vld [vmem:[%s6908_s16 + $0x78] sm:$0xff]  ;;  %s605_s16 = sshll.u32 %s11957_s6, 4  ;;  %v7088_v4 = vld [vmem:[%s12135_s3] ss:$0 sm:$0xff]  ;;  %s606_s16 = int_to_ptr.hbm [resolvable:$true] %s605_s16 }
  0x7c   : > { %5526 = vmatmul.msk.f32.gmra.mxu1 %vm652_vm1, %v625_v47  ;;  %610 = dma.hbm_to_vmem [thread:$0]  %s606_s16, 1024, %s608_s22, [#allocation7 + $0x4] }
  0x82   : > { %5535 = vmatmul.msk.f32.gmra.mxu2 %vm652_vm1, %v634_v48  ;;  %5543 = vmatmul.msk.f32.gmra.mxu3 %vm652_vm1, %v642_v49 }
  0x83   : > { %5519 = vmatmul.msk.f32.gmra.mxu0 %vm652_vm1, %v618_v50 }
  0x84   : > { %5527 = vmatmul.msk.f32.gmra.mxu1 %vm652_vm1, %v626_v51 }
  0x8a   : > { %5536 = vmatmul.msk.f32.gmra.mxu2 %vm652_vm1, %v635_v52  ;;  %5544 = vmatmul.msk.f32.gmra.mxu3 %vm652_vm1, %v643_v53 }
  0x8b   : > { %5520 = vmatmul.msk.f32.gmra.mxu0 %vm652_vm1, %v619_v54 }
  0x8c   : > { %5528 = vmatmul.msk.f32.gmra.mxu1 %vm652_vm1, %v627_v55 }
  0x92   : > { %5537 = vmatmul.msk.f32.gmra.mxu2 %vm652_vm1, %v636_v56  ;;  %5545 = vmatmul.msk.f32.gmra.mxu3 %vm652_vm1, %v644_v57 }
  0x93   : > { %5521 = vmatmul.msk.f32.gmra.mxu0 %vm652_vm1, %v620_v58 }
  0x94   : > { %5529 = vmatmul.msk.f32.gmra.mxu1 %vm652_vm1, %v628_v59 }
  0x9a   : > { %5538 = vmatmul.msk.f32.gmra.mxu2 %vm652_vm1, %v637_v60  ;;  %5546 = vmatmul.msk.f32.gmra.mxu3 %vm652_vm1, %v645_v61 }
  0x9b   : > { %5522 = vmatmul.msk.f32.gmra.mxu0 %vm652_vm1, %v621_v62 }
  0x9c   : > { %5530 = vmatmul.msk.f32.gmra.mxu1 %vm652_vm1, %v629_v63 }
  0xa2   : > { %5539 = vmatmul.msk.f32.gmra.mxu2 %vm652_vm1, %v638_v0  ;;  %5547 = vmatmul.msk.f32.gmra.mxu3 %vm652_vm1, %v646_v1 }
  0xa3   : > { %5523 = vmatmul.msk.f32.gmra.mxu0 %vm652_vm1, %v622_v2 }
  0xa4   : > { %5531 = vmatmul.msk.f32.gmra.mxu1 %vm652_vm1, %v630_v3 }
  0xdc   : > { %v770_v5 = vpop.f32.mrf.mxu0  ;;  %v794_v6 = vpop.f32.mrf.mxu1 }
  0xdd   : > { %v771_v7 = vadd.f32 %v7088_v4, %v770_v5  ;;  %v795_v8 = vadd.f32 %v7088_v4, %v794_v6 }
  0xdf   : > { %866 = vst [vmem:[#allocation3 + $0xa8] sm:$0xff] %v771_v7 }
  0xe0   : > { %874 = vst [vmem:[#allocation3 + $0x80] sm:$0xff] %v795_v8  ;;  %v818_v9 = vpop.f32.mrf.mxu2  ;;  %v842_v10 = vpop.f32.mrf.mxu3 }
  0xe1   : > { %v819_v11 = vadd.f32 %v7088_v4, %v818_v9  ;;  %v843_v12 = vadd.f32 %v7088_v4, %v842_v10 }
  0xe3   : > { %882 = vst [vmem:[#allocation3 + $0x88] sm:$0xff] %v819_v11 }
  0xe4   : > { %890 = vst [vmem:[#allocation3] sm:$0xff] %v843_v12 }
  0xf0   : > { %v773_v13 = vpop.f32.mrf.mxu0 }
  0xf1   : > { %v797_v14 = vpop.f32.mrf.mxu1  ;;  %v774_v15 = vadd.f32 %v7088_v4, %v773_v13 }
  0xf2   : > { %v798_v16 = vadd.f32 %v7088_v4, %v797_v14 }
  0xf3   : > { %867 = vst [vmem:[#allocation3 + $0xd0] sm:$0xff] %v774_v15 }
  0xf4   : > { %875 = vst [vmem:[#allocation3 + $0xe0] sm:$0xff] %v798_v16 }
  0xf5   : > { %v821_v17 = vpop.f32.mrf.mxu2  ;;  %v845_v18 = vpop.f32.mrf.mxu3 }
  0xf6   : > { %v822_v19 = vadd.f32 %v7088_v4, %v821_v17  ;;  %v846_v20 = vadd.f32 %v7088_v4, %v845_v18 }
  0xf8   : > { %883 = vst [vmem:[#allocation3 + $0x58] sm:$0xff] %v822_v19  ;;  %v776_v21 = vpop.f32.mrf.mxu0 }
  0xf9   : > { %891 = vst [vmem:[#allocation3 + $0x8] sm:$0xff] %v846_v20  ;;  %v800_v22 = vpop.f32.mrf.mxu1  ;;  %v777_v23 = vadd.f32 %v7088_v4, %v776_v21 }
  0xfa   : > { %v801_v24 = vadd.f32 %v7088_v4, %v800_v22 }
  0xfb   : > { %868 = vst [vmem:[#allocation3 + $0x10] sm:$0xff] %v777_v23 }
  0xfc   : > { %876 = vst [vmem:[#allocation3 + $0xf8] sm:$0xff] %v801_v24 }
  0xfd   : > { %v824_v25 = vpop.f32.mrf.mxu2  ;;  %v848_v26 = vpop.f32.mrf.mxu3 }
  0xfe   : > { %v825_v27 = vadd.f32 %v7088_v4, %v824_v25  ;;  %v849_v28 = vadd.f32 %v7088_v4, %v848_v26 }
 0x100   : > { %884 = vst [vmem:[#allocation3 + $0x30] sm:$0xff] %v825_v27  ;;  %v779_v29 = vpop.f32.mrf.mxu0 }
 0x101   : > { %892 = vst [vmem:[#allocation3 + $0xd8] sm:$0xff] %v849_v28  ;;  %v803_v30 = vpop.f32.mrf.mxu1  ;;  %v780_v31 = vadd.f32 %v7088_v4, %v779_v29 }
 0x102   : > { %v804_v32 = vadd.f32 %v7088_v4, %v803_v30 }
 0x103   : > { %869 = vst [vmem:[#allocation3 + $0x48] sm:$0xff] %v780_v31 }
 0x104   : > { %877 = vst [vmem:[#allocation3 + $0xb8] sm:$0xff] %v804_v32 }
 0x105   : > { %v827_v33 = vpop.f32.mrf.mxu2  ;;  %v851_v34 = vpop.f32.mrf.mxu3 }
 0x106   : > { %v828_v35 = vadd.f32 %v7088_v4, %v827_v33  ;;  %v852_v36 = vadd.f32 %v7088_v4, %v851_v34 }
 0x108   : > { %885 = vst [vmem:[#allocation3 + $0xc8] sm:$0xff] %v828_v35  ;;  %v782_v37 = vpop.f32.mrf.mxu0 }
 0x109   : > { %893 = vst [vmem:[#allocation3 + $0x68] sm:$0xff] %v852_v36  ;;  %v806_v38 = vpop.f32.mrf.mxu1  ;;  %v783_v39 = vadd.f32 %v7088_v4, %v782_v37 }
 0x10a   : > { %v807_v40 = vadd.f32 %v7088_v4, %v806_v38 }
 0x10b   : > { %870 = vst [vmem:[#allocation3 + $0x60] sm:$0xff] %v783_v39 }
 0x10c   : > { %878 = vst [vmem:[#allocation3 + $0x20] sm:$0xff] %v807_v40 }
 0x10d   : > { %v830_v41 = vpop.f32.mrf.mxu2  ;;  %v854_v42 = vpop.f32.mrf.mxu3 }
 0x10e   : > { %v831_v43 = vadd.f32 %v7088_v4, %v830_v41  ;;  %v855_v44 = vadd.f32 %v7088_v4, %v854_v42 }
 0x110   : > { %886 = vst [vmem:[#allocation3 + $0x18] sm:$0xff] %v831_v43  ;;  %v785_v45 = vpop.f32.mrf.mxu0 }
 0x111   : > { %894 = vst [vmem:[#allocation3 + $0xa0] sm:$0xff] %v855_v44  ;;  %v809_v46 = vpop.f32.mrf.mxu1  ;;  %v786_v47 = vadd.f32 %v7088_v4, %v785_v45 }
 0x112   : > { %v810_v48 = vadd.f32 %v7088_v4, %v809_v46 }
 0x113   : > { %871 = vst [vmem:[#allocation3 + $0x28] sm:$0xff] %v786_v47 }
 0x114   : > { %879 = vst [vmem:[#allocation3 + $0xf0] sm:$0xff] %v810_v48 }
 0x115   : > { %v833_v49 = vpop.f32.mrf.mxu2  ;;  %v857_v50 = vpop.f32.mrf.mxu3 }
 0x116   : > { %v834_v51 = vadd.f32 %v7088_v4, %v833_v49  ;;  %v858_v52 = vadd.f32 %v7088_v4, %v857_v50 }
 0x118   : > { %887 = vst [vmem:[#allocation3 + $0x90] sm:$0xff] %v834_v51  ;;  %v788_v53 = vpop.f32.mrf.mxu0 }
 0x119   : > { %895 = vst [vmem:[#allocation3 + $0x50] sm:$0xff] %v858_v52  ;;  %v812_v54 = vpop.f32.mrf.mxu1  ;;  %v789_v55 = vadd.f32 %v7088_v4, %v788_v53 }
 0x11a   : > { %v813_v56 = vadd.f32 %v7088_v4, %v812_v54 }
 0x11b   : > { %872 = vst [vmem:[#allocation3 + $0x40] sm:$0xff] %v789_v55 }
 0x11c   : > { %880 = vst [vmem:[#allocation3 + $0xb0] sm:$0xff] %v813_v56 }
 0x11d   : > { %v836_v57 = vpop.f32.mrf.mxu2  ;;  %v860_v58 = vpop.f32.mrf.mxu3 }
 0x11e   : > { %v837_v59 = vadd.f32 %v7088_v4, %v836_v57  ;;  %v861_v60 = vadd.f32 %v7088_v4, %v860_v58 }
 0x120   : > { %888 = vst [vmem:[#allocation3 + $0x70] sm:$0xff] %v837_v59  ;;  %v791_v61 = vpop.f32.mrf.mxu0 }
 0x121   : > { %896 = vst [vmem:[#allocation3 + $0xe8] sm:$0xff] %v861_v60  ;;  %v815_v62 = vpop.f32.mrf.mxu1  ;;  %v792_v63 = vadd.f32 %v7088_v4, %v791_v61 }
 0x122   : > { %v816_v0 = vadd.f32 %v7088_v4, %v815_v62 }
 0x123   : > { %873 = vst [vmem:[#allocation3 + $0x78] sm:$0xff] %v792_v63 }
 0x124   : > { %881 = vst [vmem:[#allocation3 + $0x38] sm:$0xff] %v816_v0 }
 0x125   : > { %v839_v1 = vpop.f32.mrf.mxu2  ;;  %v863_v2 = vpop.f32.mrf.mxu3 }
 0x126   : > { %v840_v3 = vadd.f32 %v7088_v4, %v839_v1  ;;  %v864_v5 = vadd.f32 %v7088_v4, %v863_v2 }
 0x128   : > { %889 = vst [vmem:[#allocation3 + $0xc0] sm:$0xff] %v840_v3 }
 0x129   : > { %897 = vst [vmem:[#allocation3 + $0x98] sm:$0xff] %v864_v5 }
 0x12a LB: >> { %p904_p1 = scmp.lt.s32.totalorder %s6689_s28, 0  ;;  %s905_s14 = ssub.s32 0, %s6689_s28  ;;  %s6689_s28 = sphi %s7122_s28, %s12620_s28  }
 0x12b   : >> { %s5548_s18 = smin.u32 %s6689_s28, %s905_s14 }
 0x12c   : >> { %s907_s23 = sand.u32 1, %s5548_s18  }
 0x12d   : >> { %s908_s20 = ssub.s32 0, %s907_s23 }
 0x12e   : >> { %s12637_s20 = smov (!%p904_p1, %s908_s20), %s907_s23 }
 0x12f   : >> { %p5550_p4 = scmp.lt.s32.totalorder %s12637_s20, 0  ;;  %s914_s29 = sadd.s32 2, %s12637_s20 }
 0x131   : >> { %s12639_s29 = smov (!%p5550_p4, %s914_s29), %s12637_s20 }
 0x132   : >> { %s5867_s30 = sshll.u32 %s12639_s29, 8  ;;  %s919_s16 = scalar_lea.sflag [#allocation7], %s12639_s29 }
 0x133   : >> { %s7130_s21 = scalar_lea.vmem [#allocation4], %s5867_s30 }
 0x134   : >> { %6661 = dma.done.wait %s919_s16, 4096 }
 0x135   : >> { %6662 = vsyncadd %s919_s16, 4294963200  ;;  %s5868_s25 = sshll.u32 %s12639_s29, 6  ;;  %s5411_s22 = scalar_lea.sflag %s919_s16, 2 [#allocation7] }
 0x136   : >> { %s7132_s27 = scalar_lea.vmem [#allocation5], %s5868_s25 }
 0x137   : >> { %6663 = dma.done.wait %s5411_s22, 1024 }
 0x138   : >> { %6664 = vsyncadd %s5411_s22, 4294966272  ;;  %s5415_s0 = scalar_lea.sflag %s919_s16, 4 [#allocation7]  ;;  %s7134_s14 = scalar_lea.vmem [#allocation6], %s5868_s25 }
 0x139   : >> { %6665 = dma.done.wait %s5415_s0, 1024 }
 0x13a   : >> { %6666 = vsyncadd %s5415_s0, 4294966272  ;;  %s11977_s18 = sadd.s32 1, %s6689_s28  }
 0x13b   : >> { %p7139_p11 = scmp.ge.s32.totalorder %s11977_s18, 2 }
 0x13c   : >> { %s7145_s20 = ssub.s32 (!%p7139_p11), 1, %s12639_s29  ;;  %s5557_s30 = sshll.u32 (!%p7139_p11), %s6689_s28, 8 }
 0x13d   : >> { %942 = sbr.rel (%p7139_p11) target bundleno = 404 (0x194), region = 118  ;;  %s12137_s4 = sld [smem:[#allocation107_spill]] (!%p7139_p11) }
 0x13e   : >> { %s5870_s0 = sshll.u32 (!%p7139_p11), %s7145_s20, 8 }
 0x13f   : >> { %s7157_s29 = scalar_lea.vmem (!%p7139_p11), [#allocation4], %s5870_s0 }
 0x143   : >> { %s7151_s22 = scalar_lea.vmem %s12137_s4, %s5557_s30  ;;  %s7221_s30 = scalar_lea.sflag [#allocation7], %s7145_s20 }
 0x144   : >> { %v5560_v4 = vld [vmem:[%s7151_s22 + $0x100] sm:$0xff]  ;;  %v5561_v6 = vld [vmem:[%s7151_s22 + $0x108] sm:$0xff]  ;;  %v5562_v7 = vld [vmem:[%s7151_s22 + $0x110] sm:$0xff] }
 0x145   : >> { %962 = vst [vmem:[%s7157_s29] sm:$0xff] %v5560_v4  ;;  %v5563_v8 = vld [vmem:[%s7151_s22 + $0x118] sm:$0xff]  ;;  %v5564_v9 = vld [vmem:[%s7151_s22 + $0x120] sm:$0xff]  ;;  %v5565_v10 = vld [vmem:[%s7151_s22 + $0x128] sm:$0xff] }
 0x146   : >> { %964 = vst [vmem:[%s7157_s29 + $0x8] sm:$0xff] %v5561_v6  ;;  %v5566_v11 = vld [vmem:[%s7151_s22 + $0x130] sm:$0xff]  ;;  %v5567_v12 = vld [vmem:[%s7151_s22 + $0x138] sm:$0xff]  ;;  %v5568_v13 = vld [vmem:[%s7151_s22 + $0x140] sm:$0xff] }
 0x147   : >> { %966 = vst [vmem:[%s7157_s29 + $0x10] sm:$0xff] %v5562_v7  ;;  %v5569_v14 = vld [vmem:[%s7151_s22 + $0x148] sm:$0xff]  ;;  %v5570_v15 = vld [vmem:[%s7151_s22 + $0x150] sm:$0xff]  ;;  %v5571_v16 = vld [vmem:[%s7151_s22 + $0x158] sm:$0xff] }
 0x148   : >> { %968 = vst [vmem:[%s7157_s29 + $0x18] sm:$0xff] %v5563_v8  ;;  %v5572_v17 = vld [vmem:[%s7151_s22 + $0x160] sm:$0xff]  ;;  %v5573_v18 = vld [vmem:[%s7151_s22 + $0x168] sm:$0xff]  ;;  %v5574_v19 = vld [vmem:[%s7151_s22 + $0x170] sm:$0xff] }
 0x149   : >> { %970 = vst [vmem:[%s7157_s29 + $0x20] sm:$0xff] %v5564_v9  ;;  %v5575_v20 = vld [vmem:[%s7151_s22 + $0x178] sm:$0xff]  ;;  %v5576_v21 = vld [vmem:[%s7151_s22 + $0x180] sm:$0xff]  ;;  %v5577_v22 = vld [vmem:[%s7151_s22 + $0x188] sm:$0xff] }
 0x14a   : >> { %972 = vst [vmem:[%s7157_s29 + $0x28] sm:$0xff] %v5565_v10  ;;  %v5578_v23 = vld [vmem:[%s7151_s22 + $0x190] sm:$0xff]  ;;  %v5579_v24 = vld [vmem:[%s7151_s22 + $0x198] sm:$0xff]  ;;  %v5580_v25 = vld [vmem:[%s7151_s22 + $0x1a0] sm:$0xff] }
 0x14b   : >> { %974 = vst [vmem:[%s7157_s29 + $0x30] sm:$0xff] %v5566_v11  ;;  %v5581_v26 = vld [vmem:[%s7151_s22 + $0x1a8] sm:$0xff]  ;;  %v5582_v27 = vld [vmem:[%s7151_s22 + $0x1b0] sm:$0xff]  ;;  %v5583_v28 = vld [vmem:[%s7151_s22 + $0x1b8] sm:$0xff] }
 0x14c   : >> { %976 = vst [vmem:[%s7157_s29 + $0x38] sm:$0xff] %v5567_v12  ;;  %v5584_v29 = vld [vmem:[%s7151_s22 + $0x1c0] sm:$0xff]  ;;  %v5585_v30 = vld [vmem:[%s7151_s22 + $0x1c8] sm:$0xff]  ;;  %v5586_v31 = vld [vmem:[%s7151_s22 + $0x1d0] sm:$0xff] }
 0x14d   : >> { %978 = vst [vmem:[%s7157_s29 + $0x40] sm:$0xff] %v5568_v13  ;;  %v5587_v32 = vld [vmem:[%s7151_s22 + $0x1d8] sm:$0xff]  ;;  %v5588_v33 = vld [vmem:[%s7151_s22 + $0x1e0] sm:$0xff]  ;;  %v5589_v34 = vld [vmem:[%s7151_s22 + $0x1e8] sm:$0xff] }
 0x14e   : >> { %980 = vst [vmem:[%s7157_s29 + $0x48] sm:$0xff] %v5569_v14  ;;  %v5590_v35 = vld [vmem:[%s7151_s22 + $0x1f0] sm:$0xff]  ;;  %v5591_v36 = vld [vmem:[%s7151_s22 + $0x1f8] sm:$0xff] }
 0x14f   : >> { %982 = vst [vmem:[%s7157_s29 + $0x50] sm:$0xff] %v5570_v15 }
 0x150   : >> { %984 = vst [vmem:[%s7157_s29 + $0x58] sm:$0xff] %v5571_v16 }
 0x151   : >> { %986 = vst [vmem:[%s7157_s29 + $0x60] sm:$0xff] %v5572_v17 }
 0x152   : >> { %988 = vst [vmem:[%s7157_s29 + $0x68] sm:$0xff] %v5573_v18 }
 0x153   : >> { %990 = vst [vmem:[%s7157_s29 + $0x70] sm:$0xff] %v5574_v19 }
 0x154   : >> { %992 = vst [vmem:[%s7157_s29 + $0x78] sm:$0xff] %v5575_v20 }
 0x155   : >> { %994 = vst [vmem:[%s7157_s29 + $0x80] sm:$0xff] %v5576_v21 }
 0x156   : >> { %996 = vst [vmem:[%s7157_s29 + $0x88] sm:$0xff] %v5577_v22 }
 0x157   : >> { %998 = vst [vmem:[%s7157_s29 + $0x90] sm:$0xff] %v5578_v23 }
 0x158   : >> { %1000 = vst [vmem:[%s7157_s29 + $0x98] sm:$0xff] %v5579_v24 }
 0x159   : >> { %1002 = vst [vmem:[%s7157_s29 + $0xa0] sm:$0xff] %v5580_v25 }
 0x15a   : >> { %1004 = vst [vmem:[%s7157_s29 + $0xa8] sm:$0xff] %v5581_v26 }
 0x15b   : >> { %1006 = vst [vmem:[%s7157_s29 + $0xb0] sm:$0xff] %v5582_v27 }
 0x15c   : >> { %1008 = vst [vmem:[%s7157_s29 + $0xb8] sm:$0xff] %v5583_v28 }
 0x15d   : >> { %1010 = vst [vmem:[%s7157_s29 + $0xc0] sm:$0xff] %v5584_v29 }
 0x15e   : >> { %1012 = vst [vmem:[%s7157_s29 + $0xc8] sm:$0xff] %v5585_v30 }
 0x15f   : >> { %1014 = vst [vmem:[%s7157_s29 + $0xd0] sm:$0xff] %v5586_v31 }
 0x160   : >> { %1016 = vst [vmem:[%s7157_s29 + $0xd8] sm:$0xff] %v5587_v32 }
 0x161   : >> { %1018 = vst [vmem:[%s7157_s29 + $0xe0] sm:$0xff] %v5588_v33 }
 0x162   : >> { %1020 = vst [vmem:[%s7157_s29 + $0xe8] sm:$0xff] %v5589_v34 }
 0x163   : >> { %1022 = vst [vmem:[%s7157_s29 + $0xf0] sm:$0xff] %v5590_v35 }
 0x164   : >> { %1024 = vst [vmem:[%s7157_s29 + $0xf8] sm:$0xff] %v5591_v36 }
 0x165   : >> { %1030 = vsyncadd %s7221_s30, 4096  ;;  %s5592_s16 = sshll.u32 %s6689_s28, 6  ;;  %s5871_s25 = sshll.u32 %s7145_s20, 6 }
 0x166   : >> { %s5423_s1 = scalar_lea.hbm %s11956_s5, %s5592_s16  ;;  %s5428_s2 = scalar_lea.sflag %s7221_s30, 2 [#allocation7] }
 0x167   : >> { %s5424_s22 = scalar_lea.hbm %s5423_s1, 64  ;;  %s1036_s29 = scalar_lea.vmem [#allocation5], %s5871_s25 }
 0x168   : >> { %s1046_s3 = sshll.u32 %s5424_s22, 4  ;;  %s1048_s4 = sshll.u32 %s1036_s29, 4  ;;  %s1047_s3 = int_to_ptr.hbm [resolvable:$true] %s1046_s3  ;;  %s1049_s4 = int_to_ptr.vmem [resolvable:$true] %s1048_s4 }
 0x169   : >> { %s6557_s17 = sshra.s32 %s1047_s3, 4  ;;  %s6561_s13 = scalar_lea.hbm %s11956_s5, 128  ;;  %s6558_s17 = int_to_ptr.hbm [resolvable:$true] %s6557_s17 }
 0x16a   : >> { %s6559_s24 = scalar_lea.hbm %s6558_s17, 64  ;;  %p6562_p2 = scmp.lt.s32.totalorder %s6558_s17, %s11956_s5 }
 0x16b   : >> { %p6560_p9 = scmp.ne.s32.totalorder %s6558_s17, %s6559_s24  ;;  %p6563_p10 = scmp.lt.s32.totalorder %s6561_s13, %s6559_s24 }
 0x16d   : >> { %p6564_p12 = por %p6563_p10, %p6562_p2 }
 0x16f   : >> { %p6565_p13 = pnand %p6564_p12, %p6560_p9 }
 0x171   : >> { %6568 = shalt.err (!%p6565_p13)  }
 0x172   : >> { %s6569_s1 = sshra.s32 %s1049_s4, 4  ;;  %s6696_s0 = smov [#allocation5]   ;;  %s6570_s1 = int_to_ptr.vmem [resolvable:$true] %s6569_s1 }
 0x173   : >> { %s6571_s18 = scalar_lea.vmem %s6570_s1, 64  ;;  %s6573_s22 = scalar_lea.vmem %s6696_s0, 128 }
 0x174   : >> { %p6572_p0 = scmp.ne.s32.totalorder %s6570_s1, %s6571_s18  ;;  %p6574_p5 = scmp.lt.s32.totalorder %s6570_s1, [#allocation5] }
 0x175   : >> { %p6575_p7 = scmp.lt.s32.totalorder %s6573_s22, %s6571_s18 }
 0x177   : >> { %p6576_p8 = por %p6575_p7, %p6574_p5 }
 0x179   : >> { %p6577_p1 = pnand %p6576_p8, %p6572_p0 }
 0x17b   : >> { %6580 = shalt.err (!%p6577_p1)  }
 0x17c   : >> { %1051 = dma.hbm_to_vmem [thread:$0]  %s1047_s3, 1024, %s1049_s4, %s5428_s2 }
 0x17d   : >> { %s5430_s24 = scalar_lea.hbm %s11957_s6, %s5592_s16  ;;  %s5435_s17 = scalar_lea.sflag %s7221_s30, 4 [#allocation7] }
 0x17e   : >> { %s5431_s15 = scalar_lea.hbm %s5430_s24, 64  ;;  %s1055_s19 = scalar_lea.vmem [#allocation6], %s5871_s25 }
 0x17f   : >> { %s1065_s13 = sshll.u32 %s5431_s15, 4  ;;  %s1067_s29 = sshll.u32 %s1055_s19, 4  ;;  %s1066_s13 = int_to_ptr.hbm [resolvable:$true] %s1065_s13  ;;  %s1068_s29 = int_to_ptr.vmem [resolvable:$true] %s1067_s29 }
 0x180   : >> { %s6581_s1 = sshra.s32 %s1066_s13, 4  ;;  %s6585_s4 = scalar_lea.hbm %s11957_s6, 128  ;;  %s6582_s1 = int_to_ptr.hbm [resolvable:$true] %s6581_s1 }
 0x181   : >> { %s6583_s18 = scalar_lea.hbm %s6582_s1, 64  ;;  %p6586_p9 = scmp.lt.s32.totalorder %s6582_s1, %s11957_s6 }
 0x182   : >> { %p6584_p4 = scmp.ne.s32.totalorder %s6582_s1, %s6583_s18  ;;  %p6587_p2 = scmp.lt.s32.totalorder %s6585_s4, %s6583_s18 }
 0x184   : >> { %p6588_p10 = por %p6587_p2, %p6586_p9 }
 0x186   : >> { %p6589_p12 = pnand %p6588_p10, %p6584_p4 }
 0x188   : >> { %6592 = shalt.err (!%p6589_p12)  }
 0x189   : >> { %s6593_s20 = sshra.s32 %s1068_s29, 4  ;;  %s6697_s16 = smov [#allocation6]   ;;  %s6594_s20 = int_to_ptr.vmem [resolvable:$true] %s6593_s20 }
 0x18a   : >> { %s6595_s30 = scalar_lea.vmem %s6594_s20, 64  ;;  %s6597_s25 = scalar_lea.vmem %s6697_s16, 128 }
 0x18b   : >> { %p6596_p13 = scmp.ne.s32.totalorder %s6594_s20, %s6595_s30  ;;  %p6598_p0 = scmp.lt.s32.totalorder %s6594_s20, [#allocation6] }
 0x18c   : >> { %p6599_p5 = scmp.lt.s32.totalorder %s6597_s25, %s6595_s30 }
 0x18e   : >> { %p6600_p7 = por %p6599_p5, %p6598_p0 }
 0x190   : >> { %p6601_p8 = pnand %p6600_p7, %p6596_p13 }
 0x192   : >> { %6604 = shalt.err (!%p6601_p8)  }
 0x193   : >> { %1070 = dma.hbm_to_vmem [thread:$0]  %s1066_s13, 1024, %s1068_s29, %s5435_s17 }
 0x194 PF: >> { %v5713_v37 = vld [vmem:[%s7130_s21 + $0xe0] sm:$0xf]  ;;  %v5903_v38 = vld [vmem:[%s7130_s21 + $0xec] sm:$0xf0]  ;;  %v5721_v39 = vld [vmem:[%s7130_s21 + $0xe8] sm:$0xf]  ;;  %s1401_s24 = scalar_lea.vmem %s11959_s8, %s6689_s28  ;;  %s10481_s4 = scalar_lea.vmem %s11960_s9, %s6689_s28 }
 0x195   : >> { %v5714_v40 = vor.u32 %v5903_v38, %v5713_v37  ;;  %v5904_v41 = vld [vmem:[%s7130_s21 + $0xf4] sm:$0xf0]  ;;  %v5697_v42 = vld [vmem:[%s7130_s21 + $0xc0] sm:$0xf]  ;;  %v5899_v43 = vld [vmem:[%s7130_s21 + $0xcc] sm:$0xf0] }
 0x196   : >> { %v5722_v44 = vor.u32 %v5904_v41, %v5721_v39  ;;  %v5705_v45 = vld [vmem:[%s7130_s21 + $0xc8] sm:$0xf]  ;;  %v5900_v46 = vld [vmem:[%s7130_s21 + $0xd4] sm:$0xf0]  ;;  %v5698_v47 = vor.u32 %v5899_v43, %v5697_v42  ;;  %v5681_v49 = vld [vmem:[%s7130_s21 + $0xa0] sm:$0xf] }
 0x197   : >> { %1313 = vmatpush.bf16.msra.mxu0 %v5714_v40  ;;  %v5706_v48 = vor.u32 %v5900_v46, %v5705_v45  ;;  %v5895_v50 = vld [vmem:[%s7130_s21 + $0xac] sm:$0xf0]  ;;  %v5689_v51 = vld [vmem:[%s7130_s21 + $0xa8] sm:$0xf]  ;;  %v5896_v52 = vld [vmem:[%s7130_s21 + $0xb4] sm:$0xf0] }
 0x198   : >> { %1341 = vmatpush.bf16.msra.mxu2 %v5722_v44  ;;  %v5682_v53 = vor.u32 %v5895_v50, %v5681_v49  ;;  %v5665_v54 = vld [vmem:[%s7130_s21 + $0x80] sm:$0xf]  ;;  %v5690_v55 = vor.u32 %v5896_v52, %v5689_v51  ;;  %v5891_v56 = vld [vmem:[%s7130_s21 + $0x8c] sm:$0xf0]  ;;  %v5902_v57 = vld [vmem:[%s7130_s21 + $0xec] sm:$0xf] }
 0x199   : >> { %v5723_v58 = vld [vmem:[%s7130_s21 + $0xf8] sm:$0xf0]  ;;  %v5673_v59 = vld [vmem:[%s7130_s21 + $0x88] sm:$0xf]  ;;  %v5892_v60 = vld [vmem:[%s7130_s21 + $0x94] sm:$0xf0]  ;;  %v5666_v0 = vor.u32 %v5891_v56, %v5665_v54 }
 0x19a   : >> { %v5726_v61 = vor.u32 %v5902_v57, %v5723_v58  ;;  %v5898_v62 = vld [vmem:[%s7130_s21 + $0xcc] sm:$0xf]  ;;  %v5707_v63 = vld [vmem:[%s7130_s21 + $0xd8] sm:$0xf0]  ;;  %v5649_v1 = vld [vmem:[%s7130_s21 + $0x60] sm:$0xf]  ;;  %v5674_v3 = vor.u32 %v5892_v60, %v5673_v59 }
 0x19b   : >> { %1314 = vmatpush.bf16.msra.mxu0 %v5698_v47  ;;  %v5710_v2 = vor.u32 %v5898_v62, %v5707_v63  ;;  %v5887_v5 = vld [vmem:[%s7130_s21 + $0x6c] sm:$0xf0]  ;;  %v5894_v4 = vld [vmem:[%s7130_s21 + $0xac] sm:$0xf]  ;;  %v5691_v6 = vld [vmem:[%s7130_s21 + $0xb8] sm:$0xf0] }
 0x19c   : >> { %1342 = vmatpush.bf16.msra.mxu2 %v5706_v48  ;;  %1355 = vmatpush.bf16.msra.mxu3 %v5726_v61  ;;  %v5657_v7 = vld [vmem:[%s7130_s21 + $0x68] sm:$0xf]  ;;  %v5888_v8 = vld [vmem:[%s7130_s21 + $0x74] sm:$0xf0]  ;;  %v5650_v9 = vor.u32 %v5887_v5, %v5649_v1  ;;  %v5633_v10 = vld [vmem:[%s7130_s21 + $0x40] sm:$0xf]  ;;  %v5694_v11 = vor.u32 %v5894_v4, %v5691_v6 }
 0x19d   : >> { %v5658_v12 = vor.u32 %v5888_v8, %v5657_v7  ;;  %v5883_v13 = vld [vmem:[%s7130_s21 + $0x4c] sm:$0xf0]  ;;  %v5890_v14 = vld [vmem:[%s7130_s21 + $0x8c] sm:$0xf]  ;;  %v5675_v15 = vld [vmem:[%s7130_s21 + $0x98] sm:$0xf0] }
 0x19e   : >> { %v5641_v16 = vld [vmem:[%s7130_s21 + $0x48] sm:$0xf]  ;;  %v5884_v17 = vld [vmem:[%s7130_s21 + $0x54] sm:$0xf0]  ;;  %v5634_v18 = vor.u32 %v5883_v13, %v5633_v10  ;;  %v5617_v19 = vld [vmem:[%s7130_s21 + $0x20] sm:$0xf]  ;;  %v5678_v20 = vor.u32 %v5890_v14, %v5675_v15 }
 0x19f   : >> { %1315 = vmatpush.bf16.msra.mxu0 %v5682_v53  ;;  %v5642_v21 = vor.u32 %v5884_v17, %v5641_v16  ;;  %v5879_v22 = vld [vmem:[%s7130_s21 + $0x2c] sm:$0xf0]  ;;  %v5886_v23 = vld [vmem:[%s7130_s21 + $0x6c] sm:$0xf]  ;;  %v5659_v24 = vld [vmem:[%s7130_s21 + $0x78] sm:$0xf0] }
 0x1a0   : >> { %1343 = vmatpush.bf16.msra.mxu2 %v5690_v55  ;;  %1356 = vmatpush.bf16.msra.mxu3 %v5710_v2  ;;  %v5625_v25 = vld [vmem:[%s7130_s21 + $0x28] sm:$0xf]  ;;  %v5880_v26 = vld [vmem:[%s7130_s21 + $0x34] sm:$0xf0]  ;;  %v5618_v27 = vor.u32 %v5879_v22, %v5617_v19  ;;  %v5601_v28 = vld [vmem:[%s7130_s21] sm:$0xf]  ;;  %v5662_v29 = vor.u32 %v5886_v23, %v5659_v24 }
 0x1a1   : >> { %v5626_v30 = vor.u32 %v5880_v26, %v5625_v25  ;;  %v5875_v31 = vld [vmem:[%s7130_s21 + $0xc] sm:$0xf0]  ;;  %v5882_v32 = vld [vmem:[%s7130_s21 + $0x4c] sm:$0xf]  ;;  %v5643_v33 = vld [vmem:[%s7130_s21 + $0x58] sm:$0xf0] }
 0x1a2   : >> { %v5609_v34 = vld [vmem:[%s7130_s21 + $0x8] sm:$0xf]  ;;  %v5876_v35 = vld [vmem:[%s7130_s21 + $0x14] sm:$0xf0]  ;;  %v5602_v36 = vor.u32 %v5875_v31, %v5601_v28  ;;  %v1071_v37 = vld [vmem:[#allocation2] sm:$0xff]  ;;  %v5646_v39 = vor.u32 %v5882_v32, %v5643_v33  ;;  %s5597_s29 = sshll.u32 %s6689_s28, 3 }
 0x1a3   : >> { %1316 = vmatpush.bf16.msra.mxu0 %v5666_v0  ;;  %v1072_v38 = vld [vmem:[#allocation2 + $0x8] sm:$0xff]  ;;  %v5610_v40 = vor.u32 %v5876_v35, %v5609_v34  ;;  %v5912_v41 = vld [vmem:[%s7132_s27 + $0x38] sm:$0xff]  ;;  %v5901_v45 = vld [vmem:[%s7130_s21 + $0xe4] sm:$0xf]  ;;  %s9057_s2 = scalar_lea.vmem %s11961_s10, %s5597_s29  ;;  %s12621_s20 = sld [smem:[#allocation109_spill]] (%p7139_p11) }
 0x1a4   : >> { %1344 = vmatpush.bf16.msra.mxu2 %v5674_v3  ;;  %1357 = vmatpush.bf16.msra.mxu3 %v5694_v11  ;;  %v5878_v42 = vld [vmem:[%s7130_s21 + $0x2c] sm:$0xf]  ;;  %v5627_v43 = vld [vmem:[%s7130_s21 + $0x38] sm:$0xf0]  ;;  %v7301_v44 = vpack.c.bf16 %v1072_v38, %v1071_v37  ;;  %v5715_v46 = vld [vmem:[%s7130_s21 + $0xf0] sm:$0xf0] }
 0x1a5   : >> { %v5911_v47 = vld [vmem:[%s7132_s27 + $0x30] sm:$0xff]  ;;  %v5630_v48 = vor.u32 %v5878_v42, %v5627_v43  ;;  %v5874_v49 = vld [vmem:[%s7130_s21 + $0xc] sm:$0xf]  ;;  %v5718_v50 = vor.u32 %v5901_v45, %v5715_v46  ;;  %v5611_v51 = vld [vmem:[%s7130_s21 + $0x18] sm:$0xf0]  ;;  %s12622_s30 = sld [smem:[#allocation37_spill]] (%p7139_p11) }
 0x1a6   : >> { %v5897_v52 = vld [vmem:[%s7130_s21 + $0xc4] sm:$0xf]  ;;  %v5699_v53 = vld [vmem:[%s7130_s21 + $0xd0] sm:$0xf0]  ;;  %v5614_v57 = vor.u32 %v5874_v49, %v5611_v51  ;;  %v5910_v58 = vld [vmem:[%s7132_s27 + $0x28] sm:$0xff]  ;;  %s12623_s16 = sld [smem:[#allocation43_spill]] (%p7139_p11) }
 0x1a7   : >> { %1317 = vmatpush.bf16.msra.mxu0 %v5650_v9  ;;  %1327 = vmatpush.bf16.msra.mxu1 %v5718_v50  ;;  %v5702_v54 = vor.u32 %v5897_v52, %v5699_v53  ;;  %v5893_v55 = vld [vmem:[%s7130_s21 + $0xa4] sm:$0xf]  ;;  %v5683_v56 = vld [vmem:[%s7130_s21 + $0xb0] sm:$0xf0]  ;;  %v5908_v0 = vld [vmem:[%s7132_s27 + $0x18] sm:$0xff]  ;;  %s12624_s26 = sld [smem:[#allocation110_spill]] (%p7139_p11) }
 0x1a8   : >> { %1345 = vmatpush.bf16.msra.mxu2 %v5658_v12  ;;  %1358 = vmatpush.bf16.msra.mxu3 %v5678_v20  ;;  %v5686_v59 = vor.u32 %v5893_v55, %v5683_v56  ;;  %v5889_v60 = vld [vmem:[%s7130_s21 + $0x84] sm:$0xf]  ;;  %v5667_v61 = vld [vmem:[%s7130_s21 + $0x90] sm:$0xf0]  ;;  %v5906_v10 = vld [vmem:[%s7132_s27 + $0x8] sm:$0xff]  ;;  %s12625_s15 = sld [smem:[#allocation111_spill]] (%p7139_p11) }
 0x1a9   : >> { %v5909_v62 = vld [vmem:[%s7132_s27 + $0x20] sm:$0xff]  ;;  %v5670_v63 = vor.u32 %v5889_v60, %v5667_v61  ;;  %v5651_v2 = vld [vmem:[%s7130_s21 + $0x70] sm:$0xf0]  ;;  %v1073_v15 = vld [vmem:[#allocation3 + $0xa8] sm:$0xff] }
 0x1aa   : >> { %v5885_v1 = vld [vmem:[%s7130_s21 + $0x64] sm:$0xf]  ;;  %v5907_v5 = vld [vmem:[%s7132_s27 + $0x10] sm:$0xff]  ;;  %v1089_v17 = vld [vmem:[#allocation3 + $0x88] sm:$0xff] }
 0x1ab   : >> { %1318 = vmatpush.bf16.msra.mxu0 %v5634_v18  ;;  %1328 = vmatpush.bf16.msra.mxu1 %v5702_v54  ;;  %v5654_v3 = vor.u32 %v5885_v1, %v5651_v2  ;;  %v5881_v4 = vld [vmem:[%s7130_s21 + $0x44] sm:$0xf]  ;;  %v5635_v6 = vld [vmem:[%s7130_s21 + $0x50] sm:$0xf0]  ;;  %v1090_v18 = vld [vmem:[#allocation3 + $0x58] sm:$0xff] }
 0x1ac   : >> { %1346 = vmatpush.bf16.msra.mxu2 %v5642_v21  ;;  %1359 = vmatpush.bf16.msra.mxu3 %v5662_v29  ;;  %v5638_v7 = vor.u32 %v5881_v4, %v5635_v6  ;;  %v5877_v8 = vld [vmem:[%s7130_s21 + $0x24] sm:$0xf]  ;;  %v5619_v9 = vld [vmem:[%s7130_s21 + $0x30] sm:$0xf0]  ;;  %v1377_v21 = vpack.c.bf16 %v1090_v18, %v1089_v17  ;;  %v1076_v23 = vld [vmem:[#allocation3 + $0x48] sm:$0xff]  ;;  %s5316_s29 = sshll.u32 (%p7139_p11), %s12623_s16, 4  ;;  %s5317_s29 = int_to_ptr.vmem [resolvable:$true] %s5316_s29 }
 0x1ad   : >> { %v5622_v11 = vor.u32 %v5877_v8, %v5619_v9  ;;  %v5873_v12 = vld [vmem:[%s7130_s21 + $0x4] sm:$0xf]  ;;  %v5603_v13 = vld [vmem:[%s7130_s21 + $0x10] sm:$0xf0]  ;;  %v1092_v25 = vld [vmem:[#allocation3 + $0xc8] sm:$0xff]  ;;  %s5598_s21 = sshll.u32 %s6689_s28, 2 }
 0x1ae   : >> { %v5905_v14 = vld [vmem:[%s7132_s27] sm:$0xff]  ;;  %v5606_v19 = vor.u32 %v5873_v12, %v5603_v13  ;;  %v1077_v28 = vld [vmem:[#allocation3 + $0x60] sm:$0xff]  ;;  %v1078_v29 = vld [vmem:[#allocation3 + $0x28] sm:$0xff]  ;;  %s1142_s17 = scalar_lea.vmem %s11958_s7, %s5598_s21  ;;  %s12620_s28 = sadd.s32 1, %s6689_s28  }
 0x1af   : >> { %1319 = vmatpush.bf16.msra.mxu0 %v5618_v27  ;;  %1329 = vmatpush.bf16.msra.mxu1 %v5686_v59  ;;  %v1074_v16 = vld [vmem:[#allocation3 + $0xd0] sm:$0xff]  ;;  %v1371_v32 = vpack.c.bf16 %v1078_v29, %v1077_v28  ;;  %v1079_v34 = vld [vmem:[#allocation3 + $0x40] sm:$0xff]  ;;  %v1080_v35 = vld [vmem:[#allocation3 + $0x78] sm:$0xff]  ;;  %s6625_s28 = scalar_lea.hbm (%p7139_p11), %s12625_s15, 4 }
 0x1b0   : >> { %1347 = vmatpush.bf16.msra.mxu2 %v5626_v30  ;;  %1360 = vmatpush.bf16.msra.mxu3 %v5646_v39  ;;  %v1369_v20 = vpack.c.bf16 %v1074_v16, %v1073_v15  ;;  %v1075_v22 = vld [vmem:[#allocation3 + $0x10] sm:$0xff]  ;;  %v1093_v30 = vld [vmem:[#allocation3 + $0x18] sm:$0xff]  ;;  %v1096_v37 = vld [vmem:[#allocation3 + $0xc0] sm:$0xff]  ;;  %v1372_v38 = vpack.c.bf16 %v1080_v35, %v1079_v34 }
 0x1b1   : >> { %v1091_v24 = vld [vmem:[#allocation3 + $0x30] sm:$0xff]  ;;  %v1370_v26 = vpack.c.bf16 %v1076_v23, %v1075_v22  ;;  %v1097_v42 = vld [vmem:[#allocation3] sm:$0xff]  ;;  %v1098_v43 = vld [vmem:[#allocation3 + $0x8] sm:$0xff] }
 0x1b2   : >> { %v1378_v27 = vpack.c.bf16 %v1092_v25, %v1091_v24  ;;  %v1094_v31 = vld [vmem:[#allocation3 + $0x90] sm:$0xff]  ;;  %v1381_v45 = vpack.c.bf16 %v1098_v43, %v1097_v42  ;;  %v1083_v46 = vld [vmem:[#allocation3 + $0xf8] sm:$0xff]  ;;  %v1100_v49 = vld [vmem:[#allocation3 + $0x68] sm:$0xff] }
 0x1b3   : >> { %1320 = vmatpush.bf16.msra.mxu0 %v5602_v36  ;;  %1330 = vmatpush.bf16.msra.mxu1 %v5670_v63  ;;  %v1379_v33 = vpack.c.bf16 %v1094_v31, %v1093_v30  ;;  %v1095_v36 = vld [vmem:[#allocation3 + $0x70] sm:$0xff]  ;;  %v1085_v52 = vld [vmem:[#allocation3 + $0x20] sm:$0xff]  ;;  %v1088_v1 = vld [vmem:[#allocation3 + $0x38] sm:$0xff] }
 0x1b4   : >> { %1348 = vmatpush.bf16.msra.mxu2 %v5610_v40  ;;  %1361 = vmatpush.bf16.msra.mxu3 %v5630_v48  ;;  %v1380_v39 = vpack.c.bf16 %v1096_v37, %v1095_v36  ;;  %v1081_v40 = vld [vmem:[#allocation3 + $0x80] sm:$0xff]  ;;  %v1099_v48 = vld [vmem:[#allocation3 + $0xd8] sm:$0xff]  ;;  %v1086_v53 = vld [vmem:[#allocation3 + $0xf0] sm:$0xff] }
 0x1b5   : >> { %v1382_v51 = vpack.c.bf16 %v1100_v49, %v1099_v48  ;;  %v1101_v54 = vld [vmem:[#allocation3 + $0xa0] sm:$0xff]  ;;  %v1102_v55 = vld [vmem:[#allocation3 + $0x50] sm:$0xff]  ;;  %v1103_v2 = vld [vmem:[#allocation3 + $0xe8] sm:$0xff] }
 0x1b6   : >> { %1321 = vmatmul.bf16.vlgmr.msra.gmra.mxu0 %v7301_v44  ;;  %v7340_v56 = vld [vmem:[%s1142_s17] sm:$0xf]  ;;  %s12626_s17 = sld [smem:[#allocation42_spill]] (%p7139_p11) }
 0x1b7   : >> { %1454 = vmatpush.bf16.msrb.mxu0 %v5912_v41  ;;  %1349 = vmatmul.bf16.vlgmr.msra.gmra.mxu2 %v7301_v44  ;;  %v1145_v59 = vperm.slane %v7340_v56, 0  ;;  %v1148_v8 = vperm.slane %v7340_v56, 3  ;;  %v1147_v9 = vperm.slane %v7340_v56, 2 }
 0x1b8   : >> { %5924 = vmatpush.bf16.msrb.mxu2 %v5912_v41  ;;  %1362 = vmatpush.bf16.msra.mxu3 %v5614_v57  ;;  %v1082_v41 = vld [vmem:[#allocation3 + $0xe0] sm:$0xff]  ;;  %v1375_v57 = vpack.c.bf16 %v1086_v53, %v1085_v52 }
 0x1b9   : >> { %1331 = vmatpush.bf16.msra.mxu1 %v5654_v3  ;;  %v1104_v3 = vld [vmem:[#allocation3 + $0x98] sm:$0xff] }
 0x1ba   : >> { %v1384_v4 = vpack.c.bf16 %v1104_v3, %v1103_v2 }
 0x1bb   : >> { %1455 = vmatpush.bf16.msrb.mxu0 %v5911_v47  ;;  %1363 = vmatmul.bf16.vlgmr.msra.gmra.mxu3 %v7301_v44 }
 0x1bc   : >> { %5925 = vmatpush.bf16.msrb.mxu2 %v5911_v47  ;;  %v1084_v47 = vld [vmem:[#allocation3 + $0xb8] sm:$0xff]  ;;  %s5304_s18 = scalar_lea.sflag (%p7139_p11), [#allocation11], %s12626_s17 }
 0x1bd   : >> { %1332 = vmatpush.bf16.msra.mxu1 %v5638_v7  ;;  %v1374_v50 = vpack.c.bf16 %v1084_v47, %v1083_v46 }
 0x1bf   : >> { %1456 = vmatpush.bf16.msrb.mxu0 %v5910_v58 }
 0x1c0   : >> { %5926 = vmatpush.bf16.msrb.mxu2 %v5910_v58  ;;  %v1383_v58 = vpack.c.bf16 %v1102_v55, %v1101_v54 }
 0x1c1   : >> { %1333 = vmatpush.bf16.msra.mxu1 %v5622_v11  ;;  %v7356_v11 = vld [vmem:[%s1401_s24] ss:$0 sm:$0xff]  ;;  %s5856_s24 = sshll.u32 (%p7139_p11), %s12622_s30, 1 }
 0x1c2   : > { %s5314_s13 = scalar_lea.hbm (%p7139_p11), %s12625_s15, %s5856_s24 }
 0x1c3   : >> { %1457 = vmatpush.bf16.msrb.mxu0 %v5909_v62  ;;  %s5318_s1 = sshll.u32 (%p7139_p11), %s5314_s13, 4  ;;  %s5319_s1 = int_to_ptr.hbm [resolvable:$true] %s5318_s1 }
 0x1c4   : >> { %5927 = vmatpush.bf16.msrb.mxu2 %v5909_v62 }
 0x1c5   : >> { %1334 = vmatpush.bf16.msra.mxu1 %v5606_v19 }
 0x1c7   : >> { %1458 = vmatpush.bf16.msrb.mxu0 %v5908_v0 }
 0x1c8   : >> { %5928 = vmatpush.bf16.msrb.mxu2 %v5908_v0  ;;  %1335 = vmatmul.bf16.vlgmr.msra.gmra.mxu1 %v7301_v44  ;;  %v1373_v44 = vpack.c.bf16 %v1082_v41, %v1081_v40  ;;  %v1087_v0 = vld [vmem:[#allocation3 + $0xb0] sm:$0xff] }
 0x1cb   : >> { %1459 = vmatpush.bf16.msrb.mxu0 %v5907_v5 }
 0x1cc   : >> { %5929 = vmatpush.bf16.msrb.mxu2 %v5907_v5  ;;  %v1376_v5 = vpack.c.bf16 %v1088_v1, %v1087_v0 }
 0x1cf   : >> { %1460 = vmatpush.bf16.msrb.mxu0 %v5906_v10 }
 0x1d0   : >> { %5930 = vmatpush.bf16.msrb.mxu2 %v5906_v10 }
 0x1d3   : >> { %1461 = vmatpush.bf16.msrb.mxu0 %v5905_v14 }
 0x1d4   : >> { %5931 = vmatpush.bf16.msrb.mxu2 %v5905_v14 }
 0x1d6   : >> { %1462 = vmatmul.bf16.vlgmr.msrb.gmra.mxu0 %v1369_v20 }
 0x1d7   : >> { %1502 = vmatmul.bf16.vlgmr.msrb.gmra.mxu2 %v1377_v21 }
 0x1e6   : >> { %1467 = vmatmul.bf16.gmra.mxu0 %v1370_v26 }
 0x1e7   : >> { %1507 = vmatmul.bf16.gmra.mxu2 %v1378_v27 }
 0x1f6   : >> { %1472 = vmatmul.bf16.gmra.mxu0 %v1371_v32 }
 0x1f7   : >> { %1512 = vmatmul.bf16.gmra.mxu2 %v1379_v33 }
 0x206   : >> { %1477 = vmatmul.bf16.gmra.mxu0 %v1372_v38 }
 0x207   : >> { %1517 = vmatmul.bf16.gmra.mxu2 %v1380_v39 }
 0x216   : >> { %1482 = vmatmul.bf16.gmra.mxu0 %v1373_v44 }
 0x217   : >> { %1522 = vmatmul.bf16.gmra.mxu2 %v1381_v45 }
 0x226   : >> { %1487 = vmatmul.bf16.gmra.mxu0 %v1374_v50 }
 0x227   : >> { %1527 = vmatmul.bf16.gmra.mxu2 %v1382_v51 }
 0x233   : >> { %v1322_v60 = vpop.f32.mrf.mxu0 }
 0x234   : >> { %v7343_v61 = vadd.f32 %v1322_v60, %v1145_v59 }
 0x236   : >> { %1492 = vmatmul.bf16.gmra.mxu0 %v1375_v57  ;;  %12138 = vst [vmem:[#allocation44_spill] sm:$0xff] %v7343_v61 }
 0x237   : >> { %1532 = vmatmul.bf16.gmra.mxu2 %v1383_v58 }
 0x23a   : >> { %v1350_v6 = vpop.f32.mrf.mxu2 }
 0x23b   : >> { %v1324_v62 = vpop.f32.mrf.mxu0  ;;  %v7358_v14 = vadd.f32 %v1350_v6, %v1147_v9 }
 0x23c   : >> { %v7345_v63 = vadd.f32 %v1324_v62, %v1145_v59 }
 0x23e   : >> { %12139 = vst [vmem:[#allocation45_spill] sm:$0xff] %v7345_v63  ;;  %v1364_v7 = vpop.f32.mrf.mxu3 }
 0x23f   : >> { %v7349_v10 = vadd.f32 %v1364_v7, %v1148_v8 }
 0x241   : >> { %v1591_v17 = vperm.slane %v7349_v10, 0  ;;  %v1577_v38 = vrot.slane %v7349_v10, 1  ;;  %v1578_v59 = vrot.slane %v7349_v10, 2 }
 0x242   : >> { %v1352_v12 = vpop.f32.mrf.mxu2 }
 0x243   : >> { %v7370_v25 = vadd.f32 %v1352_v12, %v1147_v9  ;;  %v1592_v43 = vperm.slane %v1577_v38, 0  ;;  %v1593_v2 = vperm.slane %v1578_v59, 0 }
 0x246   : >> { %1497 = vmatmul.bf16.gmra.mxu0 %v1376_v5  ;;  %v1366_v16 = vpop.f32.mrf.mxu3 }
 0x247   : >> { %1537 = vmatmul.bf16.gmra.mxu2 %v1384_v4  ;;  %v7363_v19 = vadd.f32 %v1366_v16, %v1148_v8 }
 0x249   : >> { %v1599_v24 = vperm.slane %v7363_v19, 0  ;;  %v1584_v41 = vrot.slane %v7363_v19, 1  ;;  %v1585_v3 = vrot.slane %v7363_v19, 2 }
 0x24b   : >> { %v1600_v46 = vperm.slane %v1584_v41, 0  ;;  %v1601_v6 = vperm.slane %v1585_v3, 0 }
 0x253   : >> { %v1463_v13 = vpop.f32.mrf.mxu0 }
 0x254   : >> { %v1464_v15 = vadd.f32 %v7356_v11, %v1463_v13 }
 0x256   : >> { %v1543_v18 = vadd.f32 %v1464_v15, %v7358_v14 }
 0x258   : >> { %v7365_v20 = vadd.f32 %v1591_v17, %v1543_v18 }
 0x25a   : >> { %v1503_v21 = vpop.f32.mrf.mxu2  ;;  %2503 = vadd.xlane.f32.xlu1 %v7365_v20  ;;  %v5759_v1 = vmul.f32 -1.442695, %v7365_v20 }
 0x25b   : >> { %v1504_v22 = vadd.f32 %v7356_v11, %v1503_v21  ;;  %v1465_v23 = vpop.f32.mrf.mxu0 }
 0x25c   : >> { %v1466_v26 = vadd.f32 %v7356_v11, %v1465_v23  ;;  %6015 = vpow2.f32 %v5759_v1 }
 0x25d   : >> { %v1559_v27 = vadd.f32 %v1504_v22, %v7358_v14 }
 0x25e   : >> { %v1544_v28 = vadd.f32 %v1466_v26, %v7370_v25 }
 0x25f   : >> { %v7375_v29 = vadd.f32 %v1599_v24, %v1559_v27 }
 0x260   : >> { %v7377_v30 = vadd.f32 %v1591_v17, %v1544_v28 }
 0x261   : >> { %2535 = vadd.xlane.f32.xlu0 %v7375_v29  ;;  %v5775_v9 = vmul.f32 -1.442695, %v7375_v29 }
 0x262   : >> { %v1505_v31 = vpop.f32.mrf.mxu2  ;;  %2505 = vadd.xlane.f32.xlu1 %v7377_v30  ;;  %v5760_v15 = vmul.f32 -1.442695, %v7377_v30  ;;  %v6016_v16 = vpop.eup %6015 }
 0x263   : >> { %v1506_v32 = vadd.f32 %v7356_v11, %v1505_v31  ;;  %v1468_v33 = vpop.f32.mrf.mxu0  ;;  %6017 = vpow2.f32 %v5775_v9  ;;  %v7427_v23 = vadd.f32 1.0, %v6016_v16  ;;  %v1581_v9 = vrot.slane %v7349_v10, 5 }
 0x264   : >> { %v1469_v35 = vadd.f32 %v7356_v11, %v1468_v33  ;;  %6019 = vpow2.f32 %v5760_v15  ;;  %v1582_v15 = vrot.slane %v7349_v10, 6  ;;  %v1589_v16 = vrot.slane %v7363_v19, 6 }
 0x265   : >> { %v1560_v34 = vadd.f32 %v1506_v32, %v7370_v25  ;;  %v1586_v32 = vrot.slane %v7363_v19, 3  ;;  %6021 = vrcp.f32 %v7427_v23  ;;  %vm1788_vm2 = vweird.f32 %v7427_v23 }
 0x266   : >> { %v1545_v42 = vadd.f32 %v1469_v35, %v7358_v14  ;;  %v1579_v35 = vrot.slane %v7349_v10, 3 }
 0x267   : >> { %v7384_v36 = vadd.f32 %v1599_v24, %v1560_v34  ;;  %v1602_v41 = vperm.slane %v1586_v32, 0 }
 0x268   : >> { %v7393_v47 = vadd.f32 %v1592_v43, %v1545_v42 }
 0x269   : >> { %2537 = vadd.xlane.f32.xlu0 %v7384_v36  ;;  %v6018_v33 = vpop.eup %6017 }
 0x26a   : >> { %v1508_v37 = vpop.f32.mrf.mxu2  ;;  %v6020_v38 = vpop.eup %6019 }
 0x26b   : >> { %v1509_v39 = vadd.f32 %v7356_v11, %v1508_v37  ;;  %v1470_v40 = vpop.f32.mrf.mxu0 }
 0x26c   : >> { %v1471_v45 = vadd.f32 %v7356_v11, %v1470_v40  ;;  %v7443_v40 = vadd.f32 1.0, %v6018_v33 }
 0x26d   : >> { %v1561_v44 = vadd.f32 %v1509_v39, %v7358_v14 }
 0x26e   : >> { %v1546_v48 = vadd.f32 %v1471_v45, %v7370_v25  ;;  %v7446_v45 = vadd.f32 1.0, %v6020_v38  ;;  %6023 = vrcp.f32 %v7443_v40  ;;  %vm2028_vm6 = vweird.f32 %v7443_v40 }
 0x26f   : >> { %v7396_v49 = vadd.f32 %v1600_v46, %v1561_v44 }
 0x270   : >> { %v7401_v53 = vadd.f32 %v1592_v43, %v1546_v48  ;;  %v1594_v43 = vperm.slane %v1579_v35, 0  ;;  %6025 = vrcp.f32 %v7446_v45  ;;  %vm1803_vm7 = vweird.f32 %v7446_v45 }
 0x271   : >> { %2507 = vadd.xlane.f32.xlu0 %v7393_v47  ;;  %2539 = vadd.xlane.f32.xlu2 %v7396_v49 }
 0x272   : >> { %v1510_v50 = vpop.f32.mrf.mxu2  ;;  %12140 = vst [vmem:[#allocation46_spill] sm:$0xff] %v7401_v53  ;;  %2509 = vadd.xlane.f32.xlu1 %v7401_v53 }
 0x273   : >> { %v1511_v51 = vadd.f32 %v7356_v11, %v1510_v50  ;;  %v1473_v52 = vpop.f32.mrf.mxu0  ;;  %v5776_v50 = vmul.f32 -1.442695, %v7384_v36 }
 0x274   : >> { %v1474_v55 = vadd.f32 %v7356_v11, %v1473_v52  ;;  %v5761_v52 = vmul.f32 -1.442695, %v7393_v47 }
 0x275   : >> { %v1562_v54 = vadd.f32 %v1511_v51, %v7370_v25  ;;  %6027 = vpow2.f32 %v5776_v50 }
 0x276   : >> { %v1547_v62 = vadd.f32 %v1474_v55, %v7358_v14  ;;  %v1336_v55 = vpop.f32.mrf.mxu1  ;;  %6029 = vpow2.f32 %v5761_v52 }
 0x277   : >> { %v7406_v57 = vadd.f32 %v1600_v46, %v1562_v54  ;;  %v7457_v54 = vpop.eup %6021 }
 0x278   : >> { %v7415_v4 = vadd.f32 %v1593_v2, %v1547_v62  ;;  %v5762_v62 = vmul.f32 -1.442695, %v7401_v53  ;;  %vm1789_vm3 = vweird.f32 %v7457_v54 }
 0x279   : >> { %12141 = vst [vmem:[#allocation47_spill] sm:$0xff] %v7406_v57  ;;  %2541 = vadd.xlane.f32.xlu2 %v7406_v57  ;;  %v5778_v1 = vmul.f32 -1.442695, %v7406_v57  ;;  %vm7551_vm5 = vmor %vm1788_vm2, %vm1789_vm3 }
 0x27a   : >> { %v1513_v58 = vpop.f32.mrf.mxu2  ;;  %12142 = vst [vmem:[#allocation48_spill] sm:$0xff] %v7415_v4  ;;  %2511 = vadd.xlane.f32.xlu1 %v7415_v4 }
 0x27b   : >> { %v1475_v60 = vpop.f32.mrf.mxu0  ;;  %v1514_v0 = vadd.f32 %v7356_v11, %v1513_v58 }
 0x27c   : >> { %v1476_v12 = vadd.f32 %v7356_v11, %v1475_v60  ;;  %v5777_v60 = vmul.f32 -1.442695, %v7396_v49 }
 0x27d   : >> { %v1563_v5 = vadd.f32 %v1514_v0, %v7358_v14  ;;  %v1784_v0 = vmul.f32 %v7457_v54, %v7427_v23 }
 0x27e   : >> { %v1548_v17 = vadd.f32 %v1476_v12, %v7370_v25  ;;  %6031 = vpow2.f32 %v5777_v60  ;;  %v1588_v12 = vrot.slane %v7363_v19, 5 }
 0x27f   : >> { %v7420_v13 = vadd.f32 %v1601_v6, %v1563_v5  ;;  %v1580_v5 = vrot.slane %v7349_v10, 4  ;;  %6033 = vpow2.f32 %v5762_v62 }
 0x280   : >> { %v7430_v27 = vadd.f32 %v1593_v2, %v1548_v17  ;;  %v1583_v17 = vrot.slane %v7349_v10, 7  ;;  %6035 = vpow2.f32 %v5778_v1  ;;  %v1792_v10 = vand.u32 2147483647, %v7427_v23 }
 0x281   : >> { %12143 = vst [vmem:[#allocation49_spill] sm:$0xff] %v7420_v13  ;;  %2543 = vadd.xlane.f32.xlu2 %v7420_v13  ;;  %v7499_v38 = vperm.slane %v1588_v12, 0  ;;  %v5763_v12 = vmul.f32 -1.442695, %v7415_v4 }
 0x282   : >> { %v1515_v7 = vpop.f32.mrf.mxu2  ;;  %12144 = vst [vmem:[#allocation50_spill] sm:$0xff] %v7430_v27  ;;  %vm7521_vm4 = vcmp.eq.f32.partialorder %v1792_v10, 8.507059e+37 }
 0x283   : >> { %v1478_v8 = vpop.f32.mrf.mxu0  ;;  %v1516_v18 = vadd.f32 %v7356_v11, %v1515_v7  ;;  %v7474_v7 = vpop.eup %6023 }
 0x284   : >> { %v1479_v26 = vadd.f32 %v7356_v11, %v1478_v8  ;;  %v2024_v32 = vmul.f32 %v7474_v7, %v7443_v40  ;;  %vm2029_vm9 = vweird.f32 %v7474_v7 }
 0x285   : >> { %v1564_v21 = vadd.f32 %v1516_v18, %v7370_v25  ;;  %v1590_v18 = vrot.slane %v7363_v19, 7  ;;  %vm7598_vm12 = vmor %vm2028_vm6, %vm2029_vm9 }
 0x286   : >> { %v1549_v39 = vadd.f32 %v1479_v26, %v7358_v14  ;;  %v2025_v1 = vsub.f32 1.0, %v2024_v32 }
 0x287   : >> { %v7432_v28 = vadd.f32 %v1601_v6, %v1564_v21  ;;  %v1587_v6 = vrot.slane %v7363_v19, 4  ;;  %v7484_v21 = vpop.eup %6025 }
 0x288   : >> { %v7453_v51 = vadd.f32 %v1594_v43, %v1549_v39  ;;  %v6028_v26 = vpop.eup %6027  ;;  %v7502_v39 = vperm.slane %v1582_v15, 0  ;;  %v1799_v52 = vmul.f32 %v7484_v21, %v7446_v45  ;;  %vm1804_vm10 = vweird.f32 %v7484_v21 }
 0x289   : >> { %12145 = vst [vmem:[#allocation51_spill] sm:$0xff] %v7432_v28  ;;  %2513 = vadd.xlane.f32.xlu2 %v7430_v27  ;;  %2545 = vadd.xlane.f32.xlu0 %v7432_v28  ;;  %v6030_v35 = vpop.eup %6029  ;;  %v7495_v19 = vperm.slane %v1587_v6, 0  ;;  %vm7631_vm13 = vmor %vm1803_vm7, %vm1804_vm10 }
 0x28a   : >> { %v1518_v22 = vpop.f32.mrf.mxu2  ;;  %12147 = vst [vmem:[#allocation53_spill] sm:$0xff] %v7453_v51  ;;  %v1800_v32 = vsub.f32 1.0, %v1799_v52 }
 0x28b   : >> { %v1480_v24 = vpop.f32.mrf.mxu0  ;;  %v1519_v31 = vadd.f32 %v7356_v11, %v1518_v22  ;;  %v1785_v22 = vsub.f32 1.0, %v1784_v0 }
 0x28c   : >> { %v1481_v34 = vadd.f32 %v7356_v11, %v1480_v24  ;;  %v1146_v24 = vperm.slane %v7340_v56, 1  ;;  %v1338_v56 = vpop.f32.mrf.mxu1 }
 0x28d   : >> { %v1565_v37 = vadd.f32 %v1519_v31, %v7358_v14  ;;  %v1794_v31 = vand.u32 2147483648, %v7427_v23  ;;  %v1786_v50 = vmul.f32 %v7457_v54, %v1785_v22  ;;  %v1807_v22 = vand.u32 2147483647, %v7446_v45 }
 0x28e   : >> { %v1550_v42 = vadd.f32 %v1481_v34, %v7370_v25  ;;  %v7492_v34 = vperm.slane %v1580_v5, 0  ;;  %v7515_v60 = vadd.f32 %v1336_v55, %v1146_v24  ;;  %v7526_v15 = vadd.f32 %v1338_v56, %v1146_v24 }
 0x28f   : >> { %v7448_v46 = vadd.f32 %v1602_v41, %v1565_v37  ;;  %v7497_v37 = vperm.slane %v1581_v9, 0  ;;  %v1795_v0 = vor.u32 1.1754944e-38, %v1794_v31  ;;  %v1787_v31 = vadd.f32 %v7457_v54, %v1786_v50 }
 0x290   : >> { %v7462_v59 = vadd.f32 %v1594_v43, %v1550_v42  ;;  %v7504_v42 = vperm.slane %v1589_v16, 0  ;;  %v7508_v43 = vperm.slane %v1590_v18, 0  ;;  %12151 = vst [vmem:[#allocation55_spill] sm:$0xff] %v7526_v15  ;;  %v2034_v18 = vand.u32 2147483648, %v7443_v40 }
 0x291   : >> { %12146 = vst [vmem:[#allocation52_spill] sm:$0xff] %v7448_v46  ;;  %2547 = vadd.xlane.f32.xlu2 %v7448_v46  ;;  %2515 = vadd.xlane.f32.xlu0 %v7453_v51  ;;  %v2026_v24 = vmul.f32 %v7474_v7, %v2025_v1  ;;  %v1809_v56 = vand.u32 2147483648, %v7446_v45  ;;  %v1801_v23 = vmul.f32 %v7484_v21, %v1800_v32  ;;  %vm7575_vm11 = vcmp.eq.f32.partialorder %v1807_v22, 8.507059e+37 }
 0x292   : >> { %v1520_v44 = vpop.f32.mrf.mxu2  ;;  %12148 = vst [vmem:[#allocation54_spill] sm:$0xff] %v7462_v59  ;;  %2517 = vadd.xlane.f32.xlu1 %v7462_v59  ;;  %v5764_v15 = vmul.f32 -1.442695, %v7430_v27 }
 0x293   : >> { %v7450_v48 = vpop.f32.mrf.mxu0  ;;  %v1521_v58 = vadd.f32 %v7356_v11, %v1520_v44  ;;  %v6032_v44 = vpop.eup %6031 }
 0x294   : >> { %v6034_v62 = vpop.eup %6033  ;;  %v1484_v55 = vadd.f32 %v7356_v11, %v7450_v48 }
 0x295   : >> { %v1566_v2 = vadd.f32 %v1521_v58, %v7370_v25  ;;  %v7513_v58 = vadd.f32 1.0, %v6028_v26  ;;  %v6036_v6 = vpop.eup %6035  ;;  %v7533_v26 = vadd.f32 1.0, %v6032_v44  ;;  %v5779_v44 = vmul.f32 -1.442695, %v7420_v13 }
 0x296   : >> { %v7541_v48 = vadd.f32 1.0, %v6036_v6  ;;  %v1551_v50 = vadd.f32 %v1484_v55, %v7358_v14 }
 0x297   : >> { %v7490_v33 = vadd.f32 %v1602_v41, %v1566_v2  ;;  %v7506_v41 = vperm.slane %v1583_v17, 0  ;;  %v7518_v2 = vadd.f32 1.0, %v6030_v35  ;;  %v2032_v17 = vand.u32 2147483647, %v7443_v40 }
 0x298   : >> { %6037 = vrcp.f32 %v7513_v58  ;;  %v7537_v35 = vadd.f32 1.0, %v6034_v62  ;;  %v2035_v62 = vor.u32 1.1754944e-38, %v2034_v18  ;;  %v2049_v6 = vand.u32 2147483648, %v7513_v58 }
 0x299   : >> { %2549 = vadd.xlane.f32.xlu0 %v7490_v33  ;;  %6039 = vrcp.f32 %v7518_v2  ;;  %vm7561_vm8 = vcmp.eq.f32.partialorder %v2032_v17, 8.507059e+37  ;;  %v7580_v32 = vadd.f32 %v7492_v34, %v1551_v50  ;;  %v1822_v63 = vand.u32 2147483647, %v7518_v2 }
 0x29a   : >> { %v1523_v3 = vpop.f32.mrf.mxu2  ;;  %6041 = vpow2.f32 %v5763_v12  ;;  %v2027_v12 = vadd.f32 %v7474_v7, %v2026_v24  ;;  %v7603_v9 = vor.u32 1.1754944e-38, %v2049_v6  ;;  %vm2043_vm14 = vweird.f32 %v7513_v58 }
 0x29b   : >> { %v7476_v8 = vpop.f32.mrf.mxu0  ;;  %v1524_v10 = vadd.f32 %v7356_v11, %v1523_v3  ;;  %6043 = vrcp.f32 %v7533_v26  ;;  %v1791_v3 = vsel %vm7551_vm5, %v7457_v54, %v1787_v31  ;;  %v1810_v31 = vor.u32 1.1754944e-38, %v1809_v56  ;;  %12158 = vst [vmem:[#allocation56_spill] sm:$0xff] %v7580_v32  ;;  %2519 = vadd.xlane.f32.xlu2 %v7580_v32 }
 0x29c   : >> { %6045 = vrcp.f32 %v7537_v35  ;;  %v1486_v22 = vadd.f32 %v7356_v11, %v7476_v8  ;;  %v2031_v40 = vsel %vm7598_vm12, %v7474_v7, %v2027_v12  ;;  %vm1818_vm0 = vweird.f32 %v7518_v2 }
 0x29d   : >> { %6047 = vrcp.f32 %v7541_v48  ;;  %v1567_v55 = vadd.f32 %v1524_v10, %v7358_v14  ;;  %v7586_v10 = vsel %vm7521_vm4, %v1795_v0, %v1791_v3  ;;  %v1802_v0 = vadd.f32 %v7484_v21, %v1801_v23 }
 0x29e   : >> { %v7572_v54 = vpop.eup %6037  ;;  %6049 = vpow2.f32 %v5779_v44  ;;  %v1552_v23 = vadd.f32 %v1486_v22, %v7370_v25  ;;  %vm2058_vm1 = vweird.f32 %v7533_v26  ;;  %vm7701_vm3 = vcmp.eq.f32.partialorder %v1822_v63, 8.507059e+37 }
 0x29f   : >> { %v7582_v52 = vpop.eup %6039  ;;  %v7592_v61 = vadd.f32 %v7495_v19, %v1567_v55  ;;  %v2039_v55 = vmul.f32 %v7572_v54, %v7513_v58  ;;  %v1806_v57 = vsel %vm7631_vm13, %v7484_v21, %v1802_v0  ;;  %6051 = vpow2.f32 %v5764_v15 }
 0x2a0   : >> { %v6042_v56 = vpop.eup %6041  ;;  %v7638_v13 = vadd.f32 %v7492_v34, %v1552_v23  ;;  %v7653_v34 = vsel %vm7561_vm8, %v2035_v62, %v2031_v40  ;;  %v7667_v62 = vsel %vm7575_vm11, %v1810_v31, %v1806_v57  ;;  %vm2044_vm15 = vweird.f32 %v7572_v54 }
 0x2a1   : >> { %12159 = vst [vmem:[#allocation57_spill] sm:$0xff] %v7592_v61  ;;  %v7608_v3 = vpop.eup %6043  ;;  %2551 = vadd.xlane.f32.xlu1 %v7592_v61  ;;  %v7635_v44 = vadd.f32 1.0, %v6042_v56  ;;  %v2064_v31 = vand.u32 2147483648, %v7533_v26  ;;  %vm1819_vm5 = vweird.f32 %v7582_v52  ;;  %vm1833_vm6 = vweird.f32 %v7537_v35  ;;  %vm7734_vm8 = vmor %vm2043_vm14, %vm2044_vm15 }
 0x2a2   : >> { %v1525_v5 = vpop.f32.mrf.mxu2  ;;  %v7618_v6 = vpop.eup %6045  ;;  %12164 = vst [vmem:[#allocation58_spill] sm:$0xff] %v7638_v13  ;;  %v2054_v45 = vmul.f32 %v7608_v3, %v7533_v26  ;;  %2521 = vadd.xlane.f32.xlu0 %v7638_v13  ;;  %vm2059_vm7 = vweird.f32 %v7608_v3  ;;  %vm7760_vm10 = vmor %vm1818_vm0, %vm1819_vm5  ;;  %vm2073_vm13 = vweird.f32 %v7541_v48 }
 0x2a3   : >> { %v1488_v16 = vpop.f32.mrf.mxu0  ;;  %v1526_v8 = vadd.f32 %v7356_v11, %v1525_v5  ;;  %v1814_v5 = vmul.f32 %v7582_v52, %v7518_v2  ;;  %v7625_v12 = vpop.eup %6047  ;;  %12166 = vst [vmem:[#allocation60_spill] sm:$0xff] %v7653_v34  ;;  %6053 = vrcp.f32 %v7635_v44  ;;  %vm1834_vm11 = vweird.f32 %v7618_v6  ;;  %vm7776_vm12 = vmor %vm2058_vm1, %vm2059_vm7 }
 0x2a4   : >> { %v1489_v50 = vadd.f32 %v7356_v11, %v1488_v16  ;;  %v1824_v16 = vand.u32 2147483648, %v7518_v2  ;;  %12168 = vst [vmem:[#allocation62_spill] sm:$0xff] %v7667_v62  ;;  %v2055_v15 = vsub.f32 1.0, %v2054_v45  ;;  %vm2074_vm14 = vweird.f32 %v7625_v12  ;;  %vm7805_vm15 = vmor %vm1833_vm6, %vm1834_vm11 }
 0x2a5   : >> { %v1568_v7 = vadd.f32 %v1526_v8, %v7370_v25  ;;  %v6050_v8 = vpop.eup %6049  ;;  %v1815_v0 = vsub.f32 1.0, %v1814_v5  ;;  %v2062_v5 = vand.u32 2147483647, %v7533_v26  ;;  %vm7821_vm1 = vmor %vm2073_vm13, %vm2074_vm14 }
 0x2a6   : >> { %v1553_v4 = vadd.f32 %v1489_v50, %v7358_v14  ;;  %v2040_v50 = vsub.f32 1.0, %v2039_v55  ;;  %v7677_v1 = vor.u32 1.1754944e-38, %v1824_v16  ;;  %v2056_v34 = vmul.f32 %v7608_v3, %v2055_v15 }
 0x2a7   : >> { %v7648_v53 = vadd.f32 %v7495_v19, %v1568_v7  ;;  %v1829_v19 = vmul.f32 %v7618_v6, %v7537_v35  ;;  %v1816_v16 = vmul.f32 %v7582_v52, %v1815_v0  ;;  %v5766_v15 = vmul.f32 -1.442695, %v7462_v59 }
 0x2a8   : >> { %v7658_v23 = vadd.f32 %v7497_v37, %v1553_v4  ;;  %v2069_v4 = vmul.f32 %v7625_v12, %v7541_v48  ;;  %v2041_v17 = vmul.f32 %v7572_v54, %v2040_v50  ;;  %v6052_v50 = vpop.eup %6051  ;;  %vm7718_vm4 = vcmp.eq.f32.partialorder %v2062_v5, 8.507059e+37 }
 0x2a9   : >> { %12165 = vst [vmem:[#allocation59_spill] sm:$0xff] %v7648_v53  ;;  %2553 = vadd.xlane.f32.xlu2 %v7648_v53  ;;  %v1830_v22 = vsub.f32 1.0, %v1829_v19  ;;  %v5781_v19 = vmul.f32 -1.442695, %v7448_v46  ;;  %v7710_v62 = vpop.eup %6053 }
 0x2aa   : >> { %v1528_v18 = vpop.f32.mrf.mxu2  ;;  %12167 = vst [vmem:[#allocation61_spill] sm:$0xff] %v7658_v23  ;;  %2523 = vadd.xlane.f32.xlu1 %v7658_v23  ;;  %v2070_v45 = vsub.f32 1.0, %v2069_v4  ;;  %vm1849_vm5 = vweird.f32 %v7710_v62 }
 0x2ab   : >> { %v1490_v24 = vpop.f32.mrf.mxu0  ;;  %v1529_v27 = vadd.f32 %v7356_v11, %v1528_v18 }
 0x2ac   : >> { %v1491_v56 = vadd.f32 %v7356_v11, %v1490_v24  ;;  %v5780_v24 = vmul.f32 -1.442695, %v7432_v28  ;;  %v1839_v28 = vand.u32 2147483648, %v7537_v35 }
 0x2ad   : >> { %v1569_v18 = vadd.f32 %v1529_v27, %v7358_v14  ;;  %v7673_v27 = vadd.f32 1.0, %v6050_v8  ;;  %v1837_v8 = vand.u32 2147483647, %v7537_v35 }
 0x2ae   : >> { %v1554_v57 = vadd.f32 %v1491_v56, %v7370_v25  ;;  %6055 = vpow2.f32 %v5780_v24  ;;  %v5765_v56 = vmul.f32 -1.442695, %v7453_v51  ;;  %v2065_v51 = vor.u32 1.1754944e-38, %v2064_v31 }
 0x2af   : >> { %v7685_v40 = vadd.f32 %v7499_v38, %v1569_v18  ;;  %6057 = vrcp.f32 %v7673_v27  ;;  %v12170_v18 = vand.u32 2147483647, %v7513_v58  ;;  %v7728_v31 = vadd.f32 1.0, %v6052_v50 }
 0x2b0   : >> { %v7708_v4 = vadd.f32 %v7497_v37, %v1554_v57  ;;  %v1817_v37 = vadd.f32 %v7582_v52, %v1816_v16  ;;  %v1831_v57 = vmul.f32 %v7618_v6, %v1830_v22  ;;  %6059 = vpow2.f32 %v5765_v56 }
 0x2b1   : >> { %12169 = vst [vmem:[#allocation63_spill] sm:$0xff] %v7685_v40  ;;  %vm7696_vm2 = vcmp.eq.f32.partialorder %v12170_v18, 8.507059e+37  ;;  %v2042_v18 = vadd.f32 %v7572_v54, %v2041_v17  ;;  %2555 = vadd.xlane.f32.xlu0 %v7685_v40  ;;  %v2071_v17 = vmul.f32 %v7625_v12, %v2070_v45  ;;  %v2057_v16 = vadd.f32 %v7608_v3, %v2056_v34 }
 0x2b2   : >> { %v1530_v21 = vpop.f32.mrf.mxu2  ;;  %12175 = vst [vmem:[#allocation64_spill] sm:$0xff] %v7708_v4  ;;  %vm7739_vm9 = vcmp.eq.f32.partialorder %v1837_v8, 8.507059e+37  ;;  %v1844_v45 = vmul.f32 %v7710_v62, %v7635_v44  ;;  %6061 = vpow2.f32 %v5781_v19  ;;  %2525 = vadd.xlane.f32.xlu2 %v7708_v4  ;;  %v1840_v19 = vor.u32 1.1754944e-38, %v1839_v28 }
 0x2b3   : >> { %v7663_v7 = vpop.f32.mrf.mxu0  ;;  %v1531_v55 = vadd.f32 %v7356_v11, %v1530_v21  ;;  %v2046_v34 = vsel %vm7734_vm8, %v7572_v54, %v2042_v18  ;;  %6063 = vpow2.f32 %v5766_v15  ;;  %v1832_v59 = vadd.f32 %v7618_v6, %v1831_v57 }
 0x2b4   : >> { %v2079_v54 = vand.u32 2147483648, %v7541_v48  ;;  %v2072_v2 = vadd.f32 %v7625_v12, %v2071_v17  ;;  %6065 = vrcp.f32 %v7728_v31  ;;  %v1845_v18 = vsub.f32 1.0, %v1844_v45 }
 0x2b5   : >> { %v1570_v24 = vadd.f32 %v1531_v55, %v7370_v25  ;;  %v6056_v55 = vpop.eup %6055  ;;  %v7794_v57 = vsel %vm7696_vm2, %v7603_v9, %v2046_v34  ;;  %v1854_v9 = vand.u32 2147483648, %v7635_v44  ;;  %v1494_v45 = vadd.f32 %v7356_v11, %v7663_v7 }
 0x2b6   : >> { %v7751_v50 = vpop.eup %6057  ;;  %v7789_v15 = vadd.f32 1.0, %v6056_v55  ;;  %v2080_v0 = vor.u32 1.1754944e-38, %v2079_v54  ;;  %vm1848_vm2 = vweird.f32 %v7635_v44  ;;  %v2092_v28 = vand.u32 2147483647, %v7673_v27 }
 0x2b7   : >> { %v7747_v56 = vadd.f32 %v7499_v38, %v1570_v24  ;;  %v2077_v38 = vand.u32 2147483647, %v7541_v48  ;;  %v1821_v24 = vsel %vm7760_vm10, %v7582_v52, %v1817_v37  ;;  %v2061_v52 = vsel %vm7776_vm12, %v7608_v3, %v2057_v16  ;;  %v6060_v37 = vpop.eup %6059  ;;  %vm7897_vm7 = vmor %vm1848_vm2, %vm1849_vm5 }
 0x2b8   : >> { %v2084_v26 = vmul.f32 %v7751_v50, %v7673_v27  ;;  %v7799_v17 = vsel %vm7701_vm3, %v7677_v1, %v1821_v24  ;;  %v6062_v5 = vpop.eup %6061  ;;  %v1836_v1 = vsel %vm7805_vm15, %v7618_v6, %v1832_v59  ;;  %v1852_v16 = vand.u32 2147483647, %v7635_v44 }
 0x2b9   : >> { %12182 = vst [vmem:[#allocation65_spill] sm:$0xff] %v7747_v56  ;;  %2557 = vadd.xlane.f32.xlu1 %v7747_v56  ;;  %vm7809_vm0 = vcmp.eq.f32.partialorder %v2077_v38, 8.507059e+37  ;;  %v6064_v34 = vpop.eup %6063  ;;  %v7830_v8 = vsel %vm7718_vm4, %v2065_v51, %v2061_v52  ;;  %v2076_v59 = vsel %vm7821_vm1, %v7625_v12, %v2072_v2  ;;  %v2094_v48 = vand.u32 2147483648, %v7673_v27 }
 0x2ba   : >> { %v7716_v63 = vpop.f32.mrf.mxu2  ;;  %12193 = vst [vmem:[#allocation66_spill] sm:$0xff] %v7830_v8  ;;  %v7838_v6 = vmul.f32 %v7586_v10, %v7515_v60  ;;  %v1846_v38 = vmul.f32 %v7710_v62, %v1845_v18  ;;  %v2085_v24 = vsub.f32 1.0, %v2084_v26  ;;  %6067 = vrcp.f32 %v7789_v15  ;;  %v7844_v46 = vpop.eup %6065 }
 0x2bb   : >> { %v7749_v58 = vpop.f32.mrf.mxu0  ;;  %v7842_v7 = vadd.f32 1.0, %v6060_v37  ;;  %v7848_v51 = vsel %vm7739_vm9, %v1840_v19, %v1836_v1  ;;  %v1855_v12 = vor.u32 1.1754944e-38, %v1854_v9  ;;  %v7851_v54 = vadd.f32 1.0, %v6062_v5 }
 0x2bc   : >> { %vm7853_vm3 = vcmp.eq.f32.partialorder %v1852_v16, 8.507059e+37  ;;  %vm2088_vm4 = vweird.f32 %v7673_v27  ;;  %v7859_v2 = vadd.f32 1.0, %v6064_v34  ;;  %v1555_v52 = vadd.f32 %v1494_v45, %v7358_v14 }
 0x2bd   : >> { %v7864_v19 = vsel %vm7809_vm0, %v2080_v0, %v2076_v59  ;;  %v2095_v18 = vor.u32 1.1754944e-38, %v2094_v48  ;;  %v5782_v26 = vmul.f32 -1.442695, %v7490_v33  ;;  %v1847_v37 = vadd.f32 %v7710_v62, %v1846_v38 }
 0x2be   : >> { %12196 = vst [vmem:[#allocation67_spill] sm:$0xff] %v7864_v19  ;;  %v2086_v3 = vmul.f32 %v7751_v50, %v2085_v24  ;;  %v1859_v9 = vmul.f32 %v7844_v46, %v7728_v31  ;;  %6069 = vrcp.f32 %v7842_v7  ;;  %v1867_v5 = vand.u32 2147483647, %v7728_v31 }
 0x2bf   : >> { %v1869_v55 = vand.u32 2147483648, %v7728_v31  ;;  %6071 = vrcp.f32 %v7851_v54  ;;  %v1534_v1 = vadd.f32 %v7356_v11, %v7716_v63  ;;  %vm7880_vm6 = vcmp.eq.f32.partialorder %v2092_v28, 8.507059e+37 }
 0x2c0   : >> { %v7878_v35 = vpop.eup %6067  ;;  %v2109_v16 = vand.u32 2147483648, %v7789_v15  ;;  %6073 = vrcp.f32 %v7859_v2  ;;  %v7887_v45 = vadd.f32 %v7502_v39, %v1555_v52  ;;  %v1496_v34 = vadd.f32 %v7356_v11, %v7749_v58 }
 0x2c1   : >> { %vm2089_vm8 = vweird.f32 %v7751_v50  ;;  %6075 = vpow2.f32 %v5782_v26  ;;  %v1571_v48 = vadd.f32 %v1534_v1, %v7358_v14  ;;  %v1851_v58 = vsel %vm7897_vm7, %v7710_v62, %v1847_v37 }
 0x2c2   : >> { %v1535_v21 = vpop.f32.mrf.mxu2  ;;  %12199 = vst [vmem:[#allocation68_spill] sm:$0xff] %v7887_v45  ;;  %v2087_v24 = vadd.f32 %v7751_v50, %v2086_v3  ;;  %v1860_v28 = vsub.f32 1.0, %v1859_v9  ;;  %2527 = vadd.xlane.f32.xlu0 %v7887_v45  ;;  %v1556_v44 = vadd.f32 %v1496_v34, %v7370_v25  ;;  %v7910_v52 = vor.u32 1.1754944e-38, %v1869_v55  ;;  %vm7935_vm10 = vmor %vm2088_vm4, %vm2089_vm8 }
 0x2c3   : >> { %v1498_v22 = vpop.f32.mrf.mxu0  ;;  %v1536_v38 = vadd.f32 %v7356_v11, %v1535_v21  ;;  %v2099_v26 = vmul.f32 %v7878_v35, %v7789_v15  ;;  %v7915_v1 = vadd.f32 %v7504_v42, %v1571_v48  ;;  %vm1864_vm9 = vweird.f32 %v7844_v46 }
 0x2c4   : >> { %v1499_v21 = vadd.f32 %v7356_v11, %v1498_v22  ;;  %v7918_v8 = vpop.eup %6069  ;;  %v2107_v62 = vand.u32 2147483647, %v7789_v15  ;;  %v7922_v37 = vor.u32 1.1754944e-38, %v2109_v16  ;;  %v7929_v55 = vsel %vm7853_vm3, %v1855_v12, %v1851_v58 }
 0x2c5   : >> { %12202 = vst [vmem:[#allocation69_spill] sm:$0xff] %v7915_v1  ;;  %v1572_v3 = vadd.f32 %v1536_v38, %v7370_v25  ;;  %v7925_v9 = vpop.eup %6071  ;;  %vm1863_vm11 = vweird.f32 %v7728_v31  ;;  %v5767_v34 = vmul.f32 -1.442695, %v7580_v32  ;;  %2559 = vadd.xlane.f32.xlu2 %v7915_v1  ;;  %v7944_v10 = vadd.f32 %v7502_v39, %v1556_v44 }
 0x2c6   : >> { %12203 = vst [vmem:[#allocation70_spill] sm:$0xff] %v7925_v9  ;;  %v7946_v12 = vpop.eup %6073  ;;  %v2091_v27 = vsel %vm7935_vm10, %v7751_v50, %v2087_v24  ;;  %v1861_v63 = vmul.f32 %v7844_v46, %v1860_v28  ;;  %v2124_v48 = vand.u32 2147483648, %v7851_v54  ;;  %v2100_v32 = vsub.f32 1.0, %v2099_v26  ;;  %vm8005_vm0 = vmor %vm1863_vm11, %vm1864_vm9 }
 0x2c7   : >> { %12206 = vst [vmem:[#allocation71_spill] sm:$0xff] %v7944_v10  ;;  %v7954_v38 = vadd.f32 %v7504_v42, %v1572_v3  ;;  %v6076_v16 = vpop.eup %6075  ;;  %v5783_v39 = vmul.f32 -1.442695, %v7592_v61  ;;  %2529 = vadd.xlane.f32.xlu1 %v7944_v10  ;;  %v1557_v44 = vadd.f32 %v1499_v21, %v7358_v14  ;;  %vm2104_vm12 = vweird.f32 %v7878_v35 }
 0x2c8   : >> { %v2114_v50 = vmul.f32 %v7925_v9, %v7851_v54  ;;  %v1874_v42 = vmul.f32 %v7918_v8, %v7842_v7  ;;  %v1884_v24 = vand.u32 2147483648, %v7842_v7  ;;  %v7968_v28 = vsel %vm7880_vm6, %v2095_v18, %v2091_v27 }
 0x2c9   : >> { %12207 = vst [vmem:[#allocation72_spill] sm:$0xff] %v7954_v38  ;;  %vm7970_vm13 = vcmp.eq.f32.partialorder %v1867_v5, 8.507059e+37  ;;  %vm2103_vm14 = vweird.f32 %v7789_v15  ;;  %6077 = vpow2.f32 %v5767_v34  ;;  %v1862_v3 = vadd.f32 %v7844_v46, %v1861_v63 }
 0x2ca   : >> { %v7891_v59 = vpop.f32.mrf.mxu2  ;;  %12208 = vst [vmem:[#allocation73_spill] sm:$0xff] %v7968_v28  ;;  %v7977_v22 = vor.u32 1.1754944e-38, %v2124_v48  ;;  %v1889_v19 = vmul.f32 %v7946_v12, %v7859_v2  ;;  %v7981_v61 = vadd.f32 1.0, %v6076_v16  ;;  %2561 = vadd.xlane.f32.xlu0 %v7954_v38  ;;  %v2101_v0 = vmul.f32 %v7878_v35, %v2100_v32  ;;  %vm8043_vm6 = vmor %vm2103_vm14, %vm2104_vm12 }
 0x2cb   : >> { %v1500_v58 = vpop.f32.mrf.mxu0  ;;  %6079 = vpow2.f32 %v5783_v39  ;;  %v7988_v34 = vadd.f32 %v7506_v41, %v1557_v44  ;;  %v2115_v63 = vsub.f32 1.0, %v2114_v50  ;;  %v1875_v48 = vsub.f32 1.0, %v1874_v42 }
 0x2cc   : >> { %v1501_v21 = vadd.f32 %v7356_v11, %v1500_v58  ;;  %12211 = vst [vmem:[#allocation74_spill] sm:$0xff] %v7977_v22  ;;  %v5768_v58 = vmul.f32 -1.442695, %v7638_v13  ;;  %v6698_v22 = vmov 128.0   ;;  %vm1878_vm15 = vweird.f32 %v7842_v7 }
 0x2cd   : >> { %12212 = vst [vmem:[#allocation75_spill] sm:$0xff] %v7988_v34  ;;  %6081 = vrcp.f32 %v6698_v22  ;;  %v7993_v16 = vor.u32 1.1754944e-38, %v1884_v24  ;;  %v1539_v28 = vadd.f32 %v7356_v11, %v7891_v59  ;;  %vm8009_vm1 = vcmp.eq.f32.partialorder %v2107_v62, 8.507059e+37  ;;  %v8017_v59 = vpop.xlane.xlu1 %2503 }
 0x2ce   : >> { %v1558_v27 = vadd.f32 %v1501_v21, %v7370_v25  ;;  %vm2118_vm2 = vweird.f32 %v7851_v54  ;;  %vm1879_vm3 = vweird.f32 %v7918_v8  ;;  %6083 = vrcp.f32 %v7981_v61 }
 0x2cf   : >> { %v6078_v31 = vpop.eup %6077  ;;  %v1866_v42 = vsel %vm8005_vm0, %v7844_v46, %v1862_v3  ;;  %v2102_v62 = vadd.f32 %v7878_v35, %v2101_v0  ;;  %vm2119_vm4 = vweird.f32 %v7925_v9  ;;  %v1899_v24 = vand.u32 2147483648, %v7859_v2  ;;  %2531 = vadd.xlane.f32.xlu1 %v7988_v34  ;;  %vm8077_vm8 = vmor %vm1878_vm15, %vm1879_vm3 }
 0x2d0   : >> { %v7999_v39 = vadd.f32 %v7506_v41, %v1558_v27  ;;  %v5784_v41 = vmul.f32 -1.442695, %v7648_v53  ;;  %v1876_v21 = vmul.f32 %v7918_v8, %v1875_v48  ;;  %6085 = vpow2.f32 %v5768_v58  ;;  %vm8096_vm9 = vmor %vm2118_vm2, %vm2119_vm4 }
 0x2d1   : >> { %v5769_v22 = vmul.f32 -1.442695, %v7658_v23  ;;  %vm1893_vm5 = vweird.f32 %v7859_v2  ;;  %v1573_v3 = vadd.f32 %v1539_v28, %v7358_v14  ;;  %v8037_v44 = vsel %vm7970_vm13, %v7910_v52, %v1866_v42 }
 0x2d2   : >> { %v1540_v18 = vpop.f32.mrf.mxu2  ;;  %12213 = vst [vmem:[#allocation76_spill] sm:$0xff] %v7999_v39  ;;  %2533 = vadd.xlane.f32.xlu2 %v7999_v39  ;;  %v8048_v58 = vadd.f32 1.0, %v6078_v31  ;;  %6087 = vpow2.f32 %v5784_v41  ;;  %v2106_v14 = vsel %vm8043_vm6, %v7878_v35, %v2102_v62  ;;  %v5785_v52 = vmul.f32 -1.442695, %v7685_v40 }
 0x2d3   : >> { %v1541_v32 = vadd.f32 %v7356_v11, %v1540_v18  ;;  %v1890_v11 = vsub.f32 1.0, %v1889_v19  ;;  %v2116_v19 = vmul.f32 %v7925_v9, %v2115_v63  ;;  %v6080_v18 = vpop.eup %6079  ;;  %vm1894_vm7 = vweird.f32 %v7946_v12 }
 0x2d4   : >> { %v7984_v5 = vpop.xlane.xlu0 %2535  ;;  %v6082_v27 = vpop.eup %6081  ;;  %6089 = vpow2.f32 %v5769_v22  ;;  %v8065_v41 = vadd.f32 1.0, %v6080_v18  ;;  %v8068_v31 = vadd.f32 %v7508_v43, %v1573_v3  ;;  %v5770_v22 = vmul.f32 -1.442695, %v7708_v4  ;;  %vm8117_vm11 = vmor %vm1893_vm5, %vm1894_vm7 }
 0x2d5   : >> { %v1574_v0 = vadd.f32 %v1541_v32, %v7370_v25  ;;  %v1891_v48 = vmul.f32 %v7946_v12, %v1890_v11  ;;  %v8053_v25 = vor.u32 1.1754944e-38, %v1899_v24  ;;  %v2453_v28 = vmul.f32 128.0, %v6082_v27  ;;  %v8056_v26 = vpop.eup %6083 }
 0x2d6   : >> { %12220 = vst [vmem:[#allocation77_spill] sm:$0xff] %v8056_v26  ;;  %v8059_v15 = vadd.f32 %v7925_v9, %v2116_v19  ;;  %v8062_v32 = vadd.f32 %v7918_v8, %v1876_v21  ;;  %v6086_v62 = vpop.eup %6085  ;;  %v2139_v21 = vand.u32 2147483648, %v7981_v61  ;;  %6091 = vrcp.f32 %v8048_v58 }
 0x2d7   : >> { %12222 = vst [vmem:[#allocation79_spill] sm:$0xff] %v8065_v41  ;;  %v2454_v35 = vsub.f32 1.0, %v2453_v28  ;;  %v8071_v42 = vadd.f32 %v7508_v43, %v1574_v0  ;;  %v8082_v19 = vadd.f32 %v7946_v12, %v1891_v48  ;;  %v8090_v43 = vsel %vm8009_vm1, %v7922_v37, %v2106_v14  ;;  %2563 = vadd.xlane.f32.xlu1 %v8068_v31  ;;  %v2506_v14 = vpop.xlane.xlu1 %2505 }
 0x2d8   : >> { %12221 = vst [vmem:[#allocation78_spill] sm:$0xff] %v8059_v15  ;;  %v12227_v18 = vmov 0  ;;  %v2129_v3 = vmul.f32 %v8056_v26, %v7981_v61  ;;  %6093 = vpow2.f32 %v5785_v52  ;;  %v6088_v50 = vpop.eup %6087  ;;  %v1914_v48 = vand.u32 2147483648, %v8048_v58 }
 0x2d9   : >> { %12223 = vst [vmem:[#allocation80_spill] sm:$0xff] %v8068_v31  ;;  %v12228_v18 = vsel %vm8096_vm9, 4294967295, %v12227_v18  ;;  %v2455_v0 = vmul.f32 %v6082_v27, %v2454_v35  ;;  %vm2457_vm10 = vweird.f32 %v6082_v27  ;;  %v2154_v35 = vand.u32 2147483648, %v8065_v41 }
 0x2da   : >> { %12224 = vst [vmem:[#allocation81_spill] sm:$0xff] %v8071_v42  ;;  %2565 = vadd.xlane.f32.xlu2 %v8071_v42  ;;  %v8123_v37 = vadd.f32 1.0, %v6086_v62  ;;  %v6090_v63 = vpop.eup %6089  ;;  %v8129_v40 = vor.u32 1.1754944e-38, %v2139_v21  ;;  %6095 = vpow2.f32 %v5770_v22  ;;  %v2130_v53 = vsub.f32 1.0, %v2129_v3 }
 0x2db   : >> { %12229 = vst [vmem:[#allocation82_spill] sm:$0xff] %v12228_v18  ;;  %v2456_v46 = vadd.f32 %v6082_v27, %v2455_v0  ;;  %6097 = vrcp.f32 %v8065_v41  ;;  %v8133_v28 = vadd.f32 1.0, %v6088_v50  ;;  %v8139_v15 = vor.u32 1.1754944e-38, %v1914_v48 }
 0x2dc   : >> { %v2538_v11 = vpop.xlane.xlu0 %2537  ;;  %12232 = vst [vmem:[#allocation83_spill] sm:$0xff] %v8129_v40  ;;  %v8137_v0 = vpop.eup %6091  ;;  %vm2134_vm12 = vweird.f32 %v8056_v26  ;;  %v8147_v50 = vor.u32 1.1754944e-38, %v2154_v35  ;;  %6099 = vrcp.f32 %v8123_v37  ;;  %v5771_v48 = vmul.f32 -1.442695, %v7887_v45  ;;  %v12250_v40 = vld [vmem:[#allocation47_spill] sm:$0xff] }
 0x2dd   : >> { %12233 = vst [vmem:[#allocation84_spill] sm:$0xff] %v8133_v28  ;;  %v8135_v13 = vsel %vm2457_vm10, %v6082_v27, %v2456_v46  ;;  %v5786_v46 = vmul.f32 -1.442695, %v7747_v56  ;;  %v2131_v35 = vmul.f32 %v8056_v26, %v2130_v53  ;;  %vm2133_vm13 = vweird.f32 %v7981_v61 }
 0x2de   : >> { %v2567_v21 = vmul.f32 %v8017_v59, %v8135_v13  ;;  %v2583_v22 = vmul.f32 %v7984_v5, %v8135_v13  ;;  %v6094_v3 = vpop.eup %6093  ;;  %12234 = vst [vmem:[#allocation85_spill] sm:$0xff] %v8147_v50  ;;  %v2568_v27 = vmul.f32 %v2506_v14, %v8135_v13  ;;  %v2584_v5 = vmul.f32 %v2538_v11, %v8135_v13  ;;  %vm8225_vm14 = vmor %vm2133_vm13, %vm2134_vm12 }
 0x2df   : >> { %v1904_v23 = vmul.f32 %v8137_v0, %v8048_v58  ;;  %6101 = vrcp.f32 %v8133_v28  ;;  %vm1909_vm15 = vweird.f32 %v8137_v0  ;;  %vm1908_vm1 = vweird.f32 %v8048_v58 }
 0x2e0   : >> { %v8154_v9 = vsub.f32 %v7365_v20, %v2567_v21  ;;  %v8157_v59 = vsub.f32 %v7375_v29, %v2583_v22  ;;  %v8166_v14 = vsub.f32 %v7377_v30, %v2568_v27  ;;  %v6096_v20 = vpop.eup %6095  ;;  %v8168_v21 = vadd.f32 1.0, %v6090_v63  ;;  %vm8362_vm12 = vmor %vm1908_vm1, %vm1909_vm15 }
 0x2e1   : >> { %v8170_v29 = vadd.f32 1.0, %v6094_v3  ;;  %v8176_v45 = vpop.eup %6097  ;;  %6103 = vpow2.f32 %v5786_v46  ;;  %v1929_v27 = vand.u32 2147483648, %v8123_v37  ;;  %v1905_v46 = vsub.f32 1.0, %v1904_v23 }
 0x2e2   : >> { %12235 = vst [vmem:[#allocation86_spill] sm:$0xff] %v8154_v9  ;;  %v2647_v11 = vmul.f32 %v8157_v59, %v8157_v59  ;;  %v2631_v53 = vmul.f32 %v8154_v9, %v8154_v9  ;;  %v2632_v56 = vmul.f32 %v8166_v14, %v8166_v14  ;;  %6105 = vpow2.f32 %v5771_v48 }
 0x2e3   : >> { %12236 = vst [vmem:[#allocation87_spill] sm:$0xff] %v8157_v59  ;;  %v8185_v9 = vsub.f32 %v7384_v36, %v2584_v5  ;;  %v8187_v59 = vpop.eup %6099  ;;  %v8189_v50 = vadd.f32 1.0, %v6096_v20  ;;  %v8198_v48 = vadd.f32 %v8056_v26, %v2131_v35  ;;  %v2144_v36 = vmul.f32 %v8176_v45, %v8065_v41 }
 0x2e4   : >> { %v2540_v62 = vpop.xlane.xlu2 %2539  ;;  %v2508_v4 = vpop.xlane.xlu0 %2507  ;;  %12237 = vst [vmem:[#allocation88_spill] sm:$0xff] %v8166_v14  ;;  %2695 = vadd.xlane.f32.xlu0 %v2647_v11  ;;  %2663 = vadd.xlane.f32.xlu1 %v2631_v53  ;;  %6107 = vrcp.f32 %v8168_v21  ;;  %v5772_v23 = vmul.f32 -1.442695, %v7944_v10  ;;  %vm1924_vm0 = vweird.f32 %v8187_v59  ;;  %vm1923_vm2 = vweird.f32 %v8123_v37 }
 0x2e5   : >> { %12238 = vst [vmem:[#allocation89_spill] sm:$0xff] %v8170_v29  ;;  %v2510_v22 = vpop.xlane.xlu1 %2509  ;;  %v2585_v30 = vmul.f32 %v2540_v62, %v8135_v13  ;;  %v2569_v63 = vmul.f32 %v2508_v4, %v8135_v13  ;;  %2665 = vadd.xlane.f32.xlu2 %v2632_v56  ;;  %v8204_v5 = vpop.eup %6101  ;;  %6109 = vrcp.f32 %v8170_v29  ;;  %v2648_v35 = vmul.f32 %v8185_v9, %v8185_v9  ;;  %vm8376_vm13 = vmor %vm1923_vm2, %vm1924_vm0 }
 0x2e6   : >> { %12239 = vst [vmem:[#allocation90_spill] sm:$0xff] %v8185_v9  ;;  %v2570_v20 = vmul.f32 %v2510_v22, %v8135_v13  ;;  %6111 = vrcp.f32 %v8189_v50  ;;  %v5788_v56 = vmul.f32 -1.442695, %v7954_v38  ;;  %v12243_v22 = vmov 0 }
 0x2e7   : >> { %v8192_v62 = vsub.f32 %v7396_v49, %v2585_v30  ;;  %v8195_v4 = vsub.f32 %v7393_v47, %v2569_v63  ;;  %12242 = vst [vmem:[#allocation93_spill] sm:$0xff] %v8198_v48  ;;  %v2169_v49 = vand.u32 2147483648, %v8133_v28  ;;  %v5787_v47 = vmul.f32 -1.442695, %v7915_v1  ;;  %v6104_v30 = vpop.eup %6103 }
 0x2e8   : >> { %v1906_v63 = vmul.f32 %v8137_v0, %v1905_v46  ;;  %v6106_v10 = vpop.eup %6105  ;;  %v12244_v22 = vsel %vm8225_vm14, 4294967295, %v12243_v22  ;;  %v1919_v46 = vmul.f32 %v8187_v59, %v8123_v37  ;;  %6113 = vpow2.f32 %v5772_v23 }
 0x2e9   : >> { %12240 = vst [vmem:[#allocation91_spill] sm:$0xff] %v8192_v62  ;;  %v2633_v11 = vmul.f32 %v8195_v4, %v8195_v4  ;;  %v2649_v14 = vmul.f32 %v8192_v62, %v8192_v62  ;;  %v2159_v9 = vmul.f32 %v8204_v5, %v8133_v28  ;;  %v8239_v38 = vor.u32 1.1754944e-38, %v2169_v49 }
 0x2ea   : >> { %12241 = vst [vmem:[#allocation92_spill] sm:$0xff] %v8195_v4  ;;  %v8231_v4 = vor.u32 1.1754944e-38, %v1929_v27  ;;  %v1944_v1 = vand.u32 2147483648, %v8168_v21  ;;  %v8242_v18 = vpop.eup %6107  ;;  %6115 = vpow2.f32 %v5787_v47  ;;  %v12248_v27 = vld [vmem:[#allocation46_spill] sm:$0xff]  ;;  %v8255_v49 = vadd.f32 %v8137_v0, %v1906_v63 }
 0x2eb   : >> { %12245 = vst [vmem:[#allocation94_spill] sm:$0xff] %v12244_v22  ;;  %v8247_v23 = vsub.f32 %v12248_v27, %v2570_v20  ;;  %v8252_v48 = vpop.eup %6109  ;;  %6117 = vpow2.f32 %v5788_v56  ;;  %v1920_v20 = vsub.f32 1.0, %v1919_v46  ;;  %v5789_v56 = vmul.f32 -1.442695, %v8068_v31 }
 0x2ec   : >> { %v2542_v3 = vpop.xlane.xlu2 %2541  ;;  %12246 = vst [vmem:[#allocation95_spill] sm:$0xff] %v8239_v38  ;;  %2697 = vadd.xlane.f32.xlu1 %v2648_v35  ;;  %2667 = vadd.xlane.f32.xlu0 %v2633_v11  ;;  %v8257_v38 = vadd.f32 1.0, %v6106_v10  ;;  %v2184_v11 = vand.u32 2147483648, %v8170_v29  ;;  %v1934_v10 = vmul.f32 %v8242_v18, %v8168_v21  ;;  %v1959_v26 = vand.u32 2147483648, %v8189_v50 }
 0x2ed   : >> { %v2586_v53 = vmul.f32 %v2542_v3, %v8135_v13  ;;  %v2145_v3 = vsub.f32 1.0, %v2144_v36  ;;  %v8244_v36 = vadd.f32 1.0, %v6104_v30  ;;  %12249 = vst [vmem:[#allocation46_spill] sm:$0xff] %v8247_v23  ;;  %v2512_v62 = vpop.xlane.xlu1 %2511  ;;  %2699 = vadd.xlane.f32.xlu2 %v2649_v14  ;;  %v2160_v30 = vsub.f32 1.0, %v2159_v9  ;;  %v12253_v14 = vld [vmem:[#allocation48_spill] sm:$0xff] }
 0x2ee   : >> { %12252 = vst [vmem:[#allocation97_spill] sm:$0xff] %v8252_v48  ;;  %v2571_v47 = vmul.f32 %v2512_v62, %v8135_v13  ;;  %v2634_v46 = vmul.f32 %v8247_v23, %v8247_v23  ;;  %v8288_v23 = vor.u32 1.1754944e-38, %v1944_v1  ;;  %vm1938_vm5 = vweird.f32 %v8168_v21 }
 0x2ef   : >> { %12247 = vst [vmem:[#allocation96_spill] sm:$0xff] %v8244_v36  ;;  %v8250_v22 = vsub.f32 %v12250_v40, %v2586_v53  ;;  %v2146_v35 = vmul.f32 %v8176_v45, %v2145_v3  ;;  %v5773_v40 = vmul.f32 -1.442695, %v7988_v34  ;;  %v8263_v53 = vpop.eup %6111  ;;  %6119 = vrcp.f32 %v8244_v36 }
 0x2f0   : >> { %v8270_v63 = vsub.f32 %v12253_v14, %v2571_v47  ;;  %v6114_v62 = vpop.eup %6113  ;;  %v5774_v3 = vmul.f32 -1.442695, %v7999_v39  ;;  %v2174_v47 = vmul.f32 %v8252_v48, %v8170_v29  ;;  %6121 = vrcp.f32 %v8257_v38 }
 0x2f1   : >> { %12251 = vst [vmem:[#allocation47_spill] sm:$0xff] %v8250_v22  ;;  %v2650_v9 = vmul.f32 %v8250_v22, %v8250_v22  ;;  %v6116_v34 = vpop.eup %6115  ;;  %v1921_v39 = vmul.f32 %v8187_v59, %v1920_v20  ;;  %v1949_v22 = vmul.f32 %v8263_v53, %v8189_v50  ;;  %6123 = vpow2.f32 %v5773_v40  ;;  %v12258_v40 = vld [vmem:[#allocation49_spill] sm:$0xff] }
 0x2f2   : >> { %12254 = vst [vmem:[#allocation48_spill] sm:$0xff] %v8270_v63  ;;  %v2635_v31 = vmul.f32 %v8270_v63, %v8270_v63  ;;  %v6118_v28 = vpop.eup %6117  ;;  %v1935_v29 = vsub.f32 1.0, %v1934_v10  ;;  %v8293_v41 = vadd.f32 1.0, %v6114_v62  ;;  %6125 = vpow2.f32 %v5789_v56 }
 0x2f3   : >> { %v2161_v1 = vmul.f32 %v8204_v5, %v2160_v30  ;;  %6127 = vpow2.f32 %v5774_v3  ;;  %v5790_v20 = vmul.f32 -1.442695, %v8071_v42  ;;  %v12260_v62 = vand.u32 2147483647, %v7859_v2 }
 0x2f4   : >> { %v2544_v27 = vpop.xlane.xlu2 %2543  ;;  %2669 = vadd.xlane.f32.xlu1 %v2634_v46  ;;  %2701 = vadd.xlane.f32.xlu0 %v2650_v9  ;;  %v2175_v30 = vsub.f32 1.0, %v2174_v47  ;;  %v8316_v3 = vor.u32 1.1754944e-38, %v2184_v11  ;;  %v12265_v9 = vand.u32 2147483647, %v8048_v58  ;;  %vm1939_vm10 = vweird.f32 %v8242_v18 }
 0x2f5   : >> { %v2587_v14 = vmul.f32 %v2544_v27, %v8135_v13  ;;  %v12255_v27 = vand.u32 2147483647, %v7842_v7  ;;  %vm8308_vm4 = vcmp.eq.f32.partialorder %v12260_v62, 8.507059e+37  ;;  %v8313_v7 = vadd.f32 %v8176_v45, %v2146_v35  ;;  %2671 = vadd.xlane.f32.xlu2 %v2635_v31  ;;  %v8320_v46 = vpop.eup %6119  ;;  %vm8422_vm15 = vmor %vm1938_vm5, %vm1939_vm10 }
 0x2f6   : >> { %12264 = vst [vmem:[#allocation99_spill] sm:$0xff] %v8316_v3  ;;  %vm8324_vm6 = vcmp.eq.f32.partialorder %v12265_v9, 8.507059e+37  ;;  %v1950_v11 = vsub.f32 1.0, %v1949_v22  ;;  %v8336_v31 = vadd.f32 1.0, %v6118_v28  ;;  %v8338_v47 = vpop.eup %6121  ;;  %v1936_v62 = vmul.f32 %v8242_v18, %v1935_v29 }
 0x2f7   : >> { %vm8297_vm3 = vcmp.eq.f32.partialorder %v12255_v27, 8.507059e+37  ;;  %v8304_v10 = vsub.f32 %v12258_v40, %v2587_v14  ;;  %12263 = vst [vmem:[#allocation98_spill] sm:$0xff] %v8313_v7  ;;  %v8318_v27 = vadd.f32 1.0, %v6116_v34  ;;  %v12268_v14 = vand.u32 2147483647, %v8123_v37 }
 0x2f8   : >> { %v2199_v34 = vand.u32 2147483648, %v8244_v36  ;;  %v1922_v40 = vadd.f32 %v8187_v59, %v1921_v39  ;;  %v8342_v9 = vor.u32 1.1754944e-38, %v1959_v26  ;;  %6129 = vrcp.f32 %v8293_v41 }
 0x2f9   : >> { %12259 = vst [vmem:[#allocation49_spill] sm:$0xff] %v8304_v10  ;;  %vm8330_vm7 = vcmp.eq.f32.partialorder %v12268_v14, 8.507059e+37  ;;  %v6124_v14 = vpop.eup %6123  ;;  %v8346_v42 = vadd.f32 %v8204_v5, %v2161_v1  ;;  %6131 = vpow2.f32 %v5790_v20  ;;  %v2651_v28 = vmul.f32 %v8304_v10, %v8304_v10 }
 0x2fa   : >> { %v6126_v3 = vpop.eup %6125  ;;  %v8353_v26 = vmul.f32 %v8252_v48, %v2175_v30  ;;  %6133 = vrcp.f32 %v8318_v27  ;;  %v1951_v10 = vmul.f32 %v8263_v53, %v1950_v11  ;;  %v2189_v30 = vmul.f32 %v8320_v46, %v8244_v36  ;;  %v12280_v11 = vld [vmem:[#allocation51_spill] sm:$0xff] }
 0x2fb   : >> { %12271 = vst [vmem:[#allocation100_spill] sm:$0xff] %v8346_v42  ;;  %v6128_v42 = vpop.eup %6127  ;;  %6135 = vrcp.f32 %v8336_v31  ;;  %v8380_v58 = vadd.f32 1.0, %v6124_v14  ;;  %v8391_v36 = vadd.f32 1.0, %v6126_v3  ;;  %v1911_v37 = vsel %vm8362_vm12, %v8137_v0, %v8255_v49 }
 0x2fc   : >> { %v2514_v22 = vpop.xlane.xlu2 %2513  ;;  %v2546_v39 = vpop.xlane.xlu0 %2545  ;;  %12272 = vst [vmem:[#allocation101_spill] sm:$0xff] %v8353_v26  ;;  %v8369_v26 = vor.u32 1.1754944e-38, %v2199_v34  ;;  %v1937_v34 = vadd.f32 %v8242_v18, %v1936_v62  ;;  %2703 = vadd.xlane.f32.xlu1 %v2651_v28  ;;  %v1926_v14 = vsel %vm8376_vm13, %v8187_v59, %v1922_v40  ;;  %v12282_v28 = vsel %vm8077_vm8, %v7918_v8, %v8062_v32 }
 0x2fd   : >> { %v2572_v29 = vmul.f32 %v2514_v22, %v8135_v13  ;;  %v2588_v1 = vmul.f32 %v2546_v39, %v8135_v13  ;;  %v12278_v39 = vld [vmem:[#allocation50_spill] sm:$0xff]  ;;  %v8416_v0 = vsel %vm8297_vm3, %v7993_v16, %v12282_v28  ;;  %v2190_v49 = vsub.f32 1.0, %v2189_v30 }
 0x2fe   : >> { %12275 = vst [vmem:[#allocation102_spill] sm:$0xff] %v8369_v26  ;;  %v1964_v26 = vmul.f32 %v8338_v47, %v8257_v38  ;;  %v12285_v8 = vsel %vm8117_vm11, %v7946_v12, %v8082_v19  ;;  %v1942_v32 = vand.u32 2147483647, %v8168_v21  ;;  %v1952_v24 = vadd.f32 %v8263_v53, %v1951_v10 }
 0x2ff   : >> { %v8383_v7 = vsub.f32 %v12278_v39, %v2572_v29  ;;  %v8386_v48 = vsub.f32 %v12280_v11, %v2588_v1  ;;  %v8400_v29 = vpop.eup %6129  ;;  %v8402_v1 = vadd.f32 1.0, %v6128_v42  ;;  %v8434_v16 = vsel %vm8308_vm4, %v8053_v25, %v12285_v8  ;;  %v12290_v39 = vld [vmem:[#allocation52_spill] sm:$0xff] }
 0x300   : >> { %v6132_v59 = vpop.eup %6131  ;;  %6137 = vrcp.f32 %v8380_v58  ;;  %v8444_v52 = vsel %vm8324_vm6, %v8139_v15, %v1911_v37  ;;  %v8449_v12 = vsel %vm8330_vm7, %v8231_v4, %v1926_v14  ;;  %v1941_v25 = vsel %vm8422_vm15, %v8242_v18, %v1937_v34  ;;  %v12292_v34 = vld [vmem:[#allocation53_spill] sm:$0xff] }
 0x301   : >> { %12279 = vst [vmem:[#allocation50_spill] sm:$0xff] %v8383_v7  ;;  %v2636_v62 = vmul.f32 %v8383_v7, %v8383_v7  ;;  %v2652_v3 = vmul.f32 %v8386_v48, %v8386_v48  ;;  %v8438_v63 = vpop.eup %6133  ;;  %v1965_v21 = vsub.f32 1.0, %v1964_v26  ;;  %v1979_v10 = vmul.f32 %v8400_v29, %v8293_v41  ;;  %v12329_v7 = vld [vmem:[#allocation93_spill] sm:$0xff] }
 0x302   : >> { %12281 = vst [vmem:[#allocation51_spill] sm:$0xff] %v8386_v48  ;;  %v8454_v19 = vpop.eup %6135  ;;  %6139 = vrcp.f32 %v8391_v36  ;;  %v1957_v2 = vand.u32 2147483647, %v8189_v50  ;;  %vm12286_vm8 = vweird.f32 %v8263_v53  ;;  %vm12287_vm11 = vweird.f32 %v8189_v50  ;;  %v12331_v48 = vld [vmem:[#allocation83_spill] sm:$0xff] }
 0x303   : >> { %2673 = vadd.xlane.f32.xlu0 %v2636_v62  ;;  %2705 = vadd.xlane.f32.xlu2 %v2652_v3  ;;  %vm8464_vm0 = vmor %vm12287_vm11, %vm12286_vm8  ;;  %6141 = vrcp.f32 %v8402_v1  ;;  %v8469_v18 = vadd.f32 1.0, %v6132_v59  ;;  %v8474_v26 = vmul.f32 %v8320_v46, %v2190_v49  ;;  %vm1968_vm1 = vweird.f32 %v8257_v38 }
 0x304   : >> { %v2548_v56 = vpop.xlane.xlu2 %2547  ;;  %v2516_v15 = vpop.xlane.xlu0 %2515  ;;  %v2204_v50 = vmul.f32 %v8438_v63, %v8318_v27  ;;  %vm1943_vm2 = vcmp.eq.f32.partialorder %v1942_v32, 8.507059e+37  ;;  %v1956_v30 = vsel %vm8464_vm0, %v8263_v53, %v1952_v24  ;;  %v2219_v22 = vmul.f32 %v8454_v19, %v8336_v31  ;;  %v12294_v53 = vld [vmem:[#allocation54_spill] sm:$0xff]  ;;  %v12296_v24 = vld [vmem:[#allocation55_spill] sm:$0xff] }
 0x305   : >> { %v2589_v35 = vmul.f32 %v2548_v56, %v8135_v13  ;;  %v2573_v40 = vmul.f32 %v2516_v15, %v8135_v13  ;;  %v2518_v20 = vpop.xlane.xlu1 %2517  ;;  %v1966_v62 = vmul.f32 %v8338_v47, %v1965_v21  ;;  %v1980_v3 = vsub.f32 1.0, %v1979_v10 }
 0x306   : >> { %v2574_v14 = vmul.f32 %v2518_v20, %v8135_v13  ;;  %v8493_v28 = vsel %vm1943_vm2, %v8288_v23, %v1941_v25  ;;  %vm1958_vm3 = vcmp.eq.f32.partialorder %v1957_v2, 8.507059e+37  ;;  %v8495_v59 = vpop.eup %6137  ;;  %6143 = vrcp.f32 %v8469_v18  ;;  %v12297_v25 = vld [vmem:[#allocation62_spill] sm:$0xff] }
 0x307   : >> { %v8485_v11 = vsub.f32 %v12290_v39, %v2589_v35  ;;  %v8488_v37 = vsub.f32 %v12292_v34, %v2573_v40  ;;  %vm1983_vm4 = vweird.f32 %v8293_v41  ;;  %v8509_v23 = vsel %vm1958_vm3, %v8342_v9, %v1956_v30 }
 0x308   : >> { %v8499_v42 = vsub.f32 %v12294_v53, %v2574_v14  ;;  %v8505_v32 = vpop.eup %6139  ;;  %vm1969_vm5 = vweird.f32 %v8338_v47  ;;  %v2264_v21 = vmul.f32 %v12297_v25, %v12296_v24  ;;  %v2266_v10 = vmul.f32 %v7848_v51, %v12296_v24 }
 0x309   : >> { %12291 = vst [vmem:[#allocation52_spill] sm:$0xff] %v8485_v11  ;;  %v2653_v49 = vmul.f32 %v8485_v11, %v8485_v11  ;;  %v2637_v8 = vmul.f32 %v8488_v37, %v8488_v37  ;;  %v8516_v56 = vpop.eup %6141  ;;  %v2205_v15 = vsub.f32 1.0, %v2204_v50  ;;  %v2220_v2 = vsub.f32 1.0, %v2219_v22  ;;  %vm8553_vm6 = vmor %vm1968_vm1, %vm1969_vm5  ;;  %v12324_v11 = vld [vmem:[#allocation79_spill] sm:$0xff] }
 0x30a   : >> { %12293 = vst [vmem:[#allocation53_spill] sm:$0xff] %v8488_v37  ;;  %v2638_v4 = vmul.f32 %v8499_v42, %v8499_v42  ;;  %v2268_v9 = vmul.f32 %v8037_v44, %v12296_v24  ;;  %v1981_v35 = vmul.f32 %v8400_v29, %v1980_v3  ;;  %v1994_v40 = vmul.f32 %v8495_v59, %v8380_v58 }
 0x30b   : >> { %12295 = vst [vmem:[#allocation54_spill] sm:$0xff] %v8499_v42  ;;  %2707 = vadd.xlane.f32.xlu0 %v2653_v49  ;;  %2675 = vadd.xlane.f32.xlu1 %v2637_v8  ;;  %v1967_v20 = vadd.f32 %v8338_v47, %v1966_v62  ;;  %v2265_v51 = vmul.f32 %v7799_v17, %v7515_v60  ;;  %v1972_v30 = vand.u32 2147483647, %v8257_v38  ;;  %v1974_v22 = vand.u32 2147483648, %v8257_v38 }
 0x30c   : >> { %v8530_v50 = vmul.f32 %v8505_v32, %v8391_v36  ;;  %2677 = vadd.xlane.f32.xlu2 %v2638_v4  ;;  %v2267_v44 = vmul.f32 %v7929_v55, %v7515_v60  ;;  %v2009_v39 = vmul.f32 %v8516_v56, %v8402_v1  ;;  %v2550_v34 = vpop.xlane.xlu0 %2549  ;;  %v1987_v14 = vand.u32 2147483647, %v8293_v41  ;;  %v8540_v3 = vpop.eup %6143 }
 0x30d   : >> { %v2295_v17 = vadd.f32 %v2264_v21, %v7838_v6  ;;  %v2302_v62 = vadd.f32 %v2266_v10, %v2265_v51  ;;  %12298 = vst [vmem:[#allocation55_spill] sm:$0xff] %v8540_v3  ;;  %v8543_v53 = vmul.f32 %v8438_v63, %v2205_v15  ;;  %v8546_v49 = vmul.f32 %v8454_v19, %v2220_v2 }
 0x30e   : >> { %v2590_v8 = vmul.f32 %v2550_v34, %v8135_v13  ;;  %v2309_v6 = vadd.f32 %v2268_v9, %v2267_v44  ;;  %v1995_v25 = vsub.f32 1.0, %v1994_v40  ;;  %v1971_v21 = vsel %vm8553_vm6, %v8338_v47, %v1967_v20  ;;  %v12304_v34 = vld [vmem:[#allocation67_spill] sm:$0xff] }
 0x30f   : >> { %v1982_v10 = vadd.f32 %v8400_v29, %v1981_v35  ;;  %vm1984_vm7 = vweird.f32 %v8400_v29  ;;  %vm1973_vm10 = vcmp.eq.f32.partialorder %v1972_v30, 8.507059e+37  ;;  %v1975_v38 = vor.u32 1.1754944e-38, %v1974_v22 }
 0x310   : >> { %v8564_v2 = vsub.f32 %v7490_v33, %v2590_v8  ;;  %v2010_v4 = vsub.f32 1.0, %v2009_v39  ;;  %v8568_v9 = vmul.f32 %v8540_v3, %v8469_v18  ;;  %v2296_v40 = vrot.slane %v2295_v17, 4  ;;  %vm8576_vm12 = vmor %vm1983_vm4, %vm1984_vm7 }
 0x311   : >> { %v2303_v51 = vrot.slane %v2302_v62, 4  ;;  %v8572_v35 = vsel %vm1973_vm10, %v1975_v38, %v1971_v21  ;;  %v2310_v33 = vrot.slane %v2309_v6, 4  ;;  %v2280_v30 = vmul.f32 %v7794_v57, %v12296_v24  ;;  %v12307_v21 = vld [vmem:[#allocation60_spill] sm:$0xff] }
 0x312   : >> { %12301 = vst [vmem:[#allocation62_spill] sm:$0xff] %v8564_v2  ;;  %v2654_v47 = vmul.f32 %v8564_v2, %v8564_v2  ;;  %v1986_v22 = vsel %vm8576_vm12, %v8400_v29, %v1982_v10  ;;  %v1989_v44 = vand.u32 2147483648, %v8293_v41  ;;  %v1996_v39 = vmul.f32 %v8495_v59, %v1995_v25 }
 0x313   : >> { %v2282_v8 = vmul.f32 %v12304_v34, %v12296_v24  ;;  %vm8589_vm13 = vcmp.eq.f32.partialorder %v1987_v14, 8.507059e+37  ;;  %vm1998_vm15 = vweird.f32 %v8380_v58  ;;  %v2002_v57 = vand.u32 2147483647, %v8380_v58 }
 0x314   : >> { %2709 = vadd.xlane.f32.xlu1 %v2654_v47  ;;  %v2279_v38 = vmul.f32 %v12307_v21, %v7515_v60  ;;  %v12308_v29 = vand.u32 2147483647, %v7981_v61  ;;  %v2297_v10 = vadd.f32 %v2296_v40, %v2295_v17  ;;  %v2304_v14 = vadd.f32 %v2303_v51, %v2302_v62  ;;  %v12311_v47 = vld [vmem:[#allocation66_spill] sm:$0xff] }
 0x315   : >> { %v2281_v20 = vmul.f32 %v12311_v47, %v7515_v60  ;;  %v12312_v34 = vand.u32 2147483647, %v7851_v54  ;;  %vm1999_vm0 = vweird.f32 %v8495_v59  ;;  %v2004_v61 = vand.u32 2147483648, %v8380_v58 }
 0x316   : >> { %vm8599_vm8 = vcmp.eq.f32.partialorder %v12308_v29, 8.507059e+37  ;;  %v2311_v21 = vadd.f32 %v2310_v33, %v2309_v6  ;;  %v2351_v29 = vadd.f32 %v2280_v30, %v2279_v38  ;;  %v1990_v2 = vor.u32 1.1754944e-38, %v1989_v44  ;;  %vm8633_vm3 = vmor %vm1998_vm15, %vm1999_vm0 }
 0x317   : >> { %vm8608_vm11 = vcmp.eq.f32.partialorder %v12312_v34, 8.507059e+37  ;;  %v1997_v25 = vadd.f32 %v8495_v59, %v1996_v39  ;;  %vm2013_vm1 = vweird.f32 %v8402_v1  ;;  %v2358_v17 = vadd.f32 %v2282_v8, %v2281_v20  ;;  %v2520_v39 = vpop.xlane.xlu2 %2519  ;;  %v12321_v34 = vld [vmem:[#allocation73_spill] sm:$0xff]  ;;  %v12322_v8 = vld [vmem:[#allocation56_spill] sm:$0xff] }
 0x318   : >> { %vm8616_vm2 = vcmp.eq.f32.partialorder %v2002_v57, 8.507059e+37  ;;  %v2017_v54 = vand.u32 2147483647, %v8402_v1  ;;  %v2019_v40 = vand.u32 2147483648, %v8402_v1  ;;  %v2270_v51 = vmul.f32 %v8434_v16, %v12296_v24 }
 0x319   : >> { %v8626_v6 = vsel %vm8589_vm13, %v1990_v2, %v1986_v22  ;;  %v2011_v33 = vmul.f32 %v8516_v56, %v2010_v4  ;;  %v2298_v30 = vrot.slane %v2297_v10, 2  ;;  %v2305_v44 = vrot.slane %v2304_v14, 2  ;;  %v2552_v4 = vpop.xlane.xlu1 %2551 }
 0x31a   : >> { %v2005_v57 = vor.u32 1.1754944e-38, %v2004_v61  ;;  %v2269_v16 = vmul.f32 %v8416_v0, %v7515_v60  ;;  %v2312_v55 = vrot.slane %v2311_v21, 2  ;;  %v2352_v2 = vrot.slane %v2351_v29, 4 }
 0x31b   : >> { %v2575_v22 = vmul.f32 %v2520_v39, %v8135_v13  ;;  %v2001_v38 = vsel %vm8633_vm3, %v8495_v59, %v1997_v25  ;;  %vm2014_vm4 = vweird.f32 %v8516_v56  ;;  %v2359_v58 = vrot.slane %v2358_v17, 4 }
 0x31c   : >> { %vm2149_vm5 = vweird.f32 %v8176_v45  ;;  %v2591_v47 = vmul.f32 %v2552_v4, %v8135_v13  ;;  %vm8646_vm6 = vcmp.eq.f32.partialorder %v2017_v54, 8.507059e+37  ;;  %v2316_v0 = vadd.f32 %v2270_v51, %v2269_v16  ;;  %v12325_v54 = vld [vmem:[#allocation57_spill] sm:$0xff]  ;;  %v12337_v16 = vld [vmem:[#allocation84_spill] sm:$0xff]  ;;  %vm8689_vm12 = vmor %vm2013_vm1, %vm2014_vm4 }
 0x31d   : >> { %v2283_v61 = vmul.f32 %v12321_v34, %v7515_v60  ;;  %v2284_v39 = vmul.f32 %v8090_v43, %v12296_v24  ;;  %v8655_v59 = vsub.f32 %v12322_v8, %v2575_v22  ;;  %v2012_v25 = vadd.f32 %v8516_v56, %v2011_v33  ;;  %v12328_v34 = vld [vmem:[#allocation77_spill] sm:$0xff]  ;;  %v12334_v8 = vld [vmem:[#allocation78_spill] sm:$0xff] }
 0x31e   : >> { %v2299_v42 = vadd.f32 %v2298_v30, %v2297_v10  ;;  %v2306_v37 = vadd.f32 %v2305_v44, %v2304_v14  ;;  %vm2148_vm7 = vweird.f32 %v12324_v11  ;;  %vm2164_vm10 = vweird.f32 %v8204_v5  ;;  %v2522_v14 = vpop.xlane.xlu0 %2521 }
 0x31f   : >> { %12323 = vst [vmem:[#allocation67_spill] sm:$0xff] %v8655_v59  ;;  %v8661_v4 = vsub.f32 %v12325_v54, %v2591_v47  ;;  %v2313_v51 = vadd.f32 %v2312_v55, %v2311_v21  ;;  %v12330_v43 = vsel %vm8225_vm14, %v12328_v34, %v12329_v7  ;;  %v2353_v33 = vadd.f32 %v2352_v2, %v2351_v29  ;;  %v12333_v47 = vld [vmem:[#allocation70_spill] sm:$0xff]  ;;  %v12340_v34 = vld [vmem:[#allocation97_spill] sm:$0xff]  ;;  %vm8749_vm1 = vmor %vm2148_vm7, %vm2149_vm5 }
 0x320   : >> { %v2141_v22 = vsel %vm8599_vm8, %v12331_v48, %v12330_v43  ;;  %v2639_v10 = vmul.f32 %v8655_v59, %v8655_v59  ;;  %v2020_v30 = vor.u32 1.1754944e-38, %v2019_v40  ;;  %v12335_v21 = vsel %vm8096_vm9, %v12333_v47, %v12334_v8  ;;  %v12336_v55 = vld [vmem:[#allocation74_spill] sm:$0xff]  ;;  %v12352_v59 = vld [vmem:[#allocation61_spill] sm:$0xff] }
 0x321   : >> { %12326 = vst [vmem:[#allocation60_spill] sm:$0xff] %v8661_v4  ;;  %v2126_v54 = vsel %vm8608_vm11, %v12336_v55, %v12335_v21  ;;  %v2360_v7 = vadd.f32 %v2359_v58, %v2358_v17  ;;  %vm2163_vm14 = vweird.f32 %v12337_v16  ;;  %v2576_v48 = vmul.f32 %v2522_v14, %v8135_v13  ;;  %v12341_v43 = vld [vmem:[#allocation58_spill] sm:$0xff] }
 0x322   : >> { %v2655_v41 = vmul.f32 %v8661_v4, %v8661_v4  ;;  %v2317_v40 = vrot.slane %v2316_v0, 4  ;;  %v2365_v2 = vadd.f32 %v2284_v39, %v2283_v61  ;;  %vm2194_vm9 = vweird.f32 %v8320_v46  ;;  %2679 = vadd.xlane.f32.xlu0 %v2639_v10  ;;  %v2554_v61 = vpop.xlane.xlu2 %2553 }
 0x323   : >> { %v8696_v15 = vsel %vm8616_vm2, %v2005_v57, %v2001_v38  ;;  %v2016_v17 = vsel %vm8689_vm12, %v8516_v56, %v2012_v25  ;;  %v2300_v58 = vrot.slane %v2299_v42, 1  ;;  %v2286_v1 = vmul.f32 %v2141_v22, %v12296_v24  ;;  %v12346_v56 = vld [vmem:[#allocation96_spill] sm:$0xff]  ;;  %v2524_v25 = vpop.xlane.xlu1 %2523  ;;  %vm8770_vm2 = vmor %vm2163_vm14, %vm2164_vm10 }
 0x324   : >> { %vm2179_vm13 = vweird.f32 %v12340_v34  ;;  %v8704_v14 = vsub.f32 %v12341_v43, %v2576_v48  ;;  %2711 = vadd.xlane.f32.xlu2 %v2655_v41  ;;  %v2307_v39 = vrot.slane %v2306_v37, 1  ;;  %v2314_v10 = vrot.slane %v2313_v51, 1  ;;  %v12350_v48 = vld [vmem:[#allocation89_spill] sm:$0xff] }
 0x325   : >> { %v2354_v44 = vrot.slane %v2353_v33, 2  ;;  %v12343_v62 = vand.u32 2147483647, %v12324_v11  ;;  %vm2193_vm8 = vweird.f32 %v12346_v56  ;;  %v2592_v38 = vmul.f32 %v2554_v61, %v8135_v13 }
 0x326   : >> { %12342 = vst [vmem:[#allocation66_spill] sm:$0xff] %v8704_v14  ;;  %v2272_v22 = vmul.f32 %v8449_v12, %v12296_v24  ;;  %v2285_v47 = vmul.f32 %v2126_v54, %v7515_v60  ;;  %v2361_v8 = vrot.slane %v2360_v7, 2  ;;  %v12347_v21 = vand.u32 2147483647, %v12337_v16  ;;  %vm8799_vm4 = vmor %vm2193_vm8, %vm2194_vm9 }
 0x327   : >> { %vm8708_vm15 = vcmp.eq.f32.partialorder %v12343_v62, 8.507059e+37  ;;  %vm2178_vm0 = vweird.f32 %v12350_v48  ;;  %v2640_v41 = vmul.f32 %v8704_v14, %v8704_v14  ;;  %v2577_v29 = vmul.f32 %v2524_v25, %v8135_v13  ;;  %v12351_v62 = vld [vmem:[#allocation59_spill] sm:$0xff] }
 0x328   : >> { %vm8719_vm11 = vcmp.eq.f32.partialorder %v12347_v21, 8.507059e+37  ;;  %v2318_v43 = vadd.f32 %v2317_v40, %v2316_v0  ;;  %v2366_v61 = vrot.slane %v2365_v2, 4  ;;  %v8728_v12 = vsub.f32 %v12351_v62, %v2592_v38  ;;  %v12359_v38 = vld [vmem:[#allocation100_spill] sm:$0xff] }
 0x329   : >> { %v8732_v54 = vsel %vm8646_vm6, %v2020_v30, %v2016_v17  ;;  %v2271_v21 = vmul.f32 %v8444_v52, %v7515_v60  ;;  %v2372_v4 = vadd.f32 %v2286_v1, %v2285_v47  ;;  %2681 = vadd.xlane.f32.xlu1 %v2640_v41  ;;  %v8737_v3 = vsub.f32 %v12352_v59, %v2577_v29  ;;  %v2556_v30 = vpop.xlane.xlu0 %2555  ;;  %v12355_v17 = vld [vmem:[#allocation98_spill] sm:$0xff]  ;;  %v12360_v47 = vld [vmem:[#allocation101_spill] sm:$0xff]  ;;  %vm8815_vm6 = vmor %vm2178_vm0, %vm2179_vm13 }
 0x32a   : >> { %v8739_v14 = vadd.f32 %v2300_v58, %v2299_v42  ;;  %v8741_v25 = vadd.f32 %v2307_v39, %v2306_v37  ;;  %v8743_v0 = vadd.f32 %v2354_v44, %v2353_v33  ;;  %v2656_v52 = vmul.f32 %v8728_v12, %v8728_v12  ;;  %v2526_v44 = vpop.xlane.xlu2 %2525 }
 0x32b   : >> { %v8755_v59 = vadd.f32 %v2314_v10, %v2313_v51  ;;  %v2323_v42 = vadd.f32 %v2272_v22, %v2271_v21  ;;  %v8757_v40 = vadd.f32 %v2361_v8, %v2360_v7  ;;  %v2593_v37 = vmul.f32 %v2556_v30, %v8135_v13  ;;  %v12363_v21 = vld [vmem:[#allocation85_spill] sm:$0xff] }
 0x32c   : >> { %v2319_v33 = vrot.slane %v2318_v43, 2  ;;  %v2151_v11 = vsel %vm8749_vm1, %v8176_v45, %v12355_v17  ;;  %v8764_v58 = vadd.f32 %v2366_v61, %v2365_v2  ;;  %2713 = vadd.xlane.f32.xlu0 %v2656_v52  ;;  %v2274_v7 = vmul.f32 %v8509_v23, %v12296_v24  ;;  %v12358_v2 = vld [vmem:[#allocation63_spill] sm:$0xff]  ;;  %v2558_v62 = vpop.xlane.xlu1 %2557 }
 0x32d   : >> { %v2182_v1 = vand.u32 2147483647, %v12350_v48  ;;  %v2192_v39 = vadd.f32 %v8320_v46, %v8474_v26  ;;  %v2373_v45 = vrot.slane %v2372_v4, 4  ;;  %v8780_v10 = vsub.f32 %v12358_v2, %v2593_v37  ;;  %v12366_v17 = vld [vmem:[#allocation95_spill] sm:$0xff] }
 0x32e   : >> { %v2641_v16 = vmul.f32 %v8737_v3, %v8737_v3  ;;  %v2166_v22 = vsel %vm8770_vm2, %v8204_v5, %v12359_v38  ;;  %v2177_v23 = vadd.f32 %v12340_v34, %v12360_v47  ;;  %vm2223_vm3 = vweird.f32 %v8336_v31 }
 0x32f   : >> { %v2273_v26 = vmul.f32 %v8493_v28, %v7515_v60  ;;  %v2324_v8 = vrot.slane %v2323_v42, 4  ;;  %v2197_v41 = vand.u32 2147483647, %v12346_v56  ;;  %v2363_v29 = vrot.slane %v8757_v40, 1 }
 0x330   : >> { %vm2208_vm5 = vweird.f32 %v8318_v27  ;;  %v2578_v5 = vmul.f32 %v2526_v44, %v8135_v13  ;;  %v2657_v28 = vmul.f32 %v8780_v10, %v8780_v10  ;;  %v2156_v20 = vsel %vm8708_vm15, %v12363_v21, %v2151_v11  ;;  %v12367_v44 = vld [vmem:[#allocation65_spill] sm:$0xff] }
 0x331   : >> { %v2368_v52 = vrot.slane %v8764_v58, 2  ;;  %v2594_v30 = vmul.f32 %v2558_v62, %v8135_v13  ;;  %v2330_v37 = vadd.f32 %v2274_v7, %v2273_v26  ;;  %v2171_v51 = vsel %vm8719_vm11, %v12366_v17, %v2166_v22  ;;  %2683 = vadd.xlane.f32.xlu1 %v2641_v16  ;;  %v12368_v22 = vld [vmem:[#allocation64_spill] sm:$0xff] }
 0x332   : >> { %v2196_v57 = vsel %vm8799_vm4, %v8320_v46, %v2192_v39  ;;  %2715 = vadd.xlane.f32.xlu2 %v2657_v28  ;;  %v2320_v11 = vadd.f32 %v2319_v33, %v2318_v43  ;;  %vm2423_vm7 = vcmask 1041409   ;;  %v2181_v48 = vsel %vm8815_vm6, %v12340_v34, %v2177_v23  ;;  %v12369_v33 = vld [vmem:[#allocation102_spill] sm:$0xff] }
 0x333   : >> { %vm2183_vm10 = vcmp.eq.f32.partialorder %v2182_v1, 8.507059e+37  ;;  %v2374_v2 = vadd.f32 %v2373_v45, %v2372_v4  ;;  %v8830_v7 = vsub.f32 %v12367_v44, %v2594_v30  ;;  %v2325_v38 = vadd.f32 %v2324_v8, %v2323_v42  ;;  %v12370_v45 = vld [vmem:[#allocation99_spill] sm:$0xff] }
 0x334   : >> { %vm2425_vm14 = vcmask 1042434   ;;  %vm2198_vm12 = vcmp.eq.f32.partialorder %v2197_v41, 8.507059e+37  ;;  %v2287_v55 = vmul.f32 %v2156_v20, %v7515_v60  ;;  %v8834_v46 = vsub.f32 %v12368_v22, %v2578_v5 }
 0x335   : >> { %v2276_v43 = vmul.f32 %v8626_v6, %v12296_v24  ;;  %v2201_v39 = vsel %vm2198_vm12, %v12369_v33, %v2196_v57  ;;  %v2288_v34 = vmul.f32 %v2171_v51, %v12296_v24  ;;  %v2658_v4 = vmul.f32 %v8830_v7, %v8830_v7  ;;  %v2528_v33 = vpop.xlane.xlu0 %2527 }
 0x336   : >> { %v2331_v1 = vrot.slane %v2330_v37, 4  ;;  %v2186_v42 = vsel %vm2183_vm10, %v12370_v45, %v2181_v48  ;;  %vm2224_vm9 = vweird.f32 %v8454_v19  ;;  %v2275_v16 = vmul.f32 %v8572_v35, %v7515_v60 }
 0x337   : >> { %v2207_v47 = vadd.f32 %v8438_v63, %v8543_v53  ;;  %vm2209_vm13 = vweird.f32 %v8438_v63  ;;  %v2229_v6 = vand.u32 2147483648, %v8336_v31  ;;  %2717 = vadd.xlane.f32.xlu0 %v2658_v4  ;;  %v2214_v23 = vand.u32 2147483648, %v8318_v27  ;;  %vm8860_vm15 = vmor %vm2223_vm3, %vm2224_vm9 }
 0x338   : >> { %v2222_v26 = vadd.f32 %v8454_v19, %v8546_v49  ;;  %v2227_v8 = vand.u32 2147483647, %v8336_v31  ;;  %v2290_v41 = vmul.f32 %v2201_v39, %v12296_v24  ;;  %v2642_v35 = vmul.f32 %v8834_v46, %v8834_v46  ;;  %vm8866_vm8 = vmor %vm2208_vm5, %vm2209_vm13 }
 0x339   : >> { %v2326_v61 = vrot.slane %v2325_v38, 2  ;;  %v2337_v5 = vadd.f32 %v2276_v43, %v2275_v16  ;;  %v2212_v53 = vand.u32 2147483647, %v8318_v27  ;;  %v2332_v62 = vadd.f32 %v2331_v1, %v2330_v37  ;;  %v12375_v16 = vld [vmem:[#allocation68_spill] sm:$0xff] }
 0x33a   : >> { %v2226_v21 = vsel %vm8860_vm15, %v8454_v19, %v2222_v26  ;;  %v2289_v20 = vmul.f32 %v2186_v42, %v7515_v60  ;;  %v2379_v56 = vadd.f32 %v2288_v34, %v2287_v55  ;;  %2685 = vadd.xlane.f32.xlu2 %v2642_v35  ;;  %v2321_v31 = vrot.slane %v2320_v11, 1 }
 0x33b   : >> { %v2211_v30 = vsel %vm8866_vm8, %v8438_v63, %v2207_v47  ;;  %v2230_v37 = vor.u32 1.1754944e-38, %v2229_v6  ;;  %v8878_v27 = vadd.f32 %v2368_v52, %v8764_v58  ;;  %v2215_v17 = vor.u32 1.1754944e-38, %v2214_v23 }
 0x33c   : >> { %vm2228_vm11 = vcmp.eq.f32.partialorder %v2227_v8, 8.507059e+37  ;;  %v2375_v51 = vrot.slane %v2374_v2, 2  ;;  %v2386_v57 = vadd.f32 %v2290_v41, %v2289_v20  ;;  %v8880_v48 = vadd.f32 %v2326_v61, %v2325_v38  ;;  %v12379_v20 = vld [vmem:[#allocation55_spill] sm:$0xff] }
 0x33d   : >> { %v2338_v19 = vrot.slane %v2337_v5, 4  ;;  %vm2213_vm0 = vcmp.eq.f32.partialorder %v2212_v53, 8.507059e+37  ;;  %v2231_v44 = vsel %vm2228_vm11, %v2230_v37, %v2226_v21  ;;  %v2333_v55 = vrot.slane %v2332_v62, 2  ;;  %v12377_v53 = vld [vmem:[#allocation69_spill] sm:$0xff]  ;;  %v2562_v37 = vpop.xlane.xlu0 %2561 }
 0x33e   : >> { %v2424_v22 = vsel %vm2423_vm7, %v8741_v25, %v8739_v14  ;;  %v2216_v43 = vsel %vm2213_vm0, %v2215_v17, %v2211_v30  ;;  %v2380_v63 = vrot.slane %v2379_v56, 4  ;;  %v2356_v52 = vrot.slane %v8743_v0, 1 }
 0x33f   : >> { %v8887_v58 = vsel %vm2425_vm14, %v8755_v59, %v2424_v22  ;;  %v8893_v38 = vadd.f32 %v2363_v29, %v8757_v40  ;;  %v2370_v39 = vrot.slane %v8878_v27, 1  ;;  %v2579_v34 = vmul.f32 %v2528_v33, %v8135_v13  ;;  %v2560_v40 = vpop.xlane.xlu2 %2559  ;;  %v12386_v33 = vld [vmem:[#allocation72_spill] sm:$0xff] }
 0x340   : >> { %v8897_v4 = vadd.f32 %v2321_v31, %v2320_v11  ;;  %v2292_v14 = vmul.f32 %v2231_v44, %v12296_v24  ;;  %v2387_v25 = vrot.slane %v2386_v57, 4  ;;  %v2328_v1 = vrot.slane %v8880_v48, 1 }
 0x341   : >> { %v2339_v59 = vadd.f32 %v2338_v19, %v2337_v5  ;;  %v2291_v45 = vmul.f32 %v2216_v43, %v7515_v60  ;;  %v8902_v42 = vadd.f32 %v2375_v51, %v2374_v2  ;;  %v8905_v47 = vsub.f32 %v12375_v16, %v2579_v34  ;;  %v2530_v2 = vpop.xlane.xlu1 %2529 }
 0x342   : >> { %v8907_v29 = vadd.f32 %v2333_v55, %v2332_v62  ;;  %v12376_v6 = vsub.f32 1.0, %v8530_v50  ;;  %v2381_v23 = vadd.f32 %v2380_v63, %v2379_v56  ;;  %v2595_v26 = vmul.f32 %v2560_v40, %v8135_v13 }
 0x343   : >> { %vm2238_vm1 = vweird.f32 %v8391_v36  ;;  %v2242_v8 = vand.u32 2147483647, %v8391_v36  ;;  %v2393_v41 = vadd.f32 %v2292_v14, %v2291_v45  ;;  %v2643_v35 = vmul.f32 %v8905_v47, %v8905_v47  ;;  %v12387_v45 = vld [vmem:[#allocation71_spill] sm:$0xff] }
 0x344   : >> { %v2236_v11 = vmul.f32 %v8505_v32, %v12376_v6  ;;  %v2278_v61 = vmul.f32 %v8732_v54, %v12296_v24  ;;  %v2244_v5 = vand.u32 2147483648, %v8391_v36  ;;  %v2388_v50 = vadd.f32 %v2387_v25, %v2386_v57 }
 0x345   : >> { %v8921_v28 = vsub.f32 %v12377_v53, %v2595_v26  ;;  %v2340_v62 = vrot.slane %v2339_v59, 2  ;;  %vm2239_vm2 = vweird.f32 %v8505_v32  ;;  %vm2253_vm3 = vweird.f32 %v8469_v18  ;;  %2687 = vadd.xlane.f32.xlu0 %v2643_v35 }
 0x346   : >> { %v2277_v49 = vmul.f32 %v8696_v15, %v7515_v60  ;;  %vm2427_vm4 = vcmask 1043459   ;;  %v2237_v21 = vadd.f32 %v8505_v32, %v2236_v11  ;;  %v12378_v54 = vsub.f32 1.0, %v8568_v9  ;;  %vm8941_vm6 = vmor %vm2238_vm1, %vm2239_vm2 }
 0x347   : >> { %vm2254_vm5 = vweird.f32 %v12379_v20  ;;  %v2580_v31 = vmul.f32 %v2530_v2, %v8135_v13  ;;  %v2659_v30 = vmul.f32 %v8921_v28, %v8921_v28  ;;  %v2259_v17 = vand.u32 2147483648, %v8469_v18 }
 0x348   : >> { %v2251_v56 = vmul.f32 %v12379_v20, %v12378_v54  ;;  %v2394_v51 = vrot.slane %v2393_v41, 4  ;;  %v2596_v15 = vmul.f32 %v2562_v37, %v8135_v13  ;;  %v2344_v57 = vadd.f32 %v2278_v61, %v2277_v49  ;;  %vm8956_vm12 = vmor %vm2253_vm3, %vm2254_vm5 }
 0x349   : >> { %v2257_v44 = vand.u32 2147483647, %v8469_v18  ;;  %2719 = vadd.xlane.f32.xlu1 %v2659_v30  ;;  %v2335_v55 = vrot.slane %v8907_v29, 1  ;;  %v2341_v22 = vadd.f32 %v2340_v62, %v2339_v59  ;;  %vm8948_vm10 = vcmp.eq.f32.partialorder %v2242_v8, 8.507059e+37  ;;  %v2532_v11 = vpop.xlane.xlu1 %2531  ;;  %v2534_v8 = vpop.xlane.xlu2 %2533 }
 0x34a   : >> { %v2252_v19 = vadd.f32 %v12379_v20, %v2251_v56  ;;  %v2382_v63 = vrot.slane %v2381_v23, 2  ;;  %v8961_v34 = vsub.f32 %v12386_v33, %v2596_v15  ;;  %v2345_v14 = vrot.slane %v2344_v57, 4 }
 0x34b   : >> { %v2241_v25 = vsel %vm8941_vm6, %v8505_v32, %v2237_v21  ;;  %v8970_v16 = vsub.f32 %v12387_v45, %v2580_v31  ;;  %v2245_v18 = vor.u32 1.1754944e-38, %v2244_v5  ;;  %v2260_v40 = vor.u32 1.1754944e-38, %v2259_v17 }
 0x34c   : >> { %v2256_v59 = vsel %vm8956_vm12, %v12379_v20, %v2252_v19  ;;  %v2395_v6 = vadd.f32 %v2394_v51, %v2393_v41  ;;  %v2660_v26 = vmul.f32 %v8961_v34, %v8961_v34  ;;  %v2346_v2 = vadd.f32 %v2345_v14, %v2344_v57  ;;  %v12388_v20 = vld [vmem:[#allocation76_spill] sm:$0xff] }
 0x34d   : >> { %vm2258_vm9 = vcmp.eq.f32.partialorder %v2257_v44, 8.507059e+37  ;;  %v2389_v35 = vrot.slane %v2388_v50, 2  ;;  %v2582_v32 = vmul.f32 %v2534_v8, %v8135_v13  ;;  %v2342_v61 = vrot.slane %v2341_v22, 1 }
 0x34e   : >> { %v2246_v53 = vsel %vm8948_vm10, %v2245_v18, %v2241_v25  ;;  %v2261_v62 = vsel %vm2258_vm9, %v2260_v40, %v2256_v59  ;;  %2721 = vadd.xlane.f32.xlu2 %v2660_v26  ;;  %v2329_v41 = vadd.f32 %v2328_v1, %v8880_v48  ;;  %v2347_v5 = vrot.slane %v2346_v2, 2  ;;  %v12390_v18 = vld [vmem:[#allocation80_spill] sm:$0xff] }
 0x34f   : >> { %vm2429_vm13 = vcmask 1044484   ;;  %v2383_v49 = vadd.f32 %v2382_v63, %v2381_v23  ;;  %v2581_v21 = vmul.f32 %v2532_v11, %v8135_v13  ;;  %v2644_v54 = vmul.f32 %v8970_v16, %v8970_v16  ;;  %v12391_v11 = vld [vmem:[#allocation44_spill] sm:$0xff] }
 0x350   : >> { %v8984_v56 = vsub.f32 %v12388_v20, %v2582_v32  ;;  %v2396_v31 = vrot.slane %v2395_v6, 2  ;;  %v2336_v30 = vadd.f32 %v2335_v55, %v8907_v29  ;;  %v2348_v37 = vadd.f32 %v2347_v5, %v2346_v2  ;;  %v12389_v29 = vld [vmem:[#allocation75_spill] sm:$0xff] }
 0x351   : >> { %v2293_v17 = vmul.f32 %v2246_v53, %v7515_v60  ;;  %v2294_v51 = vmul.f32 %v2261_v62, %v12296_v24  ;;  %2689 = vadd.xlane.f32.xlu1 %v2644_v54  ;;  %v2343_v48 = vadd.f32 %v2342_v61, %v2341_v22  ;;  %v2428_v1 = vsel %vm2427_vm4, %v8897_v4, %v8887_v58  ;;  %v2564_v55 = vpop.xlane.xlu1 %2563  ;;  %v2566_v22 = vpop.xlane.xlu2 %2565 }
 0x352   : >> { %vm2431_vm15 = vcmask 1045509   ;;  %v2390_v23 = vadd.f32 %v2389_v35, %v2388_v50  ;;  %v2646_v15 = vmul.f32 %v8984_v56, %v8984_v56  ;;  %v2349_v57 = vrot.slane %v2348_v37, 1 }
 0x353   : >> { %vm2433_vm8 = vcmask 1046534   ;;  %v2400_v9 = vadd.f32 %v2294_v51, %v2293_v17  ;;  %v8995_v19 = vsub.f32 %v12389_v29, %v2581_v21  ;;  %v2430_v60 = vsel %vm2429_vm13, %v2329_v41, %v2428_v1 }
 0x354   : >> { %v2377_v24 = vrot.slane %v8902_v42, 1  ;;  %v2397_v44 = vadd.f32 %v2396_v31, %v2395_v6  ;;  %v2350_v43 = vadd.f32 %v2349_v57, %v2348_v37  ;;  %v2432_v58 = vsel %vm2431_vm15, %v2336_v30, %v2430_v60 }
 0x355   : >> { %v2384_v4 = vrot.slane %v2383_v49, 1  ;;  %v2401_v50 = vrot.slane %v2400_v9, 4  ;;  %v2597_v36 = vmul.f32 %v2564_v55, %v8135_v13  ;;  %v2598_v63 = vmul.f32 %v2566_v22, %v8135_v13 }
 0x356   : >> { %v2434_v33 = vsel %vm2433_vm8, %v2343_v48, %v2432_v58  ;;  %vm2435_vm11 = vcmask 1047559   ;;  %2693 = vadd.xlane.f32.xlu2 %v2646_v15  ;;  %v2371_v25 = vadd.f32 %v2370_v39, %v8878_v27  ;;  %v2391_v59 = vrot.slane %v2390_v23, 1  ;;  %v12393_v39 = vld [vmem:[#allocation81_spill] sm:$0xff] }
 0x357   : >> { %v2436_v14 = vsel %vm2435_vm11, %v2350_v43, %v2434_v33  ;;  %v2402_v45 = vadd.f32 %v2401_v50, %v2400_v9  ;;  %v9008_v40 = vsub.f32 %v12390_v18, %v2597_v36  ;;  %v2645_v6 = vmul.f32 %v8995_v19, %v8995_v19  ;;  %v2696_v30 = vpop.xlane.xlu0 %2695  ;;  %v12394_v15 = vld [vmem:[#allocation45_spill] sm:$0xff] }
 0x358   : >> { %v9013_v26 = vadd.f32 %v2436_v14, %v12391_v11  ;;  %v2398_v8 = vrot.slane %v2397_v44, 1  ;;  %v2357_v2 = vadd.f32 %v2356_v52, %v8743_v0  ;;  %v2378_v35 = vadd.f32 %v2377_v24, %v8902_v42 }
 0x359   : >> { %v2403_v32 = vrot.slane %v2402_v45, 2  ;;  %2691 = vadd.xlane.f32.xlu1 %v2645_v6  ;;  %v2661_v27 = vmul.f32 %v9008_v40, %v9008_v40  ;;  %v9022_v61 = vsub.f32 %v12393_v39, %v2598_v63  ;;  %v2385_v53 = vadd.f32 %v2384_v4, %v2383_v49  ;;  %v2664_v37 = vpop.xlane.xlu1 %2663  ;;  %v2666_v48 = vpop.xlane.xlu2 %2665  ;;  %v1107_v6 = vld [vmem:[%s9057_s2] sm:$0x3f] }
 0x35a   : >> { %12392 = vst [vmem:[#allocation73_spill] sm:$0xff] %v9013_v26  ;;  %v2392_v62 = vadd.f32 %v2391_v59, %v2390_v23  ;;  %v2437_v5 = vsel %vm2423_vm7, %v8893_v38, %v2357_v2  ;;  %v2399_v21 = vadd.f32 %v2398_v8, %v2397_v44  ;;  %v2743_v38 = vmul.f32 %v2696_v30, %v8135_v13 }
 0x35b   : >> { %v2404_v41 = vadd.f32 %v2403_v32, %v2402_v45  ;;  %2723 = vadd.xlane.f32.xlu0 %v2661_v27  ;;  %v2438_v0 = vsel %vm2425_vm14, %v2371_v25, %v2437_v5  ;;  %v2662_v54 = vmul.f32 %v9022_v61, %v9022_v61  ;;  %v2727_v51 = vmul.f32 %v2664_v37, %v8135_v13 }
 0x35c   : >> { %v2439_v42 = vsel %vm2427_vm4, %v2378_v35, %v2438_v0  ;;  %v2728_v23 = vmul.f32 %v2666_v48, %v8135_v13  ;;  %v2775_v9 = vadd.f32 1e-05, %v2743_v38  ;;  %v9079_v0 = vperm.slane %v1107_v6, 3 }
 0x35d   : >> { %v2405_v52 = vrot.slane %v2404_v41, 1  ;;  %v2440_v20 = vsel %vm2429_vm13, %v2385_v53, %v2439_v42  ;;  %v9040_v29 = vadd.f32 1e-05, %v2727_v51 }
 0x35e   : >> { %v2441_v49 = vsel %vm2431_vm15, %v2392_v62, %v2440_v20  ;;  %v9042_v60 = vadd.f32 1e-05, %v2728_v23  ;;  %6145 = vrsqrt.f32 %v2775_v9  ;;  %vm2957_vm7 = vweird.f32 %v2775_v9 }
 0x35f   : >> { %v2406_v31 = vadd.f32 %v2405_v52, %v2404_v41  ;;  %v2442_v17 = vsel %vm2433_vm8, %v2399_v21, %v2441_v49  ;;  %6147 = vrsqrt.f32 %v9040_v29  ;;  %v2668_v44 = vpop.xlane.xlu0 %2667  ;;  %v9077_v41 = vperm.slane %v1107_v6, 2 }
 0x360   : >> { %6149 = vrsqrt.f32 %v9042_v60  ;;  %v2729_v22 = vmul.f32 %v2668_v44, %v8135_v13  ;;  %vm2797_vm14 = vweird.f32 %v9040_v29  ;;  %vm2807_vm2 = vweird.f32 %v9042_v60 }
 0x361   : >> { %v2443_v1 = vsel %vm2435_vm11, %v2406_v31, %v2442_v17  ;;  %2725 = vadd.xlane.f32.xlu1 %v2662_v54  ;;  %v2698_v24 = vpop.xlane.xlu1 %2697  ;;  %v2700_v43 = vpop.xlane.xlu2 %2699 }
 0x362   : >> { %v9038_v57 = vadd.f32 %v2443_v1, %v12394_v15  ;;  %v2744_v55 = vmul.f32 %v2698_v24, %v8135_v13  ;;  %v2745_v58 = vmul.f32 %v2700_v43, %v8135_v13  ;;  %v9052_v36 = vadd.f32 1e-05, %v2729_v22  ;;  %v12402_v24 = vld [vmem:[#allocation88_spill] sm:$0xff] }
 0x364   : >> { %12395 = vst [vmem:[#allocation56_spill] sm:$0xff] %v9038_v57  ;;  %v6146_v4 = vpop.eup %6145  ;;  %v9050_v50 = vadd.f32 1e-05, %v2744_v55  ;;  %v9061_v14 = vadd.f32 1e-05, %v2745_v58  ;;  %vm2817_vm12 = vweird.f32 %v9052_v36 }
 0x365   : >> { %v9059_v63 = vpop.eup %6147  ;;  %v2952_v33 = vmul.f32 %v6146_v4, %v2775_v9  ;;  %vm2958_vm0 = vweird.f32 %v6146_v4 }
 0x366   : >> { %v9063_v25 = vpop.eup %6149  ;;  %v2792_v59 = vmul.f32 %v9059_v63, %v9040_v29  ;;  %6151 = vrsqrt.f32 %v9050_v50  ;;  %vm2798_vm1 = vweird.f32 %v9059_v63  ;;  %vm2959_vm3 = vmor %vm2957_vm7, %vm2958_vm0  ;;  %vm2967_vm5 = vweird.f32 %v9050_v50 }
 0x367   : >> { %v2953_v45 = vmul.f32 %v6146_v4, %v2952_v33  ;;  %v2802_v18 = vmul.f32 %v9063_v25, %v9042_v60  ;;  %6153 = vrsqrt.f32 %v9052_v36  ;;  %v2702_v32 = vpop.xlane.xlu0 %2701  ;;  %vm2808_vm4 = vweird.f32 %v9063_v25  ;;  %vm9111_vm6 = vmor %vm2797_vm14, %vm2798_vm1  ;;  %v12398_v33 = vld [vmem:[#allocation87_spill] sm:$0xff] }
 0x368   : >> { %v2793_v11 = vmul.f32 %v9059_v63, %v2792_v59  ;;  %6155 = vrsqrt.f32 %v9061_v14  ;;  %v2746_v53 = vmul.f32 %v2702_v32, %v8135_v13  ;;  %vm2809_vm13 = vmor %vm2807_vm2, %vm2808_vm4  ;;  %vm2977_vm11 = vweird.f32 %v9061_v14 }
 0x369   : >> { %v2954_v8 = vmul.f32 0.5, %v2953_v45  ;;  %v2803_v2 = vmul.f32 %v9063_v25, %v2802_v18  ;;  %v2670_v35 = vpop.xlane.xlu1 %2669  ;;  %v2672_v62 = vpop.xlane.xlu2 %2671 }
 0x36a   : >> { %v2794_v27 = vmul.f32 0.5, %v2793_v11  ;;  %v2730_v39 = vmul.f32 %v2670_v35, %v8135_v13  ;;  %v9086_v20 = vadd.f32 1e-05, %v2746_v53  ;;  %v2731_v37 = vmul.f32 %v2672_v62, %v8135_v13  ;;  %v12399_v35 = vld [vmem:[#allocation86_spill] sm:$0xff] }
 0x36b   : >> { %v2955_v5 = vsub.f32 1.5, %v2954_v8  ;;  %v2804_v21 = vmul.f32 0.5, %v2803_v2 }
 0x36c   : >> { %v9081_v52 = vpop.eup %6151  ;;  %v2795_v42 = vsub.f32 1.5, %v2794_v27  ;;  %v9084_v54 = vadd.f32 1e-05, %v2730_v39  ;;  %v9116_v22 = vadd.f32 1e-05, %v2731_v37  ;;  %vm2987_vm7 = vweird.f32 %v9086_v20 }
 0x36d   : >> { %v9088_v31 = vpop.eup %6153  ;;  %v2956_v49 = vmul.f32 %v6146_v4, %v2955_v5  ;;  %v2962_v30 = vmul.f32 %v9081_v52, %v9050_v50  ;;  %v2805_v48 = vsub.f32 1.5, %v2804_v21  ;;  %vm2968_vm10 = vweird.f32 %v9081_v52 }
 0x36e   : >> { %v9093_v17 = vpop.eup %6155  ;;  %v2796_v38 = vmul.f32 %v9059_v63, %v2795_v42  ;;  %v2812_v51 = vmul.f32 %v9088_v31, %v9052_v36  ;;  %6157 = vrsqrt.f32 %v9084_v54  ;;  %vm2818_vm9 = vweird.f32 %v9088_v31  ;;  %vm9154_vm8 = vmor %vm2967_vm5, %vm2968_vm10 }
 0x36f   : >> { %v2963_v1 = vmul.f32 %v9081_v52, %v2962_v30  ;;  %v2972_v23 = vmul.f32 %v9093_v17, %v9061_v14  ;;  %6159 = vrsqrt.f32 %v9086_v20  ;;  %v2960_v9 = vsel %vm2959_vm3, %v6146_v4, %v2956_v49  ;;  %vm9183_vm14 = vmor %vm2817_vm12, %vm2818_vm9 }
 0x370   : >> { %v2813_v15 = vmul.f32 %v9088_v31, %v2812_v51  ;;  %v3127_v59 = vmul.f32 %v2960_v9, %v12398_v33  ;;  %v2800_v45 = vsel %vm9111_vm6, %v9059_v63, %v2796_v38  ;;  %v2806_v18 = vmul.f32 %v9063_v25, %v2805_v48 }
 0x371   : >> { %v2964_v44 = vmul.f32 0.5, %v2963_v1  ;;  %v2973_v55 = vmul.f32 %v9093_v17, %v2972_v23  ;;  %v2704_v43 = vpop.xlane.xlu1 %2703  ;;  %6161 = vrsqrt.f32 %v9116_v22  ;;  %v3111_v32 = vmul.f32 %v2800_v45, %v12399_v35 }
 0x372   : >> { %v2814_v58 = vmul.f32 0.5, %v2813_v15  ;;  %v2747_v29 = vmul.f32 %v2704_v43, %v8135_v13  ;;  %v3160_v4 = vmul.f32 %v9077_v41, %v3127_v59  ;;  %vm2978_vm15 = vweird.f32 %v9093_v17  ;;  %v12403_v43 = vld [vmem:[#allocation90_spill] sm:$0xff] }
 0x373   : >> { %v2965_v6 = vsub.f32 1.5, %v2964_v44  ;;  %v2974_v11 = vmul.f32 0.5, %v2973_v55  ;;  %v3144_v21 = vmul.f32 %v9077_v41, %v3111_v32  ;;  %v2810_v48 = vsel %vm2809_vm13, %v9063_v25, %v2806_v18  ;;  %vm2979_vm4 = vmor %vm2977_vm11, %vm2978_vm15 }
 0x374   : >> { %v9125_v8 = vpop.eup %6157  ;;  %v2815_v2 = vsub.f32 1.5, %v2814_v58  ;;  %v9129_v27 = vadd.f32 1e-05, %v2747_v29  ;;  %v9140_v5 = vadd.f32 %v9079_v0, %v3160_v4  ;;  %v3112_v44 = vmul.f32 %v2810_v48, %v12402_v24 }
 0x375   : >> { %v2966_v39 = vmul.f32 %v9081_v52, %v2965_v6  ;;  %v2822_v63 = vmul.f32 %v9125_v8, %v9084_v54  ;;  %v9136_v62 = vpop.eup %6159  ;;  %v2975_v42 = vsub.f32 1.5, %v2974_v11  ;;  %v9162_v51 = vadd.f32 %v9079_v0, %v3144_v21 }
 0x376   : >> { %v2674_v53 = vpop.xlane.xlu0 %2673  ;;  %6163 = vrsqrt.f32 %v9129_v27  ;;  %v2982_v30 = vmul.f32 %v9136_v62, %v9086_v20  ;;  %v2816_v38 = vmul.f32 %v9088_v31, %v2815_v2  ;;  %v12068_v60 = vmax.f32 %v9140_v5, 0.0  ;;  %v2706_v1 = vpop.xlane.xlu2 %2705 }
 0x377   : >> { %v2823_v49 = vmul.f32 %v9125_v8, %v2822_v63  ;;  %v9165_v23 = vpop.eup %6161  ;;  %v2970_v55 = vsel %vm9154_vm8, %v9081_v52, %v2966_v39  ;;  %v12069_v25 = vmax.f32 %v9162_v51, 0.0  ;;  %vm2828_vm0 = vweird.f32 %v9125_v8 }
 0x378   : >> { %v2983_v50 = vmul.f32 %v9136_v62, %v2982_v30  ;;  %v2832_v9 = vmul.f32 %v9165_v23, %v9116_v22  ;;  %3277 = vadd.xlane.f32.xlu2 %v12068_v60  ;;  %v3128_v58 = vmul.f32 %v2970_v55, %v12403_v43  ;;  %v3145_v59 = vmul.f32 %v9077_v41, %v3112_v44  ;;  %v12406_v30 = vld [vmem:[#allocation92_spill] sm:$0xff] }
 0x379   : >> { %v2824_v15 = vmul.f32 0.5, %v2823_v49  ;;  %v2732_v45 = vmul.f32 %v2674_v53, %v8135_v13  ;;  %vm2827_vm1 = vweird.f32 %v9084_v54  ;;  %3245 = vadd.xlane.f32.xlu0 %v12069_v25  ;;  %v2748_v6 = vmul.f32 %v2706_v1, %v8135_v13 }
 0x37a   : >> { %v2984_v52 = vmul.f32 0.5, %v2983_v50  ;;  %v2833_v18 = vmul.f32 %v9165_v23, %v2832_v9  ;;  %v3161_v36 = vmul.f32 %v9077_v41, %v3128_v58  ;;  %v2820_v11 = vsel %vm9183_vm14, %v9088_v31, %v2816_v38  ;;  %vm9260_vm12 = vmor %vm2827_vm1, %vm2828_vm0 }
 0x37b   : >> { %v2976_v2 = vmul.f32 %v9093_v17, %v2975_v42  ;;  %v2825_v4 = vsub.f32 1.5, %v2824_v15  ;;  %v9205_v53 = vadd.f32 %v9079_v0, %v3145_v59  ;;  %v9210_v49 = vadd.f32 1e-05, %v2732_v45 }
 0x37c   : >> { %v9190_v29 = vpop.eup %6163  ;;  %v2985_v35 = vsub.f32 1.5, %v2984_v52  ;;  %v2834_v63 = vmul.f32 0.5, %v2833_v18  ;;  %v9208_v21 = vadd.f32 %v9079_v0, %v3161_v36  ;;  %vm2988_vm2 = vweird.f32 %v9136_v62  ;;  %v12409_v52 = vld [vmem:[#allocation91_spill] sm:$0xff] }
 0x37d   : >> { %v2992_v32 = vmul.f32 %v9190_v29, %v9129_v27  ;;  %v9214_v42 = vadd.f32 1e-05, %v2748_v6  ;;  %v3113_v37 = vmul.f32 %v2820_v11, %v12406_v30  ;;  %vm2837_vm3 = vweird.f32 %v9116_v22  ;;  %vm9238_vm6 = vmor %vm2987_vm7, %vm2988_vm2 }
 0x37e   : >> { %v2676_v39 = vpop.xlane.xlu1 %2675  ;;  %v2708_v38 = vpop.xlane.xlu0 %2707  ;;  %v2986_v48 = vmul.f32 %v9136_v62, %v2985_v35  ;;  %v12067_v1 = vmax.f32 %v9205_v53, 0.0  ;;  %v12066_v15 = vmax.f32 %v9208_v21, 0.0  ;;  %6165 = vrsqrt.f32 %v9210_v49 }
 0x37f   : >> { %v2993_v31 = vmul.f32 %v9190_v29, %v2992_v32  ;;  %v2678_v50 = vpop.xlane.xlu2 %2677  ;;  %v2835_v24 = vsub.f32 1.5, %v2834_v63  ;;  %vm2838_vm5 = vweird.f32 %v9165_v23  ;;  %6167 = vrsqrt.f32 %v9214_v42 }
 0x380   : >> { %v2826_v55 = vmul.f32 %v9125_v8, %v2825_v4  ;;  %3247 = vadd.xlane.f32.xlu1 %v12067_v1  ;;  %v3146_v9 = vmul.f32 %v9077_v41, %v3113_v37  ;;  %v2980_v43 = vsel %vm2979_vm4, %v9093_v17, %v2976_v2  ;;  %v2749_v58 = vmul.f32 %v2708_v38, %v8135_v13  ;;  %vm9298_vm15 = vmor %vm2837_vm3, %vm2838_vm5 }
 0x381   : >> { %v2994_v44 = vmul.f32 0.5, %v2993_v31  ;;  %v3129_v59 = vmul.f32 %v2980_v43, %v12409_v52  ;;  %v2733_v45 = vmul.f32 %v2676_v39, %v8135_v13  ;;  %v2734_v18 = vmul.f32 %v2678_v50, %v8135_v13  ;;  %3279 = vadd.xlane.f32.xlu0 %v12066_v15  ;;  %v12412_v39 = vld [vmem:[#allocation47_spill] sm:$0xff] }
 0x382   : >> { %vm2998_vm10 = vweird.f32 %v9190_v29  ;;  %v9249_v17 = vadd.f32 %v9079_v0, %v3146_v9  ;;  %v9251_v20 = vadd.f32 1e-05, %v2749_v58  ;;  %v2990_v36 = vsel %vm9238_vm6, %v9136_v62, %v2986_v48  ;;  %v12417_v9 = vld [vmem:[#allocation46_spill] sm:$0xff] }
 0x383   : >> { %v2995_v33 = vsub.f32 1.5, %v2994_v44  ;;  %v2836_v11 = vmul.f32 %v9165_v23, %v2835_v24  ;;  %v3162_v2 = vmul.f32 %v9077_v41, %v3129_v59  ;;  %v9266_v4 = vadd.f32 1e-05, %v2733_v45 }
 0x384   : >> { %v9268_v35 = vadd.f32 1e-05, %v2734_v18  ;;  %v9270_v32 = vpop.eup %6165  ;;  %v12065_v62 = vmax.f32 %v9249_v17, 0.0  ;;  %6169 = vrsqrt.f32 %v9251_v20  ;;  %v3130_v54 = vmul.f32 %v2990_v36, %v12412_v39  ;;  %v12418_v39 = vld [vmem:[#allocation48_spill] sm:$0xff] }
 0x385   : >> { %v2830_v63 = vsel %vm9260_vm12, %v9125_v8, %v2826_v55  ;;  %v9278_v31 = vpop.eup %6167  ;;  %v2996_v30 = vmul.f32 %v9190_v29, %v2995_v33  ;;  %v2842_v37 = vmul.f32 %v9270_v32, %v9210_v49  ;;  %v9284_v38 = vadd.f32 %v9079_v0, %v3162_v2 }
 0x386   : >> { %6171 = vrsqrt.f32 %v9266_v4  ;;  %vm2997_vm9 = vweird.f32 %v9129_v27  ;;  %vm2847_vm13 = vweird.f32 %v9210_v49  ;;  %v3002_v8 = vmul.f32 %v9278_v31, %v9214_v42  ;;  %3249 = vadd.xlane.f32.xlu2 %v12065_v62 }
 0x387   : >> { %v2710_v48 = vpop.xlane.xlu1 %2709  ;;  %6173 = vrsqrt.f32 %v9268_v35  ;;  %v2843_v27 = vmul.f32 %v9270_v32, %v2842_v37  ;;  %vm3007_vm8 = vweird.f32 %v9214_v42  ;;  %v12063_v24 = vmax.f32 %v9284_v38, 0.0  ;;  %vm9308_vm11 = vmor %vm2997_vm9, %vm2998_vm10 }
 0x388   : >> { %v3163_v44 = vmul.f32 %v9077_v41, %v3130_v54  ;;  %v3003_v22 = vmul.f32 %v9278_v31, %v3002_v8  ;;  %v3114_v43 = vmul.f32 %v2830_v63, %v12417_v9  ;;  %v2750_v58 = vmul.f32 %v2710_v48, %v8135_v13  ;;  %v12419_v8 = vld [vmem:[#allocation49_spill] sm:$0xff] }
 0x389   : >> { %v2840_v14 = vsel %vm9298_vm15, %v9165_v23, %v2836_v11  ;;  %v2844_v33 = vmul.f32 0.5, %v2843_v27  ;;  %vm2848_vm7 = vweird.f32 %v9270_v32  ;;  %v3000_v59 = vsel %vm9308_vm11, %v9190_v29, %v2996_v30  ;;  %3281 = vadd.xlane.f32.xlu0 %v12063_v24 }
 0x38a   : >> { %v9320_v52 = vadd.f32 %v9079_v0, %v3163_v44  ;;  %v9325_v45 = vpop.eup %6169  ;;  %v3004_v18 = vmul.f32 0.5, %v3003_v22  ;;  %vm3008_vm14 = vweird.f32 %v9278_v31  ;;  %v3147_v23 = vmul.f32 %v9077_v41, %v3114_v43  ;;  %vm9359_vm2 = vmor %vm2847_vm13, %vm2848_vm7 }
 0x38b   : >> { %v9331_v36 = vadd.f32 1e-05, %v2750_v58  ;;  %v2845_v11 = vsub.f32 1.5, %v2844_v33  ;;  %v3012_v2 = vmul.f32 %v9325_v45, %v9251_v20  ;;  %v3115_v54 = vmul.f32 %v2840_v14, %v12418_v39  ;;  %vm3009_vm4 = vmor %vm3007_vm8, %vm3008_vm14 }
 0x38c   : >> { %v9333_v6 = vpop.eup %6171  ;;  %v12064_v29 = vmax.f32 %v9320_v52, 0.0  ;;  %v3005_v30 = vsub.f32 1.5, %v3004_v18  ;;  %v9344_v48 = vadd.f32 %v9079_v0, %v3147_v23  ;;  %v3131_v50 = vmul.f32 %v3000_v59, %v12419_v8 }
 0x38d   : >> { %v9339_v63 = vpop.eup %6173  ;;  %v2852_v37 = vmul.f32 %v9333_v6, %v9266_v4  ;;  %v2846_v27 = vmul.f32 %v9270_v32, %v2845_v11  ;;  %v3013_v44 = vmul.f32 %v9325_v45, %v3012_v2  ;;  %vm3017_vm0 = vweird.f32 %v9251_v20 }
 0x38e   : >> { %vm3018_vm1 = vweird.f32 %v9325_v45  ;;  %v2862_v55 = vmul.f32 %v9339_v63, %v9268_v35  ;;  %3283 = vadd.xlane.f32.xlu1 %v12064_v29  ;;  %v3006_v9 = vmul.f32 %v9278_v31, %v3005_v30  ;;  %vm2858_vm3 = vweird.f32 %v9333_v6 }
 0x38f   : >> { %v2853_v43 = vmul.f32 %v9333_v6, %v2852_v37  ;;  %6175 = vrsqrt.f32 %v9331_v36  ;;  %v3014_v58 = vmul.f32 0.5, %v3013_v44  ;;  %v12053_v14 = vmax.f32 %v9344_v48, 0.0  ;;  %v12422_v37 = vld [vmem:[#allocation51_spill] sm:$0xff]  ;;  %vm9412_vm10 = vmor %vm3017_vm0, %vm3018_vm1 }
 0x390   : >> { %v2863_v49 = vmul.f32 %v9339_v63, %v2862_v55  ;;  %v3148_v33 = vmul.f32 %v9077_v41, %v3115_v54  ;;  %v3164_v18 = vmul.f32 %v9077_v41, %v3131_v50  ;;  %v3010_v23 = vsel %vm3009_vm4, %v9278_v31, %v3006_v9  ;;  %v12423_v55 = vld [vmem:[#allocation50_spill] sm:$0xff] }
 0x391   : >> { %v2854_v59 = vmul.f32 0.5, %v2853_v43  ;;  %v2850_v11 = vsel %vm9359_vm2, %v9270_v32, %v2846_v27  ;;  %v3015_v2 = vsub.f32 1.5, %v3014_v58  ;;  %v3132_v8 = vmul.f32 %v3010_v23, %v12422_v37  ;;  %3251 = vadd.xlane.f32.xlu0 %v12053_v14 }
 0x392   : >> { %v2864_v39 = vmul.f32 0.5, %v2863_v49  ;;  %v9380_v30 = vadd.f32 %v9079_v0, %v3148_v33  ;;  %v9387_v31 = vadd.f32 %v9079_v0, %v3164_v18  ;;  %v3116_v32 = vmul.f32 %v2850_v11, %v12423_v55 }
 0x393   : >> { %v2855_v44 = vsub.f32 1.5, %v2854_v59  ;;  %v3016_v27 = vmul.f32 %v9325_v45, %v3015_v2  ;;  %v3165_v18 = vmul.f32 %v9077_v41, %v3132_v8  ;;  %vm2857_vm5 = vweird.f32 %v9266_v4 }
 0x394   : >> { %v2865_v22 = vsub.f32 1.5, %v2864_v39  ;;  %v12052_v9 = vmax.f32 %v9380_v30, 0.0  ;;  %v12050_v59 = vmax.f32 %v9387_v31, 0.0  ;;  %vm2868_vm6 = vweird.f32 %v9339_v63  ;;  %vm2859_vm12 = vmor %vm2857_vm5, %vm2858_vm3 }
 0x395   : >> { %v2680_v42 = vpop.xlane.xlu0 %2679  ;;  %v9393_v58 = vpop.eup %6175  ;;  %v2856_v49 = vmul.f32 %v9333_v6, %v2855_v44  ;;  %v3149_v37 = vmul.f32 %v9077_v41, %v3116_v32  ;;  %vm2867_vm9 = vweird.f32 %v9268_v35  ;;  %vm3027_vm8 = vweird.f32 %v9331_v36 }
 0x396   : >> { %v2735_v54 = vmul.f32 %v2680_v42, %v8135_v13  ;;  %v3022_v23 = vmul.f32 %v9393_v58, %v9331_v36  ;;  %3253 = vadd.xlane.f32.xlu1 %v12052_v9  ;;  %v2866_v4 = vmul.f32 %v9339_v63, %v2865_v22  ;;  %3285 = vadd.xlane.f32.xlu2 %v12050_v59  ;;  %vm9440_vm13 = vmor %vm2867_vm9, %vm2868_vm6  ;;  %vm3028_vm15 = vweird.f32 %v9393_v58  ;;  %v12431_v9 = vld [vmem:[#allocation62_spill] sm:$0xff] }
 0x397   : >> { %v2712_v50 = vpop.xlane.xlu2 %2711  ;;  %v9421_v42 = vadd.f32 %v9079_v0, %v3165_v18  ;;  %v2860_v55 = vsel %vm2859_vm12, %v9333_v6, %v2856_v49  ;;  %v12428_v18 = vld [vmem:[#allocation52_spill] sm:$0xff]  ;;  %vm3029_vm11 = vmor %vm3027_vm8, %vm3028_vm15  ;;  %v12439_v26 = vmax.f32 %v9162_v51, 0.0 }
 0x398   : >> { %v2751_v43 = vmul.f32 %v2712_v50, %v8135_v13  ;;  %v9396_v33 = vadd.f32 1e-05, %v2735_v54  ;;  %v3023_v20 = vmul.f32 %v9393_v58, %v3022_v23  ;;  %v9432_v54 = vadd.f32 %v9079_v0, %v3149_v37 }
 0x399   : >> { %v12049_v44 = vmax.f32 %v9421_v42, 0.0  ;;  %v3020_v50 = vsel %vm9412_vm10, %v9325_v45, %v3016_v27  ;;  %v2870_v27 = vsel %vm9440_vm13, %v9339_v63, %v2866_v4 }
 0x39a   : >> { %v9406_v11 = vadd.f32 1e-05, %v2751_v43  ;;  %6177 = vrsqrt.f32 %v9396_v33  ;;  %v3024_v32 = vmul.f32 0.5, %v3023_v20  ;;  %v3133_v23 = vmul.f32 %v3020_v50, %v12428_v18 }
 0x39b   : >> { %3287 = vadd.xlane.f32.xlu0 %v12049_v44  ;;  %v12051_v45 = vmax.f32 %v9432_v54, 0.0  ;;  %vm2877_vm14 = vweird.f32 %v9396_v33 }
 0x39c   : >> { %v2682_v39 = vpop.xlane.xlu1 %2681  ;;  %6179 = vrsqrt.f32 %v9406_v11  ;;  %v3025_v49 = vsub.f32 1.5, %v3024_v32  ;;  %v3166_v2 = vmul.f32 %v9077_v41, %v3133_v23  ;;  %vm3037_vm2 = vweird.f32 %v9406_v11 }
 0x39d   : >> { %v2736_v8 = vmul.f32 %v2682_v39, %v8135_v13  ;;  %v12429_v39 = vld [vmem:[#allocation53_spill] sm:$0xff] }
 0x39e   : >> { %v3117_v37 = vmul.f32 %v2860_v55, %v12429_v39  ;;  %v12430_v55 = vld [vmem:[#allocation54_spill] sm:$0xff]  ;;  %v9467_v4 = vadd.f32 %v9079_v0, %v3166_v2  ;;  %3255 = vadd.xlane.f32.xlu2 %v12051_v45 }
 0x39f   : >> { %v9444_v22 = vadd.f32 1e-05, %v2736_v8  ;;  %v2714_v43 = vpop.xlane.xlu0 %2713  ;;  %v3118_v18 = vmul.f32 %v2870_v27, %v12430_v55 }
 0x3a0   : >> { %v2752_v6 = vmul.f32 %v2714_v43, %v8135_v13  ;;  %v6178_v20 = vpop.eup %6177  ;;  %v3150_v50 = vmul.f32 %v9077_v41, %v3117_v37  ;;  %v3026_v43 = vmul.f32 %v9393_v58, %v3025_v49  ;;  %v12054_v37 = vmax.f32 %v9467_v4, 0.0 }
 0x3a1   : >> { %6181 = vrsqrt.f32 %v9444_v22  ;;  %v2872_v63 = vmul.f32 %v6178_v20, %v9396_v33  ;;  %v3151_v49 = vmul.f32 %v9077_v41, %v3118_v18  ;;  %vm2878_vm7 = vweird.f32 %v6178_v20 }
 0x3a2   : >> { %v9458_v8 = vadd.f32 1e-05, %v2752_v6  ;;  %v9462_v39 = vpop.eup %6179  ;;  %v9477_v6 = vadd.f32 %v9079_v0, %v3150_v50  ;;  %v3030_v2 = vsel %vm3029_vm11, %v9393_v58, %v3026_v43  ;;  %vm2879_vm0 = vmor %vm2877_vm14, %vm2878_vm7  ;;  %vm2887_vm5 = vweird.f32 %v9444_v22 }
 0x3a3   : >> { %v3032_v35 = vmul.f32 %v9462_v39, %v9406_v11  ;;  %v2873_v23 = vmul.f32 %v6178_v20, %v2872_v63  ;;  %3289 = vadd.xlane.f32.xlu0 %v12054_v37  ;;  %v3134_v14 = vmul.f32 %v3030_v2, %v12431_v9  ;;  %v9491_v58 = vadd.f32 %v9079_v0, %v3151_v49  ;;  %v12434_v37 = vld [vmem:[#allocation67_spill] sm:$0xff] }
 0x3a4   : >> { %6183 = vrsqrt.f32 %v9458_v8  ;;  %v12055_v59 = vmax.f32 %v9477_v6, 0.0  ;;  %vm3038_vm1 = vweird.f32 %v9462_v39  ;;  %vm3047_vm12 = vweird.f32 %v9458_v8 }
 0x3a5   : >> { %v2716_v32 = vpop.xlane.xlu2 %2715  ;;  %v3033_v27 = vmul.f32 %v9462_v39, %v3032_v35  ;;  %v2874_v44 = vmul.f32 0.5, %v2873_v23  ;;  %v3167_v49 = vmul.f32 %v9077_v41, %v3134_v14  ;;  %vm9505_vm3 = vmor %vm3037_vm2, %vm3038_vm1 }
 0x3a6   : >> { %v2753_v36 = vmul.f32 %v2716_v32, %v8135_v13  ;;  %3257 = vadd.xlane.f32.xlu1 %v12055_v59 }
 0x3a7   : >> { %v6182_v55 = vpop.eup %6181  ;;  %v3034_v45 = vmul.f32 0.5, %v3033_v27  ;;  %v2875_v35 = vsub.f32 1.5, %v2874_v44 }
 0x3a8   : >> { %v2882_v63 = vmul.f32 %v6182_v55, %v9444_v22  ;;  %v2785_v50 = vadd.f32 1e-05, %v2753_v36  ;;  %v12061_v36 = vmax.f32 %v9491_v58, 0.0  ;;  %vm2888_vm4 = vweird.f32 %v6182_v55 }
 0x3a9   : >> { %v3035_v43 = vsub.f32 1.5, %v3034_v45  ;;  %v2876_v23 = vmul.f32 %v6178_v20, %v2875_v35  ;;  %vm2889_vm10 = vmor %vm2887_vm5, %vm2888_vm4 }
 0x3aa   : >> { %v6184_v18 = vpop.eup %6183  ;;  %v2883_v32 = vmul.f32 %v6182_v55, %v2882_v63  ;;  %6185 = vrsqrt.f32 %v2785_v50  ;;  %3259 = vadd.xlane.f32.xlu2 %v12061_v36  ;;  %v9503_v63 = vadd.f32 %v9079_v0, %v3167_v49  ;;  %vm3057_vm15 = vweird.f32 %v2785_v50 }
 0x3ab   : >> { %v3042_v27 = vmul.f32 %v6184_v18, %v9458_v8  ;;  %v3036_v9 = vmul.f32 %v9462_v39, %v3035_v43  ;;  %v2880_v45 = vsel %vm2879_vm0, %v6178_v20, %v2876_v23  ;;  %vm3048_vm6 = vweird.f32 %v6184_v18 }
 0x3ac   : >> { %v2884_v44 = vmul.f32 0.5, %v2883_v32  ;;  %v3119_v32 = vmul.f32 %v2880_v45, %v12434_v37  ;;  %vm9520_vm9 = vmor %vm3047_vm12, %vm3048_vm6 }
 0x3ad   : >> { %v3043_v2 = vmul.f32 %v6184_v18, %v3042_v27  ;;  %v12062_v27 = vmax.f32 %v9503_v63, 0.0  ;;  %v3040_v11 = vsel %vm9505_vm3, %v9462_v39, %v3036_v9 }
 0x3ae   : >> { %v2885_v33 = vsub.f32 1.5, %v2884_v44  ;;  %v3152_v49 = vmul.f32 %v9077_v41, %v3119_v32 }
 0x3af   : >> { %v3044_v43 = vmul.f32 0.5, %v3043_v2  ;;  %3291 = vadd.xlane.f32.xlu1 %v12062_v27  ;;  %v12435_v2 = vld [vmem:[#allocation60_spill] sm:$0xff] }
 0x3b0   : >> { %v6186_v59 = vpop.eup %6185  ;;  %v2886_v14 = vmul.f32 %v6182_v55, %v2885_v33  ;;  %v3135_v45 = vmul.f32 %v3040_v11, %v12435_v2  ;;  %v9525_v22 = vadd.f32 %v9079_v0, %v3152_v49 }
 0x3b1   : >> { %v3045_v20 = vsub.f32 1.5, %v3044_v43  ;;  %v3052_v23 = vmul.f32 %v6186_v59, %v2785_v50  ;;  %v12438_v43 = vld [vmem:[#allocation66_spill] sm:$0xff]  ;;  %vm3058_vm13 = vweird.f32 %v6186_v59 }
 0x3b2   : >> { %v2890_v33 = vsel %vm2889_vm10, %v6182_v55, %v2886_v14  ;;  %v3168_v35 = vmul.f32 %v9077_v41, %v3135_v45  ;;  %v12060_v8 = vmax.f32 %v9525_v22, 0.0  ;;  %vm3059_vm8 = vmor %vm3057_vm15, %vm3058_vm13 }
 0x3b3   : >> { %v3046_v44 = vmul.f32 %v6184_v18, %v3045_v20  ;;  %v3053_v37 = vmul.f32 %v6186_v59, %v3052_v23  ;;  %v3120_v20 = vmul.f32 %v2890_v33, %v12438_v43 }
 0x3b4   : >> { %v9533_v55 = vadd.f32 %v9079_v0, %v3168_v35  ;;  %3261 = vadd.xlane.f32.xlu0 %v12060_v8  ;;  %v2718_v35 = vpop.xlane.xlu0 %2717 }
 0x3b5   : >> { %v3054_v9 = vmul.f32 0.5, %v3053_v37  ;;  %v3050_v32 = vsel %vm9520_vm9, %v6184_v18, %v3046_v44  ;;  %v3153_v14 = vmul.f32 %v9077_v41, %v3120_v20  ;;  %v2754_v43 = vmul.f32 %v2718_v35, %v8135_v13 }
 0x3b6   : >> { %v12058_v37 = vmax.f32 %v9533_v55, 0.0  ;;  %v3136_v18 = vmul.f32 %v3050_v32, %v8728_v12  ;;  %v2686_v32 = vpop.xlane.xlu2 %2685 }
 0x3b7   : >> { %v3055_v11 = vsub.f32 1.5, %v3054_v9  ;;  %v9540_v49 = vadd.f32 %v9079_v0, %v3153_v14  ;;  %v2738_v14 = vmul.f32 %v2686_v32, %v8135_v13 }
 0x3b8   : >> { %3293 = vadd.xlane.f32.xlu2 %v12058_v37  ;;  %v3169_v45 = vmul.f32 %v9077_v41, %v3136_v18 }
 0x3b9   : >> { %v3056_v23 = vmul.f32 %v6186_v59, %v3055_v11  ;;  %v12057_v2 = vmax.f32 %v9540_v49, 0.0  ;;  %v2786_v11 = vadd.f32 1e-05, %v2754_v43  ;;  %v2770_v18 = vadd.f32 1e-05, %v2738_v14 }
 0x3ba   : >> { %v9551_v33 = vadd.f32 %v9079_v0, %v3169_v45 }
 0x3bb   : >> { %v3060_v44 = vsel %vm3059_vm8, %v6186_v59, %v3056_v23  ;;  %3263 = vadd.xlane.f32.xlu1 %v12057_v2  ;;  %6187 = vrsqrt.f32 %v2786_v11  ;;  %vm3067_vm7 = vweird.f32 %v2786_v11  ;;  %vm2907_vm2 = vweird.f32 %v2770_v18 }
 0x3bc   : >> { %v3137_v50 = vmul.f32 %v3060_v44, %v8780_v10  ;;  %v12059_v12 = vmax.f32 %v9551_v33, 0.0  ;;  %v2684_v10 = vpop.xlane.xlu1 %2683  ;;  %6189 = vrsqrt.f32 %v2770_v18 }
 0x3bd   : >> { %v2737_v23 = vmul.f32 %v2684_v10, %v8135_v13 }
 0x3be   : >> { %v3170_v39 = vmul.f32 %v9077_v41, %v3137_v50  ;;  %3295 = vadd.xlane.f32.xlu0 %v12059_v12 }
 0x3bf   : >> { %v2769_v45 = vadd.f32 1e-05, %v2737_v23 }
 0x3c0   : >> { %v9556_v9 = vadd.f32 %v9079_v0, %v3170_v39  ;;  %v2688_v39 = vpop.xlane.xlu0 %2687 }
 0x3c1   : >> { %v6188_v50 = vpop.eup %6187  ;;  %6191 = vrsqrt.f32 %v2769_v45  ;;  %v2722_v2 = vpop.xlane.xlu2 %2721  ;;  %vm2897_vm4 = vweird.f32 %v2769_v45 }
 0x3c2   : >> { %v12056_v59 = vmax.f32 %v9556_v9, 0.0  ;;  %v9568_v37 = vpop.eup %6189  ;;  %v2756_v27 = vmul.f32 %v2722_v2, %v8135_v13  ;;  %vm3068_vm11 = vweird.f32 %v6188_v50 }
 0x3c3   : >> { %v2902_v10 = vmul.f32 %v9568_v37, %v2770_v18  ;;  %vm9592_vm14 = vmor %vm3067_vm7, %vm3068_vm11  ;;  %vm2908_vm0 = vweird.f32 %v9568_v37 }
 0x3c4   : >> { %3297 = vadd.xlane.f32.xlu1 %v12056_v59  ;;  %v2720_v20 = vpop.xlane.xlu1 %2719  ;;  %v3062_v59 = vmul.f32 %v6188_v50, %v2786_v11  ;;  %v9585_v1 = vadd.f32 1e-05, %v2756_v27  ;;  %vm9622_vm3 = vmor %vm2907_vm2, %vm2908_vm0 }
 0x3c5   : >> { %v2903_v36 = vmul.f32 %v9568_v37, %v2902_v10 }
 0x3c6   : >> { %v3063_v35 = vmul.f32 %v6188_v50, %v3062_v59  ;;  %6193 = vrsqrt.f32 %v9585_v1  ;;  %vm3087_vm10 = vweird.f32 %v9585_v1 }
 0x3c7   : >> { %v9572_v43 = vpop.eup %6191  ;;  %v2904_v62 = vmul.f32 0.5, %v2903_v36  ;;  %v2739_v36 = vmul.f32 %v2688_v39, %v8135_v13 }
 0x3c8   : >> { %v2892_v14 = vmul.f32 %v9572_v43, %v2769_v45  ;;  %v3064_v23 = vmul.f32 0.5, %v3063_v35  ;;  %vm2898_vm1 = vweird.f32 %v9572_v43 }
 0x3c9   : >> { %v9578_v8 = vpop.xlane.xlu2 %2693  ;;  %v2905_v2 = vsub.f32 1.5, %v2904_v62  ;;  %v9607_v39 = vadd.f32 1e-05, %v2739_v36  ;;  %vm9634_vm5 = vmor %vm2897_vm4, %vm2898_vm1 }
 0x3ca   : >> { %v2893_v24 = vmul.f32 %v9572_v43, %v2892_v14  ;;  %v3065_v59 = vsub.f32 1.5, %v3064_v23 }
 0x3cb   : >> { %v2906_v62 = vmul.f32 %v9568_v37, %v2905_v2  ;;  %6195 = vrsqrt.f32 %v9607_v39  ;;  %vm2917_vm13 = vweird.f32 %v9607_v39 }
 0x3cc   : >> { %v9566_v44 = vpop.xlane.xlu1 %2689  ;;  %v2894_v25 = vmul.f32 0.5, %v2893_v24  ;;  %v3066_v57 = vmul.f32 %v6188_v50, %v3065_v59  ;;  %v12442_v59 = vmax.f32 %v9140_v5, 0.0 }
 0x3ce   : >> { %v9575_v32 = vpop.xlane.xlu0 %2723  ;;  %v2895_v27 = vsub.f32 1.5, %v2894_v25  ;;  %v12443_v25 = vmax.f32 %v9205_v53, 0.0 }
 0x3d4   : >> { %v9570_v12 = vpop.xlane.xlu1 %2691 }
 0x3dc   : >> { %v9583_v29 = vpop.xlane.xlu1 %2725 }
 0x3eb   : >> { %v3278_v35 = vpop.xlane.xlu2 %3277 }
 0x3ec   : >> { %v3246_v15 = vpop.xlane.xlu0 %3245 }
 0x3ed   : >> { %v3309_v60 = vmul.f32 %v3246_v15, %v8135_v13  ;;  %v3325_v15 = vmul.f32 %v3278_v35, %v8135_v13 }
 0x3ef   : >> { %v9590_v10 = vsub.f32 %v12439_v26, %v3309_v60  ;;  %v3070_v26 = vsel %vm9592_vm14, %v6188_v50, %v3066_v57  ;;  %v2755_v60 = vmul.f32 %v2720_v20, %v8135_v13  ;;  %v9611_v35 = vsub.f32 %v12442_v59, %v3325_v15  ;;  %v9620_v50 = vpop.eup %6193 }
 0x3f0   : >> { %v3138_v57 = vmul.f32 %v3070_v26, %v8830_v7  ;;  %v2896_v20 = vmul.f32 %v9572_v43, %v2895_v27  ;;  %v2910_v15 = vsel %vm9622_vm3, %v9568_v37, %v2906_v62  ;;  %v3082_v45 = vmul.f32 %v9620_v50, %v9585_v1  ;;  %v9667_v2 = vpop.eup %6195 }
 0x3f1   : >> { %v3373_v24 = vmul.f32 %v9590_v10, %v9590_v10  ;;  %v9626_v5 = vadd.f32 1e-05, %v2755_v60  ;;  %v12448_v26 = vmax.f32 %v9208_v21, 0.0  ;;  %v2912_v18 = vmul.f32 %v9667_v2, %v9607_v39 }
 0x3f2   : >> { %v2900_v37 = vsel %vm9634_vm5, %v9572_v43, %v2896_v20  ;;  %v3083_v20 = vmul.f32 %v9620_v50, %v3082_v45  ;;  %v2758_v45 = vmul.f32 %v9583_v29, %v8135_v13  ;;  %vm3088_vm6 = vweird.f32 %v9620_v50 }
 0x3f3   : >> { %v3248_v23 = vpop.xlane.xlu1 %3247  ;;  %3405 = vadd.xlane.f32.xlu2 %v3373_v24  ;;  %v3389_v24 = vmul.f32 %v9611_v35, %v9611_v35  ;;  %6197 = vrsqrt.f32 %v9626_v5  ;;  %v3121_v21 = vmul.f32 %v2900_v37, %v8737_v3  ;;  %v2913_v29 = vmul.f32 %v9667_v2, %v2912_v18  ;;  %vm9726_vm12 = vmor %vm3087_vm10, %vm3088_vm6 }
 0x3f4   : >> { %v3310_v51 = vmul.f32 %v3248_v23, %v8135_v13  ;;  %v3280_v11 = vpop.xlane.xlu0 %3279  ;;  %v3171_v23 = vmul.f32 %v9077_v41, %v3138_v57  ;;  %vm2918_vm9 = vweird.f32 %v9667_v2  ;;  %vm3077_vm11 = vweird.f32 %v9626_v5 }
 0x3f5   : >> { %v3326_v36 = vmul.f32 %v3280_v11, %v8135_v13  ;;  %v3122_v11 = vmul.f32 %v2910_v15, %v8834_v46  ;;  %v3154_v3 = vmul.f32 %v9077_v41, %v3121_v21  ;;  %v9703_v21 = vadd.f32 1e-05, %v2758_v45  ;;  %vm9772_vm8 = vmor %vm2917_vm13, %vm2918_vm9 }
 0x3f6   : >> { %v9615_v14 = vsub.f32 %v12443_v25, %v3310_v51  ;;  %v12449_v51 = vmax.f32 %v9249_v17, 0.0  ;;  %v2740_v25 = vmul.f32 %v9566_v44, %v8135_v13  ;;  %v9661_v57 = vadd.f32 %v9079_v0, %v3171_v23 }
 0x3f7   : >> { %v9651_v60 = vsub.f32 %v12448_v26, %v3326_v36  ;;  %v3155_v36 = vmul.f32 %v9077_v41, %v3122_v11  ;;  %v9700_v11 = vadd.f32 %v9079_v0, %v3154_v3  ;;  %v2914_v18 = vmul.f32 0.5, %v2913_v29 }
 0x3f8   : >> { %v3374_v53 = vmul.f32 %v9615_v14, %v9615_v14  ;;  %v3236_v15 = vmax.f32 %v9661_v57, 0.0  ;;  %v12454_v29 = vmax.f32 %v9344_v48, 0.0  ;;  %vm3107_vm4 = vweird.f32 %v9703_v21 }
 0x3f9   : >> { %v3250_v7 = vpop.xlane.xlu2 %3249  ;;  %v3390_v46 = vmul.f32 %v9651_v60, %v9651_v60  ;;  %v9690_v37 = vadd.f32 %v9079_v0, %v3155_v36  ;;  %v12072_v3 = vmax.f32 %v9700_v11, 0.0 }
 0x3fa   : >> { %3407 = vadd.xlane.f32.xlu0 %v3374_v53  ;;  %v3311_v27 = vmul.f32 %v3250_v7, %v8135_v13  ;;  %v9673_v53 = vpop.eup %6197  ;;  %v9675_v7 = vadd.f32 1e-05, %v2740_v25 }
 0x3fb   : >> { %3437 = vadd.xlane.f32.xlu2 %v3389_v24  ;;  %v3084_v24 = vmul.f32 0.5, %v3083_v20  ;;  %v3072_v26 = vmul.f32 %v9673_v53, %v9626_v5  ;;  %vm3078_vm15 = vweird.f32 %v9673_v53 }
 0x3fc   : >> { %v9655_v62 = vsub.f32 %v12449_v51, %v3311_v27  ;;  %v3282_v59 = vpop.xlane.xlu0 %3281  ;;  %v12450_v27 = vmax.f32 %v9320_v52, 0.0  ;;  %6199 = vrsqrt.f32 %v9675_v7  ;;  %v2757_v52 = vmul.f32 %v9575_v32, %v8135_v13  ;;  %vm9791_vm7 = vmor %vm3077_vm11, %vm3078_vm15 }
 0x3fd   : >> { %v3085_v25 = vsub.f32 1.5, %v3084_v24  ;;  %v3327_v20 = vmul.f32 %v3282_v59, %v8135_v13  ;;  %6201 = vrsqrt.f32 %v9703_v21  ;;  %vm2927_vm0 = vweird.f32 %v9675_v7 }
 0x3fe   : >> { %v3375_v43 = vmul.f32 %v9655_v62, %v9655_v62 }
 0x3ff   : >> { %v3086_v24 = vmul.f32 %v9620_v50, %v3085_v25 }
 0x400   : >> { %3409 = vadd.xlane.f32.xlu1 %v3375_v43 }
 0x401   : >> { %v3284_v17 = vpop.xlane.xlu1 %3283 }
 0x402   : >> { %v3328_v44 = vmul.f32 %v3284_v17, %v8135_v13  ;;  %3439 = vadd.xlane.f32.xlu0 %v3390_v46  ;;  %v12073_v46 = vmax.f32 %v9690_v37, 0.0  ;;  %v3073_v17 = vmul.f32 %v9673_v53, %v3072_v26  ;;  %v9716_v59 = vpop.eup %6199 }
 0x403   : >> { %3299 = vadd.xlane.f32.xlu2 %v3236_v15  ;;  %vm2928_vm14 = vweird.f32 %v9716_v59 }
 0x404   : >> { %v9683_v23 = vsub.f32 %v12450_v27, %v3328_v44  ;;  %v3252_v43 = vpop.xlane.xlu0 %3251  ;;  %v9708_v44 = vadd.f32 1e-05, %v2757_v52  ;;  %v12451_v27 = vmax.f32 %v9284_v38, 0.0  ;;  %v3074_v26 = vmul.f32 0.5, %v3073_v17  ;;  %vm9840_vm1 = vmor %vm2927_vm0, %vm2928_vm14 }
 0x405   : >> { %v3312_v32 = vmul.f32 %v3252_v43, %v8135_v13  ;;  %v2915_v38 = vsub.f32 1.5, %v2914_v18  ;;  %v2922_v43 = vmul.f32 %v9716_v59, %v9675_v7  ;;  %v2741_v52 = vmul.f32 %v9570_v12, %v8135_v13 }
 0x406   : >> { %v3392_v51 = vmul.f32 %v9683_v23, %v9683_v23  ;;  %v9721_v45 = vsub.f32 %v12451_v27, %v3327_v20  ;;  %6203 = vrsqrt.f32 %v9708_v44  ;;  %v3090_v20 = vsel %vm9726_vm12, %v9620_v50, %v3086_v24 }
 0x407   : >> { %v9733_v25 = vsub.f32 %v12454_v29, %v3312_v32  ;;  %v3075_v27 = vsub.f32 1.5, %v3074_v26  ;;  %v9745_v32 = vpop.eup %6201  ;;  %v3140_v24 = vmul.f32 %v3090_v20, %v8961_v34  ;;  %v2923_v26 = vmul.f32 %v9716_v59, %v2922_v43 }
 0x408   : >> { %3443 = vadd.xlane.f32.xlu1 %v3392_v51  ;;  %v3391_v17 = vmul.f32 %v9721_v45, %v9721_v45  ;;  %vm3108_vm2 = vweird.f32 %v9745_v32  ;;  %vm3097_vm6 = vweird.f32 %v9708_v44 }
 0x409   : >> { %v3286_v36 = vpop.xlane.xlu2 %3285  ;;  %v3254_v51 = vpop.xlane.xlu1 %3253  ;;  %v3376_v29 = vmul.f32 %v9733_v25, %v9733_v25  ;;  %v3076_v34 = vmul.f32 %v9673_v53, %v3075_v27  ;;  %v3173_v27 = vmul.f32 %v9077_v41, %v3140_v24  ;;  %vm9870_vm5 = vmor %vm3107_vm4, %vm3108_vm2 }
 0x40a   : >> { %3267 = vadd.xlane.f32.xlu0 %v12073_v46  ;;  %v3313_v1 = vmul.f32 %v3254_v51, %v8135_v13  ;;  %v3329_v18 = vmul.f32 %v3286_v36, %v8135_v13  ;;  %v2916_v51 = vmul.f32 %v9667_v2, %v2915_v38  ;;  %v12455_v36 = vmax.f32 %v9380_v30, 0.0 }
 0x40b   : >> { %3265 = vadd.xlane.f32.xlu2 %v12072_v3  ;;  %v2742_v3 = vmul.f32 %v9578_v8, %v8135_v13  ;;  %v3102_v38 = vmul.f32 %v9745_v32, %v9703_v21 }
 0x40c   : >> { %v9755_v8 = vpop.eup %6203  ;;  %v9761_v46 = vsub.f32 %v12455_v36, %v3313_v1 }
 0x40d   : >> { %v9776_v30 = vadd.f32 1e-05, %v2742_v3  ;;  %v2920_v3 = vsel %vm9772_vm8, %v9667_v2, %v2916_v51  ;;  %v3080_v2 = vsel %vm9791_vm7, %v9673_v53, %v3076_v34  ;;  %v12465_v53 = vmax.f32 %v9477_v6, 0.0 }
 0x40e   : >> { %v3288_v43 = vpop.xlane.xlu0 %3287  ;;  %v3377_v5 = vmul.f32 %v9761_v46, %v9761_v46  ;;  %vm3098_vm3 = vweird.f32 %v9755_v8 }
 0x40f   : >> { %v3330_v36 = vmul.f32 %v3288_v43, %v8135_v13  ;;  %6205 = vrsqrt.f32 %v9776_v30  ;;  %vm3099_vm10 = vmor %vm3097_vm6, %vm3098_vm3  ;;  %vm2947_vm13 = vweird.f32 %v9776_v30 }
 0x411   : >> { %v3256_v48 = vpop.xlane.xlu2 %3255 }
 0x412   : >> { %3441 = vadd.xlane.f32.xlu0 %v3391_v17  ;;  %v3314_v50 = vmul.f32 %v3256_v48, %v8135_v13  ;;  %v12456_v17 = vmax.f32 %v9432_v54, 0.0  ;;  %v12459_v54 = vmax.f32 %v9387_v31, 0.0 }
 0x413   : >> { %3411 = vadd.xlane.f32.xlu2 %v3376_v29  ;;  %v2924_v29 = vmul.f32 0.5, %v2923_v26  ;;  %v3103_v26 = vmul.f32 %v9745_v32, %v3102_v38  ;;  %v12463_v38 = vmax.f32 %v9421_v42, 0.0 }
 0x414   : >> { %v9765_v48 = vsub.f32 %v12456_v17, %v3314_v50  ;;  %v9780_v20 = vsub.f32 %v12459_v54, %v3329_v18  ;;  %v3092_v50 = vmul.f32 %v9755_v8, %v9708_v44  ;;  %v9795_v18 = vadd.f32 1e-05, %v2741_v52 }
 0x415   : >> { %v9809_v52 = vadd.f32 %v9079_v0, %v3173_v27  ;;  %v3123_v17 = vmul.f32 %v2920_v3, %v8905_v47  ;;  %v2925_v43 = vsub.f32 1.5, %v2924_v29  ;;  %v9816_v54 = vsub.f32 %v12463_v38, %v3330_v36  ;;  %v9827_v3 = vpop.eup %6205 }
 0x416   : >> { %12460 = vst [vmem:[#allocation79_spill] sm:$0xff] %v9780_v20  ;;  %v3378_v39 = vmul.f32 %v9765_v48, %v9765_v48  ;;  %v3393_v51 = vmul.f32 %v9780_v20, %v9780_v20  ;;  %v3093_v12 = vmul.f32 %v9755_v8, %v3092_v50  ;;  %6207 = vrsqrt.f32 %v9795_v18 }
 0x417   : >> { %12464 = vst [vmem:[#allocation57_spill] sm:$0xff] %v9816_v54  ;;  %v3238_v27 = vmax.f32 %v9809_v52, 0.0  ;;  %v3156_v47 = vmul.f32 %v9077_v41, %v3123_v17  ;;  %v2926_v29 = vmul.f32 %v9716_v59, %v2925_v43  ;;  %v3394_v6 = vmul.f32 %v9816_v54, %v9816_v54  ;;  %v3290_v43 = vpop.xlane.xlu0 %3289 }
 0x418   : >> { %3415 = vadd.xlane.f32.xlu1 %v3378_v39  ;;  %v3139_v39 = vmul.f32 %v3080_v2, %v8921_v28  ;;  %v3094_v50 = vmul.f32 0.5, %v3093_v12  ;;  %v12469_v12 = vmax.f32 %v9503_v63, 0.0  ;;  %v12475_v44 = vmax.f32 %v9491_v58, 0.0 }
 0x419   : >> { %v3258_v1 = vpop.xlane.xlu1 %3257  ;;  %v9845_v2 = vadd.f32 %v9079_v0, %v3156_v47  ;;  %v2930_v7 = vsel %vm9840_vm1, %v9716_v59, %v2926_v29  ;;  %vm2948_vm12 = vweird.f32 %v9827_v3  ;;  %vm2937_vm8 = vweird.f32 %v9795_v18 }
 0x41a   : >> { %v3315_v24 = vmul.f32 %v3258_v1, %v8135_v13  ;;  %3413 = vadd.xlane.f32.xlu0 %v3377_v5  ;;  %v3104_v1 = vmul.f32 0.5, %v3103_v26  ;;  %v3172_v36 = vmul.f32 %v9077_v41, %v3139_v39  ;;  %v3095_v17 = vsub.f32 1.5, %v3094_v50  ;;  %vm9924_vm15 = vmor %vm2947_vm13, %vm2948_vm12 }
 0x41b   : >> { %3445 = vadd.xlane.f32.xlu2 %v3393_v51  ;;  %v2942_v51 = vmul.f32 %v9827_v3, %v9776_v30  ;;  %v3331_v50 = vmul.f32 %v3290_v43, %v8135_v13  ;;  %v12080_v59 = vmax.f32 %v9845_v2, 0.0  ;;  %v3124_v29 = vmul.f32 %v2930_v7, %v8970_v16 }
 0x41c   : >> { %v9820_v34 = vsub.f32 %v12465_v53, %v3315_v24  ;;  %v3105_v5 = vsub.f32 1.5, %v3104_v1  ;;  %v9838_v24 = vpop.eup %6207  ;;  %v9857_v53 = vadd.f32 %v9079_v0, %v3172_v36 }
 0x41d   : >> { %v2932_v39 = vmul.f32 %v9838_v24, %v9795_v18  ;;  %v3260_v47 = vpop.xlane.xlu2 %3259  ;;  %v2943_v63 = vmul.f32 %v9827_v3, %v2942_v51  ;;  %v3157_v51 = vmul.f32 %v9077_v41, %v3124_v29  ;;  %vm2938_vm9 = vweird.f32 %v9838_v24 }
 0x41e   : >> { %12466 = vst [vmem:[#allocation94_spill] sm:$0xff] %v9820_v34  ;;  %v3379_v28 = vmul.f32 %v9820_v34, %v9820_v34  ;;  %v3106_v1 = vmul.f32 %v9745_v32, %v3105_v5  ;;  %v12473_v5 = vmax.f32 %v9467_v4, 0.0  ;;  %vm2939_vm11 = vmor %vm2937_vm8, %vm2938_vm9 }
 0x41f   : >> { %v2933_v36 = vmul.f32 %v9838_v24, %v2932_v39 }
 0x420   : >> { %3303 = vadd.xlane.f32.xlu1 %v3238_v27  ;;  %v3110_v21 = vsel %vm9870_vm5, %v9745_v32, %v3106_v1  ;;  %v9887_v26 = vsub.f32 %v12473_v5, %v3331_v50 }
 0x421   : >> { %v3142_v32 = vmul.f32 %v3110_v21, %v9022_v61  ;;  %v2934_v39 = vmul.f32 0.5, %v2933_v36  ;;  %v12477_v61 = vmax.f32 %v9525_v22, 0.0 }
 0x422   : >> { %v3292_v42 = vpop.xlane.xlu1 %3291  ;;  %3447 = vadd.xlane.f32.xlu0 %v3394_v6  ;;  %12474 = vst [vmem:[#allocation93_spill] sm:$0xff] %v9887_v26  ;;  %v3395_v1 = vmul.f32 %v9887_v26, %v9887_v26 }
 0x423   : >> { %v3332_v31 = vmul.f32 %v3292_v42, %v8135_v13  ;;  %3417 = vadd.xlane.f32.xlu2 %v3379_v28  ;;  %v3096_v42 = vmul.f32 %v9755_v8, %v3095_v17  ;;  %v3316_v28 = vmul.f32 %v3260_v47, %v8135_v13  ;;  %v2944_v17 = vmul.f32 0.5, %v2943_v63 }
 0x424   : >> { %v9902_v47 = vadd.f32 %v9079_v0, %v3157_v51  ;;  %v2935_v63 = vsub.f32 1.5, %v2934_v39 }
 0x425   : >> { %v9854_v38 = vsub.f32 %v12469_v12, %v3332_v31  ;;  %v12079_v31 = vmax.f32 %v9857_v53, 0.0  ;;  %v3100_v7 = vsel %vm3099_vm10, %v9755_v8, %v3096_v42  ;;  %v9895_v12 = vsub.f32 %v12475_v44, %v3316_v28 }
 0x426   : >> { %v3141_v50 = vmul.f32 %v3100_v7, %v9008_v40  ;;  %v2945_v29 = vsub.f32 1.5, %v2944_v17  ;;  %v3175_v8 = vmul.f32 %v9077_v41, %v3142_v32  ;;  %v12078_v6 = vmax.f32 %v9902_v47, 0.0 }
 0x427   : >> { %12470 = vst [vmem:[#allocation77_spill] sm:$0xff] %v9854_v38  ;;  %v3396_v16 = vmul.f32 %v9854_v38, %v9854_v38  ;;  %v3262_v43 = vpop.xlane.xlu0 %3261  ;;  %v3380_v58 = vmul.f32 %v9895_v12, %v9895_v12  ;;  %v2936_v22 = vmul.f32 %v9838_v24, %v2935_v63 }
 0x428   : >> { %3269 = vadd.xlane.f32.xlu1 %v12080_v59  ;;  %12476 = vst [vmem:[#allocation83_spill] sm:$0xff] %v9895_v12  ;;  %v3317_v4 = vmul.f32 %v3262_v43, %v8135_v13  ;;  %v3174_v28 = vmul.f32 %v9077_v41, %v3141_v50  ;;  %v9919_v36 = vadd.f32 %v9079_v0, %v3175_v8 }
 0x429   : >> { %v2940_v39 = vsel %vm2939_vm11, %v9838_v24, %v2936_v22  ;;  %v12487_v22 = vmax.f32 %v9556_v9, 0.0 }
 0x42a   : >> { %3301 = vadd.xlane.f32.xlu0 %v12079_v31  ;;  %v9910_v42 = vsub.f32 %v12477_v61, %v3317_v4  ;;  %v9932_v43 = vadd.f32 %v9079_v0, %v3174_v28  ;;  %v12077_v32 = vmax.f32 %v9919_v36, 0.0  ;;  %v3125_v24 = vmul.f32 %v2940_v39, %v8995_v19  ;;  %v5920_v39 = vld [vmem:[%s7134_s14 + $0x38] sm:$0xff] }
 0x42b   : >> { %3451 = vadd.xlane.f32.xlu2 %v3396_v16  ;;  %v2946_v16 = vmul.f32 %v9827_v3, %v2945_v29  ;;  %v3294_v21 = vpop.xlane.xlu2 %3293  ;;  %v12483_v29 = vmax.f32 %v9533_v55, 0.0  ;;  %4671 = vmatpush.bf16.msrb.mxu1 %v5920_v39 }
 0x42c   : >> { %12478 = vst [vmem:[#allocation82_spill] sm:$0xff] %v9910_v42  ;;  %v3381_v17 = vmul.f32 %v9910_v42, %v9910_v42  ;;  %v3333_v44 = vmul.f32 %v3294_v21, %v8135_v13  ;;  %v12076_v18 = vmax.f32 %v9932_v43, 0.0  ;;  %v3158_v55 = vmul.f32 %v9077_v41, %v3125_v24  ;;  %5932 = vmatpush.bf16.msrb.mxu3 %v5920_v39 }
 0x42d   : >> { %v2950_v30 = vsel %vm9924_vm15, %v9827_v3, %v2946_v16 }
 0x42e   : >> { %v3264_v7 = vpop.xlane.xlu1 %3263  ;;  %v3126_v3 = vmul.f32 %v2950_v30, %v8984_v56 }
 0x42f   : >> { %v3318_v4 = vmul.f32 %v3264_v7, %v8135_v13 }
 0x430   : >> { %3449 = vadd.xlane.f32.xlu1 %v3395_v1  ;;  %v12481_v1 = vmax.f32 %v9551_v33, 0.0  ;;  %v12485_v33 = vmax.f32 %v9540_v49, 0.0  ;;  %v3159_v61 = vmul.f32 %v9077_v41, %v3126_v3 }
 0x431   : >> { %v3296_v40 = vpop.xlane.xlu0 %3295 }
 0x432   : >> { %3419 = vadd.xlane.f32.xlu0 %v3380_v58  ;;  %v3334_v51 = vmul.f32 %v3296_v40, %v8135_v13  ;;  %v9952_v58 = vsub.f32 %v12483_v29, %v3333_v44  ;;  %v9959_v8 = vsub.f32 %v12485_v33, %v3318_v4  ;;  %v9971_v49 = vadd.f32 %v9079_v0, %v3159_v61  ;;  %v5919_v33 = vld [vmem:[%s7134_s14 + $0x30] sm:$0xff] }
 0x433   : >> { %3271 = vadd.xlane.f32.xlu2 %v12078_v6  ;;  %v9974_v40 = vadd.f32 %v9079_v0, %v3158_v55  ;;  %4672 = vmatpush.bf16.msrb.mxu1 %v5919_v33 }
 0x434   : >> { %v9944_v50 = vsub.f32 %v12481_v1, %v3334_v51  ;;  %12484 = vst [vmem:[#allocation78_spill] sm:$0xff] %v9952_v58  ;;  %v3397_v56 = vmul.f32 %v9952_v58, %v9952_v58  ;;  %v3382_v19 = vmul.f32 %v9959_v8, %v9959_v8  ;;  %v12074_v41 = vmax.f32 %v9971_v49, 0.0  ;;  %5933 = vmatpush.bf16.msrb.mxu3 %v5919_v33 }
 0x435   : >> { %12486 = vst [vmem:[#allocation74_spill] sm:$0xff] %v9959_v8  ;;  %v12075_v5 = vmax.f32 %v9974_v40, 0.0  ;;  %v12503_v8 = vmax.f32 %v9902_v47, 0.0 }
 0x436   : >> { %12482 = vst [vmem:[#allocation70_spill] sm:$0xff] %v9944_v50  ;;  %v3398_v63 = vmul.f32 %v9944_v50, %v9944_v50 }
 0x437   : >> { %v3298_v28 = vpop.xlane.xlu1 %3297 }
 0x438   : >> { %3421 = vadd.xlane.f32.xlu1 %v3381_v17  ;;  %v3335_v16 = vmul.f32 %v3298_v28, %v8135_v13 }
 0x43a   : >> { %3307 = vadd.xlane.f32.xlu0 %v12077_v32  ;;  %v9978_v21 = vsub.f32 %v12487_v22, %v3335_v16  ;;  %v5918_v16 = vld [vmem:[%s7134_s14 + $0x28] sm:$0xff] }
 0x43b   : >> { %3305 = vadd.xlane.f32.xlu2 %v12076_v18  ;;  %4673 = vmatpush.bf16.msrb.mxu1 %v5918_v16 }
 0x43c   : >> { %12488 = vst [vmem:[#allocation84_spill] sm:$0xff] %v9978_v21  ;;  %v3399_v51 = vmul.f32 %v9978_v21, %v9978_v21  ;;  %5934 = vmatpush.bf16.msrb.mxu3 %v5918_v16 }
 0x440   : >> { %3455 = vadd.xlane.f32.xlu1 %v3398_v63 }
 0x442   : >> { %3453 = vadd.xlane.f32.xlu0 %v3397_v56 }
 0x443   : >> { %3423 = vadd.xlane.f32.xlu2 %v3382_v19 }
 0x448   : >> { %3275 = vadd.xlane.f32.xlu1 %v12074_v41 }
 0x44a   : >> { %3273 = vadd.xlane.f32.xlu0 %v12075_v5 }
 0x44b   : >> { %3457 = vadd.xlane.f32.xlu2 %v3399_v51 }
 0x466   : >> { %v3406_v0 = vpop.xlane.xlu2 %3405 }
 0x467   : >> { %v3469_v9 = vmul.f32 %v3406_v0, %v8135_v13 }
 0x469   : >> { %v3501_v17 = vadd.f32 1e-05, %v3469_v9 }
 0x46b   : >> { %6209 = vrsqrt.f32 %v3501_v17  ;;  %vm3539_vm14 = vweird.f32 %v3501_v17 }
 0x46d   : >> { %v3408_v7 = vpop.xlane.xlu0 %3407 }
 0x46e   : >> { %v3470_v30 = vmul.f32 %v3408_v7, %v8135_v13  ;;  %v3438_v44 = vpop.xlane.xlu2 %3437 }
 0x46f   : >> { %v3485_v4 = vmul.f32 %v3438_v44, %v8135_v13 }
 0x470   : >> { %v3502_v1 = vadd.f32 1e-05, %v3470_v30 }
 0x471   : >> { %v6210_v3 = vpop.eup %6209  ;;  %v9992_v29 = vadd.f32 1e-05, %v3485_v4  ;;  %v5917_v4 = vld [vmem:[%s7134_s14 + $0x20] sm:$0xff] }
 0x472   : >> { %6211 = vrsqrt.f32 %v3502_v1  ;;  %v3534_v24 = vmul.f32 %v6210_v3, %v3501_v17  ;;  %vm3540_vm7 = vweird.f32 %v6210_v3  ;;  %4674 = vmatpush.bf16.msrb.mxu1 %v5917_v4  ;;  %5935 = vmatpush.bf16.msrb.mxu3 %v5917_v4  ;;  %vm3549_vm2 = vweird.f32 %v3502_v1 }
 0x473   : >> { %6213 = vrsqrt.f32 %v9992_v29  ;;  %v3410_v9 = vpop.xlane.xlu1 %3409  ;;  %vm3541_vm0 = vmor %vm3539_vm14, %vm3540_vm7  ;;  %v12492_v4 = vmax.f32 %v9700_v11, 0.0  ;;  %vm3699_vm5 = vweird.f32 %v9992_v29 }
 0x474   : >> { %v3535_v63 = vmul.f32 %v6210_v3, %v3534_v24 }
 0x475   : >> { %v3440_v61 = vpop.xlane.xlu0 %3439 }
 0x476   : >> { %v3536_v28 = vmul.f32 0.5, %v3535_v63  ;;  %v3300_v56 = vpop.xlane.xlu2 %3299  ;;  %v3486_v55 = vmul.f32 %v3440_v61, %v8135_v13 }
 0x477   : >> { %v3336_v22 = vmul.f32 %v3300_v56, %v8135_v13  ;;  %v6405_v56 = vld [vmem:[%s9057_s2] sm:$0x3f] }
 0x478   : >> { %v6212_v19 = vpop.eup %6211  ;;  %v3537_v51 = vsub.f32 1.5, %v3536_v28  ;;  %v10003_v39 = vadd.f32 1e-05, %v3486_v55  ;;  %v10014_v55 = vperm.slane %v6405_v56, 4 }
 0x479   : >> { %v3544_v0 = vmul.f32 %v6212_v19, %v3502_v1  ;;  %v10001_v7 = vsub.f32 %v3236_v15, %v3336_v22  ;;  %v10006_v24 = vpop.eup %6213  ;;  %v3471_v15 = vmul.f32 %v3410_v9, %v8135_v13  ;;  %vm3550_vm1 = vweird.f32 %v6212_v19  ;;  %v5915_v1 = vld [vmem:[%s7134_s14 + $0x10] sm:$0xff] }
 0x47a   : >> { %v3538_v30 = vmul.f32 %v6210_v3, %v3537_v51  ;;  %v3694_v16 = vmul.f32 %v10006_v24, %v9992_v29  ;;  %6215 = vrsqrt.f32 %v10003_v39  ;;  %v5916_v51 = vld [vmem:[%s7134_s14 + $0x18] sm:$0xff]  ;;  %vm3551_vm3 = vmor %vm3549_vm2, %vm3550_vm1  ;;  %vm3700_vm4 = vweird.f32 %v10006_v24 }
 0x47b   : >> { %12489 = vst [vmem:[#allocation97_spill] sm:$0xff] %v10001_v7  ;;  %v3545_v44 = vmul.f32 %v6212_v19, %v3544_v0  ;;  %v3400_v33 = vmul.f32 %v10001_v7, %v10001_v7  ;;  %v12490_v0 = vmax.f32 %v9690_v37, 0.0  ;;  %4675 = vmatpush.bf16.msrb.mxu1 %v5916_v51  ;;  %5936 = vmatpush.bf16.msrb.mxu3 %v5916_v51  ;;  %vm3701_vm6 = vmor %vm3699_vm5, %vm3700_vm4  ;;  %vm3709_vm12 = vweird.f32 %v10003_v39 }
 0x47c   : >> { %v3542_v63 = vsel %vm3541_vm0, %v6210_v3, %v3538_v30  ;;  %v10025_v30 = vperm.slane %v6405_v56, 5  ;;  %v3695_v37 = vmul.f32 %v10006_v24, %v3694_v16  ;;  %v3444_v56 = vpop.xlane.xlu1 %3443 }
 0x47d   : >> { %v3546_v61 = vmul.f32 0.5, %v3545_v44  ;;  %v3268_v28 = vpop.xlane.xlu0 %3267  ;;  %v3853_v57 = vmul.f32 %v3542_v63, %v9590_v10  ;;  %3459 = vadd.xlane.f32.xlu0 %v3400_v33 }
 0x47e   : >> { %v3320_v17 = vmul.f32 %v3268_v28, %v8135_v13  ;;  %v3266_v3 = vpop.xlane.xlu2 %3265 }
 0x47f   : >> { %v3547_v22 = vsub.f32 1.5, %v3546_v61  ;;  %v3319_v10 = vmul.f32 %v3266_v3, %v8135_v13  ;;  %v3886_v61 = vmul.f32 %v10014_v55, %v3853_v57  ;;  %4676 = vmatpush.bf16.msrb.mxu1 %v5915_v1  ;;  %5937 = vmatpush.bf16.msrb.mxu3 %v5915_v1 }
 0x480   : >> { %v10023_v9 = vsub.f32 %v12490_v0, %v3320_v17  ;;  %v10035_v17 = vadd.f32 1e-05, %v3471_v15  ;;  %v10044_v51 = vpop.eup %6215  ;;  %v3696_v15 = vmul.f32 0.5, %v3695_v37 }
 0x481   : >> { %v3548_v44 = vmul.f32 %v6212_v19, %v3547_v22  ;;  %v10029_v33 = vsub.f32 %v12492_v4, %v3319_v10  ;;  %v10042_v3 = vadd.f32 %v10025_v30, %v3886_v61  ;;  %v5914_v10 = vld [vmem:[%s7134_s14 + $0x8] sm:$0xff]  ;;  %vm3710_vm10 = vweird.f32 %v10044_v51 }
 0x482   : >> { %12491 = vst [vmem:[#allocation58_spill] sm:$0xff] %v10023_v9  ;;  %v3384_v63 = vmul.f32 %v10023_v9, %v10023_v9  ;;  %6217 = vrsqrt.f32 %v10035_v17  ;;  %vm10109_vm9 = vmor %vm3709_vm12, %vm3710_vm10  ;;  %vm3559_vm15 = vweird.f32 %v10035_v17 }
 0x483   : >> { %12493 = vst [vmem:[#allocation96_spill] sm:$0xff] %v10029_v33  ;;  %v3552_v28 = vsel %vm3551_vm3, %v6212_v19, %v3548_v44  ;;  %v3383_v11 = vmul.f32 %v10029_v33, %v10029_v33  ;;  %v5791_v0 = vmul.f32 -1.442695, %v10042_v3  ;;  %v3704_v44 = vmul.f32 %v10044_v51, %v10003_v39  ;;  %4677 = vmatpush.bf16.msrb.mxu1 %v5914_v10 }
 0x484   : >> { %v3854_v22 = vmul.f32 %v3552_v28, %v9615_v14  ;;  %3427 = vadd.xlane.f32.xlu2 %v3384_v63  ;;  %v3488_v14 = vmul.f32 %v3444_v56, %v8135_v13  ;;  %5938 = vmatpush.bf16.msrb.mxu3 %v5914_v10  ;;  %v3697_v63 = vsub.f32 1.5, %v3696_v15  ;;  %v5913_v28 = vld [vmem:[%s7134_s14] sm:$0xff] }
 0x485   : >> { %v3442_v57 = vpop.xlane.xlu0 %3441  ;;  %3425 = vadd.xlane.f32.xlu1 %v3383_v11  ;;  %6219 = vpow2.f32 %v5791_v0  ;;  %v3705_v56 = vmul.f32 %v10044_v51, %v3704_v44 }
 0x486   : >> { %v3887_v19 = vmul.f32 %v10014_v55, %v3854_v22  ;;  %v3412_v16 = vpop.xlane.xlu2 %3411  ;;  %v10056_v61 = vadd.f32 1e-05, %v3488_v14  ;;  %v3698_v0 = vmul.f32 %v10006_v24, %v3697_v63  ;;  %v3487_v44 = vmul.f32 %v3442_v57, %v8135_v13 }
 0x487   : >> { %4678 = vmatpush.bf16.msrb.mxu1 %v5913_v28  ;;  %v3706_v14 = vmul.f32 0.5, %v3705_v56 }
 0x488   : >> { %v10054_v4 = vadd.f32 %v10025_v30, %v3887_v19  ;;  %v10061_v22 = vpop.eup %6217  ;;  %5939 = vmatpush.bf16.msrb.mxu3 %v5913_v28  ;;  %v3472_v19 = vmul.f32 %v3412_v16, %v8135_v13  ;;  %6221 = vrsqrt.f32 %v10056_v61  ;;  %v3702_v63 = vsel %vm3701_vm6, %v10006_v24, %v3698_v0 }
 0x489   : >> { %v3554_v10 = vmul.f32 %v10061_v22, %v10035_v17  ;;  %v3707_v18 = vsub.f32 1.5, %v3706_v14  ;;  %v10081_v29 = vadd.f32 1e-05, %v3487_v44  ;;  %v3869_v6 = vmul.f32 %v3702_v63, %v9611_v35 }
 0x48a   : >> { %v5792_v1 = vmul.f32 -1.442695, %v10054_v4  ;;  %v10073_v16 = vadd.f32 1e-05, %v3472_v19  ;;  %vm3560_vm13 = vweird.f32 %v10061_v22  ;;  %vm3729_vm4 = vweird.f32 %v10056_v61 }
 0x48b   : >> { %v3416_v37 = vpop.xlane.xlu1 %3415  ;;  %v6220_v41 = vpop.eup %6219  ;;  %v3555_v32 = vmul.f32 %v10061_v22, %v3554_v10  ;;  %v3708_v0 = vmul.f32 %v10044_v51, %v3707_v18  ;;  %vm10171_vm8 = vmor %vm3559_vm15, %vm3560_vm13  ;;  %vm3719_vm12 = vweird.f32 %v10081_v29 }
 0x48c   : >> { %6223 = vpow2.f32 %v5792_v1  ;;  %v10071_v28 = vadd.f32 1.0, %v6220_v41  ;;  %v3474_v24 = vmul.f32 %v3416_v37, %v8135_v13  ;;  %vm3569_vm10 = vweird.f32 %v10073_v16 }
 0x48d   : >> { %v3414_v11 = vpop.xlane.xlu0 %3413  ;;  %v3556_v14 = vmul.f32 0.5, %v3555_v32  ;;  %v3902_v32 = vmul.f32 %v10014_v55, %v3869_v6  ;;  %v3712_v39 = vsel %vm10109_vm9, %v10044_v51, %v3708_v0 }
 0x48e   : >> { %v3446_v15 = vpop.xlane.xlu2 %3445  ;;  %6225 = vrcp.f32 %v10071_v28  ;;  %v10079_v1 = vpop.eup %6221  ;;  %v3473_v10 = vmul.f32 %v3414_v11, %v8135_v13  ;;  %v10104_v18 = vadd.f32 1e-05, %v3474_v24  ;;  %v4088_v7 = vand.u32 2147483647, %v10071_v28 }
 0x48f   : >> { %6227 = vrsqrt.f32 %v10073_v16  ;;  %v3724_v35 = vmul.f32 %v10079_v1, %v10056_v61  ;;  %v10130_v51 = vadd.f32 %v10025_v30, %v3902_v32  ;;  %vm4084_vm7 = vweird.f32 %v10071_v28 }
 0x490   : >> { %6229 = vrsqrt.f32 %v10081_v29  ;;  %vm10224_vm0 = vcmp.eq.f32.partialorder %v4088_v7, 8.507059e+37  ;;  %vm3730_vm2 = vweird.f32 %v10079_v1  ;;  %vm3589_vm13 = vweird.f32 %v10104_v18 }
 0x491   : >> { %v3725_v24 = vmul.f32 %v10079_v1, %v3724_v35  ;;  %vm10304_vm15 = vmor %vm3729_vm4, %vm3730_vm2 }
 0x492   : >> { %v6224_v41 = vpop.eup %6223 }
 0x493   : >> { %v3304_v5 = vpop.xlane.xlu1 %3303  ;;  %v10098_v37 = vadd.f32 1.0, %v6224_v41  ;;  %v3557_v41 = vsub.f32 1.5, %v3556_v14  ;;  %v3870_v14 = vmul.f32 %v3712_v39, %v9651_v60  ;;  %v10151_v39 = vmul.f32 0.5, %v3725_v24 }
 0x494   : >> { %v3338_v56 = vmul.f32 %v3304_v5, %v8135_v13  ;;  %v10100_v52 = vpop.eup %6225 }
 0x495   : >> { %v3448_v57 = vpop.xlane.xlu0 %3447  ;;  %v4080_v31 = vmul.f32 %v10100_v52, %v10071_v28  ;;  %6231 = vrcp.f32 %v10098_v37  ;;  %v3903_v24 = vmul.f32 %v10014_v55, %v3870_v14  ;;  %vm4085_vm11 = vweird.f32 %v10100_v52 }
 0x496   : >> { %v10088_v19 = vsub.f32 %v3238_v27, %v3338_v56  ;;  %v3418_v5 = vpop.xlane.xlu2 %3417  ;;  %v3489_v27 = vmul.f32 %v3446_v15, %v8135_v13  ;;  %v10113_v56 = vpop.eup %6227  ;;  %v10118_v15 = vadd.f32 1e-05, %v3473_v10  ;;  %6233 = vrsqrt.f32 %v10104_v18  ;;  %vm10220_vm14 = vmor %vm4084_vm7, %vm4085_vm11 }
 0x497   : >> { %v10132_v0 = vpop.eup %6229  ;;  %v3564_v10 = vmul.f32 %v10113_v56, %v10073_v16  ;;  %v3490_v32 = vmul.f32 %v3448_v57, %v8135_v13  ;;  %v3475_v9 = vmul.f32 %v3418_v5, %v8135_v13  ;;  %v4103_v7 = vand.u32 2147483647, %v10098_v37 }
 0x498   : >> { %12494 = vst [vmem:[#allocation89_spill] sm:$0xff] %v10088_v19  ;;  %v3402_v44 = vmul.f32 %v10088_v19, %v10088_v19  ;;  %v10125_v59 = vadd.f32 1e-05, %v3489_v27  ;;  %v12497_v27 = vmax.f32 %v9845_v2, 0.0  ;;  %v10143_v19 = vmul.f32 %v10061_v22, %v3557_v41 }
 0x499   : >> { %6235 = vrsqrt.f32 %v10118_v15  ;;  %v3714_v41 = vmul.f32 %v10132_v0, %v10081_v29  ;;  %v3565_v5 = vmul.f32 %v10113_v56, %v3564_v10  ;;  %v10181_v10 = vadd.f32 1e-05, %v3475_v9 }
 0x49a   : >> { %3463 = vadd.xlane.f32.xlu1 %v3402_v44  ;;  %6237 = vrsqrt.f32 %v10125_v59  ;;  %vm4099_vm3 = vweird.f32 %v10098_v37  ;;  %vm4104_vm6 = vcmp.eq.f32.partialorder %v4103_v7, 8.507059e+37  ;;  %vm3570_vm9 = vweird.f32 %v10113_v56 }
 0x49b   : >> { %v3270_v63 = vpop.xlane.xlu1 %3269  ;;  %v3715_v33 = vmul.f32 %v10132_v0, %v3714_v41  ;;  %vm3720_vm11 = vweird.f32 %v10132_v0  ;;  %vm3739_vm7 = vweird.f32 %v10125_v59 }
 0x49c   : >> { %v3321_v6 = vmul.f32 %v3270_v63, %v8135_v13  ;;  %vm10365_vm4 = vmor %vm3719_vm12, %vm3720_vm11 }
 0x49d   : >> { %v3302_v44 = vpop.xlane.xlu0 %3301 }
 0x49e   : >> { %v3337_v11 = vmul.f32 %v3302_v44, %v8135_v13  ;;  %v3452_v35 = vpop.xlane.xlu2 %3451  ;;  %v10140_v63 = vsub.f32 %v12497_v27, %v3321_v6  ;;  %v12499_v44 = vmax.f32 %v9857_v53, 0.0  ;;  %v4081_v6 = vsub.f32 1.0, %v4080_v31 }
 0x49f   : >> { %v5807_v53 = vmul.f32 -1.442695, %v10130_v51  ;;  %v3492_v58 = vmul.f32 %v3452_v35, %v8135_v13  ;;  %v4105_v35 = vand.u32 2147483648, %v10098_v37 }
 0x4a0   : >> { %12498 = vst [vmem:[#allocation59_spill] sm:$0xff] %v10140_v63  ;;  %v10149_v60 = vsub.f32 %v12499_v44, %v3337_v11  ;;  %v3385_v2 = vmul.f32 %v10140_v63, %v10140_v63  ;;  %v10162_v11 = vpop.eup %6231  ;;  %v10175_v44 = vadd.f32 1e-05, %v3490_v32  ;;  %v4082_v14 = vmul.f32 %v10100_v52, %v4081_v6 }
 0x4a1   : >> { %v10167_v31 = vpop.eup %6233  ;;  %v4095_v32 = vmul.f32 %v10162_v11, %v10098_v37  ;;  %6239 = vpow2.f32 %v5807_v53  ;;  %v10196_v6 = vadd.f32 %v10025_v30, %v3903_v24  ;;  %v10208_v24 = vmul.f32 0.5, %v3715_v33 }
 0x4a2   : >> { %12500 = vst [vmem:[#allocation61_spill] sm:$0xff] %v10149_v60  ;;  %v3401_v57 = vmul.f32 %v10149_v60, %v10149_v60  ;;  %3429 = vadd.xlane.f32.xlu2 %v3385_v2  ;;  %v10184_v63 = vpop.eup %6235  ;;  %v3584_v17 = vmul.f32 %v10167_v31, %v10104_v18  ;;  %6241 = vrsqrt.f32 %v10175_v44  ;;  %v4083_v60 = vadd.f32 %v10100_v52, %v4082_v14 }
 0x4a3   : >> { %v10198_v21 = vpop.eup %6237  ;;  %v3574_v53 = vmul.f32 %v10184_v63, %v10118_v15  ;;  %6243 = vrsqrt.f32 %v10181_v10  ;;  %v4096_v50 = vsub.f32 1.0, %v4095_v32  ;;  %v3450_v26 = vpop.xlane.xlu1 %3449  ;;  %vm4100_vm1 = vweird.f32 %v10162_v11 }
 0x4a4   : >> { %3461 = vadd.xlane.f32.xlu0 %v3401_v57  ;;  %v10190_v57 = vmul.f32 0.5, %v3565_v5  ;;  %v4090_v5 = vand.u32 2147483648, %v10071_v28  ;;  %v3585_v38 = vmul.f32 %v10167_v31, %v3584_v17  ;;  %vm4101_vm5 = vmor %vm4099_vm3, %vm4100_vm1  ;;  %vm3590_vm1 = vweird.f32 %v10167_v31 }
 0x4a5   : >> { %v3420_v2 = vpop.xlane.xlu0 %3419  ;;  %v4097_v28 = vmul.f32 %v10162_v11, %v4096_v50  ;;  %v3575_v17 = vmul.f32 %v10184_v63, %v3574_v53  ;;  %vm3740_vm2 = vweird.f32 %v10198_v21  ;;  %vm3580_vm3 = vweird.f32 %v10184_v63 }
 0x4a6   : >> { %v3272_v9 = vpop.xlane.xlu2 %3271  ;;  %v3476_v53 = vmul.f32 %v3420_v2, %v8135_v13  ;;  %v5808_v2 = vmul.f32 -1.442695, %v10196_v6  ;;  %v3586_v33 = vmul.f32 0.5, %v3585_v38 }
 0x4a7   : >> { %v3322_v41 = vmul.f32 %v3272_v9, %v8135_v13  ;;  %v3734_v9 = vmul.f32 %v10198_v21, %v10125_v59  ;;  %v6240_v47 = vpop.eup %6239  ;;  %v4098_v50 = vadd.f32 %v10162_v11, %v4097_v28 }
 0x4a8   : >> { %v10239_v34 = vpop.eup %6241  ;;  %v10278_v7 = vadd.f32 1.0, %v6240_v47 }
 0x4a9   : >> { %v10213_v42 = vsub.f32 %v12503_v8, %v3322_v41  ;;  %v4087_v8 = vsel %vm10220_vm14, %v10100_v52, %v4083_v60  ;;  %v4091_v41 = vor.u32 1.1754944e-38, %v4090_v5  ;;  %v10241_v52 = vadd.f32 1e-05, %v3492_v58  ;;  %v10246_v32 = vpop.eup %6243 }
 0x4aa   : >> { %v3491_v5 = vmul.f32 %v3450_v26, %v8135_v13  ;;  %v4106_v58 = vor.u32 1.1754944e-38, %v4105_v35  ;;  %v4102_v37 = vsel %vm4101_vm5, %v10162_v11, %v4098_v50  ;;  %v3735_v26 = vmul.f32 %v10198_v21, %v3734_v9 }
 0x4ab   : >> { %12504 = vst [vmem:[#allocation98_spill] sm:$0xff] %v10213_v42  ;;  %v3386_v14 = vmul.f32 %v10213_v42, %v10213_v42  ;;  %v4092_v42 = vsel %vm10224_vm0, %v4091_v41, %v4087_v8  ;;  %v3744_v8 = vmul.f32 %v10239_v34, %v10175_v44  ;;  %6245 = vrsqrt.f32 %v10241_v52  ;;  %vm10324_vm0 = vmor %vm3569_vm10, %vm3570_vm9 }
 0x4ac   : >> { %v4107_v11 = vsel %vm4104_vm6, %v4106_v58, %v4102_v37  ;;  %v10272_v41 = vadd.f32 1e-05, %v3476_v53  ;;  %v10274_v50 = vadd.f32 1e-05, %v3491_v5  ;;  %v4559_v38 = vmul.f32 %v4092_v42, %v10042_v3  ;;  %vm10409_vm6 = vmor %vm3739_vm7, %vm3740_vm2 }
 0x4ad   : >> { %v3308_v12 = vpop.xlane.xlu0 %3307  ;;  %3431 = vadd.xlane.f32.xlu0 %v3386_v14  ;;  %v3594_v14 = vmul.f32 %v10246_v32, %v10181_v10  ;;  %v4560_v9 = vmul.f32 %v4107_v11, %v10054_v4  ;;  %6247 = vpow2.f32 %v5808_v2  ;;  %v3576_v42 = vmul.f32 0.5, %v3575_v17  ;;  %v3422_v4 = vpop.xlane.xlu1 %3421 }
 0x4ae   : >> { %v3340_v60 = vmul.f32 %v3308_v12, %v8135_v13  ;;  %v3306_v28 = vpop.xlane.xlu2 %3305  ;;  %v12509_v12 = vmax.f32 %v9919_v36, 0.0  ;;  %v12511_v36 = vmax.f32 %v9932_v43, 0.0  ;;  %v3736_v47 = vmul.f32 0.5, %v3735_v26 }
 0x4af   : >> { %v3339_v20 = vmul.f32 %v3306_v28, %v8135_v13  ;;  %v4591_v3 = vpack.c.bf16 %v4560_v9, %v4559_v38  ;;  %v3745_v53 = vmul.f32 %v10239_v34, %v3744_v8  ;;  %v3595_v5 = vmul.f32 %v10246_v32, %v3594_v14 }
 0x4b0   : >> { %v10258_v54 = vsub.f32 %v12509_v12, %v3340_v60  ;;  %6249 = vrcp.f32 %v10278_v7  ;;  %v12516_v37 = vsub.f32 1.5, %v10190_v57  ;;  %v3477_v2 = vmul.f32 %v3422_v4, %v8135_v13 }
 0x4b1   : >> { %v10270_v35 = vsub.f32 %v12511_v36, %v3339_v20  ;;  %v12513_v20 = vsub.f32 1.5, %v10151_v39  ;;  %v3717_v39 = vsub.f32 1.5, %v10208_v24  ;;  %6251 = vrsqrt.f32 %v10274_v50  ;;  %4679 = vmatmul.bf16.vlgmr.msrb.gmra.mxu1 %v4591_v3  ;;  %v10298_v17 = vpop.eup %6245 }
 0x4b2   : >> { %12510 = vst [vmem:[#allocation63_spill] sm:$0xff] %v10258_v54  ;;  %v3404_v58 = vmul.f32 %v10258_v54, %v10258_v54  ;;  %v3568_v12 = vmul.f32 %v10113_v56, %v12516_v37  ;;  %v3587_v24 = vsub.f32 1.5, %v3586_v33  ;;  %6253 = vrsqrt.f32 %v10272_v41  ;;  %v12523_v37 = vld [vmem:[#allocation73_spill] sm:$0xff] }
 0x4b3   : >> { %12512 = vst [vmem:[#allocation100_spill] sm:$0xff] %v10270_v35  ;;  %v3403_v60 = vmul.f32 %v10270_v35, %v10270_v35  ;;  %v10287_v43 = vmul.f32 %v10079_v1, %v12513_v20  ;;  %vm3579_vm14 = vweird.f32 %v10118_v15  ;;  %v6248_v61 = vpop.eup %6247  ;;  %v3737_v57 = vsub.f32 1.5, %v3736_v47 }
 0x4b4   : >> { %3467 = vadd.xlane.f32.xlu2 %v3404_v58  ;;  %v3577_v8 = vsub.f32 1.5, %v3576_v42  ;;  %v3746_v14 = vmul.f32 0.5, %v3745_v53  ;;  %v3596_v33 = vmul.f32 0.5, %v3595_v5  ;;  %v10329_v36 = vmul.f32 %v10132_v0, %v3717_v39  ;;  %vm10395_vm5 = vmor %vm3579_vm14, %vm3580_vm3 }
 0x4b5   : >> { %3465 = vadd.xlane.f32.xlu1 %v3403_v60  ;;  %v3764_v38 = vmul.f32 %v10298_v17, %v10241_v52  ;;  %v10334_v9 = vadd.f32 1.0, %v6248_v61  ;;  %v3572_v16 = vsel %vm10324_vm0, %v10113_v56, %v3568_v12  ;;  %v10342_v58 = vmul.f32 %v10167_v31, %v3587_v24  ;;  %v3454_v42 = vpop.xlane.xlu0 %3453 }
 0x4b6   : >> { %v10336_v60 = vpop.eup %6249  ;;  %v10344_v20 = vadd.f32 1e-05, %v3477_v2  ;;  %v12520_v3 = vsel %vm10171_vm8, %v10061_v22, %v10143_v19  ;;  %v10373_v19 = vmul.f32 %v10184_v63, %v3577_v8  ;;  %v3747_v27 = vsub.f32 1.5, %v3746_v14  ;;  %v3424_v39 = vpop.xlane.xlu2 %3423  ;;  %vm10380_vm8 = vmor %vm3589_vm13, %vm3590_vm1 }
 0x4b7   : >> { %v3855_v4 = vmul.f32 %v12520_v3, %v9655_v62  ;;  %v10352_v47 = vpop.eup %6251  ;;  %v4320_v56 = vmul.f32 %v10336_v60, %v10278_v7  ;;  %6255 = vrcp.f32 %v10334_v9  ;;  %v10370_v62 = vmul.f32 %v10198_v21, %v3737_v57 }
 0x4b8   : >> { %12519 = vst [vmem:[#allocation101_spill] sm:$0xff] %v10344_v20  ;;  %v10359_v53 = vpop.eup %6253  ;;  %v3597_v5 = vsub.f32 1.5, %v3596_v33  ;;  %v3765_v12 = vmul.f32 %v10298_v17, %v3764_v38  ;;  %v3493_v2 = vmul.f32 %v3454_v42, %v8135_v13  ;;  %v3856_v61 = vmul.f32 %v3572_v16, %v9733_v25  ;;  %v3456_v42 = vpop.xlane.xlu1 %3455 }
 0x4b9   : >> { %v4321_v24 = vsub.f32 1.0, %v4320_v56  ;;  %v3722_v57 = vsel %vm10365_vm4, %v10132_v0, %v10329_v36  ;;  %6257 = vrsqrt.f32 %v10344_v20  ;;  %v3888_v25 = vmul.f32 %v10014_v55, %v3855_v4 }
 0x4ba   : >> { %v3604_v15 = vmul.f32 %v10359_v53, %v10272_v41  ;;  %v3754_v14 = vmul.f32 %v10352_v47, %v10274_v50  ;;  %v3478_v11 = vmul.f32 %v3424_v39, %v8135_v13  ;;  %v10428_v38 = vmul.f32 %v10239_v34, %v3747_v27 }
 0x4bb   : >> { %v4322_v33 = vmul.f32 %v10336_v60, %v4321_v24  ;;  %v4328_v16 = vand.u32 2147483647, %v10278_v7  ;;  %v10432_v4 = vmul.f32 %v10246_v32, %v3597_v5  ;;  %v10434_v56 = vmul.f32 0.5, %v3765_v12 }
 0x4bc   : >> { %2448 = vadd.xlane.f32.xlu2 %v12523_v37  ;;  %v10436_v22 = vadd.f32 1e-05, %v3493_v2  ;;  %v3889_v39 = vmul.f32 %v10014_v55, %v3856_v61  ;;  %vm4325_vm10 = vweird.f32 %v10336_v60  ;;  %v10443_v36 = vadd.f32 %v10025_v30, %v3888_v25 }
 0x4bd   : >> { %v6256_v3 = vpop.eup %6255  ;;  %v4323_v24 = vadd.f32 %v10336_v60, %v4322_v33  ;;  %v3605_v8 = vmul.f32 %v10359_v53, %v3604_v15  ;;  %v3755_v5 = vmul.f32 %v10352_v47, %v3754_v14  ;;  %v4330_v12 = vand.u32 2147483648, %v10278_v7 }
 0x4be   : >> { %v4335_v27 = vmul.f32 %v6256_v3, %v10334_v9  ;;  %v10448_v59 = vadd.f32 1e-05, %v3478_v11  ;;  %vm4324_vm12 = vweird.f32 %v10278_v7  ;;  %vm10453_vm9 = vcmp.eq.f32.partialorder %v4328_v16, 8.507059e+37 }
 0x4bf   : >> { %v10450_v2 = vpop.eup %6257  ;;  %v3494_v25 = vmul.f32 %v3456_v42, %v8135_v13  ;;  %vm10458_vm13 = vmor %vm4324_vm12, %vm4325_vm10  ;;  %v4343_v14 = vand.u32 2147483647, %v10334_v9  ;;  %v4345_v11 = vand.u32 2147483648, %v10334_v9  ;;  %6259 = vrsqrt.f32 %v10436_v22  ;;  %v3274_v42 = vpop.xlane.xlu0 %3273 }
 0x4c0   : >> { %v4336_v33 = vsub.f32 1.0, %v4335_v27  ;;  %v10466_v7 = vadd.f32 %v10025_v30, %v3889_v39  ;;  %v4327_v16 = vsel %vm10458_vm13, %v10336_v60, %v4323_v24  ;;  %vm4340_vm11 = vweird.f32 %v6256_v3 }
 0x4c1   : >> { %v5793_v26 = vmul.f32 -1.442695, %v10443_v36  ;;  %vm3750_vm7 = vweird.f32 %v10239_v34  ;;  %v3614_v54 = vmul.f32 %v10450_v2, %v10344_v20  ;;  %v4331_v35 = vor.u32 1.1754944e-38, %v4330_v12 }
 0x4c2   : >> { %v4337_v27 = vmul.f32 %v6256_v3, %v4336_v33  ;;  %6261 = vrsqrt.f32 %v10448_v59  ;;  %v5794_v39 = vmul.f32 -1.442695, %v10466_v7  ;;  %vm3600_vm14 = vweird.f32 %v10246_v32 }
 0x4c3   : >> { %vm4339_vm0 = vweird.f32 %v10334_v9  ;;  %6263 = vpow2.f32 %v5793_v26  ;;  %v3871_v24 = vmul.f32 %v3722_v57, %v9721_v45  ;;  %vm3749_vm1 = vweird.f32 %v10175_v44 }
 0x4c4   : >> { %v4338_v60 = vadd.f32 %v6256_v3, %v4337_v27  ;;  %v3756_v12 = vmul.f32 0.5, %v3755_v5  ;;  %v4332_v33 = vsel %vm10453_vm9, %v4331_v35, %v4327_v16  ;;  %vm4341_vm2 = vmor %vm4339_vm0, %vm4340_vm11  ;;  %v4346_v15 = vor.u32 1.1754944e-38, %v4345_v11  ;;  %v3276_v27 = vpop.xlane.xlu1 %3275 }
 0x4c5   : >> { %v3323_v37 = vmul.f32 %v3274_v42, %v8135_v13  ;;  %vm3599_vm3 = vweird.f32 %v10181_v10  ;;  %vm4344_vm4 = vcmp.eq.f32.partialorder %v4343_v14, 8.507059e+37  ;;  %6265 = vpow2.f32 %v5794_v39  ;;  %v10498_v9 = vpop.eup %6259  ;;  %vm10545_vm13 = vmor %vm3749_vm1, %vm3750_vm7 }
 0x4c6   : >> { %v4342_v20 = vsel %vm4341_vm2, %v6256_v3, %v4338_v60  ;;  %v12534_v45 = vsel %vm10304_vm15, %v10079_v1, %v10287_v43  ;;  %vm3769_vm10 = vweird.f32 %v10241_v52  ;;  %v3606_v35 = vmul.f32 0.5, %v3605_v8  ;;  %vm10561_vm11 = vmor %vm3599_vm3, %vm3600_vm14 }
 0x4c7   : >> { %v3872_v26 = vmul.f32 %v12534_v45, %v9683_v23  ;;  %v3615_v57 = vmul.f32 %v10450_v2, %v3614_v54  ;;  %v4347_v5 = vsel %vm4344_vm4, %v4346_v15, %v4342_v20  ;;  %v10502_v61 = vadd.f32 1e-05, %v3494_v25 }
 0x4c8   : >> { %vm3759_vm12 = vweird.f32 %v10274_v50  ;;  %v4575_v3 = vmul.f32 %v4332_v33, %v10130_v51  ;;  %v4576_v28 = vmul.f32 %v4347_v5, %v10196_v6  ;;  %v3904_v14 = vmul.f32 %v10014_v55, %v3871_v24  ;;  %v10509_v1 = vpop.eup %6261  ;;  %v3458_v33 = vpop.xlane.xlu2 %3457 }
 0x4c9   : >> { %v3905_v23 = vmul.f32 %v10014_v55, %v3872_v26  ;;  %v3767_v43 = vsub.f32 1.5, %v10434_v56  ;;  %vm3770_vm15 = vweird.f32 %v10298_v17  ;;  %v3757_v54 = vsub.f32 1.5, %v3756_v12  ;;  %v6264_v8 = vpop.eup %6263 }
 0x4ca   : >> { %v3324_v20 = vmul.f32 %v3276_v27, %v8135_v13  ;;  %v4599_v25 = vpack.c.bf16 %v4576_v28, %v4575_v3  ;;  %v12535_v11 = vmax.f32 %v9974_v40, 0.0  ;;  %v10519_v6 = vadd.f32 %v10025_v30, %v3904_v14  ;;  %vm10574_vm0 = vmor %vm3769_vm10, %vm3770_vm15 }
 0x4cb   : >> { %v10522_v16 = vadd.f32 %v10025_v30, %v3905_v23  ;;  %v3607_v42 = vsub.f32 1.5, %v3606_v35  ;;  %v3616_v39 = vmul.f32 0.5, %v3615_v57  ;;  %6267 = vrsqrt.f32 %v10502_v61  ;;  %v6266_v60 = vpop.eup %6265 }
 0x4cc   : >> { %v10516_v51 = vsub.f32 %v12535_v11, %v3323_v37  ;;  %v10525_v56 = vadd.f32 1.0, %v6264_v8  ;;  %vm3760_vm9 = vweird.f32 %v10352_v47  ;;  %4719 = vmatmul.bf16.vlgmr.msrb.gmra.mxu3 %v4599_v25  ;;  %v3774_v40 = vmul.f32 %v10498_v9, %v10436_v22 }
 0x4cd   : >> { %v5809_v37 = vmul.f32 -1.442695, %v10519_v6  ;;  %v5810_v24 = vmul.f32 -1.442695, %v10522_v16  ;;  %v3624_v12 = vmul.f32 %v10509_v1, %v10448_v59  ;;  %v12536_v15 = vmax.f32 %v9971_v49, 0.0  ;;  %vm10587_vm1 = vmor %vm3759_vm12, %vm3760_vm9 }
 0x4ce   : >> { %v10538_v45 = vadd.f32 1.0, %v6266_v60  ;;  %6269 = vrcp.f32 %v10525_v56  ;;  %v10550_v35 = vmul.f32 %v10298_v17, %v3767_v43  ;;  %v10553_v57 = vmul.f32 %v10352_v47, %v3757_v54 }
 0x4cf   : >> { %v10536_v27 = vsub.f32 %v12536_v15, %v3324_v20  ;;  %6271 = vpow2.f32 %v5809_v37  ;;  %v3387_v49 = vmul.f32 %v10516_v51, %v10516_v51  ;;  %v10566_v5 = vmul.f32 %v10359_v53, %v3607_v42 }
 0x4d0   : >> { %vm3610_vm7 = vweird.f32 %v10359_v53  ;;  %v3617_v3 = vsub.f32 1.5, %v3616_v39  ;;  %6273 = vrcp.f32 %v10538_v45  ;;  %vm3609_vm14 = vweird.f32 %v10272_v41 }
 0x4d1   : >> { %v3775_v10 = vmul.f32 %v10498_v9, %v3774_v40  ;;  %v3495_v14 = vmul.f32 %v3458_v33, %v8135_v13  ;;  %6275 = vpow2.f32 %v5810_v24  ;;  %3433 = vadd.xlane.f32.xlu0 %v3387_v49  ;;  %v10581_v23 = vpop.eup %6267  ;;  %v3625_v43 = vmul.f32 %v10509_v1, %v3624_v12 }
 0x4d2   : >> { %v3388_v41 = vmul.f32 %v10536_v27, %v10536_v27  ;;  %v12545_v54 = vsel %vm10395_vm5, %v10184_v63, %v10373_v19  ;;  %v12546_v50 = vsel %vm10380_vm8, %v10167_v31, %v10342_v58  ;;  %v3752_v25 = vsel %vm10545_vm13, %v10239_v34, %v10428_v38  ;;  %vm10620_vm5 = vmor %vm3609_vm14, %vm3610_vm7 }
 0x4d3   : >> { %v3857_v20 = vmul.f32 %v12545_v54, %v9761_v46  ;;  %v3858_v8 = vmul.f32 %v12546_v50, %v9765_v48  ;;  %v3602_v18 = vsel %vm10561_vm11, %v10246_v32, %v10432_v4  ;;  %v10633_v58 = vmul.f32 %v10450_v2, %v3617_v3  ;;  %v12549_v50 = vld [vmem:[#allocation56_spill] sm:$0xff] }
 0x4d4   : >> { %v6270_v34 = vpop.eup %6269  ;;  %3435 = vadd.xlane.f32.xlu1 %v3388_v41  ;;  %v10637_v11 = vmul.f32 0.5, %v3775_v10  ;;  %v10641_v42 = vmul.f32 %v10581_v23, %v10502_v61  ;;  %v10643_v39 = vadd.f32 1e-05, %v3495_v14  ;;  %v10646_v37 = vmul.f32 0.5, %v3625_v43 }
 0x4d5   : >> { %v3890_v19 = vmul.f32 %v10014_v55, %v3857_v20  ;;  %v3891_v29 = vmul.f32 %v10014_v55, %v3858_v8  ;;  %v6272_v38 = vpop.eup %6271  ;;  %v4110_v60 = vmul.f32 %v6270_v34, %v10525_v56  ;;  %v4118_v24 = vand.u32 2147483647, %v10525_v56 }
 0x4d6   : >> { %v6274_v40 = vpop.eup %6273  ;;  %v10649_v12 = vadd.f32 1.0, %v6272_v38  ;;  %v4120_v49 = vand.u32 2147483648, %v10525_v56  ;;  %v4133_v10 = vand.u32 2147483647, %v10538_v45  ;;  %v4135_v14 = vand.u32 2147483648, %v10538_v45 }
 0x4d7   : >> { %v10652_v33 = vadd.f32 %v10025_v30, %v3890_v19  ;;  %v6276_v15 = vpop.eup %6275  ;;  %v4111_v26 = vsub.f32 1.0, %v4110_v60  ;;  %v4125_v3 = vmul.f32 %v6274_v40, %v10538_v45  ;;  %v10662_v43 = vadd.f32 %v10025_v30, %v3891_v29 }
 0x4d8   : >> { %v10658_v41 = vadd.f32 1.0, %v6276_v15  ;;  %6277 = vrcp.f32 %v10649_v12  ;;  %vm4115_vm8 = vweird.f32 %v6270_v34  ;;  %vm4114_vm2 = vweird.f32 %v10525_v56 }
 0x4d9   : >> { %v4112_v54 = vmul.f32 %v6270_v34, %v4111_v26  ;;  %v4126_v20 = vsub.f32 1.0, %v4125_v3  ;;  %2450 = vadd.xlane.f32.xlu0 %v12549_v50  ;;  %v5795_v8 = vmul.f32 -1.442695, %v10652_v33  ;;  %vm10667_vm3 = vcmp.eq.f32.partialorder %v4118_v24, 8.507059e+37  ;;  %vm4116_vm12 = vmor %vm4114_vm2, %vm4115_vm8  ;;  %v12554_v24 = vld [vmem:[#allocation79_spill] sm:$0xff] }
 0x4da   : >> { %vm4129_vm4 = vweird.f32 %v10538_v45  ;;  %6279 = vrcp.f32 %v10658_v41  ;;  %v4121_v29 = vor.u32 1.1754944e-38, %v4120_v49  ;;  %vm4130_vm10 = vweird.f32 %v6274_v40 }
 0x4db   : >> { %v4113_v38 = vadd.f32 %v6270_v34, %v4112_v54  ;;  %v4127_v60 = vmul.f32 %v6274_v40, %v4126_v20  ;;  %vm10673_vm15 = vcmp.eq.f32.partialorder %v4133_v10, 8.507059e+37  ;;  %6281 = vpow2.f32 %v5795_v8  ;;  %v12556_v20 = vld [vmem:[#allocation57_spill] sm:$0xff]  ;;  %vm4131_vm9 = vmor %vm4129_vm4, %vm4130_vm10 }
 0x4dc   : >> { %v5796_v56 = vmul.f32 -1.442695, %v10662_v43  ;;  %v12555_v26 = vsel %vm10409_vm6, %v10198_v21, %v10370_v62  ;;  %v4136_v49 = vor.u32 1.1754944e-38, %v4135_v14  ;;  %v3874_v48 = vmul.f32 %v3752_v25, %v12556_v20  ;;  %v12557_v20 = vld [vmem:[#allocation94_spill] sm:$0xff] }
 0x4dd   : >> { %v3873_v3 = vmul.f32 %v12555_v26, %v12554_v24  ;;  %v4117_v46 = vsel %vm4116_vm12, %v6270_v34, %v4113_v38  ;;  %v4128_v54 = vadd.f32 %v6274_v40, %v4127_v60  ;;  %vm4354_vm13 = vweird.f32 %v10649_v12 }
 0x4de   : >> { %v6278_v31 = vpop.eup %6277  ;;  %v4122_v10 = vsel %vm10667_vm3, %v4121_v29, %v4117_v46  ;;  %6283 = vpow2.f32 %v5796_v56  ;;  %v4358_v62 = vand.u32 2147483647, %v10649_v12  ;;  %v4360_v34 = vand.u32 2147483648, %v10649_v12 }
 0x4df   : >> { %v3906_v0 = vmul.f32 %v10014_v55, %v3873_v3  ;;  %v4132_v8 = vsel %vm4131_vm9, %v6274_v40, %v4128_v54  ;;  %v4350_v21 = vmul.f32 %v6278_v31, %v10649_v12  ;;  %v4373_v46 = vand.u32 2147483647, %v10658_v41 }
 0x4e0   : >> { %v6280_v25 = vpop.eup %6279  ;;  %v4137_v14 = vsel %vm10673_vm15, %v4136_v49, %v4132_v8  ;;  %v3907_v45 = vmul.f32 %v10014_v55, %v3874_v48  ;;  %v4561_v38 = vmul.f32 %v4122_v10, %v10443_v36  ;;  %vm4355_vm6 = vweird.f32 %v6278_v31 }
 0x4e1   : >> { %v10699_v19 = vadd.f32 %v10025_v30, %v3906_v0  ;;  %v4562_v40 = vmul.f32 %v4137_v14, %v10466_v7  ;;  %v4351_v29 = vsub.f32 1.0, %v4350_v21  ;;  %v4365_v60 = vmul.f32 %v6280_v25, %v10658_v41  ;;  %v6282_v56 = vpop.eup %6281  ;;  %vm4356_vm14 = vmor %vm4354_vm13, %vm4355_vm6 }
 0x4e2   : >> { %v4375_v24 = vand.u32 2147483648, %v10658_v41  ;;  %v10706_v15 = vadd.f32 %v10025_v30, %v3907_v45  ;;  %v10709_v49 = vadd.f32 1.0, %v6282_v56  ;;  %vm4370_vm7 = vweird.f32 %v6280_v25  ;;  %v12558_v45 = vld [vmem:[#allocation83_spill] sm:$0xff] }
 0x4e3   : >> { %v5811_v26 = vmul.f32 -1.442695, %v10699_v19  ;;  %v4592_v48 = vpack.c.bf16 %v4562_v40, %v4561_v38  ;;  %v4352_v3 = vmul.f32 %v6278_v31, %v4351_v29  ;;  %v4366_v54 = vsub.f32 1.0, %v4365_v60 }
 0x4e4   : >> { %v6284_v36 = vpop.eup %6283  ;;  %v5812_v7 = vmul.f32 -1.442695, %v10706_v15  ;;  %v3859_v10 = vmul.f32 %v3602_v18, %v12557_v20  ;;  %vm4359_vm8 = vcmp.eq.f32.partialorder %v4358_v62, 8.507059e+37  ;;  %v4361_v14 = vor.u32 1.1754944e-38, %v4360_v34 }
 0x4e5   : >> { %6285 = vpow2.f32 %v5811_v26  ;;  %4684 = vmatmul.bf16.gmra.mxu1 %v4592_v48  ;;  %v4353_v0 = vadd.f32 %v6278_v31, %v4352_v3  ;;  %v4367_v8 = vmul.f32 %v6280_v25, %v4366_v54  ;;  %v10718_v21 = vadd.f32 1.0, %v6284_v36 }
 0x4e6   : >> { %6287 = vrcp.f32 %v10709_v49  ;;  %v12559_v32 = vsel %vm10620_vm5, %v10359_v53, %v10566_v5  ;;  %vm4369_vm11 = vweird.f32 %v10658_v41  ;;  %v3785_v12 = vmul.f32 %v10581_v23, %v10641_v42 }
 0x4e7   : >> { %6289 = vpow2.f32 %v5812_v7  ;;  %v3860_v4 = vmul.f32 %v12559_v32, %v12558_v45  ;;  %v4357_v44 = vsel %vm4356_vm14, %v6278_v31, %v4353_v0  ;;  %v4368_v18 = vadd.f32 %v6280_v25, %v4367_v8  ;;  %vm4371_vm2 = vmor %vm4369_vm11, %vm4370_vm7 }
 0x4e8   : >> { %6291 = vrcp.f32 %v10718_v21  ;;  %v4362_v62 = vsel %vm4359_vm8, %v4361_v14, %v4357_v44  ;;  %v4376_v34 = vor.u32 1.1754944e-38, %v4375_v24  ;;  %vm4374_vm3 = vcmp.eq.f32.partialorder %v4373_v46, 8.507059e+37  ;;  %v12562_v44 = vld [vmem:[#allocation101_spill] sm:$0xff] }
 0x4e9   : >> { %6293 = vrsqrt.f32 %v10643_v39  ;;  %v4372_v63 = vsel %vm4371_vm2, %v6280_v25, %v4368_v18  ;;  %v4577_v53 = vmul.f32 %v4362_v62, %v10519_v6  ;;  %v3892_v5 = vmul.f32 %v10014_v55, %v3859_v10 }
 0x4ea   : >> { %v3777_v41 = vsub.f32 1.5, %v10637_v11  ;;  %v3627_v38 = vsub.f32 1.5, %v10646_v37  ;;  %v4377_v40 = vsel %vm4374_vm3, %v4376_v34, %v4372_v63  ;;  %v3893_v42 = vmul.f32 %v10014_v55, %v3860_v4  ;;  %v12573_v11 = vld [vmem:[#allocation82_spill] sm:$0xff] }
 0x4eb   : >> { %v6286_v31 = vpop.eup %6285  ;;  %v4578_v60 = vmul.f32 %v4377_v40, %v10522_v16  ;;  %v4148_v56 = vand.u32 2147483647, %v10709_v49  ;;  %v4150_v25 = vand.u32 2147483648, %v10709_v49  ;;  %v4163_v26 = vand.u32 2147483647, %v10718_v21 }
 0x4ec   : >> { %v6288_v29 = vpop.eup %6287  ;;  %v10744_v46 = vadd.f32 1.0, %v6286_v31  ;;  %v4165_v48 = vand.u32 2147483648, %v10718_v21  ;;  %v10750_v37 = vadd.f32 %v10025_v30, %v3892_v5  ;;  %v10756_v16 = vadd.f32 %v10025_v30, %v3893_v42 }
 0x4ed   : >> { %v6290_v6 = vpop.eup %6289  ;;  %v4140_v24 = vmul.f32 %v6288_v29, %v10709_v49  ;;  %v4600_v54 = vpack.c.bf16 %v4578_v60, %v4577_v53  ;;  %v10761_v20 = vmul.f32 %v10509_v1, %v3627_v38  ;;  %v10763_v10 = vmul.f32 0.5, %v3785_v12  ;;  %v12565_v38 = vld [vmem:[#allocation93_spill] sm:$0xff] }
 0x4ee   : >> { %v6292_v3 = vpop.eup %6291  ;;  %v10752_v36 = vadd.f32 1.0, %v6290_v6  ;;  %6295 = vrcp.f32 %v10744_v46  ;;  %vm3620_vm5 = vweird.f32 %v10450_v2  ;;  %vm4144_vm4 = vweird.f32 %v10709_v49  ;;  %v12567_v60 = vld [vmem:[#allocation77_spill] sm:$0xff] }
 0x4ef   : >> { %v10758_v7 = vpop.eup %6293  ;;  %v4141_v0 = vsub.f32 1.0, %v4140_v24  ;;  %v4155_v8 = vmul.f32 %v6292_v3, %v10718_v21  ;;  %4724 = vmatmul.bf16.gmra.mxu3 %v4600_v54  ;;  %vm10768_vm10 = vcmp.eq.f32.partialorder %v4148_v56, 8.507059e+37  ;;  %vm4159_vm12 = vweird.f32 %v10718_v21 }
 0x4f0   : >> { %6297 = vrcp.f32 %v10752_v36  ;;  %vm4145_vm15 = vweird.f32 %v6288_v29  ;;  %v4151_v32 = vor.u32 1.1754944e-38, %v4150_v25  ;;  %vm3619_vm9 = vweird.f32 %v12562_v44 }
 0x4f1   : >> { %v4142_v45 = vmul.f32 %v6288_v29, %v4141_v0  ;;  %v4156_v4 = vsub.f32 1.0, %v4155_v8  ;;  %vm3630_vm13 = vweird.f32 %v10509_v1  ;;  %vm10776_vm6 = vcmp.eq.f32.partialorder %v4163_v26, 8.507059e+37  ;;  %vm4146_vm11 = vmor %vm4144_vm4, %vm4145_vm15 }
 0x4f2   : >> { %v4166_v12 = vor.u32 1.1754944e-38, %v4165_v48  ;;  %v5797_v62 = vmul.f32 -1.442695, %v10750_v37  ;;  %v5798_v34 = vmul.f32 -1.442695, %v10756_v16  ;;  %vm4160_vm7 = vweird.f32 %v6292_v3  ;;  %vm10828_vm4 = vmor %vm3619_vm9, %vm3620_vm5 }
 0x4f3   : >> { %v4143_v63 = vadd.f32 %v6288_v29, %v4142_v45  ;;  %v4157_v53 = vmul.f32 %v6292_v3, %v4156_v4  ;;  %vm4384_vm14 = vweird.f32 %v10744_v46  ;;  %vm3629_vm8 = vweird.f32 %v10448_v59 }
 0x4f4   : >> { %v6296_v5 = vpop.eup %6295  ;;  %v4388_v31 = vand.u32 2147483647, %v10744_v46  ;;  %6299 = vpow2.f32 %v5797_v62  ;;  %v12566_v40 = vsel %vm10587_vm1, %v10352_v47, %v10553_v57  ;;  %v12568_v56 = vsel %vm10574_vm0, %v10298_v17, %v10550_v35  ;;  %vm4161_vm1 = vmor %vm4159_vm12, %vm4160_vm7 }
 0x4f5   : >> { %v3875_v42 = vmul.f32 %v12566_v40, %v12565_v38  ;;  %v3876_v25 = vmul.f32 %v12568_v56, %v12567_v60  ;;  %v4147_v6 = vsel %vm4146_vm11, %v6288_v29, %v4143_v63  ;;  %v4158_v49 = vadd.f32 %v6292_v3, %v4157_v53  ;;  %vm10841_vm5 = vmor %vm3629_vm8, %vm3630_vm13 }
 0x4f6   : >> { %v4380_v24 = vmul.f32 %v6296_v5, %v10744_v46  ;;  %v4390_v26 = vand.u32 2147483648, %v10744_v46  ;;  %v6298_v48 = vpop.eup %6297  ;;  %v4152_v52 = vsel %vm10768_vm10, %v4151_v32, %v4147_v6  ;;  %6301 = vpow2.f32 %v5798_v34 }
 0x4f7   : >> { %v3908_v47 = vmul.f32 %v10014_v55, %v3875_v42  ;;  %v3909_v17 = vmul.f32 %v10014_v55, %v3876_v25  ;;  %v4162_v35 = vsel %vm4161_vm1, %v6292_v3, %v4158_v49  ;;  %v4563_v57 = vmul.f32 %v4152_v52, %v10652_v33  ;;  %v12574_v49 = vld [vmem:[#allocation74_spill] sm:$0xff] }
 0x4f8   : >> { %v4381_v28 = vsub.f32 1.0, %v4380_v24  ;;  %v4395_v29 = vmul.f32 %v6298_v48, %v10752_v36  ;;  %v4167_v54 = vsel %vm10776_vm6, %v4166_v12, %v4162_v35  ;;  %vm4399_vm0 = vweird.f32 %v10752_v36 }
 0x4f9   : >> { %v10815_v0 = vadd.f32 %v10025_v30, %v3908_v47  ;;  %v10818_v21 = vadd.f32 %v10025_v30, %v3909_v17  ;;  %v4564_v8 = vmul.f32 %v4167_v54, %v10662_v43  ;;  %vm4385_vm2 = vweird.f32 %v6296_v5 }
 0x4fa   : >> { %v4382_v14 = vmul.f32 %v6296_v5, %v4381_v28  ;;  %v4396_v3 = vsub.f32 1.0, %v4395_v29  ;;  %v6300_v33 = vpop.eup %6299  ;;  %vm4400_vm3 = vweird.f32 %v6298_v48  ;;  %v4403_v45 = vand.u32 2147483647, %v10752_v36  ;;  %vm4386_vm10 = vmor %vm4384_vm14, %vm4385_vm2 }
 0x4fb   : >> { %v4405_v32 = vand.u32 2147483648, %v10752_v36  ;;  %v5813_v4 = vmul.f32 -1.442695, %v10815_v0  ;;  %v4593_v43 = vpack.c.bf16 %v4564_v8, %v4563_v57  ;;  %v10832_v34 = vadd.f32 1.0, %v6300_v33  ;;  %vm4401_vm15 = vmor %vm4399_vm0, %vm4400_vm3 }
 0x4fc   : >> { %v4383_v12 = vadd.f32 %v6296_v5, %v4382_v14  ;;  %v4397_v62 = vmul.f32 %v6298_v48, %v4396_v3  ;;  %v6302_v63 = vpop.eup %6301  ;;  %vm4389_vm12 = vcmp.eq.f32.partialorder %v4388_v31, 8.507059e+37  ;;  %v4391_v53 = vor.u32 1.1754944e-38, %v4390_v26 }
 0x4fd   : >> { %6303 = vpow2.f32 %v5813_v4  ;;  %v5814_v38 = vmul.f32 -1.442695, %v10818_v21  ;;  %4689 = vmatmul.bf16.gmra.mxu1 %v4593_v43  ;;  %v10845_v60 = vadd.f32 1.0, %v6302_v63  ;;  %v3622_v46 = vsel %vm10828_vm4, %v10450_v2, %v10633_v58 }
 0x4fe   : >> { %v4387_v40 = vsel %vm4386_vm10, %v6296_v5, %v4383_v12  ;;  %v4398_v42 = vadd.f32 %v6298_v48, %v4397_v62  ;;  %6305 = vrcp.f32 %v10832_v34  ;;  %v3787_v31 = vsub.f32 1.5, %v10763_v10 }
 0x4ff   : >> { %v4392_v56 = vsel %vm4389_vm12, %v4391_v53, %v4387_v40  ;;  %v4406_v59 = vor.u32 1.1754944e-38, %v4405_v32  ;;  %v3632_v5 = vsel %vm10841_vm5, %v10509_v1, %v10761_v20  ;;  %vm4404_vm9 = vcmp.eq.f32.partialorder %v4403_v45, 8.507059e+37 }
 0x500   : >> { %v4402_v25 = vsel %vm4401_vm15, %v6298_v48, %v4398_v42  ;;  %6307 = vrcp.f32 %v10845_v60  ;;  %v10864_v2 = vmul.f32 %v10498_v9, %v3777_v41  ;;  %vm3780_vm13 = vweird.f32 %v10498_v9 }
 0x501   : >> { %v4407_v58 = vsel %vm4404_vm9, %v4406_v59, %v4402_v25  ;;  %v3794_v36 = vmul.f32 %v10758_v7, %v10643_v39  ;;  %v4579_v10 = vmul.f32 %v4392_v56, %v10699_v19  ;;  %6309 = vpow2.f32 %v5814_v38 }
 0x502   : >> { %v4580_v6 = vmul.f32 %v4407_v58, %v10706_v15  ;;  %v10872_v20 = vmul.f32 %v10581_v23, %v3787_v31  ;;  %vm3790_vm6 = vweird.f32 %v10581_v23  ;;  %v3861_v41 = vmul.f32 %v3622_v46, %v12573_v11  ;;  %v12579_v58 = vld [vmem:[#allocation78_spill] sm:$0xff] }
 0x503   : >> { %v6304_v1 = vpop.eup %6303  ;;  %v3862_v24 = vmul.f32 %v3632_v5, %v12574_v49  ;;  %vm3779_vm7 = vweird.f32 %v10436_v22  ;;  %vm3789_vm8 = vweird.f32 %v10502_v61  ;;  %v3795_v28 = vmul.f32 %v10758_v7, %v3794_v36  ;;  %v12580_v11 = vld [vmem:[#allocation70_spill] sm:$0xff] }
 0x504   : >> { %v6306_v26 = vpop.eup %6305  ;;  %v4601_v48 = vpack.c.bf16 %v4580_v6, %v4579_v10  ;;  %v10878_v52 = vadd.f32 1.0, %v6304_v1  ;;  %vm10882_vm14 = vmor %vm3779_vm7, %vm3780_vm13  ;;  %v3894_v47 = vmul.f32 %v10014_v55, %v3861_v41  ;;  %vm4174_vm1 = vweird.f32 %v10832_v34 }
 0x505   : >> { %v4170_v15 = vmul.f32 %v6306_v26, %v10832_v34  ;;  %v3895_v17 = vmul.f32 %v10014_v55, %v3862_v24  ;;  %v3782_v22 = vsel %vm10882_vm14, %v10498_v9, %v10864_v2  ;;  %vm10894_vm11 = vmor %vm3789_vm8, %vm3790_vm6  ;;  %v3460_v9 = vpop.xlane.xlu0 %3459  ;;  %vm4175_vm0 = vweird.f32 %v6306_v26 }
 0x506   : >> { %v6308_v35 = vpop.eup %6307  ;;  %4729 = vmatmul.bf16.gmra.mxu3 %v4601_v48  ;;  %6311 = vrcp.f32 %v10878_v52  ;;  %v3792_v61 = vsel %vm10894_vm11, %v10581_v23, %v10872_v20  ;;  %v4178_v14 = vand.u32 2147483647, %v10832_v34  ;;  %v4180_v3 = vand.u32 2147483648, %v10832_v34  ;;  %vm4176_vm3 = vmor %vm4174_vm1, %vm4175_vm0 }
 0x507   : >> { %v4171_v29 = vsub.f32 1.0, %v4170_v15  ;;  %v4185_v54 = vmul.f32 %v6308_v35, %v10845_v60  ;;  %v6310_v8 = vpop.eup %6309  ;;  %v10909_v33 = vadd.f32 %v10025_v30, %v3894_v47  ;;  %v10914_v23 = vadd.f32 %v10025_v30, %v3895_v17 }
 0x508   : >> { %v10911_v4 = vadd.f32 1.0, %v6310_v8  ;;  %v4193_v18 = vand.u32 2147483647, %v10845_v60  ;;  %v4195_v43 = vand.u32 2147483648, %v10845_v60  ;;  %v3496_v12 = vmul.f32 %v3460_v9, %v8135_v13 }
 0x509   : >> { %v4172_v45 = vmul.f32 %v6306_v26, %v4171_v29  ;;  %v4186_v32 = vsub.f32 1.0, %v4185_v54  ;;  %v5799_v62 = vmul.f32 -1.442695, %v10909_v33  ;;  %vm4190_vm2 = vweird.f32 %v6308_v35 }
 0x50a   : >> { %6313 = vrcp.f32 %v10911_v4  ;;  %v4181_v44 = vor.u32 1.1754944e-38, %v4180_v3  ;;  %vm4189_vm4 = vweird.f32 %v10845_v60  ;;  %v5800_v40 = vmul.f32 -1.442695, %v10914_v23 }
 0x50b   : >> { %v4173_v63 = vadd.f32 %v6306_v26, %v4172_v45  ;;  %v4187_v53 = vmul.f32 %v6308_v35, %v4186_v32  ;;  %6315 = vpow2.f32 %v5799_v62  ;;  %vm4179_vm10 = vcmp.eq.f32.partialorder %v4178_v14, 8.507059e+37  ;;  %vm4191_vm12 = vmor %vm4189_vm4, %vm4190_vm2 }
 0x50c   : >> { %v6312_v38 = vpop.eup %6311  ;;  %vm4194_vm5 = vcmp.eq.f32.partialorder %v4193_v18, 8.507059e+37  ;;  %v4196_v59 = vor.u32 1.1754944e-38, %v4195_v43  ;;  %v10927_v5 = vadd.f32 1e-05, %v3496_v12  ;;  %vm4414_vm15 = vweird.f32 %v10878_v52 }
 0x50d   : >> { %v4177_v42 = vsel %vm4176_vm3, %v6306_v26, %v4173_v63  ;;  %v4188_v46 = vadd.f32 %v6308_v35, %v4187_v53  ;;  %v4410_v31 = vmul.f32 %v6312_v38, %v10878_v52  ;;  %v4420_v60 = vand.u32 2147483648, %v10878_v52  ;;  %v3428_v63 = vpop.xlane.xlu2 %3427  ;;  %v3426_v53 = vpop.xlane.xlu1 %3425 }
 0x50e   : >> { %v4182_v56 = vsel %vm4179_vm10, %v4181_v44, %v4177_v42  ;;  %vm4415_vm9 = vweird.f32 %v6312_v38  ;;  %6317 = vpow2.f32 %v5800_v40  ;;  %v3877_v36 = vmul.f32 %v3782_v22, %v12579_v58 }
 0x50f   : >> { %v4192_v25 = vsel %vm4191_vm12, %v6308_v35, %v4188_v46  ;;  %v4411_v34 = vsub.f32 1.0, %v4410_v31  ;;  %v4565_v6 = vmul.f32 %v4182_v56, %v10750_v37  ;;  %v3878_v41 = vmul.f32 %v3792_v61, %v12580_v11  ;;  %vm4416_vm13 = vmor %vm4414_vm15, %vm4415_vm9 }
 0x510   : >> { %v4197_v2 = vsel %vm4194_vm5, %v4196_v59, %v4192_v25  ;;  %v6314_v10 = vpop.eup %6313  ;;  %v4418_v24 = vand.u32 2147483647, %v10878_v52  ;;  %6319 = vrsqrt.f32 %v10927_v5  ;;  %v3910_v48 = vmul.f32 %v10014_v55, %v3877_v36 }
 0x511   : >> { %v4566_v1 = vmul.f32 %v4197_v2, %v10756_v16  ;;  %v4412_v20 = vmul.f32 %v6312_v38, %v4411_v34  ;;  %v6316_v49 = vpop.eup %6315  ;;  %v4425_v26 = vmul.f32 %v6314_v10, %v10911_v4  ;;  %v3911_v37 = vmul.f32 %v10014_v55, %v3878_v41 }
 0x512   : >> { %v10939_v47 = vadd.f32 1.0, %v6316_v49  ;;  %v3796_v17 = vmul.f32 0.5, %v3795_v28  ;;  %v4421_v16 = vor.u32 1.1754944e-38, %v4420_v60  ;;  %v10946_v22 = vadd.f32 %v10025_v30, %v3910_v48 }
 0x513   : >> { %v4594_v19 = vpack.c.bf16 %v4566_v1, %v4565_v6  ;;  %v4413_v15 = vadd.f32 %v6312_v38, %v4412_v20  ;;  %v4426_v35 = vsub.f32 1.0, %v4425_v26  ;;  %v4433_v61 = vand.u32 2147483647, %v10911_v4 }
 0x514   : >> { %v4435_v29 = vand.u32 2147483648, %v10911_v4  ;;  %6321 = vrcp.f32 %v10939_v47  ;;  %v6318_v54 = vpop.eup %6317  ;;  %vm4419_vm6 = vcmp.eq.f32.partialorder %v4418_v24, 8.507059e+37  ;;  %vm4430_vm7 = vweird.f32 %v6314_v10 }
 0x515   : >> { %4694 = vmatmul.bf16.gmra.mxu1 %v4594_v19  ;;  %v4417_v57 = vsel %vm4416_vm13, %v6312_v38, %v4413_v15  ;;  %v4427_v28 = vmul.f32 %v6314_v10, %v4426_v35  ;;  %v10951_v52 = vadd.f32 1.0, %v6318_v54  ;;  %v10954_v8 = vadd.f32 %v10025_v30, %v3911_v37  ;;  %v12585_v54 = vld [vmem:[#allocation84_spill] sm:$0xff] }
 0x516   : >> { %v4422_v9 = vsel %vm4419_vm6, %v4421_v16, %v4417_v57  ;;  %v10956_v14 = vpop.eup %6319  ;;  %vm4429_vm14 = vweird.f32 %v10911_v4  ;;  %v5815_v45 = vmul.f32 -1.442695, %v10946_v22  ;;  %v3797_v32 = vsub.f32 1.5, %v3796_v17 }
 0x517   : >> { %v4428_v3 = vadd.f32 %v6314_v10, %v4427_v28  ;;  %vm4431_vm8 = vmor %vm4429_vm14, %vm4430_vm7  ;;  %vm4434_vm11 = vcmp.eq.f32.partialorder %v4433_v61, 8.507059e+37  ;;  %v4436_v18 = vor.u32 1.1754944e-38, %v4435_v29  ;;  %6323 = vrcp.f32 %v10951_v52 }
 0x518   : >> { %v4581_v12 = vmul.f32 %v4422_v9, %v10815_v0  ;;  %6325 = vpow2.f32 %v5815_v45  ;;  %v5816_v62 = vmul.f32 -1.442695, %v10954_v8  ;;  %v3804_v4 = vmul.f32 %v10956_v14, %v10927_v5 }
 0x519   : >> { %v4432_v43 = vsel %vm4431_vm8, %v6314_v10, %v4428_v3  ;;  %v3480_v40 = vmul.f32 %v3428_v63, %v8135_v13  ;;  %v3798_v31 = vmul.f32 %v10758_v7, %v3797_v32  ;;  %vm3800_vm1 = vweird.f32 %v10758_v7 }
 0x51a   : >> { %v6322_v38 = vpop.eup %6321  ;;  %v4437_v44 = vsel %vm4434_vm11, %v4436_v18, %v4432_v43  ;;  %6327 = vpow2.f32 %v5816_v62  ;;  %v3479_v56 = vmul.f32 %v3426_v53, %v8135_v13  ;;  %vm3799_vm0 = vweird.f32 %v10643_v39  ;;  %v3462_v62 = vpop.xlane.xlu0 %3461 }
 0x51b   : >> { %v4582_v42 = vmul.f32 %v4437_v44, %v10818_v21  ;;  %v4200_v46 = vmul.f32 %v6322_v38, %v10939_v47  ;;  %v10970_v0 = vadd.f32 1e-05, %v3480_v40  ;;  %v3805_v60 = vmul.f32 %v10956_v14, %v3804_v4  ;;  %vm10977_vm2 = vmor %vm3799_vm0, %vm3800_vm1 }
 0x51c   : >> { %v10975_v2 = vadd.f32 1e-05, %v3479_v56  ;;  %vm4205_vm3 = vweird.f32 %v6322_v38  ;;  %v3802_v39 = vsel %vm10977_vm2, %v10758_v7, %v3798_v31  ;;  %v4210_v6 = vand.u32 2147483648, %v10939_v47 }
 0x51d   : >> { %v4602_v59 = vpack.c.bf16 %v4582_v42, %v4581_v12  ;;  %v4201_v25 = vsub.f32 1.0, %v4200_v46  ;;  %v6324_v34 = vpop.eup %6323  ;;  %6329 = vrsqrt.f32 %v10970_v0  ;;  %vm4204_vm4 = vweird.f32 %v10939_v47 }
 0x51e   : >> { %v6326_v21 = vpop.eup %6325  ;;  %v4215_v10 = vmul.f32 %v6324_v34, %v10951_v52  ;;  %6331 = vrsqrt.f32 %v10975_v2  ;;  %v4208_v41 = vand.u32 2147483647, %v10939_v47  ;;  %v3806_v24 = vmul.f32 0.5, %v3805_v60  ;;  %vm10992_vm10 = vmor %vm4204_vm4, %vm4205_vm3 }
 0x51f   : >> { %4734 = vmatmul.bf16.gmra.mxu3 %v4602_v59  ;;  %v4202_v36 = vmul.f32 %v6322_v38, %v4201_v25  ;;  %v10987_v1 = vadd.f32 1.0, %v6326_v21  ;;  %v4225_v7 = vand.u32 2147483648, %v10951_v52  ;;  %vm4220_vm12 = vweird.f32 %v6324_v34  ;;  %v3430_v25 = vpop.xlane.xlu2 %3429 }
 0x520   : >> { %v6328_v20 = vpop.eup %6327  ;;  %v4216_v49 = vsub.f32 1.0, %v4215_v10  ;;  %v4223_v37 = vand.u32 2147483647, %v10951_v52  ;;  %v4211_v47 = vor.u32 1.1754944e-38, %v4210_v6  ;;  %vm4209_vm5 = vcmp.eq.f32.partialorder %v4208_v41, 8.507059e+37 }
 0x521   : >> { %v4203_v11 = vadd.f32 %v6322_v38, %v4202_v36  ;;  %v10997_v48 = vadd.f32 1.0, %v6328_v20  ;;  %6333 = vrcp.f32 %v10987_v1  ;;  %vm4219_vm15 = vweird.f32 %v10951_v52 }
 0x522   : >> { %v4217_v15 = vmul.f32 %v6324_v34, %v4216_v49  ;;  %v3807_v57 = vsub.f32 1.5, %v3806_v24  ;;  %vm4221_vm9 = vmor %vm4219_vm15, %vm4220_vm12  ;;  %v4226_v29 = vor.u32 1.1754944e-38, %v4225_v7  ;;  %v3879_v28 = vmul.f32 %v3802_v39, %v12585_v54  ;;  %v3464_v39 = vpop.xlane.xlu1 %3463  ;;  %v11044_v24 = vld [vmem:[%s10481_s4] ss:$0 sm:$0xff] }
 0x523   : >> { %v4207_v19 = vsel %vm10992_vm10, %v6322_v38, %v4203_v11  ;;  %6335 = vrcp.f32 %v10997_v48  ;;  %v11004_v17 = vpop.eup %6329  ;;  %vm4224_vm13 = vcmp.eq.f32.partialorder %v4223_v37, 8.507059e+37  ;;  %vm3810_vm6 = vweird.f32 %v10956_v14 }
 0x524   : >> { %v4218_v16 = vadd.f32 %v6324_v34, %v4217_v15  ;;  %v11007_v35 = vpop.eup %6331  ;;  %v4212_v61 = vsel %vm4209_vm5, %v4211_v47, %v4207_v19  ;;  %v3644_v32 = vmul.f32 %v11004_v17, %v10970_v0  ;;  %v3808_v53 = vmul.f32 %v10956_v14, %v3807_v57 }
 0x525   : >> { %v4567_v18 = vmul.f32 %v4212_v61, %v10909_v33  ;;  %v3634_v12 = vmul.f32 %v11007_v35, %v10975_v2  ;;  %v3912_v38 = vmul.f32 %v10014_v55, %v3879_v28  ;;  %vm3809_vm7 = vweird.f32 %v10927_v5 }
 0x526   : >> { %v4222_v9 = vsel %vm4221_vm9, %v6324_v34, %v4218_v16  ;;  %v4450_v40 = vand.u32 2147483648, %v10987_v1  ;;  %v3645_v42 = vmul.f32 %v11004_v17, %v3644_v32  ;;  %v3497_v46 = vmul.f32 %v3462_v62, %v8135_v13  ;;  %vm11026_vm14 = vmor %vm3809_vm7, %vm3810_vm6  ;;  %v6406_v16 = vld [vmem:[#allocation3 + $0xa8] sm:$0xff] }
 0x527   : >> { %v6334_v3 = vpop.eup %6333  ;;  %v4227_v45 = vsel %vm4224_vm13, %v4226_v29, %v4222_v9  ;;  %v3635_v59 = vmul.f32 %v11007_v35, %v3634_v12  ;;  %v3812_v34 = vsel %vm11026_vm14, %v10956_v14, %v3808_v53  ;;  %vm4444_vm11 = vweird.f32 %v10987_v1  ;;  %v12588_v32 = vld [vmem:[#allocation97_spill] sm:$0xff] }
 0x528   : >> { %v4568_v43 = vmul.f32 %v4227_v45, %v10914_v23  ;;  %v4440_v52 = vmul.f32 %v6334_v3, %v10987_v1  ;;  %v4448_v23 = vand.u32 2147483647, %v10987_v1  ;;  %vm4445_vm8 = vweird.f32 %v6334_v3  ;;  %v3468_v45 = vpop.xlane.xlu2 %3467 }
 0x529   : >> { %v6336_v63 = vpop.eup %6335  ;;  %v4465_v60 = vand.u32 2147483648, %v10997_v48  ;;  %v11037_v21 = vadd.f32 %v10025_v30, %v3912_v38  ;;  %v4463_v10 = vand.u32 2147483647, %v10997_v48  ;;  %vm4446_vm0 = vmor %vm4444_vm11, %vm4445_vm8  ;;  %v4451_v6 = vor.u32 1.1754944e-38, %v4450_v40 }
 0x52a   : >> { %v4595_v44 = vpack.c.bf16 %v4568_v43, %v4567_v18  ;;  %v4441_v4 = vsub.f32 1.0, %v4440_v52  ;;  %v4455_v33 = vmul.f32 %v6336_v63, %v10997_v48  ;;  %vm4460_vm1 = vweird.f32 %v6336_v63 }
 0x52b   : >> { %vm4449_vm2 = vcmp.eq.f32.partialorder %v4448_v23, 8.507059e+37  ;;  %v3646_v20 = vmul.f32 0.5, %v3645_v42  ;;  %v11040_v11 = vadd.f32 1e-05, %v3497_v46  ;;  %vm4459_vm3 = vweird.f32 %v10997_v48  ;;  %v3432_v48 = vpop.xlane.xlu0 %3431  ;;  %v6407_v46 = vld [vmem:[#allocation3 + $0xd0] sm:$0xff] }
 0x52c   : >> { %4699 = vmatmul.bf16.gmra.mxu1 %v4595_v44  ;;  %v4442_v56 = vmul.f32 %v6334_v3, %v4441_v4  ;;  %v4456_v5 = vsub.f32 1.0, %v4455_v33  ;;  %v3636_v49 = vmul.f32 0.5, %v3635_v59  ;;  %vm4461_vm4 = vmor %vm4459_vm3, %vm4460_vm1  ;;  %v4466_v7 = vor.u32 1.1754944e-38, %v4465_v60  ;;  %v12591_v59 = vld [vmem:[#allocation96_spill] sm:$0xff] }
 0x52d   : >> { %v3498_v19 = vmul.f32 %v3464_v39, %v8135_v13  ;;  %v5817_v15 = vmul.f32 -1.442695, %v11037_v21  ;;  %vm4464_vm10 = vcmp.eq.f32.partialorder %v4463_v10, 8.507059e+37  ;;  %v3647_v29 = vsub.f32 1.5, %v3646_v20 }
 0x52e   : >> { %v4443_v58 = vadd.f32 %v6334_v3, %v4442_v56  ;;  %v4457_v36 = vmul.f32 %v6336_v63, %v4456_v5  ;;  %v4680_v14 = vpop.f32.mrf.mxu1  ;;  %v3637_v28 = vsub.f32 1.5, %v3636_v49  ;;  %v3481_v9 = vmul.f32 %v3430_v25, %v8135_v13  ;;  %v12592_v25 = vld [vmem:[#allocation58_spill] sm:$0xff] }
 0x52f   : >> { %v4760_v57 = vadd.f32 %v6406_v16, %v4680_v14  ;;  %v3880_v18 = vmul.f32 %v3812_v34, %v12588_v32  ;;  %6337 = vpow2.f32 %v5817_v15  ;;  %v11054_v52 = vadd.f32 1e-05, %v3498_v19 }
 0x530   : >> { %v4447_v1 = vsel %vm4446_vm0, %v6334_v3, %v4443_v58  ;;  %v4458_v41 = vadd.f32 %v6336_v63, %v4457_v36  ;;  %6339 = vrsqrt.f32 %v11040_v11  ;;  %vm3650_vm12 = vweird.f32 %v11004_v17  ;;  %v2449_v56 = vpop.xlane.xlu2 %2448  ;;  %v3466_v58 = vpop.xlane.xlu1 %3465 }
 0x531   : >> { %v4452_v26 = vsel %vm4449_vm2, %v4451_v6, %v4447_v1  ;;  %v4797_v3 = vadd.f32 %v11044_v24, %v4760_v57  ;;  %v3648_v12 = vmul.f32 %v11004_v17, %v3647_v29  ;;  %v3638_v62 = vmul.f32 %v11007_v35, %v3637_v28 }
 0x532   : >> { %v4462_v37 = vsel %vm4461_vm4, %v6336_v63, %v4458_v41  ;;  %v4583_v47 = vmul.f32 %v4452_v26, %v10946_v22  ;;  %v3482_v22 = vmul.f32 %v3432_v48, %v8135_v13  ;;  %vm3640_vm5 = vweird.f32 %v11007_v35 }
 0x533   : >> { %v4467_v61 = vsel %vm4464_vm10, %v4466_v7, %v4462_v37  ;;  %4829 = vst [vmem:[#allocation3 + $0xa8] sm:$0xff] %v4797_v3  ;;  %v11063_v63 = vadd.f32 1e-05, %v3481_v9  ;;  %vm3649_vm15 = vweird.f32 %v10970_v0  ;;  %vm3639_vm13 = vweird.f32 %v10975_v2  ;;  %v12593_v37 = vld [vmem:[#allocation73_spill] sm:$0xff] }
 0x534   : >> { %v4584_v54 = vmul.f32 %v4467_v61, %v10954_v8  ;;  %v3913_v8 = vmul.f32 %v10014_v55, %v3880_v18  ;;  %vm11069_vm9 = vmor %vm3649_vm15, %vm3650_vm12  ;;  %6341 = vrsqrt.f32 %v11054_v52  ;;  %v11075_v44 = vadd.f32 1e-05, %v3482_v22 }
 0x535   : >> { %v6338_v4 = vpop.eup %6337  ;;  %vm3641_vm6 = vmor %vm3639_vm13, %vm3640_vm5  ;;  %v3652_v0 = vsel %vm11069_vm9, %v11004_v17, %v3648_v12  ;;  %6343 = vrsqrt.f32 %v11063_v63  ;;  %v3500_v60 = vmul.f32 %v3468_v45, %v8135_v13  ;;  %v2459_v10 = vmul.f32 %v8135_v13, %v2449_v56 }
 0x536   : >> { %v4603_v43 = vpack.c.bf16 %v4584_v54, %v4583_v47  ;;  %v11067_v53 = vadd.f32 %v10025_v30, %v3913_v8  ;;  %v11078_v23 = vpop.eup %6339  ;;  %v3642_v40 = vsel %vm3641_vm6, %v11007_v35, %v3638_v62  ;;  %v11085_v42 = vadd.f32 1.0, %v6338_v4  ;;  %v4682_v2 = vpop.f32.mrf.mxu1 }
 0x537   : >> { %v4761_v31 = vadd.f32 %v6407_v46, %v4682_v2  ;;  %v3814_v5 = vmul.f32 %v11078_v23, %v11040_v11  ;;  %v3863_v17 = vmul.f32 %v3642_v40, %v12591_v59  ;;  %v3864_v35 = vmul.f32 %v3652_v0, %v12592_v25 }
 0x538   : >> { %4739 = vmatmul.bf16.gmra.mxu3 %v4603_v43  ;;  %v5818_v33 = vmul.f32 -1.442695, %v11067_v53  ;;  %v3499_v26 = vmul.f32 %v3466_v58, %v8135_v13  ;;  %v11112_v15 = vadd.f32 1e-05, %v3500_v60  ;;  %v11115_v47 = vsub.f32 %v12593_v37, %v2459_v10 }
 0x539   : >> { %v4798_v36 = vadd.f32 %v11044_v24, %v4761_v31  ;;  %v3815_v14 = vmul.f32 %v11078_v23, %v3814_v5  ;;  %v3896_v1 = vmul.f32 %v10014_v55, %v3863_v17  ;;  %v3897_v41 = vmul.f32 %v10014_v55, %v3864_v35 }
 0x53a   : >> { %6345 = vpow2.f32 %v5818_v33  ;;  %v11093_v34 = vpop.eup %6341  ;;  %v11131_v9 = vadd.f32 1e-05, %v3499_v26  ;;  %v2463_v18 = vmul.f32 %v11115_v47, %v11115_v47  ;;  %vm3820_vm7 = vweird.f32 %v11078_v23 }
 0x53b   : >> { %6347 = vrsqrt.f32 %v11075_v44  ;;  %v11098_v39 = vpop.eup %6343  ;;  %v3824_v20 = vmul.f32 %v11093_v34, %v11054_v52  ;;  %4830 = vst [vmem:[#allocation3 + $0xd0] sm:$0xff] %v4798_v36  ;;  %v11118_v16 = vadd.f32 %v10025_v30, %v3896_v1  ;;  %v11121_v57 = vadd.f32 %v10025_v30, %v3897_v41 }
 0x53c   : >> { %6349 = vrcp.f32 %v11085_v42  ;;  %v3816_v48 = vmul.f32 0.5, %v3815_v14  ;;  %v3654_v54 = vmul.f32 %v11098_v39, %v11063_v63  ;;  %2465 = vadd.xlane.f32.xlu1 %v2463_v18  ;;  %vm3830_vm14 = vweird.f32 %v11093_v34 }
 0x53d   : >> { %v3825_v29 = vmul.f32 %v11093_v34, %v3824_v20  ;;  %v5801_v45 = vmul.f32 -1.442695, %v11118_v16  ;;  %v5802_v32 = vmul.f32 -1.442695, %v11121_v57  ;;  %vm3819_vm11 = vweird.f32 %v11040_v11  ;;  %v6408_v20 = vld [vmem:[#allocation3 + $0x88] sm:$0xff] }
 0x53e   : >> { %v3817_v12 = vsub.f32 1.5, %v3816_v48  ;;  %v3655_v62 = vmul.f32 %v11098_v39, %v3654_v54  ;;  %v4478_v31 = vand.u32 2147483647, %v11085_v42  ;;  %v4480_v56 = vand.u32 2147483648, %v11085_v42  ;;  %vm11191_vm15 = vmor %vm3819_vm11, %vm3820_vm7 }
 0x53f   : >> { %v3826_v8 = vmul.f32 0.5, %v3825_v29  ;;  %vm4474_vm1 = vweird.f32 %v11085_v42  ;;  %vm3829_vm5 = vweird.f32 %v11054_v52  ;;  %vm3660_vm13 = vweird.f32 %v11098_v39 }
 0x540   : >> { %v6346_v6 = vpop.eup %6345  ;;  %v11152_v46 = vmul.f32 %v11078_v23, %v3817_v12  ;;  %v3656_v59 = vmul.f32 0.5, %v3655_v62  ;;  %vm4479_vm3 = vcmp.eq.f32.partialorder %v4478_v31, 8.507059e+37  ;;  %v4481_v29 = vor.u32 1.1754944e-38, %v4480_v56  ;;  %vm11204_vm9 = vmor %vm3829_vm5, %vm3830_vm14 }
 0x541   : >> { %v11105_v49 = vpop.eup %6347  ;;  %v11108_v7 = vadd.f32 1.0, %v6346_v6  ;;  %v3827_v2 = vsub.f32 1.5, %v3826_v8 }
 0x542   : >> { %v11110_v19 = vpop.eup %6349  ;;  %v3664_v28 = vmul.f32 %v11105_v49, %v11075_v44  ;;  %v3657_v18 = vsub.f32 1.5, %v3656_v59  ;;  %vm3670_vm6 = vweird.f32 %v11105_v49 }
 0x543   : >> { %v4470_v61 = vmul.f32 %v11110_v19, %v11085_v42  ;;  %6351 = vrcp.f32 %v11108_v7  ;;  %vm4475_vm8 = vweird.f32 %v11110_v19  ;;  %v4493_v36 = vand.u32 2147483647, %v11108_v7 }
 0x544   : >> { %6353 = vrsqrt.f32 %v11112_v15  ;;  %v11138_v43 = vpop.xlane.xlu0 %3433  ;;  %v3665_v38 = vmul.f32 %v11105_v49, %v3664_v28  ;;  %vm11160_vm0 = vmor %vm4474_vm1, %vm4475_vm8  ;;  %v4495_v10 = vand.u32 2147483648, %v11108_v7  ;;  %vm4489_vm4 = vweird.f32 %v11108_v7 }
 0x545   : >> { %v4471_v3 = vsub.f32 1.0, %v4470_v61  ;;  %6355 = vpow2.f32 %v5801_v45  ;;  %vm4494_vm12 = vcmp.eq.f32.partialorder %v4493_v36, 8.507059e+37  ;;  %v3483_v52 = vmul.f32 %v11138_v43, %v8135_v13  ;;  %v6409_v43 = vld [vmem:[#allocation3 + $0x58] sm:$0xff] }
 0x546   : >> { %6357 = vpow2.f32 %v5802_v32  ;;  %v3666_v17 = vmul.f32 0.5, %v3665_v38  ;;  %v3828_v32 = vmul.f32 %v11093_v34, %v3827_v2  ;;  %v11217_v59 = vmul.f32 %v11098_v39, %v3657_v18 }
 0x547   : >> { %v4472_v22 = vmul.f32 %v11110_v19, %v4471_v3  ;;  %6359 = vrsqrt.f32 %v11131_v9  ;;  %v4496_v3 = vor.u32 1.1754944e-38, %v4495_v10  ;;  %v3436_v31 = vpop.xlane.xlu1 %3435 }
 0x548   : >> { %v3484_v36 = vmul.f32 %v3436_v31, %v8135_v13 }
 0x549   : >> { %v6352_v4 = vpop.eup %6351  ;;  %v4473_v33 = vadd.f32 %v11110_v19, %v4472_v22 }
 0x54a   : >> { %v4485_v0 = vmul.f32 %v6352_v4, %v11108_v7  ;;  %v11149_v40 = vpop.eup %6353  ;;  %vm4490_vm2 = vweird.f32 %v6352_v4  ;;  %v3667_v7 = vsub.f32 1.5, %v3666_v17 }
 0x54b   : >> { %v6356_v5 = vpop.eup %6355  ;;  %v4477_v42 = vsel %vm11160_vm0, %v11110_v19, %v4473_v33  ;;  %v3844_v61 = vmul.f32 %v11149_v40, %v11112_v15  ;;  %vm4491_vm10 = vmor %vm4489_vm4, %vm4490_vm2  ;;  %vm3659_vm4 = vweird.f32 %v11063_v63 }
 0x54c   : >> { %v4486_v25 = vsub.f32 1.0, %v4485_v0  ;;  %v6358_v60 = vpop.eup %6357  ;;  %v11166_v6 = vadd.f32 1.0, %v6356_v5  ;;  %v2451_v1 = vpop.xlane.xlu0 %2450  ;;  %v4482_v28 = vsel %vm4479_vm3, %v4481_v29, %v4477_v42 }
 0x54d   : >> { %v11168_v41 = vpop.eup %6359  ;;  %v11173_v37 = vadd.f32 1.0, %v6358_v60  ;;  %v2460_v54 = vmul.f32 %v8135_v13, %v2451_v1  ;;  %v3845_v8 = vmul.f32 %v11149_v40, %v3844_v61  ;;  %v4585_v38 = vmul.f32 %v4482_v28, %v11037_v21  ;;  %v12601_v28 = vld [vmem:[#allocation89_spill] sm:$0xff] }
 0x54e   : >> { %v4487_v26 = vmul.f32 %v6352_v4, %v4486_v25  ;;  %6361 = vrcp.f32 %v11166_v6  ;;  %v3834_v19 = vmul.f32 %v11168_v41, %v11131_v9  ;;  %v3822_v21 = vsel %vm11191_vm15, %v11078_v23, %v11152_v46 }
 0x54f   : >> { %v4720_v35 = vpop.f32.mrf.mxu3  ;;  %6363 = vrcp.f32 %v11173_v37  ;;  %v11200_v0 = vsub.f32 %v12549_v50, %v2460_v54  ;;  %v3832_v50 = vsel %vm11204_vm9, %v11093_v34, %v3828_v32  ;;  %v11223_v23 = vmul.f32 0.5, %v3845_v8  ;;  %v12600_v54 = vld [vmem:[#allocation61_spill] sm:$0xff] }
 0x550   : >> { %v4776_v14 = vadd.f32 %v6408_v20, %v4720_v35  ;;  %v4488_v48 = vadd.f32 %v6352_v4, %v4487_v26  ;;  %v11221_v35 = vmul.f32 %v11105_v49, %v3667_v7  ;;  %v11228_v34 = vadd.f32 1e-05, %v3483_v52 }
 0x551   : >> { %v2464_v10 = vmul.f32 %v11200_v0, %v11200_v0  ;;  %v4240_v1 = vand.u32 2147483648, %v11166_v6  ;;  %v4253_v61 = vand.u32 2147483647, %v11173_v37  ;;  %v4255_v29 = vand.u32 2147483648, %v11173_v37 }
 0x552   : >> { %v4813_v45 = vadd.f32 %v11044_v24, %v4776_v14  ;;  %v4492_v22 = vsel %vm4491_vm10, %v6352_v4, %v4488_v48  ;;  %v4238_v14 = vand.u32 2147483647, %v11166_v6  ;;  %vm4234_vm8 = vweird.f32 %v11166_v6  ;;  %vm11264_vm10 = vmor %vm3659_vm4, %vm3660_vm13 }
 0x553   : >> { %v4497_v12 = vsel %vm4494_vm12, %v4496_v3, %v4492_v22  ;;  %2467 = vadd.xlane.f32.xlu2 %v2464_v10  ;;  %v3882_v3 = vmul.f32 %v3832_v50, %v12601_v28  ;;  %vm4249_vm11 = vweird.f32 %v11173_v37  ;;  %v11244_v32 = vadd.f32 1e-05, %v3484_v36 }
 0x554   : >> { %4845 = vst [vmem:[#allocation3 + $0x88] sm:$0xff] %v4813_v45  ;;  %v4586_v4 = vmul.f32 %v4497_v12, %v11067_v53  ;;  %v6362_v2 = vpop.eup %6361  ;;  %v3835_v53 = vmul.f32 %v11168_v41, %v3834_v19  ;;  %v3881_v19 = vmul.f32 %v3822_v21, %v12600_v54  ;;  %v4241_v18 = vor.u32 1.1754944e-38, %v4240_v1 }
 0x555   : >> { %v6364_v5 = vpop.eup %6363  ;;  %v4230_v25 = vmul.f32 %v6362_v2, %v11166_v6  ;;  %vm4235_vm7 = vweird.f32 %v6362_v2  ;;  %v3915_v8 = vmul.f32 %v10014_v55, %v3882_v3  ;;  %vm4239_vm0 = vcmp.eq.f32.partialorder %v4238_v14, 8.507059e+37  ;;  %v6410_v6 = vld [vmem:[#allocation3 + $0x10] sm:$0xff] }
 0x556   : >> { %v4604_v17 = vpack.c.bf16 %v4586_v4, %v4585_v38  ;;  %v4245_v46 = vmul.f32 %v6364_v5, %v11173_v37  ;;  %v11234_v20 = vmul.f32 0.5, %v3835_v53  ;;  %vm4250_vm14 = vweird.f32 %v6364_v5  ;;  %vm4236_vm1 = vmor %vm4234_vm8, %vm4235_vm7 }
 0x557   : >> { %v4722_v33 = vpop.f32.mrf.mxu3  ;;  %v4231_v58 = vsub.f32 1.0, %v4230_v25  ;;  %v3914_v7 = vmul.f32 %v10014_v55, %v3881_v19  ;;  %vm4251_vm2 = vmor %vm4249_vm11, %vm4250_vm14  ;;  %vm4254_vm3 = vcmp.eq.f32.partialorder %v4253_v61, 8.507059e+37  ;;  %v4256_v62 = vor.u32 1.1754944e-38, %v4255_v29 }
 0x558   : >> { %v4777_v56 = vadd.f32 %v6409_v43, %v4722_v33  ;;  %4744 = vmatmul.bf16.gmra.mxu3 %v4604_v17  ;;  %v4246_v42 = vsub.f32 1.0, %v4245_v46  ;;  %6365 = vrsqrt.f32 %v11228_v34  ;;  %v11254_v53 = vadd.f32 %v10025_v30, %v3915_v8 }
 0x559   : >> { %v4232_v26 = vmul.f32 %v6362_v2, %v4231_v58  ;;  %v11249_v37 = vadd.f32 %v10025_v30, %v3914_v7  ;;  %6367 = vrsqrt.f32 %v11244_v32  ;;  %vm3669_vm12 = vweird.f32 %v11075_v44  ;;  %v6411_v58 = vld [vmem:[#allocation3 + $0x48] sm:$0xff]  ;;  %v6412_v7 = vld [vmem:[#allocation3 + $0x30] sm:$0xff] }
 0x55a   : >> { %v4814_v60 = vadd.f32 %v11044_v24, %v4777_v56  ;;  %v4247_v48 = vmul.f32 %v6364_v5, %v4246_v42  ;;  %v5820_v56 = vmul.f32 -1.442695, %v11254_v53  ;;  %vm11271_vm5 = vmor %vm3669_vm12, %vm3670_vm6  ;;  %v3662_v63 = vsel %vm11264_vm10, %v11098_v39, %v11217_v59  ;;  %v12606_v39 = vld [vmem:[#allocation59_spill] sm:$0xff]  ;;  %v12607_v59 = vld [vmem:[#allocation98_spill] sm:$0xff] }
 0x55b   : >> { %v4233_v45 = vadd.f32 %v6362_v2, %v4232_v26  ;;  %v5819_v43 = vmul.f32 -1.442695, %v11249_v37  ;;  %v3672_v44 = vsel %vm11271_vm5, %v11105_v49, %v11221_v35  ;;  %v3847_v50 = vsub.f32 1.5, %v11223_v23 }
 0x55c   : >> { %4846 = vst [vmem:[#allocation3 + $0x58] sm:$0xff] %v4814_v60  ;;  %v4248_v22 = vadd.f32 %v6364_v5, %v4247_v48  ;;  %v3837_v17 = vsub.f32 1.5, %v11234_v20  ;;  %vm3849_vm15 = vweird.f32 %v11112_v15  ;;  %vm3850_vm9 = vweird.f32 %v11149_v40 }
 0x55d   : >> { %v4237_v12 = vsel %vm4236_vm1, %v6362_v2, %v4233_v45  ;;  %6369 = vpow2.f32 %v5819_v43  ;;  %vm3840_vm13 = vweird.f32 %v11168_v41  ;;  %v3865_v49 = vmul.f32 %v3662_v63, %v12606_v39  ;;  %vm11307_vm6 = vmor %vm3849_vm15, %vm3850_vm9 }
 0x55e   : >> { %v4242_v4 = vsel %vm4239_vm0, %v4241_v18, %v4237_v12  ;;  %v4252_v52 = vsel %vm4251_vm2, %v6364_v5, %v4248_v22  ;;  %6371 = vpow2.f32 %v5820_v56  ;;  %v11285_v25 = vpop.eup %6365  ;;  %v3866_v35 = vmul.f32 %v3672_v44, %v12607_v59  ;;  %v6414_v59 = vld [vmem:[#allocation3 + $0xc8] sm:$0xff] }
 0x55f   : >> { %v4257_v11 = vsel %vm4254_vm3, %v4256_v62, %v4252_v52  ;;  %v4569_v21 = vmul.f32 %v4242_v4, %v11118_v16  ;;  %v11287_v60 = vpop.eup %6367  ;;  %v3848_v10 = vmul.f32 %v11149_v40, %v3847_v50  ;;  %v3838_v20 = vmul.f32 %v11168_v41, %v3837_v17  ;;  %v12610_v62 = vld [vmem:[#allocation100_spill] sm:$0xff]  ;;  %v12611_v4 = vld [vmem:[#allocation63_spill] sm:$0xff] }
 0x560   : >> { %v4570_v2 = vmul.f32 %v4257_v11, %v11121_v57  ;;  %v3674_v14 = vmul.f32 %v11285_v25, %v11228_v34  ;;  %v3684_v26 = vmul.f32 %v11287_v60, %v11244_v32  ;;  %v3898_v29 = vmul.f32 %v10014_v55, %v3865_v49 }
 0x561   : >> { %v3899_v48 = vmul.f32 %v10014_v55, %v3866_v35  ;;  %vm3839_vm7 = vweird.f32 %v11131_v9  ;;  %v3852_v28 = vsel %vm11307_vm6, %v11149_v40, %v3848_v10  ;;  %vm3680_vm12 = vweird.f32 %v11285_v25 }
 0x562   : >> { %v4685_v38 = vpop.f32.mrf.mxu1  ;;  %v4596_v5 = vpack.c.bf16 %v4570_v2, %v4569_v21  ;;  %vm3841_vm14 = vmor %vm3839_vm7, %vm3840_vm13  ;;  %v3675_v3 = vmul.f32 %v11285_v25, %v3674_v14  ;;  %v3685_v9 = vmul.f32 %v11287_v60, %v3684_v26  ;;  %v11325_v18 = vadd.f32 %v10025_v30, %v3898_v29 }
 0x563   : >> { %v4762_v33 = vadd.f32 %v6410_v6, %v4685_v38  ;;  %v6370_v23 = vpop.eup %6369  ;;  %v3842_v15 = vsel %vm3841_vm14, %v11168_v41, %v3838_v20  ;;  %v11328_v22 = vadd.f32 %v10025_v30, %v3899_v48  ;;  %v3884_v52 = vmul.f32 %v3852_v28, %v12611_v4 }
 0x564   : >> { %4704 = vmatmul.bf16.gmra.mxu1 %v4596_v5  ;;  %v6372_v42 = vpop.eup %6371  ;;  %v11301_v61 = vadd.f32 1.0, %v6370_v23  ;;  %v5803_v12 = vmul.f32 -1.442695, %v11325_v18  ;;  %v3883_v38 = vmul.f32 %v3842_v15, %v12610_v62  ;;  %v11337_v11 = vmul.f32 0.5, %v3685_v9 }
 0x565   : >> { %v4799_v31 = vadd.f32 %v11044_v24, %v4762_v33  ;;  %v11312_v19 = vadd.f32 1.0, %v6372_v42  ;;  %v5804_v40 = vmul.f32 -1.442695, %v11328_v22  ;;  %v11335_v33 = vmul.f32 0.5, %v3675_v3 }
 0x566   : >> { %6373 = vrcp.f32 %v11301_v61  ;;  %vm4504_vm8 = vweird.f32 %v11301_v61  ;;  %v4508_v43 = vand.u32 2147483647, %v11301_v61  ;;  %v4510_v56 = vand.u32 2147483648, %v11301_v61 }
 0x567   : >> { %4831 = vst [vmem:[#allocation3 + $0x10] sm:$0xff] %v4799_v31  ;;  %6375 = vrcp.f32 %v11312_v19  ;;  %v3916_v31 = vmul.f32 %v10014_v55, %v3883_v38  ;;  %v3917_v5 = vmul.f32 %v10014_v55, %v3884_v52  ;;  %vm4519_vm11 = vweird.f32 %v11312_v19 }
 0x568   : >> { %6377 = vpow2.f32 %v5803_v12  ;;  %v4523_v44 = vand.u32 2147483647, %v11312_v19  ;;  %v4525_v39 = vand.u32 2147483648, %v11312_v19  ;;  %v4511_v28 = vor.u32 1.1754944e-38, %v4510_v56 }
 0x569   : >> { %6379 = vpow2.f32 %v5804_v40  ;;  %v11349_v50 = vadd.f32 %v10025_v30, %v3916_v31  ;;  %v11353_v49 = vadd.f32 %v10025_v30, %v3917_v5  ;;  %vm4509_vm3 = vcmp.eq.f32.partialorder %v4508_v43, 8.507059e+37 }
 0x56a   : >> { %v4687_v46 = vpop.f32.mrf.mxu1  ;;  %vm4524_vm10 = vcmp.eq.f32.partialorder %v4523_v44, 8.507059e+37  ;;  %v3687_v12 = vsub.f32 1.5, %v11337_v11  ;;  %vm3690_vm5 = vweird.f32 %v11287_v60  ;;  %vm3679_vm15 = vweird.f32 %v11228_v34 }
 0x56b   : >> { %v4763_v36 = vadd.f32 %v6411_v58, %v4687_v46  ;;  %v6413_v46 = vld [vmem:[#allocation3 + $0x60] sm:$0xff]  ;;  %v5821_v10 = vmul.f32 -1.442695, %v11349_v50  ;;  %v5822_v42 = vmul.f32 -1.442695, %v11353_v49  ;;  %vm3689_vm9 = vweird.f32 %v11244_v32  ;;  %vm11393_vm13 = vmor %vm3679_vm15, %vm3680_vm12 }
 0x56c   : >> { %v6374_v6 = vpop.eup %6373  ;;  %vm11403_vm6 = vmor %vm3689_vm9, %vm3690_vm5 }
 0x56d   : >> { %v4800_v1 = vadd.f32 %v11044_v24, %v4763_v36  ;;  %v6376_v21 = vpop.eup %6375  ;;  %v4500_v2 = vmul.f32 %v6374_v6, %v11301_v61  ;;  %vm4505_vm1 = vweird.f32 %v6374_v6  ;;  %6381 = vpow2.f32 %v5821_v10 }
 0x56e   : >> { %v4515_v16 = vmul.f32 %v6376_v21, %v11312_v19  ;;  %v6378_v20 = vpop.eup %6377  ;;  %vm4520_vm0 = vweird.f32 %v6376_v21  ;;  %vm4506_vm2 = vmor %vm4504_vm8, %vm4505_vm1  ;;  %6383 = vpow2.f32 %v5822_v42  ;;  %v3677_v61 = vsub.f32 1.5, %v11335_v33  ;;  %v6415_v19 = vld [vmem:[#allocation3 + $0x28] sm:$0xff] }
 0x56f   : >> { %4832 = vst [vmem:[#allocation3 + $0x48] sm:$0xff] %v4800_v1  ;;  %v4501_v63 = vsub.f32 1.0, %v4500_v2  ;;  %v6380_v26 = vpop.eup %6379  ;;  %v11359_v54 = vadd.f32 1.0, %v6378_v20  ;;  %vm4521_vm4 = vmor %vm4519_vm11, %vm4520_vm0 }
 0x570   : >> { %v4516_v36 = vsub.f32 1.0, %v4515_v16  ;;  %v11363_v3 = vadd.f32 1.0, %v6380_v26  ;;  %v11379_v11 = vmul.f32 %v11285_v25, %v3677_v61 }
 0x571   : >> { %v4502_v23 = vmul.f32 %v6374_v6, %v4501_v63  ;;  %6385 = vrcp.f32 %v11359_v54  ;;  %v4270_v63 = vand.u32 2147483648, %v11359_v54  ;;  %vm4264_vm7 = vweird.f32 %v11359_v54 }
 0x572   : >> { %v4725_v45 = vpop.f32.mrf.mxu3  ;;  %v4517_v1 = vmul.f32 %v6376_v21, %v4516_v36  ;;  %6387 = vrcp.f32 %v11363_v3  ;;  %v4283_v32 = vand.u32 2147483647, %v11363_v3  ;;  %v4285_v36 = vand.u32 2147483648, %v11363_v3 }
 0x573   : >> { %v4778_v8 = vadd.f32 %v6412_v7, %v4725_v45  ;;  %v4503_v48 = vadd.f32 %v6374_v6, %v4502_v23  ;;  %v4526_v45 = vor.u32 1.1754944e-38, %v4525_v39  ;;  %v6382_v52 = vpop.eup %6381  ;;  %v3682_v39 = vsel %vm11393_vm13, %v11285_v25, %v11379_v11 }
 0x574   : >> { %v4518_v15 = vadd.f32 %v6376_v21, %v4517_v1  ;;  %v11376_v31 = vadd.f32 1.0, %v6382_v52  ;;  %vm4279_vm11 = vweird.f32 %v11363_v3  ;;  %v4271_v42 = vor.u32 1.1754944e-38, %v4270_v63 }
 0x575   : >> { %v4815_v41 = vadd.f32 %v11044_v24, %v4778_v8  ;;  %v4507_v9 = vsel %vm4506_vm2, %v6374_v6, %v4503_v48  ;;  %v6384_v6 = vpop.eup %6383  ;;  %vm11424_vm0 = vcmp.eq.f32.partialorder %v4283_v32, 8.507059e+37  ;;  %v4286_v26 = vor.u32 1.1754944e-38, %v4285_v36 }
 0x576   : >> { %v4512_v7 = vsel %vm4509_vm3, %v4511_v28, %v4507_v9  ;;  %v4522_v8 = vsel %vm4521_vm4, %v6376_v21, %v4518_v15  ;;  %6389 = vrcp.f32 %v11376_v31  ;;  %vm4534_vm3 = vweird.f32 %v11376_v31 }
 0x577   : >> { %4847 = vst [vmem:[#allocation3 + $0x30] sm:$0xff] %v4815_v41  ;;  %v4527_v40 = vsel %vm4524_vm10, %v4526_v45, %v4522_v8  ;;  %v4587_v41 = vmul.f32 %v4512_v7, %v11249_v37  ;;  %v6386_v33 = vpop.eup %6385  ;;  %v11382_v37 = vmul.f32 %v11287_v60, %v3687_v12  ;;  %v4540_v9 = vand.u32 2147483648, %v11376_v31 }
 0x578   : >> { %v4588_v38 = vmul.f32 %v4527_v40, %v11254_v53  ;;  %v11385_v53 = vadd.f32 1.0, %v6384_v6  ;;  %v6388_v43 = vpop.eup %6387  ;;  %v4260_v56 = vmul.f32 %v6386_v33, %v11359_v54  ;;  %vm4265_vm14 = vweird.f32 %v6386_v33  ;;  %v6418_v6 = vld [vmem:[#allocation3 + $0x40] sm:$0xff] }
 0x579   : >> { %v4275_v34 = vmul.f32 %v6388_v43, %v11363_v3  ;;  %vm4280_vm1 = vweird.f32 %v6388_v43  ;;  %vm4266_vm2 = vmor %vm4264_vm7, %vm4265_vm14 }
 0x57a   : >> { %v4690_v57 = vpop.f32.mrf.mxu1  ;;  %v4727_v17 = vpop.f32.mrf.mxu3  ;;  %v4605_v21 = vpack.c.bf16 %v4588_v38, %v4587_v41  ;;  %6391 = vrcp.f32 %v11385_v53  ;;  %vm4281_vm4 = vmor %vm4279_vm11, %vm4280_vm1  ;;  %v4553_v45 = vand.u32 2147483647, %v11385_v53  ;;  %v4555_v7 = vand.u32 2147483648, %v11385_v53  ;;  %v6417_v38 = vld [vmem:[#allocation3 + $0x90] sm:$0xff] }
 0x57b   : >> { %v4764_v58 = vadd.f32 %v6413_v46, %v4690_v57  ;;  %v4779_v35 = vadd.f32 %v6414_v59, %v4727_v17  ;;  %v4268_v57 = vand.u32 2147483647, %v11359_v54  ;;  %v6416_v17 = vld [vmem:[#allocation3 + $0x18] sm:$0xff]  ;;  %v3692_v59 = vsel %vm11403_vm6, %v11287_v60, %v11382_v37 }
 0x57c   : >> { %4749 = vmatmul.bf16.gmra.mxu3 %v4605_v21  ;;  %v6390_v25 = vpop.eup %6389  ;;  %v4538_v54 = vand.u32 2147483647, %v11376_v31  ;;  %v3867_v37 = vmul.f32 %v3682_v39, %v10516_v51  ;;  %vm4549_vm9 = vweird.f32 %v11385_v53  ;;  %v4556_v32 = vor.u32 1.1754944e-38, %v4555_v7 }
 0x57d   : >> { %v4801_v14 = vadd.f32 %v11044_v24, %v4764_v58  ;;  %v4816_v29 = vadd.f32 %v11044_v24, %v4779_v35  ;;  %v4261_v58 = vsub.f32 1.0, %v4260_v56  ;;  %v4276_v35 = vsub.f32 1.0, %v4275_v34 }
 0x57e   : >> { %vm11419_vm8 = vcmp.eq.f32.partialorder %v4268_v57, 8.507059e+37  ;;  %v4530_v48 = vmul.f32 %v6390_v25, %v11376_v31  ;;  %vm4535_vm10 = vweird.f32 %v6390_v25  ;;  %v3900_v57 = vmul.f32 %v10014_v55, %v3867_v37  ;;  %v6423_v37 = vld [vmem:[#allocation3 + $0xe0] sm:$0xff] }
 0x57f   : >> { %4833 = vst [vmem:[#allocation3 + $0x60] sm:$0xff] %v4801_v14  ;;  %v4262_v10 = vmul.f32 %v6386_v33, %v4261_v58  ;;  %v4277_v14 = vmul.f32 %v6388_v43, %v4276_v35  ;;  %vm4536_vm5 = vmor %vm4534_vm3, %vm4535_vm10  ;;  %vm4539_vm15 = vcmp.eq.f32.partialorder %v4538_v54, 8.507059e+37  ;;  %vm4554_vm6 = vcmp.eq.f32.partialorder %v4553_v45, 8.507059e+37  ;;  %v6421_v54 = vld [vmem:[#allocation3 + $0xc0] sm:$0xff] }
 0x580   : >> { %4848 = vst [vmem:[#allocation3 + $0xc8] sm:$0xff] %v4816_v29  ;;  %v6392_v28 = vpop.eup %6391  ;;  %v4531_v40 = vsub.f32 1.0, %v4530_v48  ;;  %v11455_v44 = vadd.f32 %v10025_v30, %v3900_v57 }
 0x581   : >> { %v4263_v1 = vadd.f32 %v6386_v33, %v4262_v10  ;;  %v4278_v29 = vadd.f32 %v6388_v43, %v4277_v14  ;;  %v4545_v41 = vmul.f32 %v6392_v28, %v11385_v53  ;;  %vm4550_vm12 = vweird.f32 %v6392_v28 }
 0x582   : >> { %v4692_v62 = vpop.f32.mrf.mxu1  ;;  %vm4551_vm13 = vmor %vm4549_vm9, %vm4550_vm12  ;;  %v5805_v36 = vmul.f32 -1.442695, %v11455_v44 }
 0x583   : >> { %v4765_v4 = vadd.f32 %v6415_v19, %v4692_v62  ;;  %v4267_v15 = vsel %vm4266_vm2, %v6386_v33, %v4263_v1  ;;  %v4282_v61 = vsel %vm4281_vm4, %v6388_v43, %v4278_v29  ;;  %v4546_v33 = vsub.f32 1.0, %v4545_v41 }
 0x584   : >> { %v4272_v8 = vsel %vm11419_vm8, %v4271_v42, %v4267_v15  ;;  %v4287_v62 = vsel %vm11424_vm0, %v4286_v26, %v4282_v61  ;;  %v3868_v43 = vmul.f32 %v3692_v59, %v10536_v27  ;;  %v6419_v59 = vld [vmem:[#allocation3 + $0x78] sm:$0xff]  ;;  %6393 = vpow2.f32 %v5805_v36  ;;  %v6422_v15 = vld [vmem:[#allocation3 + $0x80] sm:$0xff] }
 0x585   : >> { %v4802_v2 = vadd.f32 %v11044_v24, %v4765_v4  ;;  %v4571_v3 = vmul.f32 %v4272_v8, %v11325_v18  ;;  %v4572_v52 = vmul.f32 %v4287_v62, %v11328_v22  ;;  %v4541_v22 = vor.u32 1.1754944e-38, %v4540_v9 }
 0x586   : >> { %v3901_v63 = vmul.f32 %v10014_v55, %v3868_v43 }
 0x587   : >> { %4834 = vst [vmem:[#allocation3 + $0x28] sm:$0xff] %v4802_v2  ;;  %v4532_v2 = vmul.f32 %v6390_v25, %v4531_v40  ;;  %v4597_v56 = vpack.c.bf16 %v4572_v52, %v4571_v3 }
 0x588   : >> { %v11458_v31 = vadd.f32 %v10025_v30, %v3901_v63 }
 0x589   : >> { %v4730_v5 = vpop.f32.mrf.mxu3  ;;  %v4533_v16 = vadd.f32 %v6390_v25, %v4532_v2  ;;  %4709 = vmatmul.bf16.gmra.mxu1 %v4597_v56 }
 0x58a   : >> { %v4780_v46 = vadd.f32 %v6416_v17, %v4730_v5  ;;  %v4547_v5 = vmul.f32 %v6392_v28, %v4546_v33  ;;  %v5806_v53 = vmul.f32 -1.442695, %v11458_v31  ;;  %v6394_v30 = vpop.eup %6393 }
 0x58b   : >> { %v4537_v51 = vsel %vm4536_vm5, %v6390_v25, %v4533_v16  ;;  %v4061_v14 = vadd.f32 1.0, %v6394_v30  ;;  %v6420_v25 = vld [vmem:[#allocation3 + $0x70] sm:$0xff] }
 0x58c   : >> { %v4817_v23 = vadd.f32 %v11044_v24, %v4780_v46  ;;  %v4548_v27 = vadd.f32 %v6392_v28, %v4547_v5  ;;  %v4542_v34 = vsel %vm4539_vm15, %v4541_v22, %v4537_v51  ;;  %6395 = vpow2.f32 %v5806_v53  ;;  %v6426_v30 = vld [vmem:[%s9057_s2] sm:$0x3f]  ;;  %s6619_s2 = sshra.s32 (%p7139_p11), %s5319_s1, 4  ;;  %s6620_s2 = int_to_ptr.hbm [resolvable:$true] %s6619_s2 }
 0x58d   : >> { %v4589_v55 = vmul.f32 %v4542_v34, %v11349_v50  ;;  %6397 = vrcp.f32 %v4061_v14  ;;  %v4300_v40 = vand.u32 2147483648, %v4061_v14  ;;  %v4298_v3 = vand.u32 2147483647, %v4061_v14  ;;  %s6621_s14 = scalar_lea.hbm (%p7139_p11), %s6620_s2, 2  ;;  %p6626_p9 = scmp.lt.s32.totalorder (%p7139_p11), %s6620_s2, %s12625_s15 }
 0x58e   : >> { %4849 = vst [vmem:[#allocation3 + $0x18] sm:$0xff] %v4817_v23  ;;  %v4552_v17 = vsel %vm4551_vm13, %v6392_v28, %v4548_v27  ;;  %vm4294_vm8 = vweird.f32 %v4061_v14  ;;  %v6424_v27 = vld [vmem:[#allocation3] sm:$0xff]  ;;  %p6627_p2 = scmp.lt.s32.totalorder (%p7139_p11), %s6625_s28, %s6621_s14 }
 0x58f   : >> { %v4557_v46 = vsel %vm4554_vm6, %v4556_v32, %v4552_v17  ;;  %vm4299_vm0 = vcmp.eq.f32.partialorder %v4298_v3, 8.507059e+37 }
 0x590   : >> { %v4590_v39 = vmul.f32 %v4557_v46, %v11353_v49  ;;  %p6628_p10 = por (%p7139_p11), %p6627_p2, %p6626_p9 }
 0x591   : >> { %v4732_v12 = vpop.f32.mrf.mxu3 }
 0x592   : >> { %v4781_v19 = vadd.f32 %v6417_v38, %v4732_v12  ;;  %v4695_v4 = vpop.f32.mrf.mxu1  ;;  %v4606_v23 = vpack.c.bf16 %v4590_v39, %v4589_v55  ;;  %v6396_v20 = vpop.eup %6395 }
 0x593   : >> { %v4766_v21 = vadd.f32 %v6418_v6, %v4695_v4  ;;  %v4062_v42 = vadd.f32 1.0, %v6396_v20  ;;  %v6398_v49 = vpop.eup %6397  ;;  %v4301_v6 = vor.u32 1.1754944e-38, %v4300_v40  ;;  %v2495_v20 = vperm.slane %v6426_v30, 0  ;;  %v6430_v40 = vld [vmem:[#allocation3 + $0xf8] sm:$0xff] }
 0x594   : >> { %v4818_v11 = vadd.f32 %v11044_v24, %v4781_v19  ;;  %4754 = vmatmul.bf16.gmra.mxu3 %v4606_v23  ;;  %v4290_v45 = vmul.f32 %v6398_v49, %v4061_v14  ;;  %vm4295_vm7 = vweird.f32 %v6398_v49 }
 0x595   : >> { %v4803_v18 = vadd.f32 %v11044_v24, %v4766_v21  ;;  %6399 = vrcp.f32 %v4062_v42  ;;  %v4315_v38 = vand.u32 2147483648, %v4062_v42  ;;  %v4313_v4 = vand.u32 2147483647, %v4062_v42  ;;  %vm4296_vm11 = vmor %vm4294_vm8, %vm4295_vm7 }
 0x596   : >> { %4850 = vst [vmem:[#allocation3 + $0x90] sm:$0xff] %v4818_v11  ;;  %v4291_v12 = vsub.f32 1.0, %v4290_v45  ;;  %vm4309_vm1 = vweird.f32 %v4062_v42  ;;  %vm5295_vm8 = vcmask (%p7139_p11), 1040384  }
 0x597   : >> { %4835 = vst [vmem:[#allocation3 + $0x40] sm:$0xff] %v4803_v18  ;;  %v4316_v11 = vor.u32 1.1754944e-38, %v4315_v38  ;;  %vm4314_vm3 = vcmp.eq.f32.partialorder %v4313_v4, 8.507059e+37  ;;  %v6431_v38 = vld [vmem:[#allocation3 + $0x68] sm:$0xff] }
 0x598   : >> { %v4292_v62 = vmul.f32 %v6398_v49, %v4291_v12 }
 0x59a   : >> { %v4697_v58 = vpop.f32.mrf.mxu1  ;;  %v4293_v52 = vadd.f32 %v6398_v49, %v4292_v62 }
 0x59b   : >> { %v4767_v35 = vadd.f32 %v6419_v59, %v4697_v58  ;;  %v6400_v48 = vpop.eup %6399 }
 0x59c   : >> { %v4305_v7 = vmul.f32 %v6400_v48, %v4062_v42  ;;  %vm4310_vm14 = vweird.f32 %v6400_v48  ;;  %v4297_v33 = vsel %vm4296_vm11, %v6398_v49, %v4293_v52 }
 0x59d   : >> { %v4804_v10 = vadd.f32 %v11044_v24, %v4767_v35  ;;  %vm4311_vm2 = vmor %vm4309_vm1, %vm4310_vm14  ;;  %v4302_v56 = vsel %vm4299_vm0, %v4301_v6, %v4297_v33 }
 0x59e   : >> { %v4306_v41 = vsub.f32 1.0, %v4305_v7  ;;  %v4573_v5 = vmul.f32 %v4302_v56, %v11455_v44  ;;  %v6425_v44 = vld [vmem:[#allocation3 + $0x8] sm:$0xff] }
 0x59f   : >> { %4836 = vst [vmem:[#allocation3 + $0x78] sm:$0xff] %v4804_v10 }
 0x5a0   : >> { %v4307_v19 = vmul.f32 %v6400_v48, %v4306_v41 }
 0x5a2   : >> { %v4735_v50 = vpop.f32.mrf.mxu3  ;;  %v4308_v21 = vadd.f32 %v6400_v48, %v4307_v19 }
 0x5a3   : >> { %v4782_v1 = vadd.f32 %v6420_v25, %v4735_v50 }
 0x5a4   : >> { %v4312_v18 = vsel %vm4311_vm2, %v6400_v48, %v4308_v21 }
 0x5a5   : >> { %v4819_v60 = vadd.f32 %v11044_v24, %v4782_v1  ;;  %v4317_v16 = vsel %vm4314_vm3, %v4316_v11, %v4312_v18  ;;  %v2498_v1 = vperm.slane %v6426_v30, 1  ;;  %v6439_v30 = vld [vmem:[#allocation3 + $0x98] sm:$0xff] }
 0x5a6   : >> { %v4574_v57 = vmul.f32 %v4317_v16, %v11458_v31  ;;  %v6433_v16 = vld [vmem:[#allocation2 + $0x8] sm:$0xff] }
 0x5a7   : >> { %4851 = vst [vmem:[#allocation3 + $0x70] sm:$0xff] %v4819_v60 }
 0x5a8   : >> { %v4598_v63 = vpack.c.bf16 %v4574_v57, %v4573_v5  ;;  %v6434_v57 = vld [vmem:[#allocation3 + $0xa0] sm:$0xff] }
 0x5a9   : >> { %v4700_v29 = vpop.f32.mrf.mxu1 }
 0x5aa   : >> { %v4737_v26 = vpop.f32.mrf.mxu3  ;;  %v4768_v9 = vadd.f32 %v6422_v15, %v4700_v29  ;;  %4714 = vmatmul.bf16.gmra.mxu1 %v4598_v63  ;;  %v6427_v29 = vld [vmem:[#allocation2] sm:$0xff] }
 0x5ab   : >> { %v4783_v28 = vadd.f32 %v6421_v54, %v4737_v26 }
 0x5ac   : >> { %v4805_v61 = vadd.f32 %v11044_v24, %v4768_v9  ;;  %v6428_v9 = vld [vmem:[#allocation3 + $0xd8] sm:$0xff] }
 0x5ad   : >> { %v4820_v8 = vadd.f32 %v11044_v24, %v4783_v28 }
 0x5ae   : >> { %4837 = vst [vmem:[#allocation3 + $0x80] sm:$0xff] %v4805_v61 }
 0x5af   : >> { %4852 = vst [vmem:[#allocation3 + $0xc0] sm:$0xff] %v4820_v8  ;;  %v2466_v17 = vpop.xlane.xlu1 %2465  ;;  %v11478_v8 = vld [vmem:[%s10481_s4] ss:$0 sm:$0xff] }
 0x5b0   : >> { %v2469_v55 = vmul.f32 %v2466_v17, %v8135_v13  ;;  %v6436_v17 = vld [vmem:[#allocation3 + $0x20] sm:$0xff] }
 0x5b1   : >> { %v4702_v2 = vpop.f32.mrf.mxu1 }
 0x5b2   : >> { %v4769_v43 = vadd.f32 %v6423_v37, %v4702_v2  ;;  %v2471_v46 = vadd.f32 1e-05, %v2469_v55  ;;  %v6432_v37 = vld [vmem:[#allocation3 + $0xb8] sm:$0xff] }
 0x5b4   : >> { %v4806_v22 = vadd.f32 %v11044_v24, %v4769_v43  ;;  %6401 = vrsqrt.f32 %v2471_v46  ;;  %vm2479_vm10 = vweird.f32 %v2471_v46 }
 0x5b6   : >> { %4838 = vst [vmem:[#allocation3 + $0xe0] sm:$0xff] %v4806_v22 }
 0x5ba   : >> { %v6402_v53 = vpop.eup %6401 }
 0x5bb   : >> { %v4740_v51 = vpop.f32.mrf.mxu3  ;;  %v2474_v39 = vmul.f32 %v6402_v53, %v2471_v46  ;;  %vm2480_vm4 = vweird.f32 %v6402_v53 }
 0x5bc   : >> { %v4784_v34 = vadd.f32 %v6424_v27, %v4740_v51  ;;  %vm2481_vm12 = vmor %vm2479_vm10, %vm2480_vm4 }
 0x5bd   : >> { %v2475_v59 = vmul.f32 %v6402_v53, %v2474_v39 }
 0x5be   : >> { %v4821_v32 = vadd.f32 %v11044_v24, %v4784_v34  ;;  %v6435_v34 = vld [vmem:[#allocation3 + $0x50] sm:$0xff] }
 0x5bf   : >> { %v2476_v35 = vmul.f32 0.5, %v2475_v59  ;;  %v6438_v59 = vld [vmem:[#allocation3 + $0xe8] sm:$0xff] }
 0x5c0   : >> { %4853 = vst [vmem:[#allocation3] sm:$0xff] %v4821_v32 }
 0x5c1   : >> { %v2477_v23 = vsub.f32 1.5, %v2476_v35 }
 0x5c3   : >> { %v4742_v58 = vpop.f32.mrf.mxu3  ;;  %v2478_v10 = vmul.f32 %v6402_v53, %v2477_v23 }
 0x5c4   : >> { %v4785_v36 = vadd.f32 %v6425_v44, %v4742_v58 }
 0x5c5   : >> { %v2482_v14 = vsel %vm2481_vm12, %v6402_v53, %v2478_v10 }
 0x5c6   : >> { %v4822_v31 = vadd.f32 %v11044_v24, %v4785_v36  ;;  %v2468_v50 = vpop.xlane.xlu2 %2467  ;;  %v2493_v24 = vmul.f32 %v2482_v14, %v11115_v47  ;;  %v6437_v36 = vld [vmem:[#allocation3 + $0xf0] sm:$0xff] }
 0x5c7   : >> { %v2470_v25 = vmul.f32 %v2468_v50, %v8135_v13 }
 0x5c8   : >> { %4854 = vst [vmem:[#allocation3 + $0x8] sm:$0xff] %v4822_v31  ;;  %v2496_v60 = vmul.f32 %v2495_v20, %v2493_v24 }
 0x5c9   : >> { %v2472_v42 = vadd.f32 1e-05, %v2470_v25  ;;  %v6440_v25 = vld [vmem:[#allocation3 + $0xb0] sm:$0xff] }
 0x5ca   : >> { %v2499_v49 = vadd.f32 %v2498_v1, %v2496_v60  ;;  %v6441_v60 = vld [vmem:[#allocation3 + $0x38] sm:$0xff] }
 0x5cb   : >> { %6403 = vrsqrt.f32 %v2472_v42  ;;  %vm2489_vm15 = vweird.f32 %v2472_v42 }
 0x5cc   : >> { %v2501_v26 = vmax.f32 %v2499_v49, 0.0 }
 0x5ce   : >> { %v3241_v48 = vadd.f32 %v6427_v29, %v2501_v26  ;;  %v4953_v29 = vld [vmem:[#allocation12 + $0x78] sm:$0xff] (%p7139_p11) }
 0x5cf   : > { %4954 = vmatpush.msra.mxu0 (%p7139_p11), %v4953_v29  ;;  %5077 = vmatpush.msra.mxu1 (%p7139_p11), %v4953_v29  ;;  %v11573_v29 = vld [vmem:[#allocation3 + $0x8] sm:$0xff] (%p7139_p11) }
 0x5d0   : >> { %3243 = vst [vmem:[#allocation2] sm:$0xff] %v3241_v48  ;;  %v4952_v48 = vld [vmem:[#allocation12 + $0x70] sm:$0xff] (%p7139_p11) }
 0x5d1   : >> { %v6404_v54 = vpop.eup %6403  ;;  %4955 = vmatpush.msra.mxu0 (%p7139_p11), %v4952_v48  ;;  %5078 = vmatpush.msra.mxu1 (%p7139_p11), %v4952_v48 }
 0x5d2   : >> { %v2484_v15 = vmul.f32 %v6404_v54, %v2472_v42  ;;  %vm2490_vm5 = vweird.f32 %v6404_v54 }
 0x5d3   : >> { %vm2491_vm9 = vmor %vm2489_vm15, %vm2490_vm5 }
 0x5d4   : >> { %v2485_v7 = vmul.f32 %v6404_v54, %v2484_v15  ;;  %v11499_v15 = vld [vmem:[#allocation3 + $0xa8] sm:$0xff] (%p7139_p11) }
 0x5d6   : >> { %v2486_v61 = vmul.f32 0.5, %v2485_v7  ;;  %v11503_v7 = vld [vmem:[#allocation3 + $0x10] sm:$0xff] (%p7139_p11) }
 0x5d8   : >> { %v2487_v47 = vsub.f32 1.5, %v2486_v61  ;;  %v4948_v61 = vld [vmem:[#allocation12 + $0x50] sm:$0xff] (%p7139_p11) }
 0x5da   : >> { %v2488_v3 = vmul.f32 %v6404_v54, %v2487_v47 }
 0x5db   : >> { %v4745_v28 = vpop.f32.mrf.mxu3 }
 0x5dc   : >> { %v4786_v45 = vadd.f32 %v6428_v9, %v4745_v28  ;;  %v2492_v52 = vsel %vm2491_vm9, %v6404_v54, %v2488_v3  ;;  %v4951_v54 = vld [vmem:[#allocation12 + $0x68] sm:$0xff] (%p7139_p11)  ;;  %v4950_v28 = vld [vmem:[#allocation12 + $0x60] sm:$0xff] (%p7139_p11) }
 0x5dd   : >> { %v2494_v21 = vmul.f32 %v2492_v52, %v11200_v0  ;;  %4956 = vmatpush.msra.mxu0 (%p7139_p11), %v4951_v54  ;;  %v11501_v9 = vld [vmem:[#allocation3 + $0xd0] sm:$0xff] (%p7139_p11)  ;;  %5079 = vmatpush.msra.mxu1 (%p7139_p11), %v4951_v54  ;;  %v4946_v3 = vld [vmem:[#allocation12 + $0x40] sm:$0xff] (%p7139_p11)  ;;  %v6699_v54 = vmov (%p7139_p11), 256.0  }
 0x5de   : >> { %v4823_v13 = vadd.f32 %v11478_v8, %v4786_v45  ;;  %v4949_v45 = vld [vmem:[#allocation12 + $0x58] sm:$0xff] (%p7139_p11)  ;;  %6445 = vrcp.f32 (%p7139_p11), %v6699_v54 }
 0x5df   : >> { %v2497_v2 = vmul.f32 %v2495_v20, %v2494_v21  ;;  %4957 = vmatpush.msra.mxu0 (%p7139_p11), %v4950_v28  ;;  %5080 = vmatpush.msra.mxu1 (%p7139_p11), %v4950_v28  ;;  %v4944_v21 = vld [vmem:[#allocation12 + $0x30] sm:$0xff] (%p7139_p11) }
 0x5e0   : >> { %4855 = vst [vmem:[#allocation3 + $0xd8] sm:$0xff] %v4823_v13  ;;  %v11507_v13 = vld [vmem:[#allocation3 + $0x48] sm:$0xff] (%p7139_p11) }
 0x5e1   : >> { %v4705_v12 = vpop.f32.mrf.mxu1  ;;  %v2500_v11 = vadd.f32 %v2498_v1, %v2497_v2  ;;  %4958 = vmatpush.msra.mxu0 (%p7139_p11), %v4949_v45  ;;  %5081 = vmatpush.msra.mxu1 (%p7139_p11), %v4949_v45 }
 0x5e2   : >> { %v4770_v41 = vadd.f32 %v6430_v40, %v4705_v12  ;;  %v11510_v12 = vld [vmem:[#allocation3 + $0x60] sm:$0xff] (%p7139_p11)  ;;  %v4947_v40 = vld [vmem:[#allocation12 + $0x48] sm:$0xff] (%p7139_p11) }
 0x5e3   : >> { %v4747_v62 = vpop.f32.mrf.mxu3  ;;  %v2502_v56 = vmax.f32 %v2500_v11, 0.0  ;;  %4959 = vmatpush.msra.mxu0 (%p7139_p11), %v4948_v61  ;;  %5082 = vmatpush.msra.mxu1 (%p7139_p11), %v4948_v61  ;;  %v4943_v11 = vld [vmem:[#allocation12 + $0x28] sm:$0xff] (%p7139_p11) }
 0x5e4   : >> { %v4787_v19 = vadd.f32 %v6431_v38, %v4747_v62  ;;  %v4807_v4 = vadd.f32 %v11478_v8, %v4770_v41  ;;  %v11513_v62 = vld [vmem:[#allocation3 + $0x28] sm:$0xff] (%p7139_p11) }
 0x5e5   : >> { %v3242_v5 = vadd.f32 %v6433_v16, %v2502_v56  ;;  %4960 = vmatpush.msra.mxu0 (%p7139_p11), %v4947_v40  ;;  %5083 = vmatpush.msra.mxu1 (%p7139_p11), %v4947_v40  ;;  %v4942_v56 = vld [vmem:[#allocation12 + $0x20] sm:$0xff] (%p7139_p11)  ;;  %v6446_v40 = vpop.eup (%p7139_p11), %6445 }
 0x5e6   : >> { %v4824_v6 = vadd.f32 %v11478_v8, %v4787_v19  ;;  %4839 = vst [vmem:[#allocation3 + $0xf8] sm:$0xff] %v4807_v4  ;;  %v11516_v19 = vld [vmem:[#allocation3 + $0x40] sm:$0xff] (%p7139_p11)  ;;  %vm4935_vm13 = vweird.f32 (%p7139_p11), %v6446_v40 }
 0x5e7   : >> { %3244 = vst [vmem:[#allocation2 + $0x8] sm:$0xff] %v3242_v5  ;;  %v4945_v4 = vld [vmem:[#allocation12 + $0x38] sm:$0xff] (%p7139_p11)  ;;  %4961 = vmatpush.msra.mxu0 (%p7139_p11), %v4946_v3  ;;  %5084 = vmatpush.msra.mxu1 (%p7139_p11), %v4946_v3 }
 0x5e8   : >> { %4856 = vst [vmem:[#allocation3 + $0x68] sm:$0xff] %v4824_v6  ;;  %v11519_v6 = vld [vmem:[#allocation3 + $0x78] sm:$0xff] (%p7139_p11) }
 0x5e9   : >> { %v4707_v33 = vpop.f32.mrf.mxu1  ;;  %4962 = vmatpush.msra.mxu0 (%p7139_p11), %v4945_v4  ;;  %5085 = vmatpush.msra.mxu1 (%p7139_p11), %v4945_v4  ;;  %v4941_v5 = vld [vmem:[#allocation12 + $0x18] sm:$0xff] (%p7139_p11) }
 0x5ea   : >> { %v4771_v43 = vadd.f32 %v6432_v37, %v4707_v33  ;;  %v11522_v33 = vld [vmem:[#allocation3 + $0x80] sm:$0xff] (%p7139_p11)  ;;  %v11576_v28 = vld [vmem:[#allocation3 + $0xd8] sm:$0xff] (%p7139_p11) }
 0x5eb   : > { %4963 = vmatpush.msra.mxu0 (%p7139_p11), %v4944_v21  ;;  %5086 = vmatpush.msra.mxu1 (%p7139_p11), %v4944_v21 }
 0x5ec   : >> { %v4808_v18 = vadd.f32 %v11478_v8, %v4771_v43  ;;  %v11525_v43 = vld [vmem:[#allocation3 + $0xe0] sm:$0xff] (%p7139_p11) }
 0x5ed   : > { %4964 = vmatpush.msra.mxu0 (%p7139_p11), %v4943_v11  ;;  %v11528_v16 = vld [vmem:[#allocation3 + $0xf8] sm:$0xff] (%p7139_p11)  ;;  %5087 = vmatpush.msra.mxu1 (%p7139_p11), %v4943_v11 }
 0x5ee   : >> { %4840 = vst [vmem:[#allocation3 + $0xb8] sm:$0xff] %v4808_v18 }
 0x5ef   : > { %4965 = vmatpush.msra.mxu0 (%p7139_p11), %v4942_v56  ;;  %5088 = vmatpush.msra.mxu1 (%p7139_p11), %v4942_v56 }
 0x5f1   : > { %4966 = vmatpush.msra.mxu0 (%p7139_p11), %v4941_v5  ;;  %5089 = vmatpush.msra.mxu1 (%p7139_p11), %v4941_v5 }
 0x5ff   : >> { %v4750_v22 = vpop.f32.mrf.mxu3 }
 0x600   : >> { %v4788_v63 = vadd.f32 %v6434_v57, %v4750_v22  ;;  %v11531_v57 = vld [vmem:[#allocation3 + $0xb8] sm:$0xff] (%p7139_p11) }
 0x602   : >> { %v4825_v51 = vadd.f32 %v11478_v8, %v4788_v63  ;;  %v4940_v63 = vld [vmem:[#allocation12 + $0x10] sm:$0xff] (%p7139_p11) }
 0x603   : > { %4967 = vmatpush.msra.mxu0 (%p7139_p11), %v4940_v63  ;;  %5090 = vmatpush.msra.mxu1 (%p7139_p11), %v4940_v63 }
 0x604   : >> { %4857 = vst [vmem:[#allocation3 + $0xa0] sm:$0xff] %v4825_v51 }
 0x606   : >> { %v4710_v27 = vpop.f32.mrf.mxu1 }
 0x607   : >> { %v4752_v0 = vpop.f32.mrf.mxu3  ;;  %v4772_v55 = vadd.f32 %v6436_v17, %v4710_v27  ;;  %v4939_v27 = vld [vmem:[#allocation12 + $0x8] sm:$0xff] (%p7139_p11)  ;;  %v4938_v17 = vld [vmem:[#allocation12] sm:$0xff] (%p7139_p11) }
 0x608   : >> { %v4789_v32 = vadd.f32 %v6435_v34, %v4752_v0  ;;  %4968 = vmatpush.msra.mxu0 (%p7139_p11), %v4939_v27  ;;  %5091 = vmatpush.msra.mxu1 (%p7139_p11), %v4939_v27 }
 0x609   : >> { %v4809_v58 = vadd.f32 %v11478_v8, %v4772_v55 }
 0x60a   : >> { %v4826_v46 = vadd.f32 %v11478_v8, %v4789_v32  ;;  %4969 = vmatpush.msra.mxu0 (%p7139_p11), %v4938_v17  ;;  %5092 = vmatpush.msra.mxu1 (%p7139_p11), %v4938_v17 }
 0x60b   : >> { %4841 = vst [vmem:[#allocation3 + $0x20] sm:$0xff] %v4809_v58 }
 0x60c   : >> { %4858 = vst [vmem:[#allocation3 + $0x50] sm:$0xff] %v4826_v46 }
 0x60e   : >> { %v4712_v44 = vpop.f32.mrf.mxu1 }
 0x60f   : >> { %v4773_v31 = vadd.f32 %v6437_v36, %v4712_v44 }
 0x611   : >> { %v4810_v53 = vadd.f32 %v11478_v8, %v4773_v31  ;;  %v11546_v31 = vld [vmem:[#allocation3 + $0x88] sm:$0xff] (%p7139_p11) }
 0x612   : > { %v11534_v0 = vld [vmem:[#allocation3 + $0x20] sm:$0xff] (%p7139_p11) }
 0x613   : >> { %4842 = vst [vmem:[#allocation3 + $0xf0] sm:$0xff] %v4810_v53  ;;  %v11585_v3 = vld [vmem:[#allocation3 + $0x50] sm:$0xff] (%p7139_p11) }
 0x617   : >> { %v4755_v39 = vpop.f32.mrf.mxu3 }
 0x618   : >> { %v4790_v35 = vadd.f32 %v6438_v59, %v4755_v39  ;;  %v11549_v39 = vld [vmem:[#allocation3 + $0x58] sm:$0xff] (%p7139_p11) }
 0x61a   : >> { %v4827_v23 = vadd.f32 %v11478_v8, %v4790_v35  ;;  %v11537_v32 = vld [vmem:[#allocation3 + $0xf0] sm:$0xff] (%p7139_p11) }
 0x61b   : > { %v11552_v35 = vld [vmem:[#allocation3 + $0x30] sm:$0xff] (%p7139_p11) }
 0x61c   : >> { %4859 = vst [vmem:[#allocation3 + $0xe8] sm:$0xff] %v4827_v23 }
 0x61f   : >> { %v4757_v10 = vpop.f32.mrf.mxu3 }
 0x620   : >> { %v4791_v20 = vadd.f32 %v6439_v30, %v4757_v10  ;;  %v11555_v10 = vld [vmem:[#allocation3 + $0xc8] sm:$0xff] (%p7139_p11) }
 0x622   : >> { %v4828_v50 = vadd.f32 %v11478_v8, %v4791_v20  ;;  %v11558_v20 = vld [vmem:[#allocation3 + $0x18] sm:$0xff] (%p7139_p11) }
 0x623   : > { %v11588_v4 = vld [vmem:[#allocation3 + $0xe8] sm:$0xff] (%p7139_p11) }
 0x624   : >> { %4860 = vst [vmem:[#allocation3 + $0x98] sm:$0xff] %v4828_v50 }
 0x627   : >> { %v4715_v14 = vpop.f32.mrf.mxu1 }
 0x628   : >> { %v4774_v1 = vadd.f32 %v6440_v25, %v4715_v14  ;;  %v11561_v14 = vld [vmem:[#allocation3 + $0x90] sm:$0xff] (%p7139_p11) }
 0x62a   : >> { %v4811_v24 = vadd.f32 %v11478_v8, %v4774_v1  ;;  %v11564_v1 = vld [vmem:[#allocation3 + $0x70] sm:$0xff] (%p7139_p11) }
 0x62c   : >> { %4843 = vst [vmem:[#allocation3 + $0xb0] sm:$0xff] %v4811_v24 }
 0x62f   : >> { %v4717_v42 = vpop.f32.mrf.mxu1 }
 0x630   : >> { %v4775_v49 = vadd.f32 %v6441_v60, %v4717_v42  ;;  %902 = sbr.rel (!%p7139_p11) target bundleno = 298 (0x12a), region = 223  ;;  %v11567_v42 = vld [vmem:[#allocation3 + $0xc0] sm:$0xff] (%p7139_p11) }
 0x632   : >> { %v4812_v26 = vadd.f32 %v11478_v8, %v4775_v49  ;;  %v4893_v8 = vadd.f32 (%p7139_p11), %v11501_v9, %v11499_v15  ;;  %v11570_v49 = vld [vmem:[#allocation3] sm:$0xff] (%p7139_p11) }
 0x633   : > { %v11540_v46 = vld [vmem:[#allocation3 + $0xb0] sm:$0xff] (%p7139_p11) }
 0x634   : >> { %4844 = vst [vmem:[#allocation3 + $0x38] sm:$0xff] %v4812_v26  ;;  %v4894_v47 = vadd.f32 (%p7139_p11), %v4893_v8, %v11503_v7  ;;  %v11579_v8 = vld [vmem:[#allocation3 + $0x68] sm:$0xff] (%p7139_p11)  ;;  %p6622_p11 = scmp.ne.s32.totalorder (%p7139_p11), %s6620_s2, %s6621_s14 }
 0x636   : > { %v4895_v41 = vadd.f32 %v4894_v47, %v11507_v13  ;;  %v11582_v47 = vld [vmem:[#allocation3 + $0xa0] sm:$0xff]  ;;  %p6623_p1 = pnand %p6622_p11, %p6858_p3 }
 0x638   : > { %v4896_v38 = vadd.f32 %v4895_v41, %v11510_v12  ;;  %p6624_p4 = pneg %p6623_p1 }
 0x63a   : > { %v4897_v52 = vadd.f32 %v4896_v38, %v11513_v62  ;;  %p6629_p12 = pnand %p6628_p10, %p6624_p4 }
 0x63b   : > { %v11543_v44 = vld [vmem:[#allocation3 + $0x38] sm:$0xff] }
 0x63c   : > { %v4898_v2 = vadd.f32 %v4897_v52, %v11516_v19  ;;  %v4931_v52 = vmul.f32 256.0, %v6446_v40 }
 0x63e   : > { %v4899_v37 = vadd.f32 %v4898_v2, %v11519_v6  ;;  %v11591_v2 = vld [vmem:[#allocation3 + $0x98] sm:$0xff] }
 0x640   : > { %v4900_v18 = vadd.f32 %v4899_v37, %v11522_v33  ;;  %v4932_v37 = vsub.f32 1.0, %v4931_v52 }
 0x642   : > { %v4901_v22 = vadd.f32 %v4900_v18, %v11525_v43  ;;  %v4933_v5 = vmul.f32 %v6446_v40, %v4932_v37 }
 0x644   : > { %v4902_v51 = vadd.f32 %v4901_v22, %v11528_v16 }
 0x646   : > { %v4903_v34 = vadd.f32 %v4902_v51, %v11531_v57  ;;  %v4934_v51 = vadd.f32 %v6446_v40, %v4933_v5 }
 0x648   : > { %v4904_v55 = vadd.f32 %v4903_v34, %v11534_v0  ;;  %v11595_v17 = vsel %vm4935_vm13, %v6446_v40, %v4934_v51 }
 0x64a   : > { %v4905_v58 = vadd.f32 %v4904_v55, %v11537_v32 }
 0x64c   : > { %v4906_v36 = vadd.f32 %v4905_v58, %v11540_v46 }
 0x64e   : > { %v4907_v53 = vadd.f32 %v4906_v36, %v11543_v44 }
 0x650   : > { %v4908_v59 = vadd.f32 %v4907_v53, %v11546_v31 }
 0x652   : > { %v4909_v23 = vadd.f32 %v4908_v59, %v11549_v39 }
 0x654   : > { %v4910_v30 = vadd.f32 %v4909_v23, %v11552_v35 }
 0x656   : > { %v4911_v50 = vadd.f32 %v4910_v30, %v11555_v10 }
 0x658   : > { %v4912_v25 = vadd.f32 %v4911_v50, %v11558_v20 }
 0x65a   : > { %v4913_v24 = vadd.f32 %v4912_v25, %v11561_v14 }
 0x65c   : > { %v4914_v60 = vadd.f32 %v4913_v24, %v11564_v1 }
 0x65e   : > { %v4915_v26 = vadd.f32 %v4914_v60, %v11567_v42 }
 0x660   : > { %v4916_v48 = vadd.f32 %v4915_v26, %v11570_v49 }
 0x662   : > { %v4917_v45 = vadd.f32 %v4916_v48, %v11573_v29 }
 0x664   : > { %v4918_v61 = vadd.f32 %v4917_v45, %v11576_v28 }
 0x666   : > { %v4919_v41 = vadd.f32 %v4918_v61, %v11579_v8 }
 0x668   : > { %v4920_v38 = vadd.f32 %v4919_v41, %v11582_v47 }
 0x66a   : > { %v4921_v21 = vadd.f32 %v4920_v38, %v11585_v3 }
 0x66c   : > { %v4922_v11 = vadd.f32 %v4921_v21, %v11588_v4 }
 0x66e   : > { %v4923_v56 = vadd.f32 %v4922_v11, %v11591_v2 }
 0x670   : > { %v4924_v18 = vrot.slane %v4923_v56, 4 }
 0x672   : > { %v4925_v22 = vadd.f32 %v4924_v18, %v4923_v56 }
 0x674   : > { %v4926_v63 = vrot.slane %v4925_v22, 2 }
 0x676   : > { %v4927_v27 = vadd.f32 %v4926_v63, %v4925_v22 }
 0x678   : > { %v4928_v34 = vrot.slane %v4927_v27, 1 }
 0x67a   : > { %v4929_v55 = vadd.f32 %v4928_v34, %v4927_v27 }
 0x67c   : > { %v4937_v58 = vmul.f32 %v11595_v17, %v4929_v55 }
 0x67e   : > { %4970 = vmatmul.f32.vlgmr.msra.gmra.mxu0 %v4937_v58 }
 0x6fb   : > { %v4971_v36 = vpop.f32.mrf.mxu0 }
 0x6fc   : > { %v11598_v53 = vperm.slane %v4971_v36, 0 }
 0x6fe   : > { %v11602_v59 = vsub.f32 %v11499_v15, %v11598_v53  ;;  %v11606_v23 = vsub.f32 %v11501_v9, %v11598_v53  ;;  %v11610_v30 = vsub.f32 %v11503_v7, %v11598_v53  ;;  %v11618_v24 = vsub.f32 %v11507_v13, %v11598_v53 }
 0x6ff   : > { %v11622_v15 = vsub.f32 %v11510_v12, %v11598_v53  ;;  %v11628_v7 = vsub.f32 %v11513_v62, %v11598_v53  ;;  %v11634_v13 = vsub.f32 %v11516_v19, %v11598_v53  ;;  %v11640_v45 = vsub.f32 %v11519_v6, %v11598_v53 }
 0x700   : > { %v5007_v50 = vmul.f32 %v11602_v59, %v11602_v59  ;;  %v5008_v25 = vmul.f32 %v11606_v23, %v11606_v23  ;;  %v5009_v9 = vmul.f32 %v11610_v30, %v11610_v30  ;;  %v5010_v26 = vmul.f32 %v11618_v24, %v11618_v24 }
 0x701   : > { %v5011_v12 = vmul.f32 %v11622_v15, %v11622_v15  ;;  %v5012_v62 = vmul.f32 %v11628_v7, %v11628_v7  ;;  %v11646_v40 = vsub.f32 %v11522_v33, %v11598_v53  ;;  %v5013_v19 = vmul.f32 %v11634_v13, %v11634_v13 }
 0x702   : > { %v5039_v60 = vadd.f32 %v5008_v25, %v5007_v50  ;;  %v11652_v38 = vsub.f32 %v11525_v43, %v11598_v53  ;;  %v5014_v6 = vmul.f32 %v11640_v45, %v11640_v45  ;;  %v11658_v21 = vsub.f32 %v11528_v16, %v11598_v53 }
 0x703   : > { %v5015_v33 = vmul.f32 %v11646_v40, %v11646_v40  ;;  %v11664_v37 = vsub.f32 %v11531_v57, %v11598_v53  ;;  %v11670_v18 = vsub.f32 %v11534_v0, %v11598_v53  ;;  %v11676_v22 = vsub.f32 %v11537_v32, %v11598_v53 }
 0x704   : > { %v5040_v48 = vadd.f32 %v5039_v60, %v5009_v9  ;;  %v5016_v43 = vmul.f32 %v11652_v38, %v11652_v38  ;;  %v5017_v16 = vmul.f32 %v11658_v21, %v11658_v21  ;;  %v11682_v51 = vsub.f32 %v11540_v46, %v11598_v53 }
 0x705   : > { %v5018_v57 = vmul.f32 %v11664_v37, %v11664_v37  ;;  %v5019_v0 = vmul.f32 %v11670_v18, %v11670_v18  ;;  %v11688_v34 = vsub.f32 %v11543_v44, %v11598_v53  ;;  %v5020_v32 = vmul.f32 %v11676_v22, %v11676_v22 }
 0x706   : > { %v5041_v54 = vadd.f32 %v5040_v48, %v5010_v26  ;;  %v11694_v58 = vsub.f32 %v11546_v31, %v11598_v53  ;;  %v5021_v46 = vmul.f32 %v11682_v51, %v11682_v51  ;;  %v11700_v50 = vsub.f32 %v11549_v39, %v11598_v53 }
 0x707   : > { %v5022_v44 = vmul.f32 %v11688_v34, %v11688_v34  ;;  %v11706_v9 = vsub.f32 %v11552_v35, %v11598_v53  ;;  %v11712_v26 = vsub.f32 %v11555_v10, %v11598_v53 }
 0x708   : > { %v5042_v61 = vadd.f32 %v5041_v54, %v5011_v12  ;;  %v5023_v31 = vmul.f32 %v11694_v58, %v11694_v58  ;;  %v5024_v39 = vmul.f32 %v11700_v50, %v11700_v50  ;;  %v11718_v12 = vsub.f32 %v11558_v20, %v11598_v53 }
 0x709   : > { %v5025_v35 = vmul.f32 %v11706_v9, %v11706_v9  ;;  %v5026_v10 = vmul.f32 %v11712_v26, %v11712_v26 }
 0x70a   : > { %v5043_v41 = vadd.f32 %v5042_v61, %v5012_v62  ;;  %v11724_v62 = vsub.f32 %v11561_v14, %v11598_v53  ;;  %v5027_v20 = vmul.f32 %v11718_v12, %v11718_v12 }
 0x70c   : > { %v5044_v52 = vadd.f32 %v5043_v41, %v5013_v19  ;;  %v11730_v19 = vsub.f32 %v11564_v1, %v11598_v53  ;;  %v5028_v14 = vmul.f32 %v11724_v62, %v11724_v62 }
 0x70e   : > { %v5045_v11 = vadd.f32 %v5044_v52, %v5014_v6  ;;  %v11736_v6 = vsub.f32 %v11567_v42, %v11598_v53  ;;  %v5029_v1 = vmul.f32 %v11730_v19, %v11730_v19 }
 0x710   : > { %v5046_v56 = vadd.f32 %v5045_v11, %v5015_v33  ;;  %v11742_v33 = vsub.f32 %v11570_v49, %v11598_v53  ;;  %v5030_v42 = vmul.f32 %v11736_v6, %v11736_v6 }
 0x712   : > { %v5047_v5 = vadd.f32 %v5046_v56, %v5016_v43  ;;  %v11748_v43 = vsub.f32 %v11573_v29, %v11598_v53  ;;  %v5031_v49 = vmul.f32 %v11742_v33, %v11742_v33 }
 0x714   : > { %v5048_v63 = vadd.f32 %v5047_v5, %v5017_v16  ;;  %v11754_v16 = vsub.f32 %v11576_v28, %v11598_v53  ;;  %v5032_v29 = vmul.f32 %v11748_v43, %v11748_v43 }
 0x716   : > { %v5049_v27 = vadd.f32 %v5048_v63, %v5018_v57  ;;  %v11760_v57 = vsub.f32 %v11579_v8, %v11598_v53  ;;  %v5005_v8 = vsub.f32 %v11588_v4, %v11598_v53 }
 0x718   : > { %v5050_v55 = vadd.f32 %v5049_v27, %v5019_v0  ;;  %v5003_v0 = vsub.f32 %v11582_v47, %v11598_v53  ;;  %v5033_v27 = vmul.f32 %v11754_v16, %v11754_v16 }
 0x71a   : > { %v5051_v36 = vadd.f32 %v5050_v55, %v5020_v32  ;;  %v5004_v32 = vsub.f32 %v11585_v3, %v11598_v53  ;;  %v5034_v55 = vmul.f32 %v11760_v57, %v11760_v57 }
 0x71c   : > { %v5052_v25 = vadd.f32 %v5051_v36, %v5021_v46  ;;  %v5035_v36 = vmul.f32 %v5003_v0, %v5003_v0  ;;  %v5036_v47 = vmul.f32 %v5004_v32, %v5004_v32 }
 0x71e   : > { %v5053_v60 = vadd.f32 %v5052_v25, %v5022_v44  ;;  %v5006_v25 = vsub.f32 %v11591_v2, %v11598_v53 }
 0x720   : > { %v5054_v48 = vadd.f32 %v5053_v60, %v5023_v31  ;;  %v5037_v60 = vmul.f32 %v5005_v8, %v5005_v8 }
 0x722   : > { %v5055_v54 = vadd.f32 %v5054_v48, %v5024_v39  ;;  %v5038_v48 = vmul.f32 %v5006_v25, %v5006_v25 }
 0x724   : > { %v5056_v61 = vadd.f32 %v5055_v54, %v5025_v35 }
 0x726   : > { %v5057_v41 = vadd.f32 %v5056_v61, %v5026_v10 }
 0x728   : > { %v5058_v52 = vadd.f32 %v5057_v41, %v5027_v20 }
 0x72a   : > { %v5059_v11 = vadd.f32 %v5058_v52, %v5028_v14 }
 0x72c   : > { %v5060_v56 = vadd.f32 %v5059_v11, %v5029_v1 }
 0x72e   : > { %v5061_v5 = vadd.f32 %v5060_v56, %v5030_v42 }
 0x730   : > { %v5062_v63 = vadd.f32 %v5061_v5, %v5031_v49 }
 0x732   : > { %v5063_v28 = vadd.f32 %v5062_v63, %v5032_v29 }
 0x734   : > { %v5064_v46 = vadd.f32 %v5063_v28, %v5033_v27  ;;  %v11789_v27 = vld [vmem:[%s12621_s20] ss:$0 sm:$0xff] }
 0x736   : > { %v5065_v44 = vadd.f32 %v5064_v46, %v5034_v55 }
 0x738   : > { %v5066_v31 = vadd.f32 %v5065_v44, %v5035_v36 }
 0x73a   : > { %v5067_v39 = vadd.f32 %v5066_v31, %v5036_v47 }
 0x73c   : > { %v5068_v35 = vadd.f32 %v5067_v39, %v5037_v60 }
 0x73e   : > { %v5069_v54 = vadd.f32 %v5068_v35, %v5038_v48 }
 0x740   : > { %v5070_v3 = vrot.slane %v5069_v54, 4 }
 0x742   : > { %v5071_v10 = vadd.f32 %v5070_v3, %v5069_v54 }
 0x744   : > { %v5072_v61 = vrot.slane %v5071_v10, 2 }
 0x746   : > { %v5073_v20 = vadd.f32 %v5072_v61, %v5071_v10 }
 0x748   : > { %v5074_v41 = vrot.slane %v5073_v20, 1 }
 0x74a   : > { %v5075_v14 = vadd.f32 %v5074_v41, %v5073_v20 }
 0x74c   : > { %v5076_v4 = vmul.f32 %v5075_v14, %v11595_v17  ;;  %v11782_v17 = vld [vmem:[%s11963_s12] ss:$0 sm:$0xff] }
 0x74e   : > { %5093 = vmatmul.f32.vlgmr.msra.gmra.mxu1 %v5076_v4 }
 0x7cb   : > { %v5094_v52 = vpop.f32.mrf.mxu1 }
 0x7cc   : > { %v5095_v1 = vadd.f32 1e-05, %v5094_v52 }
 0x7ce   : > { %6447 = vrsqrt.f32 %v5095_v1  ;;  %vm5103_vm7 = vweird.f32 %v5095_v1 }
 0x7d4   : > { %v6448_v2 = vpop.eup %6447 }
 0x7d5   : > { %v5098_v53 = vmul.f32 %v6448_v2, %v5095_v1  ;;  %vm5104_vm6 = vweird.f32 %v6448_v2 }
 0x7d6   : > { %vm5105_vm14 = vmor %vm5103_vm7, %vm5104_vm6 }
 0x7d7   : > { %v5099_v11 = vmul.f32 %v6448_v2, %v5098_v53 }
 0x7d9   : > { %v5100_v42 = vmul.f32 0.5, %v5099_v11 }
 0x7db   : > { %v5101_v56 = vsub.f32 1.5, %v5100_v42 }
 0x7dd   : > { %v5102_v49 = vmul.f32 %v6448_v2, %v5101_v56 }
 0x7df   : > { %v5106_v5 = vsel %vm5105_vm14, %v6448_v2, %v5102_v49 }
 0x7e0   : > { %v11777_v29 = vperm.slane %v5106_v5, 0 }
 0x7e2   : > { %v5123_v63 = vmul.f32 %v11777_v29, %v11688_v34  ;;  %v5139_v28 = vmul.f32 %v11777_v29, %v5006_v25  ;;  %v5122_v55 = vmul.f32 %v11777_v29, %v11682_v51  ;;  %v5138_v46 = vmul.f32 %v11777_v29, %v5005_v8 }
 0x7e3   : > { %v5121_v36 = vmul.f32 %v11777_v29, %v11676_v22  ;;  %v5137_v44 = vmul.f32 %v11777_v29, %v5004_v32  ;;  %v5120_v22 = vmul.f32 %v11777_v29, %v11670_v18  ;;  %v5136_v32 = vmul.f32 %v11777_v29, %v5003_v0 }
 0x7e4   : > { %v5159_v47 = vmul.f32 %v11782_v17, %v5123_v63  ;;  %v5175_v34 = vmul.f32 %v11782_v17, %v5139_v28  ;;  %v5158_v31 = vmul.f32 %v11782_v17, %v5122_v55  ;;  %v5174_v60 = vmul.f32 %v11782_v17, %v5138_v46 }
 0x7e5   : > { %v5157_v51 = vmul.f32 %v11782_v17, %v5121_v36  ;;  %v5173_v8 = vmul.f32 %v11782_v17, %v5137_v44  ;;  %v5156_v20 = vmul.f32 %v11782_v17, %v5120_v22  ;;  %v5172_v41 = vmul.f32 %v11782_v17, %v5136_v32 }
 0x7e6   : > { %v5195_v25 = vadd.f32 %v11789_v27, %v5159_v47  ;;  %v5211_v39 = vadd.f32 %v11789_v27, %v5175_v34  ;;  %v5194_v54 = vadd.f32 %v11789_v27, %v5158_v31  ;;  %v5210_v3 = vadd.f32 %v11789_v27, %v5174_v60 }
 0x7e7   : > { %v5193_v10 = vadd.f32 %v11789_v27, %v5157_v51  ;;  %v5209_v61 = vadd.f32 %v11789_v27, %v5173_v8  ;;  %v5119_v0 = vmul.f32 %v11777_v29, %v11664_v37  ;;  %v5135_v4 = vmul.f32 %v11777_v29, %v11760_v57 }
 0x7e8   : > { %v5227_v48 = vmax.f32 %v5195_v25, 0.0  ;;  %v5243_v35 = vmax.f32 %v5211_v39, 0.0  ;;  %v5226_v14 = vmax.f32 %v5194_v54, 0.0  ;;  %v5242_v18 = vmax.f32 %v5210_v3, 0.0 }
 0x7e9   : > { %v5225_v52 = vmax.f32 %v5193_v10, 0.0  ;;  %v5192_v1 = vadd.f32 %v11789_v27, %v5156_v20  ;;  %v5208_v2 = vadd.f32 %v11789_v27, %v5172_v41  ;;  %v5118_v53 = vmul.f32 %v11777_v29, %v11658_v21 }
 0x7ea   : > { %5252 = vmatpush.xpose.msra.mxu2 %v5227_v48  ;;  %5272 = vmatpush.xpose.msra.mxu3 %v5243_v35  ;;  %v5241_v11 = vmax.f32 %v5209_v61, 0.0  ;;  %v5155_v42 = vmul.f32 %v11782_v17, %v5119_v0  ;;  %v5171_v56 = vmul.f32 %v11782_v17, %v5135_v4  ;;  %v5134_v37 = vmul.f32 %v11777_v29, %v11754_v16 }
 0x7eb   : > { %v5224_v57 = vmax.f32 %v5192_v1, 0.0  ;;  %v5154_v49 = vmul.f32 %v11782_v17, %v5118_v53  ;;  %v5117_v5 = vmul.f32 %v11777_v29, %v11652_v38  ;;  %v5133_v63 = vmul.f32 %v11777_v29, %v11748_v43 }
 0x7ec   : > { %v5240_v21 = vmax.f32 %v5208_v2, 0.0  ;;  %v5191_v28 = vadd.f32 %v11789_v27, %v5155_v42  ;;  %v5207_v55 = vadd.f32 %v11789_v27, %v5171_v56  ;;  %v5170_v46 = vmul.f32 %v11782_v17, %v5134_v37  ;;  %v5245_v42 = vld [vmem:[#allocation8] sm:$0x1] }
 0x7ed   : > { %v5190_v16 = vadd.f32 %v11789_v27, %v5154_v49  ;;  %v5153_v36 = vmul.f32 %v11782_v17, %v5117_v5  ;;  %v5169_v44 = vmul.f32 %v11782_v17, %v5133_v63  ;;  %v5116_v38 = vmul.f32 %v11777_v29, %v11646_v40 }
 0x7ee   : > { %5253 = vmatpush.xpose.msra.mxu2 %v5226_v14  ;;  %5273 = vmatpush.xpose.msra.mxu3 %v5242_v18  ;;  %v5223_v47 = vmax.f32 %v5191_v28, 0.0  ;;  %v5239_v43 = vmax.f32 %v5207_v55, 0.0  ;;  %v5206_v34 = vadd.f32 %v11789_v27, %v5170_v46  ;;  %v5132_v31 = vmul.f32 %v11777_v29, %v11742_v33 }
 0x7ef   : > { %v5222_v60 = vmax.f32 %v5190_v16, 0.0  ;;  %v5189_v25 = vadd.f32 %v11789_v27, %v5153_v36  ;;  %v5205_v39 = vadd.f32 %v11789_v27, %v5169_v44  ;;  %v5152_v51 = vmul.f32 %v11782_v17, %v5116_v38 }
 0x7f0   : > { %v5238_v8 = vmax.f32 %v5206_v34, 0.0  ;;  %v5168_v22 = vmul.f32 %v11782_v17, %v5132_v31  ;;  %v5115_v40 = vmul.f32 %v11777_v29, %v11640_v45  ;;  %v5131_v32 = vmul.f32 %v11777_v29, %v11736_v6 }
 0x7f1   : > { %v5221_v33 = vmax.f32 %v5189_v25, 0.0  ;;  %v5237_v48 = vmax.f32 %v5205_v39, 0.0  ;;  %v5188_v35 = vadd.f32 %v11789_v27, %v5152_v51  ;;  %v5114_v54 = vmul.f32 %v11777_v29, %v11634_v13 }
 0x7f2   : > { %5254 = vmatpush.xpose.msra.mxu2 %v5225_v52  ;;  %5274 = vmatpush.xpose.msra.mxu3 %v5241_v11  ;;  %v5204_v3 = vadd.f32 %v11789_v27, %v5168_v22  ;;  %v5151_v10 = vmul.f32 %v11782_v17, %v5115_v40  ;;  %v5167_v61 = vmul.f32 %v11782_v17, %v5131_v32  ;;  %v6700_v5 = vmov 0  }
 0x7f3   : > { %v5130_v45 = vmul.f32 %v11777_v29, %v11730_v19  ;;  %v5220_v6 = vmax.f32 %v5188_v35, 0.0  ;;  %v5150_v20 = vmul.f32 %v11782_v17, %v5114_v54  ;;  %v5113_v41 = vmul.f32 %v11777_v29, %v11628_v7  ;;  %6442 = vset.pattern.permute.xlu0 %v6700_v5 }
 0x7f4   : > { %v5129_v13 = vmul.f32 %v11777_v29, %v11724_v62  ;;  %v5236_v14 = vmax.f32 %v5204_v3, 0.0  ;;  %v5187_v18 = vadd.f32 %v11789_v27, %v5151_v10  ;;  %v5203_v0 = vadd.f32 %v11789_v27, %v5167_v61  ;;  %5248 = vperm.xlu0 %6442, %v5245_v42  }
 0x7f5   : > { %v5166_v4 = vmul.f32 %v11782_v17, %v5130_v45  ;;  %v5186_v19 = vadd.f32 %v11789_v27, %v5150_v20  ;;  %v5149_v52 = vmul.f32 %v11782_v17, %v5113_v41  ;;  %v5112_v7 = vmul.f32 %v11777_v29, %v11622_v15 }
 0x7f6   : > { %5255 = vmatpush.xpose.msra.mxu2 %v5224_v57  ;;  %5275 = vmatpush.xpose.msra.mxu3 %v5240_v21  ;;  %v5165_v1 = vmul.f32 %v11782_v17, %v5129_v13  ;;  %v5219_v2 = vmax.f32 %v5187_v18, 0.0  ;;  %v5235_v62 = vmax.f32 %v5203_v0, 0.0  ;;  %v5128_v11 = vmul.f32 %v11777_v29, %v11718_v12 }
 0x7f7   : > { %v5202_v53 = vadd.f32 %v11789_v27, %v5166_v4  ;;  %v5218_v56 = vmax.f32 %v5186_v19, 0.0  ;;  %v5185_v37 = vadd.f32 %v11789_v27, %v5149_v52  ;;  %v5148_v49 = vmul.f32 %v11782_v17, %v5112_v7 }
 0x7f8   : > { %v5201_v57 = vadd.f32 %v11789_v27, %v5165_v1  ;;  %v5164_v63 = vmul.f32 %v11782_v17, %v5128_v11  ;;  %v5111_v21 = vmul.f32 %v11777_v29, %v11618_v24  ;;  %v5127_v12 = vmul.f32 %v11777_v29, %v11712_v26 }
 0x7f9   : > { %v5234_v15 = vmax.f32 %v5202_v53, 0.0  ;;  %v5217_v28 = vmax.f32 %v5185_v37, 0.0  ;;  %v5184_v46 = vadd.f32 %v11789_v27, %v5148_v49  ;;  %v5110_v16 = vmul.f32 %v11777_v29, %v11610_v30 }
 0x7fa   : > { %5256 = vmatpush.xpose.msra.mxu2 %v5223_v47  ;;  %5276 = vmatpush.xpose.msra.mxu3 %v5239_v43  ;;  %v5233_v55 = vmax.f32 %v5201_v57, 0.0  ;;  %v5200_v36 = vadd.f32 %v11789_v27, %v5164_v63  ;;  %v5147_v44 = vmul.f32 %v11782_v17, %v5111_v21  ;;  %v5163_v38 = vmul.f32 %v11782_v17, %v5127_v12 }
 0x7fb   : > { %v5126_v24 = vmul.f32 %v11777_v29, %v11706_v9  ;;  %v5216_v26 = vmax.f32 %v5184_v46, 0.0  ;;  %v5146_v47 = vmul.f32 %v11782_v17, %v5110_v16  ;;  %v5109_v43 = vmul.f32 %v11777_v29, %v11606_v23 }
 0x7fc   : > { %v5125_v30 = vmul.f32 %v11777_v29, %v11700_v50  ;;  %v5232_v34 = vmax.f32 %v5200_v36, 0.0  ;;  %v5183_v31 = vadd.f32 %v11789_v27, %v5147_v44  ;;  %v5108_v23 = vmul.f32 %v11777_v29, %v11602_v59 }
 0x7fd   : > { %v5162_v25 = vmul.f32 %v11782_v17, %v5126_v24  ;;  %v5182_v9 = vadd.f32 %v11789_v27, %v5146_v47  ;;  %v5145_v39 = vmul.f32 %v11782_v17, %v5109_v43  ;;  %v5124_v40 = vmul.f32 %v11777_v29, %v11694_v58 }
 0x7fe   : > { %5257 = vmatpush.xpose.msra.mxu2 %v5222_v60  ;;  %5277 = vmatpush.xpose.msra.mxu3 %v5238_v8  ;;  %v5199_v60 = vadd.f32 %v11789_v27, %v5163_v38  ;;  %v5161_v51 = vmul.f32 %v11782_v17, %v5125_v30  ;;  %v5215_v8 = vmax.f32 %v5183_v31, 0.0 }
 0x7ff   : > { %v5198_v22 = vadd.f32 %v11789_v27, %v5162_v25  ;;  %v5181_v32 = vadd.f32 %v11789_v27, %v5145_v39  ;;  %v5160_v3 = vmul.f32 %v11782_v17, %v5124_v40 }
 0x800   : > { %v5231_v50 = vmax.f32 %v5199_v60, 0.0  ;;  %v5197_v54 = vadd.f32 %v11789_v27, %v5161_v51 }
 0x801   : > { %v5230_v35 = vmax.f32 %v5198_v22, 0.0  ;;  %v5213_v59 = vmax.f32 %v5181_v32, 0.0  ;;  %v5196_v58 = vadd.f32 %v11789_v27, %v5160_v3 }
 0x802   : > { %5258 = vmatpush.xpose.msra.mxu2 %v5221_v33  ;;  %5278 = vmatpush.xpose.msra.mxu3 %v5237_v48  ;;  %v5144_v33 = vmul.f32 %v11782_v17, %v5108_v23  ;;  %v5214_v48 = vmax.f32 %v5182_v9, 0.0  ;;  %v5229_v10 = vmax.f32 %v5197_v54, 0.0  ;;  %v5244_v17 = vld [vmem:[%s12624_s26] sm:$0x1] }
 0x803   : > { %v5228_v45 = vmax.f32 %v5196_v58, 0.0 }
 0x804   : > { %v5180_v61 = vadd.f32 %v11789_v27, %v5144_v33  ;;  %v5298_v27 = vlaneseq }
 0x806   : > { %5259 = vmatpush.xpose.msra.mxu2 %v5220_v6  ;;  %5279 = vmatpush.xpose.msra.mxu3 %v5236_v14  ;;  %v5212_v29 = vmax.f32 %v5180_v61, 0.0  ;;  %vm5300_vm11 = vcmp.lt.s32.totalorder %v5298_v27, 256 }
 0x80a   : > { %5260 = vmatpush.xpose.msra.mxu2 %v5219_v2  ;;  %5280 = vmatpush.xpose.msra.mxu3 %v5235_v62 }
 0x80e   : > { %5261 = vmatpush.xpose.msra.mxu2 %v5218_v56  ;;  %5281 = vmatpush.xpose.msra.mxu3 %v5234_v15 }
 0x812   : > { %5262 = vmatpush.xpose.msra.mxu2 %v5217_v28  ;;  %5282 = vmatpush.xpose.msra.mxu3 %v5233_v55 }
 0x816   : > { %5263 = vmatpush.xpose.msra.mxu2 %v5216_v26  ;;  %5283 = vmatpush.xpose.msra.mxu3 %v5232_v34 }
 0x81a   : > { %5264 = vmatpush.xpose.msra.mxu2 %v5215_v8  ;;  %5284 = vmatpush.xpose.msra.mxu3 %v5231_v50 }
 0x81e   : > { %5265 = vmatpush.xpose.msra.mxu2 %v5214_v48  ;;  %5285 = vmatpush.xpose.msra.mxu3 %v5230_v35 }
 0x822   : > { %5266 = vmatpush.xpose.msra.mxu2 %v5213_v59  ;;  %5286 = vmatpush.xpose.msra.mxu3 %v5229_v10 }
 0x826   : > { %5267 = vmatpush.xpose.msra.mxu2 %v5212_v29  ;;  %5287 = vmatpush.xpose.msra.mxu3 %v5228_v45 }
 0x829   : > { %5268 = vmatmul.f32.vlgmr.msra.gmra.mxu2 %v5244_v17  ;;  %5288 = vmatmul.f32.vlgmr.msra.gmra.mxu3 %v5244_v17 }
 0x866   : > { %v5249_v6 = vpop.permute.xlu0 %5248 }
 0x867   : > { %v5251_v20 = vperm.slane %v5249_v6, 0 }
 0x8ac   : > { %v5269_v41 = vpop.f32.mrf.mxu2  ;;  %v5289_v13 = vpop.f32.mrf.mxu3 }
 0x8ad   : > { %v5290_v14 = vadd.f32 %v5289_v13, %v5251_v20  ;;  %v5270_v18 = vadd.f32 %v5269_v41, %v5251_v20 }
 0x8af   : > { %v5294_v0 = vrot.slane %v5290_v14, 7 }
 0x8b1   : > { %v5296_v4 = vsel %vm5295_vm8, %v5270_v18, %v5294_v0 }
 0x8b2   : > { %5302 = vst.msk [vmem:[%s12623_s16] sm:$0x3] %vm5300_vm11, %v5296_v4 }
 0x8b3   : > { %6632 = shalt.err (!%p6629_p12)
}
 0x8b4   : > { %5946 = dma.vmem_to_hbm [thread:$0]  (%p6858_p3), %s5317_s29, 32, %s5319_s1, %s5304_s18  }
 0x8b5 PF: > { %s12628_s22 = sld [smem:[#allocation33_spill]] }
 0x8b6   : > { %s12630_s30 = sld [smem:[#allocation36_spill]] }
 0x8bb   : > { %s5330_s16 = sand.u32 1, %s12628_s22  }
 0x8bc   : > { %p12631_p13 = scmp.ge.s32.totalorder %s12630_s30, 2  ;;  %s5331_s25 = scalar_lea.sflag [#allocation11], %s5330_s16 }
 0x8be   : > { %p5957_p0 = pnand %p12631_p13, %p6824_p6 }
 0x8c0   : > { %p5958_p5 = pneg %p5957_p0 }
 0x8c2   : > { %6668 = dma.done.wait (%p5958_p5), %s5331_s25, 32  }
 0x8c3   : > { %6670 = vsyncadd (%p5958_p5), %s5331_s25, 4294967264  ;;  %s12632_s26 = sld [smem:[#allocation39_spill]] }
 0x8c4   : > { %s12633_s23 = sld [smem:[#allocation34_spill]] }
 0x8c5   : > { %s12634_s24 = sld [smem:[#allocation35_spill]] }
 0x8c6   : > { %s12635_s25 = sld [smem:[#allocation40_spill]] }
 0x8c9   : > { %p32_p7 = scmp.ge.s32.totalorder %s12632_s26, 4  }
 0x8cb   :  { %34 = sbr.rel (!%p32_p7) target bundleno = 16 (0x10), region = 234 }
 0x8d0   :  { %5337 = vsyncpa [#allocation10], 1 }
 0x8d1   :  { %5339 = vsyncpa [#allocation10 + $0x1], 1 }
 0x8d2   :  { %5340 = vsyncpa [#allocation13], 1 }
 0x8d3   :  { %5341 = vsyncpa [#allocation11], 1 }
 0x8d4   :  { %5343 = vsyncpa [#allocation11 + $0x1], 1 }
 0x8d5   :  { %5344 = vsyncmov [#allocation7] }
 0x8d8   :  { %s5345_s11 = vpop.sfrf %5344 }
 0x8d9   :  { %p5859_p6 = scmp.ne.s32.totalorder %s5345_s11, 0 }
 0x8db   :  { %5349 = shalt.err (%p5859_p6)  }
 0x8dc   :  { %5351 = vsyncmov [#allocation7 + $0x1] }
 0x8df   :  { %s5352_s21 = vpop.sfrf %5351 }
 0x8e0   :  { %p5860_p3 = scmp.ne.s32.totalorder %s5352_s21, 0 }
 0x8e2   :  { %5356 = shalt.err (%p5860_p3)  }
 0x8e3   :  { %5358 = vsyncmov [#allocation7 + $0x2] }
 0x8e6   :  { %s5359_s27 = vpop.sfrf %5358 }
 0x8e7   :  { %p5861_p8 = scmp.ne.s32.totalorder %s5359_s27, 0 }
 0x8e9   :  { %5363 = shalt.err (%p5861_p8)  }
 0x8ea   :  { %5365 = vsyncmov [#allocation7 + $0x3] }
 0x8ed   :  { %s5366_s26 = vpop.sfrf %5365 }
 0x8ee   :  { %p5862_p11 = scmp.ne.s32.totalorder %s5366_s26, 0 }
 0x8f0   :  { %5370 = shalt.err (%p5862_p11)  }
 0x8f1   :  { %5372 = vsyncmov [#allocation7 + $0x4] }
 0x8f4   :  { %s5373_s5 = vpop.sfrf %5372 }
 0x8f5   :  { %p5863_p1 = scmp.ne.s32.totalorder %s5373_s5, 0 }
 0x8f7   :  { %5377 = shalt.err (%p5863_p1)  }
 0x8f8   :  { %5379 = vsyncmov [#allocation7 + $0x5] }
 0x8fb   :  { %s5380_s6 = vpop.sfrf %5379 }
 0x8fc   :  { %p5864_p4 = scmp.ne.s32.totalorder %s5380_s6, 0 }
 0x8fe   :  { %5384 = shalt.err (%p5864_p4)  }

</bundles_post_ra>
